<compile_context>
chip_gen: v7x
topology: tpu7x:2x2x1
jax: 0.10.0
libtpu: 0.0.40
codegen_flags: <defaults>
</compile_context>

<pallas_src>
import jax
import jax.numpy as jnp
import numpy as np
from jax import lax
from jax.experimental import pallas as pl
from jax.experimental.pallas import tpu as pltpu  # noqa: F401  (TPU backend assumed)


def _round_up(x, m):
    return ((x + m - 1) // m) * m


def _attention_decode_kernel(
    feats_ref,    # (nBp, nT, nC)   batch-major encoder features (resident)
    w_i2h_ref,    # (nC, Hp)        i2h weight, pre-transposed, lane-padded
    w_h4_ref,     # (Hp, 4*Hp)      [h2h | gru_r | gru_z | gru_n], gate blocks 128-aligned
    b_h4_ref,     # (1, 4*Hp)
    w_score_ref,  # (1, 1, Hp)      score weight row (VPU multiply + lane reduce)
    w_ih_ref,     # (nC, 3*Hp)      GRU input weight, gate blocks 128-aligned
    b_ih_ref,     # (1, 3*Hp)
    w_gen_ref,    # (Hp, NCLSp)     generator weight, pre-transposed, lane-padded
    b_gen_ref,    # (1, NCLSp)
    probs_ref,    # (num_steps, nBp, NCLSp)  resident output slab
):
    nB, nT, nC = feats_ref.shape
    Hp = w_i2h_ref.shape[1]
    num_steps = probs_ref.shape[0]

    feats = feats_ref[...]
    w_h4 = w_h4_ref[...]
    b_h4 = b_h4_ref[...]
    w_score = w_score_ref[...]
    w_ih = w_ih_ref[...]
    b_ih = b_ih_ref[...]
    w_gen = w_gen_ref[...]
    b_gen = b_gen_ref[...]

    # feats projection is decode-step invariant: ONE matmul, reused every step.
    fp = jnp.dot(feats.reshape(nB * nT, nC), w_i2h_ref[...],
                 preferred_element_type=jnp.float32).reshape(nB, nT, Hp)

    def step(t, h):
        # fused prev_hidden projections: h2h(h) and all GRU hidden gates in ONE matmul
        hp = jnp.dot(h, w_h4, preferred_element_type=jnp.float32) + b_h4  # (nB, 4Hp)
        ph_proj = hp[:, 0:Hp]            # h2h(prev_hidden) + bias   (128-lane aligned)
        h_r = hp[:, Hp:2 * Hp]
        h_z = hp[:, 2 * Hp:3 * Hp]
        h_n = hp[:, 3 * Hp:4 * Hp]

        # attention scores: VPU multiply + lane reduction (no N=1 MXU matmul)
        act = jnp.tanh(fp + ph_proj[:, None, :])                 # (nB, nT, Hp)
        emition = jnp.sum(act * w_score, axis=-1)                # (nB, nT)

        # stable softmax over time; divide -> EUP approx reciprocal + multiply
        e_max = jnp.max(emition, axis=-1, keepdims=True)
        e_exp = jnp.exp(emition - e_max)
        denom = jnp.sum(e_exp, axis=-1, keepdims=True)
        alpha = e_exp * pl.reciprocal(denom, approx=True)        # (nB, nT)

        # context on the MXU: batched contraction over time (flash-attn style einsum)
        ctx = jnp.einsum('bqt,btc->bqc', alpha[:, None, :], feats,
                         preferred_element_type=jnp.float32)[:, 0, :]   # (nB, nC)

        # GRUCell(context, h)
        gi = jnp.dot(ctx, w_ih, preferred_element_type=jnp.float32) + b_ih  # (nB, 3Hp)
        i_r = gi[:, 0:Hp]
        i_z = gi[:, Hp:2 * Hp]
        i_n = gi[:, 2 * Hp:3 * Hp]

        r = jax.nn.sigmoid(i_r + h_r)
        z = jax.nn.sigmoid(i_z + h_z)
        n = jnp.tanh(i_n + r * h_n)
        new_h = (1.0 - z) * n + z * h                            # (nB, Hp)

        # generator logits for this step, stored into the resident output slab
        logits = jnp.dot(new_h, w_gen, preferred_element_type=jnp.float32) + b_gen
        probs_ref[t] = logits.astype(probs_ref.dtype)
        return new_h

    h0 = jnp.zeros((nB, Hp), jnp.float32)
    lax.fori_loop(0, num_steps, step, h0, unroll=True)


def attention_forward(feats, text_length, params):
    """Full Attention.forward.

    feats:       (nT, nB, nC) float32, time-major (PyTorch layout)
    text_length: numpy int array of shape (nB,)
    params:      PyTorch-layout tensors
                 (i2h.w (H,nC), h2h.w (H,H), h2h.b (H,), score.w (1,H),
                  rnn.w_ih (3H,nC), rnn.w_hh (3H,H), rnn.b_ih (3H,), rnn.b_hh (3H,),
                  generator.w (NCLS,H), generator.b (NCLS,))
    Returns probs of shape (sum(text_length), NCLS).
    """
    (w_i2h, w_h2h, b_h2h, w_score, w_ih, w_hh, b_ih, b_hh, w_gen, b_gen) = params
    nT, nB, nC = feats.shape
    H = w_h2h.shape[0]
    NCLS = w_gen.shape[0]
    text_length = np.asarray(text_length)
    num_steps = int(text_length.max())

    Hp = _round_up(H, 128)        # lane-align all gate regions / hidden state
    NCLSp = _round_up(NCLS, 128)  # lane-dense logit store
    nBp = _round_up(nB, 8)        # fill sublanes
    f32 = jnp.float32

    # ---- one-time host-side layout prep (transpose, fuse, zero-pad) -------------
    feats_bm = jnp.transpose(jnp.asarray(feats, f32), (1, 0, 2))          # (nB, nT, nC)
    feats_p = jnp.zeros((nBp, nT, nC), f32).at[:nB].set(feats_bm)

    w_i2h_p = jnp.zeros((nC, Hp), f32).at[:, :H].set(jnp.asarray(w_i2h, f32).T)

    w_h2h_t = jnp.asarray(w_h2h, f32).T          # (H, H)
    w_hh_t = jnp.asarray(w_hh, f32).T            # (H, 3H) -> gates r|z|n
    b_hh_a = jnp.asarray(b_hh, f32)
    w_h4_p = jnp.zeros((Hp, 4 * Hp), f32).at[:H, 0:H].set(w_h2h_t)
    b_h4_p = jnp.zeros((1, 4 * Hp), f32).at[0, 0:H].set(jnp.asarray(b_h2h, f32))
    for g in range(3):
        c0 = (g + 1) * Hp
        w_h4_p = w_h4_p.at[:H, c0:c0 + H].set(w_hh_t[:, g * H:(g + 1) * H])
        b_h4_p = b_h4_p.at[0, c0:c0 + H].set(b_hh_a[g * H:(g + 1) * H])

    w_score_p = jnp.zeros((1, 1, Hp), f32).at[0, 0, :H].set(
        jnp.asarray(w_score, f32).reshape(H))

    w_ih_t = jnp.asarray(w_ih, f32).T            # (nC, 3H) -> gates r|z|n
    b_ih_a = jnp.asarray(b_ih, f32)
    w_ih_p = jnp.zeros((nC, 3 * Hp), f32)
    b_ih_p = jnp.zeros((1, 3 * Hp), f32)
    for g in range(3):
        c0 = g * Hp
        w_ih_p = w_ih_p.at[:, c0:c0 + H].set(w_ih_t[:, g * H:(g + 1) * H])
        b_ih_p = b_ih_p.at[0, c0:c0 + H].set(b_ih_a[g * H:(g + 1) * H])

    w_gen_p = jnp.zeros((Hp, NCLSp), f32).at[:H, :NCLS].set(jnp.asarray(w_gen, f32).T)
    b_gen_p = jnp.zeros((1, NCLSp), f32).at[0, :NCLS].set(jnp.asarray(b_gen, f32))

    # ---- ONE Pallas program, no grid: everything resident, one HBM writeback ----
    probs_all = pl.pallas_call(
        _attention_decode_kernel,
        out_shape=jax.ShapeDtypeStruct((num_steps, nBp, NCLSp), jnp.float32),
    )(feats_p, w_i2h_p, w_h4_p, b_h4_p, w_score_p, w_ih_p, b_ih_p,
      w_gen_p, b_gen_p)

    # ---- un-pad, then ragged text_length gather (static host indices),
    #      matching the PyTorch new_hiddens packing order.
    probs_all = probs_all[:, :nB, :NCLS]
    step_idx = np.concatenate(
        [np.arange(int(L), dtype=np.int32) for L in text_length])
    batch_idx = np.concatenate(
        [np.full(int(L), b, dtype=np.int32) for b, L in enumerate(text_length)])
    return probs_all[step_idx, batch_idx, :]                     # (num_labels, NCLS)


def _reference(feats, text_length, params):
    """Pure-JAX reference matching the PyTorch Attention.forward exactly."""
    (w_i2h, w_h2h, b_h2h, w_score, w_ih, w_hh, b_ih, b_hh, w_gen, b_gen) = params
    nT, nB, nC = feats.shape
    H = w_h2h.shape[0]
    text_length = np.asarray(text_length)
    num_steps = int(text_length.max())

    hidden = jnp.zeros((nB, H), jnp.float32)
    out_hiddens = []
    for _ in range(num_steps):
        feats_proj = feats.reshape(-1, nC) @ w_i2h.T
        ph = hidden @ w_h2h.T + b_h2h
        ph_rep = jnp.broadcast_to(ph[None], (nT, nB, H)).reshape(-1, H)
        emition = (jnp.tanh(feats_proj + ph_rep) @ w_score.T).reshape(nT, nB).T
        alpha = jax.nn.softmax(emition, axis=1)
        context = jnp.sum(feats * alpha.T[:, :, None], axis=0)
        gi = context @ w_ih.T + b_ih
        gh = hidden @ w_hh.T + b_hh
        i_r, i_z, i_n = jnp.split(gi, 3, axis=1)
        h_r, h_z, h_n = jnp.split(gh, 3, axis=1)
        r = jax.nn.sigmoid(i_r + h_r)
        z = jax.nn.sigmoid(i_z + h_z)
        n = jnp.tanh(i_n + r * h_n)
        hidden = (1.0 - z) * n + z * hidden
        out_hiddens.append(hidden)
    oh = jnp.stack(out_hiddens)                        # (num_steps, nB, H)
    new_hiddens = jnp.concatenate(
        [oh[:int(L), b, :] for b, L in enumerate(text_length)], axis=0)
    return new_hiddens @ w_gen.T + b_gen


if __name__ == "__main__":
    # Small shapes consistent with the module: seq nT=8, batch nB=2,
    # input_size nC=4, hidden_size H=32, num_classes=16.
    nT, nB, nC, H, NCLS = 8, 2, 4, 32, 16

    key = jax.random.PRNGKey(0)
    ks = jax.random.split(key, 12)
    scale = 0.1
    params = (
        scale * jax.random.normal(ks[0], (H, nC), jnp.float32),      # i2h.weight
        scale * jax.random.normal(ks[1], (H, H), jnp.float32),       # h2h.weight
        scale * jax.random.normal(ks[2], (H,), jnp.float32),         # h2h.bias
        scale * jax.random.normal(ks[3], (1, H), jnp.float32),       # score.weight
        scale * jax.random.normal(ks[4], (3 * H, nC), jnp.float32),  # rnn.weight_ih
        scale * jax.random.normal(ks[5], (3 * H, H), jnp.float32),   # rnn.weight_hh
        scale * jax.random.normal(ks[6], (3 * H,), jnp.float32),     # rnn.bias_ih
        scale * jax.random.normal(ks[7], (3 * H,), jnp.float32),     # rnn.bias_hh
        scale * jax.random.normal(ks[8], (NCLS, H), jnp.float32),    # generator.weight
        scale * jax.random.normal(ks[9], (NCLS,), jnp.float32),      # generator.bias
    )
    feats = jax.random.normal(ks[10], (nT, nB, nC), jnp.float32)
    text_length = np.array([5, 8], dtype=np.int32)   # num_steps=8, num_labels=13

    probs = attention_forward(feats, text_length, params)
    jax.block_until_ready(probs)

    ref = _reference(feats, text_length, params)
    # tolerance allows the EUP approx-reciprocal in the in-kernel softmax
    np.testing.assert_allclose(np.asarray(probs), np.asarray(ref),
                               rtol=5e-3, atol=5e-4)

    print("KERNEL_OK")
</pallas_src>

<mosaic_0001>
module attributes {stable_mosaic.version = 11 : i64} {
  func.func @_attention_decode_kernel(%arg0: memref<8x8x4xf32, #tpu.memory_space<vmem>>, %arg1: memref<4x128xf32, #tpu.memory_space<vmem>>, %arg2: memref<128x512xf32, #tpu.memory_space<vmem>>, %arg3: memref<1x512xf32, #tpu.memory_space<vmem>>, %arg4: memref<1x1x128xf32, #tpu.memory_space<vmem>>, %arg5: memref<4x384xf32, #tpu.memory_space<vmem>>, %arg6: memref<1x384xf32, #tpu.memory_space<vmem>>, %arg7: memref<128x128xf32, #tpu.memory_space<vmem>>, %arg8: memref<1x128xf32, #tpu.memory_space<vmem>>, %arg9: memref<8x8x128xf32, #tpu.memory_space<vmem>>) attributes {dimension_semantics = [], scalar_prefetch = 0 : i64, scratch_operands = 0 : i64, tpu.core_type = #tpu.core_type<tc>} {
    %c0 = arith.constant 0 : index
    %c0_0 = arith.constant 0 : index
    %c0_1 = arith.constant 0 : index
    %0 = vector.load %arg0[%c0, %c0_0, %c0_1] : memref<8x8x4xf32, #tpu.memory_space<vmem>>, vector<8x8x4xf32>
    %c0_2 = arith.constant 0 : index
    %c0_3 = arith.constant 0 : index
    %1 = vector.load %arg2[%c0_2, %c0_3] : memref<128x512xf32, #tpu.memory_space<vmem>>, vector<128x512xf32>
    %c0_4 = arith.constant 0 : index
    %c0_5 = arith.constant 0 : index
    %2 = vector.load %arg3[%c0_4, %c0_5] : memref<1x512xf32, #tpu.memory_space<vmem>>, vector<1x512xf32>
    %c0_6 = arith.constant 0 : index
    %c0_7 = arith.constant 0 : index
    %c0_8 = arith.constant 0 : index
    %3 = vector.load %arg4[%c0_6, %c0_7, %c0_8] : memref<1x1x128xf32, #tpu.memory_space<vmem>>, vector<1x1x128xf32>
    %c0_9 = arith.constant 0 : index
    %c0_10 = arith.constant 0 : index
    %4 = vector.load %arg5[%c0_9, %c0_10] : memref<4x384xf32, #tpu.memory_space<vmem>>, vector<4x384xf32>
    %c0_11 = arith.constant 0 : index
    %c0_12 = arith.constant 0 : index
    %5 = vector.load %arg6[%c0_11, %c0_12] : memref<1x384xf32, #tpu.memory_space<vmem>>, vector<1x384xf32>
    %c0_13 = arith.constant 0 : index
    %c0_14 = arith.constant 0 : index
    %6 = vector.load %arg7[%c0_13, %c0_14] : memref<128x128xf32, #tpu.memory_space<vmem>>, vector<128x128xf32>
    %c0_15 = arith.constant 0 : index
    %c0_16 = arith.constant 0 : index
    %7 = vector.load %arg8[%c0_15, %c0_16] : memref<1x128xf32, #tpu.memory_space<vmem>>, vector<1x128xf32>
    %8 = vector.shape_cast %0 : vector<8x8x4xf32> to vector<64x4xf32>
    %c0_17 = arith.constant 0 : index
    %c0_18 = arith.constant 0 : index
    %9 = vector.load %arg1[%c0_17, %c0_18] : memref<4x128xf32, #tpu.memory_space<vmem>>, vector<4x128xf32>
    %cst = arith.constant dense<0.000000e+00> : vector<64x128xf32>
    %10 = tpu.matmul %8, %9, %cst {dimension_numbers = #tpu.dot_dimension_numbers<[1], [0], [0], [1], [0, 0, 1, 1], [], []>} : vector<64x4xf32>, vector<4x128xf32>, vector<64x128xf32> -> vector<64x128xf32>
    %11 = vector.shape_cast %10 : vector<64x128xf32> to vector<8x8x128xf32>
    %cst_19 = arith.constant 0.000000e+00 : f32
    %12 = vector.broadcast %cst_19 : f32 to vector<8x128xf32>
    %c0_i32 = arith.constant 0 : i32
    %cst_20 = arith.constant dense<0.000000e+00> : vector<8x512xf32>
    %13 = tpu.matmul %12, %1, %cst_20 {dimension_numbers = #tpu.dot_dimension_numbers<[1], [0], [0], [1], [0, 0, 1, 1], [], []>} : vector<8x128xf32>, vector<128x512xf32>, vector<8x512xf32> -> vector<8x512xf32>
    %14 = vector.broadcast %2 : vector<1x512xf32> to vector<8x512xf32>
    %15 = arith.addf %13, %14 : vector<8x512xf32>
    %16 = vector.extract_strided_slice %15 {offsets = [0, 0], sizes = [8, 128], strides = [1, 1]} : vector<8x512xf32> to vector<8x128xf32>
    %17 = vector.extract_strided_slice %15 {offsets = [0, 128], sizes = [8, 128], strides = [1, 1]} : vector<8x512xf32> to vector<8x128xf32>
    %18 = vector.extract_strided_slice %15 {offsets = [0, 256], sizes = [8, 128], strides = [1, 1]} : vector<8x512xf32> to vector<8x128xf32>
    %19 = vector.extract_strided_slice %15 {offsets = [0, 384], sizes = [8, 128], strides = [1, 1]} : vector<8x512xf32> to vector<8x128xf32>
    %20 = vector.shape_cast %16 : vector<8x128xf32> to vector<8x1x128xf32>
    %21 = vector.broadcast %20 : vector<8x1x128xf32> to vector<8x8x128xf32>
    %22 = arith.addf %11, %21 : vector<8x8x128xf32>
    %23 = math.tanh %22 : vector<8x8x128xf32>
    %24 = vector.broadcast %3 : vector<1x1x128xf32> to vector<8x8x128xf32>
    %25 = arith.mulf %23, %24 : vector<8x8x128xf32>
    %cst_21 = arith.constant dense<0.000000e+00> : vector<8x8xf32>
    %26 = vector.multi_reduction <add>, %25, %cst_21 [2] : vector<8x8x128xf32> to vector<8x8xf32>
    %cst_22 = arith.constant dense<0xFF800000> : vector<8xf32>
    %27 = vector.multi_reduction <maximumf>, %26, %cst_22 [1] : vector<8x8xf32> to vector<8xf32>
    %28 = vector.shape_cast %27 : vector<8xf32> to vector<8x1xf32>
    %29 = vector.broadcast %28 : vector<8x1xf32> to vector<8x8xf32>
    %30 = arith.subf %26, %29 : vector<8x8xf32>
    %31 = math.exp %30 : vector<8x8xf32>
    %cst_23 = arith.constant dense<0.000000e+00> : vector<8xf32>
    %32 = vector.multi_reduction <add>, %31, %cst_23 [1] : vector<8x8xf32> to vector<8xf32>
    %33 = vector.shape_cast %32 : vector<8xf32> to vector<8x1xf32>
    %34 = tpu.reciprocal %33 {approx = true} : vector<8x1xf32> -> vector<8x1xf32>
    %35 = vector.broadcast %34 : vector<8x1xf32> to vector<8x8xf32>
    %36 = arith.mulf %31, %35 : vector<8x8xf32>
    %37 = vector.shape_cast %36 : vector<8x8xf32> to vector<8x1x8xf32>
    "tpu.trace_start"() <{level = 10 : i32, message = "bqt,btc->bqc"}> : () -> ()
    %cst_24 = arith.constant dense<0.000000e+00> : vector<8x1x4xf32>
    %38 = tpu.matmul %37, %0, %cst_24 {dimension_numbers = #tpu.dot_dimension_numbers<[2], [1], [1], [2], [0, 0, 0, 1, 1, 2], [0], [0]>} : vector<8x1x8xf32>, vector<8x8x4xf32>, vector<8x1x4xf32> -> vector<8x1x4xf32>
    "tpu.trace_stop"() : () -> ()
    %39 = vector.shape_cast %38 : vector<8x1x4xf32> to vector<8x4xf32>
    %cst_25 = arith.constant dense<0.000000e+00> : vector<8x384xf32>
    %40 = tpu.matmul %39, %4, %cst_25 {dimension_numbers = #tpu.dot_dimension_numbers<[1], [0], [0], [1], [0, 0, 1, 1], [], []>} : vector<8x4xf32>, vector<4x384xf32>, vector<8x384xf32> -> vector<8x384xf32>
    %41 = vector.broadcast %5 : vector<1x384xf32> to vector<8x384xf32>
    %42 = arith.addf %40, %41 : vector<8x384xf32>
    %43 = vector.extract_strided_slice %42 {offsets = [0, 0], sizes = [8, 128], strides = [1, 1]} : vector<8x384xf32> to vector<8x128xf32>
    %44 = vector.extract_strided_slice %42 {offsets = [0, 128], sizes = [8, 128], strides = [1, 1]} : vector<8x384xf32> to vector<8x128xf32>
    %45 = vector.extract_strided_slice %42 {offsets = [0, 256], sizes = [8, 128], strides = [1, 1]} : vector<8x384xf32> to vector<8x128xf32>
    %46 = arith.addf %43, %17 : vector<8x128xf32>
    %47 = arith.negf %46 : vector<8x128xf32>
    %48 = math.exp %47 : vector<8x128xf32>
    %cst_26 = arith.constant 1.000000e+00 : f32
    %49 = vector.broadcast %cst_26 : f32 to vector<8x128xf32>
    %50 = arith.addf %49, %48 : vector<8x128xf32>
    %51 = arith.divf %49, %50 : vector<8x128xf32>
    %52 = arith.addf %44, %18 : vector<8x128xf32>
    %53 = arith.negf %52 : vector<8x128xf32>
    %54 = math.exp %53 : vector<8x128xf32>
    %cst_27 = arith.constant 1.000000e+00 : f32
    %55 = vector.broadcast %cst_27 : f32 to vector<8x128xf32>
    %56 = arith.addf %55, %54 : vector<8x128xf32>
    %57 = arith.divf %55, %56 : vector<8x128xf32>
    %58 = arith.mulf %51, %19 : vector<8x128xf32>
    %59 = arith.addf %45, %58 : vector<8x128xf32>
    %60 = math.tanh %59 : vector<8x128xf32>
    %cst_28 = arith.constant 1.000000e+00 : f32
    %61 = vector.broadcast %cst_28 : f32 to vector<8x128xf32>
    %62 = arith.subf %61, %57 : vector<8x128xf32>
    %63 = arith.mulf %62, %60 : vector<8x128xf32>
    %64 = arith.mulf %57, %12 : vector<8x128xf32>
    %65 = arith.addf %63, %64 : vector<8x128xf32>
    %cst_29 = arith.constant dense<0.000000e+00> : vector<8x128xf32>
    %66 = tpu.matmul %65, %6, %cst_29 {dimension_numbers = #tpu.dot_dimension_numbers<[1], [0], [0], [1], [0, 0, 1, 1], [], []>} : vector<8x128xf32>, vector<128x128xf32>, vector<8x128xf32> -> vector<8x128xf32>
    %67 = vector.broadcast %7 : vector<1x128xf32> to vector<8x128xf32>
    %68 = arith.addf %66, %67 : vector<8x128xf32>
    %69 = arith.index_cast %c0_i32 : i32 to index
    %c0_30 = arith.constant 0 : index
    %c0_31 = arith.constant 0 : index
    %70 = vector.load %arg9[%69, %c0_30, %c0_31] : memref<8x8x128xf32, #tpu.memory_space<vmem>>, vector<1x8x128xf32>
    %71 = vector.shape_cast %70 : vector<1x8x128xf32> to vector<8x128xf32>
    %72 = vector.shape_cast %68 : vector<8x128xf32> to vector<1x8x128xf32>
    tpu.vector_store %arg9[%69, %c0_30, %c0_31], %72 {strides = array<i32>} : memref<8x8x128xf32, #tpu.memory_space<vmem>>, vector<1x8x128xf32>,
    %c1_i32 = arith.constant 1 : i32
    %cst_32 = arith.constant dense<0.000000e+00> : vector<8x512xf32>
    %73 = tpu.matmul %65, %1, %cst_32 {dimension_numbers = #tpu.dot_dimension_numbers<[1], [0], [0], [1], [0, 0, 1, 1], [], []>} : vector<8x128xf32>, vector<128x512xf32>, vector<8x512xf32> -> vector<8x512xf32>
    %74 = vector.broadcast %2 : vector<1x512xf32> to vector<8x512xf32>
    %75 = arith.addf %73, %74 : vector<8x512xf32>
    %76 = vector.extract_strided_slice %75 {offsets = [0, 0], sizes = [8, 128], strides = [1, 1]} : vector<8x512xf32> to vector<8x128xf32>
    %77 = vector.extract_strided_slice %75 {offsets = [0, 128], sizes = [8, 128], strides = [1, 1]} : vector<8x512xf32> to vector<8x128xf32>
    %78 = vector.extract_strided_slice %75 {offsets = [0, 256], sizes = [8, 128], strides = [1, 1]} : vector<8x512xf32> to vector<8x128xf32>
    %79 = vector.extract_strided_slice %75 {offsets = [0, 384], sizes = [8, 128], strides = [1, 1]} : vector<8x512xf32> to vector<8x128xf32>
    %80 = vector.shape_cast %76 : vector<8x128xf32> to vector<8x1x128xf32>
    %81 = vector.broadcast %80 : vector<8x1x128xf32> to vector<8x8x128xf32>
    %82 = arith.addf %11, %81 : vector<8x8x128xf32>
    %83 = math.tanh %82 : vector<8x8x128xf32>
    %84 = vector.broadcast %3 : vector<1x1x128xf32> to vector<8x8x128xf32>
    %85 = arith.mulf %83, %84 : vector<8x8x128xf32>
    %cst_33 = arith.constant dense<0.000000e+00> : vector<8x8xf32>
    %86 = vector.multi_reduction <add>, %85, %cst_33 [2] : vector<8x8x128xf32> to vector<8x8xf32>
    %cst_34 = arith.constant dense<0xFF800000> : vector<8xf32>
    %87 = vector.multi_reduction <maximumf>, %86, %cst_34 [1] : vector<8x8xf32> to vector<8xf32>
    %88 = vector.shape_cast %87 : vector<8xf32> to vector<8x1xf32>
    %89 = vector.broadcast %88 : vector<8x1xf32> to vector<8x8xf32>
    %90 = arith.subf %86, %89 : vector<8x8xf32>
    %91 = math.exp %90 : vector<8x8xf32>
    %cst_35 = arith.constant dense<0.000000e+00> : vector<8xf32>
    %92 = vector.multi_reduction <add>, %91, %cst_35 [1] : vector<8x8xf32> to vector<8xf32>
    %93 = vector.shape_cast %92 : vector<8xf32> to vector<8x1xf32>
    %94 = tpu.reciprocal %93 {approx = true} : vector<8x1xf32> -> vector<8x1xf32>
    %95 = vector.broadcast %94 : vector<8x1xf32> to vector<8x8xf32>
    %96 = arith.mulf %91, %95 : vector<8x8xf32>
    %97 = vector.shape_cast %96 : vector<8x8xf32> to vector<8x1x8xf32>
    "tpu.trace_start"() <{level = 10 : i32, message = "bqt,btc->bqc"}> : () -> ()
    %cst_36 = arith.constant dense<0.000000e+00> : vector<8x1x4xf32>
    %98 = tpu.matmul %97, %0, %cst_36 {dimension_numbers = #tpu.dot_dimension_numbers<[2], [1], [1], [2], [0, 0, 0, 1, 1, 2], [0], [0]>} : vector<8x1x8xf32>, vector<8x8x4xf32>, vector<8x1x4xf32> -> vector<8x1x4xf32>
    "tpu.trace_stop"() : () -> ()
    %99 = vector.shape_cast %98 : vector<8x1x4xf32> to vector<8x4xf32>
    %cst_37 = arith.constant dense<0.000000e+00> : vector<8x384xf32>
    %100 = tpu.matmul %99, %4, %cst_37 {dimension_numbers = #tpu.dot_dimension_numbers<[1], [0], [0], [1], [0, 0, 1, 1], [], []>} : vector<8x4xf32>, vector<4x384xf32>, vector<8x384xf32> -> vector<8x384xf32>
    %101 = vector.broadcast %5 : vector<1x384xf32> to vector<8x384xf32>
    %102 = arith.addf %100, %101 : vector<8x384xf32>
    %103 = vector.extract_strided_slice %102 {offsets = [0, 0], sizes = [8, 128], strides = [1, 1]} : vector<8x384xf32> to vector<8x128xf32>
    %104 = vector.extract_strided_slice %102 {offsets = [0, 128], sizes = [8, 128], strides = [1, 1]} : vector<8x384xf32> to vector<8x128xf32>
    %105 = vector.extract_strided_slice %102 {offsets = [0, 256], sizes = [8, 128], strides = [1, 1]} : vector<8x384xf32> to vector<8x128xf32>
    %106 = arith.addf %103, %77 : vector<8x128xf32>
    %107 = arith.negf %106 : vector<8x128xf32>
    %108 = math.exp %107 : vector<8x128xf32>
    %cst_38 = arith.constant 1.000000e+00 : f32
    %109 = vector.broadcast %cst_38 : f32 to vector<8x128xf32>
    %110 = arith.addf %109, %108 : vector<8x128xf32>
    %111 = arith.divf %109, %110 : vector<8x128xf32>
    %112 = arith.addf %104, %78 : vector<8x128xf32>
    %113 = arith.negf %112 : vector<8x128xf32>
    %114 = math.exp %113 : vector<8x128xf32>
    %cst_39 = arith.constant 1.000000e+00 : f32
    %115 = vector.broadcast %cst_39 : f32 to vector<8x128xf32>
    %116 = arith.addf %115, %114 : vector<8x128xf32>
    %117 = arith.divf %115, %116 : vector<8x128xf32>
    %118 = arith.mulf %111, %79 : vector<8x128xf32>
    %119 = arith.addf %105, %118 : vector<8x128xf32>
    %120 = math.tanh %119 : vector<8x128xf32>
    %cst_40 = arith.constant 1.000000e+00 : f32
    %121 = vector.broadcast %cst_40 : f32 to vector<8x128xf32>
    %122 = arith.subf %121, %117 : vector<8x128xf32>
    %123 = arith.mulf %122, %120 : vector<8x128xf32>
    %124 = arith.mulf %117, %65 : vector<8x128xf32>
    %125 = arith.addf %123, %124 : vector<8x128xf32>
    %cst_41 = arith.constant dense<0.000000e+00> : vector<8x128xf32>
    %126 = tpu.matmul %125, %6, %cst_41 {dimension_numbers = #tpu.dot_dimension_numbers<[1], [0], [0], [1], [0, 0, 1, 1], [], []>} : vector<8x128xf32>, vector<128x128xf32>, vector<8x128xf32> -> vector<8x128xf32>
    %127 = vector.broadcast %7 : vector<1x128xf32> to vector<8x128xf32>
    %128 = arith.addf %126, %127 : vector<8x128xf32>
    %129 = arith.index_cast %c1_i32 : i32 to index
    %c0_42 = arith.constant 0 : index
    %c0_43 = arith.constant 0 : index
    %130 = vector.load %arg9[%129, %c0_42, %c0_43] : memref<8x8x128xf32, #tpu.memory_space<vmem>>, vector<1x8x128xf32>
    %131 = vector.shape_cast %130 : vector<1x8x128xf32> to vector<8x128xf32>
    %132 = vector.shape_cast %128 : vector<8x128xf32> to vector<1x8x128xf32>
    tpu.vector_store %arg9[%129, %c0_42, %c0_43], %132 {strides = array<i32>} : memref<8x8x128xf32, #tpu.memory_space<vmem>>, vector<1x8x128xf32>,
    %c2_i32 = arith.constant 2 : i32
    %cst_44 = arith.constant dense<0.000000e+00> : vector<8x512xf32>
    %133 = tpu.matmul %125, %1, %cst_44 {dimension_numbers = #tpu.dot_dimension_numbers<[1], [0], [0], [1], [0, 0, 1, 1], [], []>} : vector<8x128xf32>, vector<128x512xf32>, vector<8x512xf32> -> vector<8x512xf32>
    %134 = vector.broadcast %2 : vector<1x512xf32> to vector<8x512xf32>
    %135 = arith.addf %133, %134 : vector<8x512xf32>
    %136 = vector.extract_strided_slice %135 {offsets = [0, 0], sizes = [8, 128], strides = [1, 1]} : vector<8x512xf32> to vector<8x128xf32>
    %137 = vector.extract_strided_slice %135 {offsets = [0, 128], sizes = [8, 128], strides = [1, 1]} : vector<8x512xf32> to vector<8x128xf32>
    %138 = vector.extract_strided_slice %135 {offsets = [0, 256], sizes = [8, 128], strides = [1, 1]} : vector<8x512xf32> to vector<8x128xf32>
    %139 = vector.extract_strided_slice %135 {offsets = [0, 384], sizes = [8, 128], strides = [1, 1]} : vector<8x512xf32> to vector<8x128xf32>
    %140 = vector.shape_cast %136 : vector<8x128xf32> to vector<8x1x128xf32>
    %141 = vector.broadcast %140 : vector<8x1x128xf32> to vector<8x8x128xf32>
    %142 = arith.addf %11, %141 : vector<8x8x128xf32>
    %143 = math.tanh %142 : vector<8x8x128xf32>
    %144 = vector.broadcast %3 : vector<1x1x128xf32> to vector<8x8x128xf32>
    %145 = arith.mulf %143, %144 : vector<8x8x128xf32>
    %cst_45 = arith.constant dense<0.000000e+00> : vector<8x8xf32>
    %146 = vector.multi_reduction <add>, %145, %cst_45 [2] : vector<8x8x128xf32> to vector<8x8xf32>
    %cst_46 = arith.constant dense<0xFF800000> : vector<8xf32>
    %147 = vector.multi_reduction <maximumf>, %146, %cst_46 [1] : vector<8x8xf32> to vector<8xf32>
    %148 = vector.shape_cast %147 : vector<8xf32> to vector<8x1xf32>
    %149 = vector.broadcast %148 : vector<8x1xf32> to vector<8x8xf32>
    %150 = arith.subf %146, %149 : vector<8x8xf32>
    %151 = math.exp %150 : vector<8x8xf32>
    %cst_47 = arith.constant dense<0.000000e+00> : vector<8xf32>
    %152 = vector.multi_reduction <add>, %151, %cst_47 [1] : vector<8x8xf32> to vector<8xf32>
    %153 = vector.shape_cast %152 : vector<8xf32> to vector<8x1xf32>
    %154 = tpu.reciprocal %153 {approx = true} : vector<8x1xf32> -> vector<8x1xf32>
    %155 = vector.broadcast %154 : vector<8x1xf32> to vector<8x8xf32>
    %156 = arith.mulf %151, %155 : vector<8x8xf32>
    %157 = vector.shape_cast %156 : vector<8x8xf32> to vector<8x1x8xf32>
    "tpu.trace_start"() <{level = 10 : i32, message = "bqt,btc->bqc"}> : () -> ()
    %cst_48 = arith.constant dense<0.000000e+00> : vector<8x1x4xf32>
    %158 = tpu.matmul %157, %0, %cst_48 {dimension_numbers = #tpu.dot_dimension_numbers<[2], [1], [1], [2], [0, 0, 0, 1, 1, 2], [0], [0]>} : vector<8x1x8xf32>, vector<8x8x4xf32>, vector<8x1x4xf32> -> vector<8x1x4xf32>
    "tpu.trace_stop"() : () -> ()
    %159 = vector.shape_cast %158 : vector<8x1x4xf32> to vector<8x4xf32>
    %cst_49 = arith.constant dense<0.000000e+00> : vector<8x384xf32>
    %160 = tpu.matmul %159, %4, %cst_49 {dimension_numbers = #tpu.dot_dimension_numbers<[1], [0], [0], [1], [0, 0, 1, 1], [], []>} : vector<8x4xf32>, vector<4x384xf32>, vector<8x384xf32> -> vector<8x384xf32>
    %161 = vector.broadcast %5 : vector<1x384xf32> to vector<8x384xf32>
    %162 = arith.addf %160, %161 : vector<8x384xf32>
    %163 = vector.extract_strided_slice %162 {offsets = [0, 0], sizes = [8, 128], strides = [1, 1]} : vector<8x384xf32> to vector<8x128xf32>
    %164 = vector.extract_strided_slice %162 {offsets = [0, 128], sizes = [8, 128], strides = [1, 1]} : vector<8x384xf32> to vector<8x128xf32>
    %165 = vector.extract_strided_slice %162 {offsets = [0, 256], sizes = [8, 128], strides = [1, 1]} : vector<8x384xf32> to vector<8x128xf32>
    %166 = arith.addf %163, %137 : vector<8x128xf32>
    %167 = arith.negf %166 : vector<8x128xf32>
    %168 = math.exp %167 : vector<8x128xf32>
    %cst_50 = arith.constant 1.000000e+00 : f32
    %169 = vector.broadcast %cst_50 : f32 to vector<8x128xf32>
    %170 = arith.addf %169, %168 : vector<8x128xf32>
    %171 = arith.divf %169, %170 : vector<8x128xf32>
    %172 = arith.addf %164, %138 : vector<8x128xf32>
    %173 = arith.negf %172 : vector<8x128xf32>
    %174 = math.exp %173 : vector<8x128xf32>
    %cst_51 = arith.constant 1.000000e+00 : f32
    %175 = vector.broadcast %cst_51 : f32 to vector<8x128xf32>
    %176 = arith.addf %175, %174 : vector<8x128xf32>
    %177 = arith.divf %175, %176 : vector<8x128xf32>
    %178 = arith.mulf %171, %139 : vector<8x128xf32>
    %179 = arith.addf %165, %178 : vector<8x128xf32>
    %180 = math.tanh %179 : vector<8x128xf32>
    %cst_52 = arith.constant 1.000000e+00 : f32
    %181 = vector.broadcast %cst_52 : f32 to vector<8x128xf32>
    %182 = arith.subf %181, %177 : vector<8x128xf32>
    %183 = arith.mulf %182, %180 : vector<8x128xf32>
    %184 = arith.mulf %177, %125 : vector<8x128xf32>
    %185 = arith.addf %183, %184 : vector<8x128xf32>
    %cst_53 = arith.constant dense<0.000000e+00> : vector<8x128xf32>
    %186 = tpu.matmul %185, %6, %cst_53 {dimension_numbers = #tpu.dot_dimension_numbers<[1], [0], [0], [1], [0, 0, 1, 1], [], []>} : vector<8x128xf32>, vector<128x128xf32>, vector<8x128xf32> -> vector<8x128xf32>
    %187 = vector.broadcast %7 : vector<1x128xf32> to vector<8x128xf32>
    %188 = arith.addf %186, %187 : vector<8x128xf32>
    %189 = arith.index_cast %c2_i32 : i32 to index
    %c0_54 = arith.constant 0 : index
    %c0_55 = arith.constant 0 : index
    %190 = vector.load %arg9[%189, %c0_54, %c0_55] : memref<8x8x128xf32, #tpu.memory_space<vmem>>, vector<1x8x128xf32>
    %191 = vector.shape_cast %190 : vector<1x8x128xf32> to vector<8x128xf32>
    %192 = vector.shape_cast %188 : vector<8x128xf32> to vector<1x8x128xf32>
    tpu.vector_store %arg9[%189, %c0_54, %c0_55], %192 {strides = array<i32>} : memref<8x8x128xf32, #tpu.memory_space<vmem>>, vector<1x8x128xf32>,
    %c3_i32 = arith.constant 3 : i32
    %cst_56 = arith.constant dense<0.000000e+00> : vector<8x512xf32>
    %193 = tpu.matmul %185, %1, %cst_56 {dimension_numbers = #tpu.dot_dimension_numbers<[1], [0], [0], [1], [0, 0, 1, 1], [], []>} : vector<8x128xf32>, vector<128x512xf32>, vector<8x512xf32> -> vector<8x512xf32>
    %194 = vector.broadcast %2 : vector<1x512xf32> to vector<8x512xf32>
    %195 = arith.addf %193, %194 : vector<8x512xf32>
    %196 = vector.extract_strided_slice %195 {offsets = [0, 0], sizes = [8, 128], strides = [1, 1]} : vector<8x512xf32> to vector<8x128xf32>
    %197 = vector.extract_strided_slice %195 {offsets = [0, 128], sizes = [8, 128], strides = [1, 1]} : vector<8x512xf32> to vector<8x128xf32>
    %198 = vector.extract_strided_slice %195 {offsets = [0, 256], sizes = [8, 128], strides = [1, 1]} : vector<8x512xf32> to vector<8x128xf32>
    %199 = vector.extract_strided_slice %195 {offsets = [0, 384], sizes = [8, 128], strides = [1, 1]} : vector<8x512xf32> to vector<8x128xf32>
    %200 = vector.shape_cast %196 : vector<8x128xf32> to vector<8x1x128xf32>
    %201 = vector.broadcast %200 : vector<8x1x128xf32> to vector<8x8x128xf32>
    %202 = arith.addf %11, %201 : vector<8x8x128xf32>
    %203 = math.tanh %202 : vector<8x8x128xf32>
    %204 = vector.broadcast %3 : vector<1x1x128xf32> to vector<8x8x128xf32>
    %205 = arith.mulf %203, %204 : vector<8x8x128xf32>
    %cst_57 = arith.constant dense<0.000000e+00> : vector<8x8xf32>
    %206 = vector.multi_reduction <add>, %205, %cst_57 [2] : vector<8x8x128xf32> to vector<8x8xf32>
    %cst_58 = arith.constant dense<0xFF800000> : vector<8xf32>
    %207 = vector.multi_reduction <maximumf>, %206, %cst_58 [1] : vector<8x8xf32> to vector<8xf32>
    %208 = vector.shape_cast %207 : vector<8xf32> to vector<8x1xf32>
    %209 = vector.broadcast %208 : vector<8x1xf32> to vector<8x8xf32>
    %210 = arith.subf %206, %209 : vector<8x8xf32>
    %211 = math.exp %210 : vector<8x8xf32>
    %cst_59 = arith.constant dense<0.000000e+00> : vector<8xf32>
    %212 = vector.multi_reduction <add>, %211, %cst_59 [1] : vector<8x8xf32> to vector<8xf32>
    %213 = vector.shape_cast %212 : vector<8xf32> to vector<8x1xf32>
    %214 = tpu.reciprocal %213 {approx = true} : vector<8x1xf32> -> vector<8x1xf32>
    %215 = vector.broadcast %214 : vector<8x1xf32> to vector<8x8xf32>
    %216 = arith.mulf %211, %215 : vector<8x8xf32>
    %217 = vector.shape_cast %216 : vector<8x8xf32> to vector<8x1x8xf32>
    "tpu.trace_start"() <{level = 10 : i32, message = "bqt,btc->bqc"}> : () -> ()
    %cst_60 = arith.constant dense<0.000000e+00> : vector<8x1x4xf32>
    %218 = tpu.matmul %217, %0, %cst_60 {dimension_numbers = #tpu.dot_dimension_numbers<[2], [1], [1], [2], [0, 0, 0, 1, 1, 2], [0], [0]>} : vector<8x1x8xf32>, vector<8x8x4xf32>, vector<8x1x4xf32> -> vector<8x1x4xf32>
    "tpu.trace_stop"() : () -> ()
    %219 = vector.shape_cast %218 : vector<8x1x4xf32> to vector<8x4xf32>
    %cst_61 = arith.constant dense<0.000000e+00> : vector<8x384xf32>
    %220 = tpu.matmul %219, %4, %cst_61 {dimension_numbers = #tpu.dot_dimension_numbers<[1], [0], [0], [1], [0, 0, 1, 1], [], []>} : vector<8x4xf32>, vector<4x384xf32>, vector<8x384xf32> -> vector<8x384xf32>
    %221 = vector.broadcast %5 : vector<1x384xf32> to vector<8x384xf32>
    %222 = arith.addf %220, %221 : vector<8x384xf32>
    %223 = vector.extract_strided_slice %222 {offsets = [0, 0], sizes = [8, 128], strides = [1, 1]} : vector<8x384xf32> to vector<8x128xf32>
    %224 = vector.extract_strided_slice %222 {offsets = [0, 128], sizes = [8, 128], strides = [1, 1]} : vector<8x384xf32> to vector<8x128xf32>
    %225 = vector.extract_strided_slice %222 {offsets = [0, 256], sizes = [8, 128], strides = [1, 1]} : vector<8x384xf32> to vector<8x128xf32>
    %226 = arith.addf %223, %197 : vector<8x128xf32>
    %227 = arith.negf %226 : vector<8x128xf32>
    %228 = math.exp %227 : vector<8x128xf32>
    %cst_62 = arith.constant 1.000000e+00 : f32
    %229 = vector.broadcast %cst_62 : f32 to vector<8x128xf32>
    %230 = arith.addf %229, %228 : vector<8x128xf32>
    %231 = arith.divf %229, %230 : vector<8x128xf32>
    %232 = arith.addf %224, %198 : vector<8x128xf32>
    %233 = arith.negf %232 : vector<8x128xf32>
    %234 = math.exp %233 : vector<8x128xf32>
    %cst_63 = arith.constant 1.000000e+00 : f32
    %235 = vector.broadcast %cst_63 : f32 to vector<8x128xf32>
    %236 = arith.addf %235, %234 : vector<8x128xf32>
    %237 = arith.divf %235, %236 : vector<8x128xf32>
    %238 = arith.mulf %231, %199 : vector<8x128xf32>
    %239 = arith.addf %225, %238 : vector<8x128xf32>
    %240 = math.tanh %239 : vector<8x128xf32>
    %cst_64 = arith.constant 1.000000e+00 : f32
    %241 = vector.broadcast %cst_64 : f32 to vector<8x128xf32>
    %242 = arith.subf %241, %237 : vector<8x128xf32>
    %243 = arith.mulf %242, %240 : vector<8x128xf32>
    %244 = arith.mulf %237, %185 : vector<8x128xf32>
    %245 = arith.addf %243, %244 : vector<8x128xf32>
    %cst_65 = arith.constant dense<0.000000e+00> : vector<8x128xf32>
    %246 = tpu.matmul %245, %6, %cst_65 {dimension_numbers = #tpu.dot_dimension_numbers<[1], [0], [0], [1], [0, 0, 1, 1], [], []>} : vector<8x128xf32>, vector<128x128xf32>, vector<8x128xf32> -> vector<8x128xf32>
    %247 = vector.broadcast %7 : vector<1x128xf32> to vector<8x128xf32>
    %248 = arith.addf %246, %247 : vector<8x128xf32>
    %249 = arith.index_cast %c3_i32 : i32 to index
    %c0_66 = arith.constant 0 : index
    %c0_67 = arith.constant 0 : index
    %250 = vector.load %arg9[%249, %c0_66, %c0_67] : memref<8x8x128xf32, #tpu.memory_space<vmem>>, vector<1x8x128xf32>
    %251 = vector.shape_cast %250 : vector<1x8x128xf32> to vector<8x128xf32>
    %252 = vector.shape_cast %248 : vector<8x128xf32> to vector<1x8x128xf32>
    tpu.vector_store %arg9[%249, %c0_66, %c0_67], %252 {strides = array<i32>} : memref<8x8x128xf32, #tpu.memory_space<vmem>>, vector<1x8x128xf32>,
    %c4_i32 = arith.constant 4 : i32
    %cst_68 = arith.constant dense<0.000000e+00> : vector<8x512xf32>
    %253 = tpu.matmul %245, %1, %cst_68 {dimension_numbers = #tpu.dot_dimension_numbers<[1], [0], [0], [1], [0, 0, 1, 1], [], []>} : vector<8x128xf32>, vector<128x512xf32>, vector<8x512xf32> -> vector<8x512xf32>
    %254 = vector.broadcast %2 : vector<1x512xf32> to vector<8x512xf32>
    %255 = arith.addf %253, %254 : vector<8x512xf32>
    %256 = vector.extract_strided_slice %255 {offsets = [0, 0], sizes = [8, 128], strides = [1, 1]} : vector<8x512xf32> to vector<8x128xf32>
    %257 = vector.extract_strided_slice %255 {offsets = [0, 128], sizes = [8, 128], strides = [1, 1]} : vector<8x512xf32> to vector<8x128xf32>
    %258 = vector.extract_strided_slice %255 {offsets = [0, 256], sizes = [8, 128], strides = [1, 1]} : vector<8x512xf32> to vector<8x128xf32>
    %259 = vector.extract_strided_slice %255 {offsets = [0, 384], sizes = [8, 128], strides = [1, 1]} : vector<8x512xf32> to vector<8x128xf32>
    %260 = vector.shape_cast %256 : vector<8x128xf32> to vector<8x1x128xf32>
    %261 = vector.broadcast %260 : vector<8x1x128xf32> to vector<8x8x128xf32>
    %262 = arith.addf %11, %261 : vector<8x8x128xf32>
    %263 = math.tanh %262 : vector<8x8x128xf32>
    %264 = vector.broadcast %3 : vector<1x1x128xf32> to vector<8x8x128xf32>
    %265 = arith.mulf %263, %264 : vector<8x8x128xf32>
    %cst_69 = arith.constant dense<0.000000e+00> : vector<8x8xf32>
    %266 = vector.multi_reduction <add>, %265, %cst_69 [2] : vector<8x8x128xf32> to vector<8x8xf32>
    %cst_70 = arith.constant dense<0xFF800000> : vector<8xf32>
    %267 = vector.multi_reduction <maximumf>, %266, %cst_70 [1] : vector<8x8xf32> to vector<8xf32>
    %268 = vector.shape_cast %267 : vector<8xf32> to vector<8x1xf32>
    %269 = vector.broadcast %268 : vector<8x1xf32> to vector<8x8xf32>
    %270 = arith.subf %266, %269 : vector<8x8xf32>
    %271 = math.exp %270 : vector<8x8xf32>
    %cst_71 = arith.constant dense<0.000000e+00> : vector<8xf32>
    %272 = vector.multi_reduction <add>, %271, %cst_71 [1] : vector<8x8xf32> to vector<8xf32>
    %273 = vector.shape_cast %272 : vector<8xf32> to vector<8x1xf32>
    %274 = tpu.reciprocal %273 {approx = true} : vector<8x1xf32> -> vector<8x1xf32>
    %275 = vector.broadcast %274 : vector<8x1xf32> to vector<8x8xf32>
    %276 = arith.mulf %271, %275 : vector<8x8xf32>
    %277 = vector.shape_cast %276 : vector<8x8xf32> to vector<8x1x8xf32>
    "tpu.trace_start"() <{level = 10 : i32, message = "bqt,btc->bqc"}> : () -> ()
    %cst_72 = arith.constant dense<0.000000e+00> : vector<8x1x4xf32>
    %278 = tpu.matmul %277, %0, %cst_72 {dimension_numbers = #tpu.dot_dimension_numbers<[2], [1], [1], [2], [0, 0, 0, 1, 1, 2], [0], [0]>} : vector<8x1x8xf32>, vector<8x8x4xf32>, vector<8x1x4xf32> -> vector<8x1x4xf32>
    "tpu.trace_stop"() : () -> ()
    %279 = vector.shape_cast %278 : vector<8x1x4xf32> to vector<8x4xf32>
    %cst_73 = arith.constant dense<0.000000e+00> : vector<8x384xf32>
    %280 = tpu.matmul %279, %4, %cst_73 {dimension_numbers = #tpu.dot_dimension_numbers<[1], [0], [0], [1], [0, 0, 1, 1], [], []>} : vector<8x4xf32>, vector<4x384xf32>, vector<8x384xf32> -> vector<8x384xf32>
    %281 = vector.broadcast %5 : vector<1x384xf32> to vector<8x384xf32>
    %282 = arith.addf %280, %281 : vector<8x384xf32>
    %283 = vector.extract_strided_slice %282 {offsets = [0, 0], sizes = [8, 128], strides = [1, 1]} : vector<8x384xf32> to vector<8x128xf32>
    %284 = vector.extract_strided_slice %282 {offsets = [0, 128], sizes = [8, 128], strides = [1, 1]} : vector<8x384xf32> to vector<8x128xf32>
    %285 = vector.extract_strided_slice %282 {offsets = [0, 256], sizes = [8, 128], strides = [1, 1]} : vector<8x384xf32> to vector<8x128xf32>
    %286 = arith.addf %283, %257 : vector<8x128xf32>
    %287 = arith.negf %286 : vector<8x128xf32>
    %288 = math.exp %287 : vector<8x128xf32>
    %cst_74 = arith.constant 1.000000e+00 : f32
    %289 = vector.broadcast %cst_74 : f32 to vector<8x128xf32>
    %290 = arith.addf %289, %288 : vector<8x128xf32>
    %291 = arith.divf %289, %290 : vector<8x128xf32>
    %292 = arith.addf %284, %258 : vector<8x128xf32>
    %293 = arith.negf %292 : vector<8x128xf32>
    %294 = math.exp %293 : vector<8x128xf32>
    %cst_75 = arith.constant 1.000000e+00 : f32
    %295 = vector.broadcast %cst_75 : f32 to vector<8x128xf32>
    %296 = arith.addf %295, %294 : vector<8x128xf32>
    %297 = arith.divf %295, %296 : vector<8x128xf32>
    %298 = arith.mulf %291, %259 : vector<8x128xf32>
    %299 = arith.addf %285, %298 : vector<8x128xf32>
    %300 = math.tanh %299 : vector<8x128xf32>
    %cst_76 = arith.constant 1.000000e+00 : f32
    %301 = vector.broadcast %cst_76 : f32 to vector<8x128xf32>
    %302 = arith.subf %301, %297 : vector<8x128xf32>
    %303 = arith.mulf %302, %300 : vector<8x128xf32>
    %304 = arith.mulf %297, %245 : vector<8x128xf32>
    %305 = arith.addf %303, %304 : vector<8x128xf32>
    %cst_77 = arith.constant dense<0.000000e+00> : vector<8x128xf32>
    %306 = tpu.matmul %305, %6, %cst_77 {dimension_numbers = #tpu.dot_dimension_numbers<[1], [0], [0], [1], [0, 0, 1, 1], [], []>} : vector<8x128xf32>, vector<128x128xf32>, vector<8x128xf32> -> vector<8x128xf32>
    %307 = vector.broadcast %7 : vector<1x128xf32> to vector<8x128xf32>
    %308 = arith.addf %306, %307 : vector<8x128xf32>
    %309 = arith.index_cast %c4_i32 : i32 to index
    %c0_78 = arith.constant 0 : index
    %c0_79 = arith.constant 0 : index
    %310 = vector.load %arg9[%309, %c0_78, %c0_79] : memref<8x8x128xf32, #tpu.memory_space<vmem>>, vector<1x8x128xf32>
    %311 = vector.shape_cast %310 : vector<1x8x128xf32> to vector<8x128xf32>
    %312 = vector.shape_cast %308 : vector<8x128xf32> to vector<1x8x128xf32>
    tpu.vector_store %arg9[%309, %c0_78, %c0_79], %312 {strides = array<i32>} : memref<8x8x128xf32, #tpu.memory_space<vmem>>, vector<1x8x128xf32>,
    %c5_i32 = arith.constant 5 : i32
    %cst_80 = arith.constant dense<0.000000e+00> : vector<8x512xf32>
    %313 = tpu.matmul %305, %1, %cst_80 {dimension_numbers = #tpu.dot_dimension_numbers<[1], [0], [0], [1], [0, 0, 1, 1], [], []>} : vector<8x128xf32>, vector<128x512xf32>, vector<8x512xf32> -> vector<8x512xf32>
    %314 = vector.broadcast %2 : vector<1x512xf32> to vector<8x512xf32>
    %315 = arith.addf %313, %314 : vector<8x512xf32>
    %316 = vector.extract_strided_slice %315 {offsets = [0, 0], sizes = [8, 128], strides = [1, 1]} : vector<8x512xf32> to vector<8x128xf32>
    %317 = vector.extract_strided_slice %315 {offsets = [0, 128], sizes = [8, 128], strides = [1, 1]} : vector<8x512xf32> to vector<8x128xf32>
    %318 = vector.extract_strided_slice %315 {offsets = [0, 256], sizes = [8, 128], strides = [1, 1]} : vector<8x512xf32> to vector<8x128xf32>
    %319 = vector.extract_strided_slice %315 {offsets = [0, 384], sizes = [8, 128], strides = [1, 1]} : vector<8x512xf32> to vector<8x128xf32>
    %320 = vector.shape_cast %316 : vector<8x128xf32> to vector<8x1x128xf32>
    %321 = vector.broadcast %320 : vector<8x1x128xf32> to vector<8x8x128xf32>
    %322 = arith.addf %11, %321 : vector<8x8x128xf32>
    %323 = math.tanh %322 : vector<8x8x128xf32>
    %324 = vector.broadcast %3 : vector<1x1x128xf32> to vector<8x8x128xf32>
    %325 = arith.mulf %323, %324 : vector<8x8x128xf32>
    %cst_81 = arith.constant dense<0.000000e+00> : vector<8x8xf32>
    %326 = vector.multi_reduction <add>, %325, %cst_81 [2] : vector<8x8x128xf32> to vector<8x8xf32>
    %cst_82 = arith.constant dense<0xFF800000> : vector<8xf32>
    %327 = vector.multi_reduction <maximumf>, %326, %cst_82 [1] : vector<8x8xf32> to vector<8xf32>
    %328 = vector.shape_cast %327 : vector<8xf32> to vector<8x1xf32>
    %329 = vector.broadcast %328 : vector<8x1xf32> to vector<8x8xf32>
    %330 = arith.subf %326, %329 : vector<8x8xf32>
    %331 = math.exp %330 : vector<8x8xf32>
    %cst_83 = arith.constant dense<0.000000e+00> : vector<8xf32>
    %332 = vector.multi_reduction <add>, %331, %cst_83 [1] : vector<8x8xf32> to vector<8xf32>
    %333 = vector.shape_cast %332 : vector<8xf32> to vector<8x1xf32>
    %334 = tpu.reciprocal %333 {approx = true} : vector<8x1xf32> -> vector<8x1xf32>
    %335 = vector.broadcast %334 : vector<8x1xf32> to vector<8x8xf32>
    %336 = arith.mulf %331, %335 : vector<8x8xf32>
    %337 = vector.shape_cast %336 : vector<8x8xf32> to vector<8x1x8xf32>
    "tpu.trace_start"() <{level = 10 : i32, message = "bqt,btc->bqc"}> : () -> ()
    %cst_84 = arith.constant dense<0.000000e+00> : vector<8x1x4xf32>
    %338 = tpu.matmul %337, %0, %cst_84 {dimension_numbers = #tpu.dot_dimension_numbers<[2], [1], [1], [2], [0, 0, 0, 1, 1, 2], [0], [0]>} : vector<8x1x8xf32>, vector<8x8x4xf32>, vector<8x1x4xf32> -> vector<8x1x4xf32>
    "tpu.trace_stop"() : () -> ()
    %339 = vector.shape_cast %338 : vector<8x1x4xf32> to vector<8x4xf32>
    %cst_85 = arith.constant dense<0.000000e+00> : vector<8x384xf32>
    %340 = tpu.matmul %339, %4, %cst_85 {dimension_numbers = #tpu.dot_dimension_numbers<[1], [0], [0], [1], [0, 0, 1, 1], [], []>} : vector<8x4xf32>, vector<4x384xf32>, vector<8x384xf32> -> vector<8x384xf32>
    %341 = vector.broadcast %5 : vector<1x384xf32> to vector<8x384xf32>
    %342 = arith.addf %340, %341 : vector<8x384xf32>
    %343 = vector.extract_strided_slice %342 {offsets = [0, 0], sizes = [8, 128], strides = [1, 1]} : vector<8x384xf32> to vector<8x128xf32>
    %344 = vector.extract_strided_slice %342 {offsets = [0, 128], sizes = [8, 128], strides = [1, 1]} : vector<8x384xf32> to vector<8x128xf32>
    %345 = vector.extract_strided_slice %342 {offsets = [0, 256], sizes = [8, 128], strides = [1, 1]} : vector<8x384xf32> to vector<8x128xf32>
    %346 = arith.addf %343, %317 : vector<8x128xf32>
    %347 = arith.negf %346 : vector<8x128xf32>
    %348 = math.exp %347 : vector<8x128xf32>
    %cst_86 = arith.constant 1.000000e+00 : f32
    %349 = vector.broadcast %cst_86 : f32 to vector<8x128xf32>
    %350 = arith.addf %349, %348 : vector<8x128xf32>
    %351 = arith.divf %349, %350 : vector<8x128xf32>
    %352 = arith.addf %344, %318 : vector<8x128xf32>
    %353 = arith.negf %352 : vector<8x128xf32>
    %354 = math.exp %353 : vector<8x128xf32>
    %cst_87 = arith.constant 1.000000e+00 : f32
    %355 = vector.broadcast %cst_87 : f32 to vector<8x128xf32>
    %356 = arith.addf %355, %354 : vector<8x128xf32>
    %357 = arith.divf %355, %356 : vector<8x128xf32>
    %358 = arith.mulf %351, %319 : vector<8x128xf32>
    %359 = arith.addf %345, %358 : vector<8x128xf32>
    %360 = math.tanh %359 : vector<8x128xf32>
    %cst_88 = arith.constant 1.000000e+00 : f32
    %361 = vector.broadcast %cst_88 : f32 to vector<8x128xf32>
    %362 = arith.subf %361, %357 : vector<8x128xf32>
    %363 = arith.mulf %362, %360 : vector<8x128xf32>
    %364 = arith.mulf %357, %305 : vector<8x128xf32>
    %365 = arith.addf %363, %364 : vector<8x128xf32>
    %cst_89 = arith.constant dense<0.000000e+00> : vector<8x128xf32>
    %366 = tpu.matmul %365, %6, %cst_89 {dimension_numbers = #tpu.dot_dimension_numbers<[1], [0], [0], [1], [0, 0, 1, 1], [], []>} : vector<8x128xf32>, vector<128x128xf32>, vector<8x128xf32> -> vector<8x128xf32>
    %367 = vector.broadcast %7 : vector<1x128xf32> to vector<8x128xf32>
    %368 = arith.addf %366, %367 : vector<8x128xf32>
    %369 = arith.index_cast %c5_i32 : i32 to index
    %c0_90 = arith.constant 0 : index
    %c0_91 = arith.constant 0 : index
    %370 = vector.load %arg9[%369, %c0_90, %c0_91] : memref<8x8x128xf32, #tpu.memory_space<vmem>>, vector<1x8x128xf32>
    %371 = vector.shape_cast %370 : vector<1x8x128xf32> to vector<8x128xf32>
    %372 = vector.shape_cast %368 : vector<8x128xf32> to vector<1x8x128xf32>
    tpu.vector_store %arg9[%369, %c0_90, %c0_91], %372 {strides = array<i32>} : memref<8x8x128xf32, #tpu.memory_space<vmem>>, vector<1x8x128xf32>,
    %c6_i32 = arith.constant 6 : i32
    %cst_92 = arith.constant dense<0.000000e+00> : vector<8x512xf32>
    %373 = tpu.matmul %365, %1, %cst_92 {dimension_numbers = #tpu.dot_dimension_numbers<[1], [0], [0], [1], [0, 0, 1, 1], [], []>} : vector<8x128xf32>, vector<128x512xf32>, vector<8x512xf32> -> vector<8x512xf32>
    %374 = vector.broadcast %2 : vector<1x512xf32> to vector<8x512xf32>
    %375 = arith.addf %373, %374 : vector<8x512xf32>
    %376 = vector.extract_strided_slice %375 {offsets = [0, 0], sizes = [8, 128], strides = [1, 1]} : vector<8x512xf32> to vector<8x128xf32>
    %377 = vector.extract_strided_slice %375 {offsets = [0, 128], sizes = [8, 128], strides = [1, 1]} : vector<8x512xf32> to vector<8x128xf32>
    %378 = vector.extract_strided_slice %375 {offsets = [0, 256], sizes = [8, 128], strides = [1, 1]} : vector<8x512xf32> to vector<8x128xf32>
    %379 = vector.extract_strided_slice %375 {offsets = [0, 384], sizes = [8, 128], strides = [1, 1]} : vector<8x512xf32> to vector<8x128xf32>
    %380 = vector.shape_cast %376 : vector<8x128xf32> to vector<8x1x128xf32>
    %381 = vector.broadcast %380 : vector<8x1x128xf32> to vector<8x8x128xf32>
    %382 = arith.addf %11, %381 : vector<8x8x128xf32>
    %383 = math.tanh %382 : vector<8x8x128xf32>
    %384 = vector.broadcast %3 : vector<1x1x128xf32> to vector<8x8x128xf32>
    %385 = arith.mulf %383, %384 : vector<8x8x128xf32>
    %cst_93 = arith.constant dense<0.000000e+00> : vector<8x8xf32>
    %386 = vector.multi_reduction <add>, %385, %cst_93 [2] : vector<8x8x128xf32> to vector<8x8xf32>
    %cst_94 = arith.constant dense<0xFF800000> : vector<8xf32>
    %387 = vector.multi_reduction <maximumf>, %386, %cst_94 [1] : vector<8x8xf32> to vector<8xf32>
    %388 = vector.shape_cast %387 : vector<8xf32> to vector<8x1xf32>
    %389 = vector.broadcast %388 : vector<8x1xf32> to vector<8x8xf32>
    %390 = arith.subf %386, %389 : vector<8x8xf32>
    %391 = math.exp %390 : vector<8x8xf32>
    %cst_95 = arith.constant dense<0.000000e+00> : vector<8xf32>
    %392 = vector.multi_reduction <add>, %391, %cst_95 [1] : vector<8x8xf32> to vector<8xf32>
    %393 = vector.shape_cast %392 : vector<8xf32> to vector<8x1xf32>
    %394 = tpu.reciprocal %393 {approx = true} : vector<8x1xf32> -> vector<8x1xf32>
    %395 = vector.broadcast %394 : vector<8x1xf32> to vector<8x8xf32>
    %396 = arith.mulf %391, %395 : vector<8x8xf32>
    %397 = vector.shape_cast %396 : vector<8x8xf32> to vector<8x1x8xf32>
    "tpu.trace_start"() <{level = 10 : i32, message = "bqt,btc->bqc"}> : () -> ()
    %cst_96 = arith.constant dense<0.000000e+00> : vector<8x1x4xf32>
    %398 = tpu.matmul %397, %0, %cst_96 {dimension_numbers = #tpu.dot_dimension_numbers<[2], [1], [1], [2], [0, 0, 0, 1, 1, 2], [0], [0]>} : vector<8x1x8xf32>, vector<8x8x4xf32>, vector<8x1x4xf32> -> vector<8x1x4xf32>
    "tpu.trace_stop"() : () -> ()
    %399 = vector.shape_cast %398 : vector<8x1x4xf32> to vector<8x4xf32>
    %cst_97 = arith.constant dense<0.000000e+00> : vector<8x384xf32>
    %400 = tpu.matmul %399, %4, %cst_97 {dimension_numbers = #tpu.dot_dimension_numbers<[1], [0], [0], [1], [0, 0, 1, 1], [], []>} : vector<8x4xf32>, vector<4x384xf32>, vector<8x384xf32> -> vector<8x384xf32>
    %401 = vector.broadcast %5 : vector<1x384xf32> to vector<8x384xf32>
    %402 = arith.addf %400, %401 : vector<8x384xf32>
    %403 = vector.extract_strided_slice %402 {offsets = [0, 0], sizes = [8, 128], strides = [1, 1]} : vector<8x384xf32> to vector<8x128xf32>
    %404 = vector.extract_strided_slice %402 {offsets = [0, 128], sizes = [8, 128], strides = [1, 1]} : vector<8x384xf32> to vector<8x128xf32>
    %405 = vector.extract_strided_slice %402 {offsets = [0, 256], sizes = [8, 128], strides = [1, 1]} : vector<8x384xf32> to vector<8x128xf32>
    %406 = arith.addf %403, %377 : vector<8x128xf32>
    %407 = arith.negf %406 : vector<8x128xf32>
    %408 = math.exp %407 : vector<8x128xf32>
    %cst_98 = arith.constant 1.000000e+00 : f32
    %409 = vector.broadcast %cst_98 : f32 to vector<8x128xf32>
    %410 = arith.addf %409, %408 : vector<8x128xf32>
    %411 = arith.divf %409, %410 : vector<8x128xf32>
    %412 = arith.addf %404, %378 : vector<8x128xf32>
    %413 = arith.negf %412 : vector<8x128xf32>
    %414 = math.exp %413 : vector<8x128xf32>
    %cst_99 = arith.constant 1.000000e+00 : f32
    %415 = vector.broadcast %cst_99 : f32 to vector<8x128xf32>
    %416 = arith.addf %415, %414 : vector<8x128xf32>
    %417 = arith.divf %415, %416 : vector<8x128xf32>
    %418 = arith.mulf %411, %379 : vector<8x128xf32>
    %419 = arith.addf %405, %418 : vector<8x128xf32>
    %420 = math.tanh %419 : vector<8x128xf32>
    %cst_100 = arith.constant 1.000000e+00 : f32
    %421 = vector.broadcast %cst_100 : f32 to vector<8x128xf32>
    %422 = arith.subf %421, %417 : vector<8x128xf32>
    %423 = arith.mulf %422, %420 : vector<8x128xf32>
    %424 = arith.mulf %417, %365 : vector<8x128xf32>
    %425 = arith.addf %423, %424 : vector<8x128xf32>
    %cst_101 = arith.constant dense<0.000000e+00> : vector<8x128xf32>
    %426 = tpu.matmul %425, %6, %cst_101 {dimension_numbers = #tpu.dot_dimension_numbers<[1], [0], [0], [1], [0, 0, 1, 1], [], []>} : vector<8x128xf32>, vector<128x128xf32>, vector<8x128xf32> -> vector<8x128xf32>
    %427 = vector.broadcast %7 : vector<1x128xf32> to vector<8x128xf32>
    %428 = arith.addf %426, %427 : vector<8x128xf32>
    %429 = arith.index_cast %c6_i32 : i32 to index
    %c0_102 = arith.constant 0 : index
    %c0_103 = arith.constant 0 : index
    %430 = vector.load %arg9[%429, %c0_102, %c0_103] : memref<8x8x128xf32, #tpu.memory_space<vmem>>, vector<1x8x128xf32>
    %431 = vector.shape_cast %430 : vector<1x8x128xf32> to vector<8x128xf32>
    %432 = vector.shape_cast %428 : vector<8x128xf32> to vector<1x8x128xf32>
    tpu.vector_store %arg9[%429, %c0_102, %c0_103], %432 {strides = array<i32>} : memref<8x8x128xf32, #tpu.memory_space<vmem>>, vector<1x8x128xf32>,
    %c7_i32 = arith.constant 7 : i32
    %cst_104 = arith.constant dense<0.000000e+00> : vector<8x512xf32>
    %433 = tpu.matmul %425, %1, %cst_104 {dimension_numbers = #tpu.dot_dimension_numbers<[1], [0], [0], [1], [0, 0, 1, 1], [], []>} : vector<8x128xf32>, vector<128x512xf32>, vector<8x512xf32> -> vector<8x512xf32>
    %434 = vector.broadcast %2 : vector<1x512xf32> to vector<8x512xf32>
    %435 = arith.addf %433, %434 : vector<8x512xf32>
    %436 = vector.extract_strided_slice %435 {offsets = [0, 0], sizes = [8, 128], strides = [1, 1]} : vector<8x512xf32> to vector<8x128xf32>
    %437 = vector.extract_strided_slice %435 {offsets = [0, 128], sizes = [8, 128], strides = [1, 1]} : vector<8x512xf32> to vector<8x128xf32>
    %438 = vector.extract_strided_slice %435 {offsets = [0, 256], sizes = [8, 128], strides = [1, 1]} : vector<8x512xf32> to vector<8x128xf32>
    %439 = vector.extract_strided_slice %435 {offsets = [0, 384], sizes = [8, 128], strides = [1, 1]} : vector<8x512xf32> to vector<8x128xf32>
    %440 = vector.shape_cast %436 : vector<8x128xf32> to vector<8x1x128xf32>
    %441 = vector.broadcast %440 : vector<8x1x128xf32> to vector<8x8x128xf32>
    %442 = arith.addf %11, %441 : vector<8x8x128xf32>
    %443 = math.tanh %442 : vector<8x8x128xf32>
    %444 = vector.broadcast %3 : vector<1x1x128xf32> to vector<8x8x128xf32>
    %445 = arith.mulf %443, %444 : vector<8x8x128xf32>
    %cst_105 = arith.constant dense<0.000000e+00> : vector<8x8xf32>
    %446 = vector.multi_reduction <add>, %445, %cst_105 [2] : vector<8x8x128xf32> to vector<8x8xf32>
    %cst_106 = arith.constant dense<0xFF800000> : vector<8xf32>
    %447 = vector.multi_reduction <maximumf>, %446, %cst_106 [1] : vector<8x8xf32> to vector<8xf32>
    %448 = vector.shape_cast %447 : vector<8xf32> to vector<8x1xf32>
    %449 = vector.broadcast %448 : vector<8x1xf32> to vector<8x8xf32>
    %450 = arith.subf %446, %449 : vector<8x8xf32>
    %451 = math.exp %450 : vector<8x8xf32>
    %cst_107 = arith.constant dense<0.000000e+00> : vector<8xf32>
    %452 = vector.multi_reduction <add>, %451, %cst_107 [1] : vector<8x8xf32> to vector<8xf32>
    %453 = vector.shape_cast %452 : vector<8xf32> to vector<8x1xf32>
    %454 = tpu.reciprocal %453 {approx = true} : vector<8x1xf32> -> vector<8x1xf32>
    %455 = vector.broadcast %454 : vector<8x1xf32> to vector<8x8xf32>
    %456 = arith.mulf %451, %455 : vector<8x8xf32>
    %457 = vector.shape_cast %456 : vector<8x8xf32> to vector<8x1x8xf32>
    "tpu.trace_start"() <{level = 10 : i32, message = "bqt,btc->bqc"}> : () -> ()
    %cst_108 = arith.constant dense<0.000000e+00> : vector<8x1x4xf32>
    %458 = tpu.matmul %457, %0, %cst_108 {dimension_numbers = #tpu.dot_dimension_numbers<[2], [1], [1], [2], [0, 0, 0, 1, 1, 2], [0], [0]>} : vector<8x1x8xf32>, vector<8x8x4xf32>, vector<8x1x4xf32> -> vector<8x1x4xf32>
    "tpu.trace_stop"() : () -> ()
    %459 = vector.shape_cast %458 : vector<8x1x4xf32> to vector<8x4xf32>
    %cst_109 = arith.constant dense<0.000000e+00> : vector<8x384xf32>
    %460 = tpu.matmul %459, %4, %cst_109 {dimension_numbers = #tpu.dot_dimension_numbers<[1], [0], [0], [1], [0, 0, 1, 1], [], []>} : vector<8x4xf32>, vector<4x384xf32>, vector<8x384xf32> -> vector<8x384xf32>
    %461 = vector.broadcast %5 : vector<1x384xf32> to vector<8x384xf32>
    %462 = arith.addf %460, %461 : vector<8x384xf32>
    %463 = vector.extract_strided_slice %462 {offsets = [0, 0], sizes = [8, 128], strides = [1, 1]} : vector<8x384xf32> to vector<8x128xf32>
    %464 = vector.extract_strided_slice %462 {offsets = [0, 128], sizes = [8, 128], strides = [1, 1]} : vector<8x384xf32> to vector<8x128xf32>
    %465 = vector.extract_strided_slice %462 {offsets = [0, 256], sizes = [8, 128], strides = [1, 1]} : vector<8x384xf32> to vector<8x128xf32>
    %466 = arith.addf %463, %437 : vector<8x128xf32>
    %467 = arith.negf %466 : vector<8x128xf32>
    %468 = math.exp %467 : vector<8x128xf32>
    %cst_110 = arith.constant 1.000000e+00 : f32
    %469 = vector.broadcast %cst_110 : f32 to vector<8x128xf32>
    %470 = arith.addf %469, %468 : vector<8x128xf32>
    %471 = arith.divf %469, %470 : vector<8x128xf32>
    %472 = arith.addf %464, %438 : vector<8x128xf32>
    %473 = arith.negf %472 : vector<8x128xf32>
    %474 = math.exp %473 : vector<8x128xf32>
    %cst_111 = arith.constant 1.000000e+00 : f32
    %475 = vector.broadcast %cst_111 : f32 to vector<8x128xf32>
    %476 = arith.addf %475, %474 : vector<8x128xf32>
    %477 = arith.divf %475, %476 : vector<8x128xf32>
    %478 = arith.mulf %471, %439 : vector<8x128xf32>
    %479 = arith.addf %465, %478 : vector<8x128xf32>
    %480 = math.tanh %479 : vector<8x128xf32>
    %cst_112 = arith.constant 1.000000e+00 : f32
    %481 = vector.broadcast %cst_112 : f32 to vector<8x128xf32>
    %482 = arith.subf %481, %477 : vector<8x128xf32>
    %483 = arith.mulf %482, %480 : vector<8x128xf32>
    %484 = arith.mulf %477, %425 : vector<8x128xf32>
    %485 = arith.addf %483, %484 : vector<8x128xf32>
    %cst_113 = arith.constant dense<0.000000e+00> : vector<8x128xf32>
    %486 = tpu.matmul %485, %6, %cst_113 {dimension_numbers = #tpu.dot_dimension_numbers<[1], [0], [0], [1], [0, 0, 1, 1], [], []>} : vector<8x128xf32>, vector<128x128xf32>, vector<8x128xf32> -> vector<8x128xf32>
    %487 = vector.broadcast %7 : vector<1x128xf32> to vector<8x128xf32>
    %488 = arith.addf %486, %487 : vector<8x128xf32>
    %489 = arith.index_cast %c7_i32 : i32 to index
    %c0_114 = arith.constant 0 : index
    %c0_115 = arith.constant 0 : index
    %490 = vector.load %arg9[%489, %c0_114, %c0_115] : memref<8x8x128xf32, #tpu.memory_space<vmem>>, vector<1x8x128xf32>
    %491 = vector.shape_cast %490 : vector<1x8x128xf32> to vector<8x128xf32>
    %492 = vector.shape_cast %488 : vector<8x128xf32> to vector<1x8x128xf32>
    tpu.vector_store %arg9[%489, %c0_114, %c0_115], %492 {strides = array<i32>} : memref<8x8x128xf32, #tpu.memory_space<vmem>>, vector<1x8x128xf32>,
    %c8_i32 = arith.constant 8 : i32
    return
  }
}

</mosaic_0001>

<bundles_post_ra>
// kernel: tpu_custom_call.1
= control target key start
LH: loop header
LB: loop body
LE: loop exit
PB: predicated region body
PF: predicated region fallthrough
CT: control target
= control target key end

     0   :  { %14 = vsyncpa [#allocation3], 0  ;;  %s16256_s0 = inlined_call_operand.vmem [shape: f32[8,8,4], index: 0, kind: input, shape index: {}]   ;;  %s16257_s1 = inlined_call_operand.vmem [shape: f32[4,128], index: 1, kind: input, shape index: {}]   ;;  %s16258_s2 = inlined_call_operand.hbm [shape: f32[128,512], index: 2, kind: input, shape index: {}]   ;;  %s16259_s3 = inlined_call_operand.vmem [shape: f32[1,512], index: 3, kind: input, shape index: {}]   ;;  %s16260_s4 = inlined_call_operand.vmem [shape: f32[1,1,128], index: 4, kind: input, shape index: {}]   ;;  %s16261_s5 = inlined_call_operand.vmem [shape: f32[4,384], index: 5, kind: input, shape index: {}]   ;;  %s16262_s6 = inlined_call_operand.vmem [shape: f32[1,384], index: 6, kind: input, shape index: {}]   ;;  %s16263_s7 = inlined_call_operand.hbm [shape: f32[128,128], index: 7, kind: input, shape index: {}]   ;;  %s16264_s8 = inlined_call_operand.vmem [shape: f32[1,128], index: 8, kind: input, shape index: {}]   ;;  %s16265_s9 = inlined_call_operand.hbm [shape: f32[8,8,128], index: 9, kind: output, shape index: {}]  }
   0x1   :  { %15 = vsyncpa [#allocation6], 0 }
   0x2   :  { %16 = vsyncpa [#allocation4], 0  ;;  %s13925_s30 = smov [#allocation2]   ;;  %s13853_s13 = scalar_lea.hbm %s16258_s2, 8192 }
   0x3   :  { %s26_s10 = sshll.u32 %s13925_s30, 4  ;;  %p13854_p0 = scmp.ne.s32.totalorder %s16258_s2, %s13853_s13  ;;  %s27_s10 = int_to_ptr.vmem [resolvable:$true] %s26_s10 }
   0x4   :  { %p13857_p1 = scmp.lt.u32.totalorder %s13853_s13, %s16258_s2 }
   0x6   :  { %p13859_p2 = pnand %p13857_p1, %p13854_p0 }
   0x8   :  { %13862 = shalt.err (!%p13859_p2)
}
   0x9   :  { %s13863_s18 = scalar_lea.vmem %s27_s10, 8192  ;;  %p13868_p4 = scmp.lt.s32.totalorder %s27_s10, %s27_s10 }
   0xa   :  { %p13864_p3 = scmp.ne.s32.totalorder %s27_s10, %s13863_s18  ;;  %p13869_p5 = scmp.lt.s32.totalorder %s13863_s18, %s13863_s18 }
   0xc   :  { %p13870_p6 = por %p13869_p5, %p13868_p4 }
   0xe   :  { %p13871_p7 = pnand %p13870_p6, %p13864_p3 }
  0x10   :  { %13874 = shalt.err (!%p13871_p7)
}
  0x11   :  { %s13926_s19 = smov 512   ;;  %s13927_s20 = smov 32  }
  0x12   :  { %32 = dma.hbm_to_vmem [thread:$0]  %s16258_s2, 8192, %s27_s10, [#allocation3], %s13926_s19, %s13926_s19, %s13927_s20  }
  0x13   :  { %s13928_s23 = smov [#allocation5]   ;;  %s13875_s27 = scalar_lea.hbm %s16263_s7, 2048 }
  0x14   :  { %s46_s24 = sshll.u32 %s13928_s23, 4  ;;  %p13876_p8 = scmp.ne.s32.totalorder %s16263_s7, %s13875_s27  ;;  %s47_s24 = int_to_ptr.vmem [resolvable:$true] %s46_s24 }
  0x15   :  { %p13879_p9 = scmp.lt.u32.totalorder %s13875_s27, %s16263_s7 }
  0x17   :  { %p13881_p10 = pnand %p13879_p9, %p13876_p8 }
  0x19   :  { %13884 = shalt.err (!%p13881_p10)
}
  0x1a   :  { %s13885_s12 = scalar_lea.vmem %s47_s24, 2048  ;;  %p13890_p12 = scmp.lt.s32.totalorder %s47_s24, %s47_s24 }
  0x1b   :  { %p13886_p11 = scmp.ne.s32.totalorder %s47_s24, %s13885_s12  ;;  %p13891_p13 = scmp.lt.s32.totalorder %s13885_s12, %s13885_s12 }
  0x1d   :  { %p13892_p0 = por %p13891_p13, %p13890_p12 }
  0x1f   :  { %p13893_p1 = pnand %p13892_p0, %p13886_p11 }
  0x21   :  { %13896 = shalt.err (!%p13893_p1)
}
  0x22   :  { %s13929_s2 = smov 128   ;;  %s13930_s10 = smov 8  }
  0x23   :  { %52 = dma.hbm_to_vmem [thread:$0]  %s16263_s7, 2048, %s47_s24, [#allocation6], %s13929_s2, %s13929_s2, %s13930_s10  }
  0x24   :  { %13919 = dma.done.wait [#allocation3], 8192  }
  0x25   :  { %13920 = vsyncadd [#allocation3], 4294959104 }
  0x26   :  { %13921 = dma.done.wait [#allocation6], 2048  }
  0x27   :  { %13922 = vsyncadd [#allocation6], 4294965248  ;;  %v16266_v0 = vmov 0.0   ;;  %v70_v1 = vld [vmem:[#allocation2 + $0x8] sm:$0xff]  ;;  %v69_v3 = vld [vmem:[#allocation2] sm:$0xff]  ;;  %vm181_vm0 = vcmask 1043456   ;;  %v291_v62 = vlaneseq }
  0x28   :  { %375 = vmatprep.mubr.f32.mxu1 %v16266_v0  ;;  %v74_v2 = vld [vmem:[#allocation2 + $0x28] sm:$0xff]  ;;  %v73_v5 = vld [vmem:[#allocation2 + $0x20] sm:$0xff]  ;;  %vm156_vm1 = vcmask 31744   ;;  %v14055_v30 = vld [vmem:[%s16256_s0 + $0x10] sm:$0xff]  ;;  %vm631_vm2 = vcmask 1041409   ;;  %vm633_vm3 = vcmask 1042434  }
  0x29   :  { %v14015_v4 = vpack.c.bf16 %v74_v2, %v70_v1  ;;  %v78_v6 = vld [vmem:[#allocation2 + $0x48] sm:$0xff]  ;;  %v14017_v8 = vpack.c.bf16 %v73_v5, %v69_v3  ;;  %v77_v10 = vld [vmem:[#allocation2 + $0x40] sm:$0xff]  ;;  %v14069_v36 = vld [vmem:[%s16256_s0 + $0x18] sm:$0xff]  ;;  %v14140_v2 = vshrl.u32 %v291_v62, 7  ;;  %v13932_v3 = vmov 1966171168  }
  0x2a   :  { %v82_v7 = vld [vmem:[#allocation2 + $0x68] sm:$0xff]  ;;  %v81_v11 = vld [vmem:[#allocation2 + $0x60] sm:$0xff]  ;;  %v14097_v46 = vld [vmem:[%s16256_s0 + $0x30] sm:$0xff]  ;;  %v456_v5 = vunpack.c.l.s4 %v13932_v3  ;;  %vm635_vm4 = vcmask 1043459   ;;  %vm637_vm5 = vcmask 1044484   ;;  %vm639_vm6 = vcmask 1045509  }
  0x2b   :  { %v14019_v9 = vpack.c.bf16 %v82_v7, %v78_v6  ;;  %v86_v12 = vld [vmem:[#allocation2 + $0x88] sm:$0xff]  ;;  %12738 = vmatprep.subr.bf16.mxu1 %v14015_v4  ;;  %v14023_v14 = vpack.c.bf16 %v81_v11, %v77_v10  ;;  %v85_v16 = vld [vmem:[#allocation2 + $0x80] sm:$0xff]  ;;  %v14109_v52 = vld [vmem:[%s16256_s0 + $0x38] sm:$0xff]  ;;  %v14147_v10 = vsub.s32 0, %v14140_v2  ;;  %vm641_vm7 = vcmask 1046534  }
  0x2c   :  { %v90_v13 = vld [vmem:[#allocation2 + $0xa8] sm:$0xff]  ;;  %12740 = vmatpush1.bf16.msra.mxu1 %v14017_v8  ;;  %v89_v17 = vld [vmem:[#allocation2 + $0xa0] sm:$0xff]  ;;  %vm643_vm8 = vcmask 1047559   ;;  %vm646_vm9 = vcmask 64512   ;;  %vm13934_vm10 = vmmov 0  }
  0x2d   :  { %12742 = vmatprep.subr.bf16.mxu1 %v14019_v9  ;;  %v14026_v15 = vpack.c.bf16 %v90_v13, %v86_v12  ;;  %v94_v18 = vld [vmem:[#allocation2 + $0xc8] sm:$0xff]  ;;  %v14029_v20 = vpack.c.bf16 %v89_v17, %v85_v16  ;;  %v93_v22 = vld [vmem:[#allocation2 + $0xc0] sm:$0xff]  ;;  %v457_v12 = vunpack.c.0.s8 %v456_v5 }
  0x2e   :  { %v98_v19 = vld [vmem:[#allocation2 + $0xe8] sm:$0xff]  ;;  %v97_v23 = vld [vmem:[#allocation2 + $0xe0] sm:$0xff] }
  0x2f   :  { %v14032_v21 = vpack.c.bf16 %v98_v19, %v94_v18  ;;  %v102_v24 = vld [vmem:[#allocation2 + $0x108] sm:$0xff]  ;;  %v155_v26 = vld [vmem:[%s16257_s1] sm:$0xf]  ;;  %v14049_v29 = vpack.c.bf16 %v97_v23, %v93_v22  ;;  %v14159_v16 = vsub.s32 %v457_v12, %v14140_v2 }
  0x30   :  { %12744 = vmatpush1.bf16.msra.mxu1 %v14023_v14  ;;  %v106_v25 = vld [vmem:[#allocation2 + $0x128] sm:$0xff]  ;;  %12083 = vmatprep.subr.msk.mxu0 %vm181_vm0, %v155_v26  ;;  %v14041_v27 = vld [vmem:[%s16256_s0] sm:$0xff] }
  0x31   :  { %12746 = vmatprep.subr.bf16.mxu1 %v14026_v15  ;;  %v14046_v28 = vld [vmem:[%s16256_s0 + $0x8] sm:$0xff]  ;;  %12084 = vmatpush3.msk.msra.mxu0 %vm181_vm0, %v155_v26  ;;  %v14058_v31 = vpack.c.bf16 %v106_v25, %v102_v24  ;;  %v101_v32 = vld [vmem:[#allocation2 + $0x100] sm:$0xff]  ;;  %16406 = vst [vmem:[#allocation25_spill] sm:$0xff] %v14159_v16 }
  0x32   :  { %v105_v33 = vld [vmem:[#allocation2 + $0x120] sm:$0xff]  ;;  %12085 = vmatprep.mubr.msk.f32.mxu0 %vm156_vm1, %v14041_v27  ;;  %v110_v34 = vld [vmem:[#allocation2 + $0x148] sm:$0xff] }
  0x33   :  { %v114_v35 = vld [vmem:[#allocation2 + $0x168] sm:$0xff]  ;;  %12086 = vmatmul.mubr.msk.f32.vlgmr.msra.gmra.mrb[0].mxu0 %vm156_vm1, %v14046_v28  ;;  %v14072_v37 = vpack.c.bf16 %v105_v33, %v101_v32  ;;  %v14077_v38 = vld [vmem:[%s16256_s0 + $0x20] sm:$0xff] }
  0x34   :  { %12748 = vmatpush1.bf16.msra.mxu1 %v14029_v20  ;;  %12088 = vmatprep.mubr.msk.f32.mxu0 %vm156_vm1, %v14055_v30  ;;  %v14080_v39 = vpack.c.bf16 %v114_v35, %v110_v34  ;;  %v109_v40 = vld [vmem:[#allocation2 + $0x140] sm:$0xff]  ;;  %v118_v42 = vld [vmem:[#allocation2 + $0x188] sm:$0xff] }
  0x35   :  { %12750 = vmatprep.subr.bf16.mxu1 %v14032_v21  ;;  %v113_v41 = vld [vmem:[#allocation2 + $0x160] sm:$0xff]  ;;  %v122_v43 = vld [vmem:[#allocation2 + $0x1a8] sm:$0xff] }
  0x36   :  { %v14089_v44 = vld [vmem:[%s16256_s0 + $0x28] sm:$0xff]  ;;  %v14092_v45 = vpack.c.bf16 %v113_v41, %v109_v40  ;;  %v14100_v47 = vpack.c.bf16 %v122_v43, %v118_v42  ;;  %v117_v48 = vld [vmem:[#allocation2 + $0x180] sm:$0xff] }
  0x37   :  { %12089 = vmatmul.mubr.msk.f32.gmra.mrb[2].mxu0 %vm156_vm1, %v14069_v36  ;;  %v121_v49 = vld [vmem:[#allocation2 + $0x1a0] sm:$0xff]  ;;  %v126_v50 = vld [vmem:[#allocation2 + $0x1c8] sm:$0xff] }
  0x38   :  { %12752 = vmatpush1.bf16.msra.mxu1 %v14049_v29  ;;  %12091 = vmatprep.mubr.msk.f32.mxu0 %vm156_vm1, %v14077_v38  ;;  %16392 = vst [vmem:[#allocation11_spill] sm:$0xff] %v14092_v45  ;;  %16393 = vst [vmem:[#allocation12_spill] sm:$0xff] %v14100_v47  ;;  %v130_v51 = vld [vmem:[#allocation2 + $0x1e8] sm:$0xff]  ;;  %v14112_v53 = vpack.c.bf16 %v121_v49, %v117_v48  ;;  %v125_v55 = vld [vmem:[#allocation2 + $0x1c0] sm:$0xff] }
  0x39   :  { %12754 = vmatprep.subr.bf16.mxu1 %v14058_v31  ;;  %v14115_v54 = vpack.c.bf16 %v130_v51, %v126_v50  ;;  %v129_v56 = vld [vmem:[#allocation2 + $0x1e0] sm:$0xff] }
  0x3a   :  { %16394 = vst [vmem:[#allocation13_spill] sm:$0xff] %v14112_v53  ;;  %v14121_v57 = vpack.c.bf16 %v129_v56, %v125_v55  ;;  %v14152_v11 = vld [vmem:[%s16259_s3] sm:$0xf] }
  0x3b   :  { %12092 = vmatmul.mubr.msk.f32.gmra.mrb[4].mxu0 %vm156_vm1, %v14089_v44  ;;  %16395 = vst [vmem:[#allocation14_spill] sm:$0xff] %v14115_v54  ;;  %v14156_v13 = vrot.slane %v14152_v11, %v14147_v10 }
  0x3c   :  { %12756 = vmatpush1.bf16.msra.mxu1 %v14072_v37  ;;  %12094 = vmatprep.mubr.msk.f32.mxu0 %vm156_vm1, %v14097_v46  ;;  %16396 = vst [vmem:[#allocation15_spill] sm:$0xff] %v14121_v57 }
  0x3d   :  { %12758 = vmatprep.subr.bf16.mxu1 %v14080_v39  ;;  %16405 = vst [vmem:[#allocation24_spill] sm:$0xff] %v14156_v13 }
  0x3f   :  { %12095 = vmatmul.mubr.msk.f32.gmra.mrb[6].mxu0 %vm156_vm1, %v14109_v52 }
  0x40   :  { %12760 = vmatpush1.bf16.msra.mxu1 %v14092_v45  ;;  %446 = vmatprep.mubr.f32.mxu0 %v16266_v0 }
  0x41   :  { %12762 = vmatprep.subr.bf16.mxu1 %v14100_v47 }
  0x44   :  { %12764 = vmatpush1.bf16.msra.mxu1 %v14112_v53 }
  0x45   :  { %12766 = vmatprep.subr.bf16.mxu1 %v14115_v54 }
  0x48   :  { %12768 = vmatpush1.bf16.msra.mxu1 %v14121_v57 }
  0x4b   :  { %376 = vmatmul.mubr.f32.vlgmr.msra.gmra.mrb[0].mxu1 %v16266_v0 }
  0x4c   :  { %1593 = vmatprep.mubr.f32.mxu1 %v16266_v0 }
 0x106   :  { %v14127_v58 = vpop.f32.mrb[0].mxu0 }
 0x107   :  { %16397 = vst [vmem:[#allocation16_spill] sm:$0xff] %v14127_v58  ;;  %v14129_v59 = vpop.f32.mrb[1].mxu0 }
 0x108   :  { %16398 = vst [vmem:[#allocation17_spill] sm:$0xff] %v14129_v59 }
 0x10a   :  { %v14131_v60 = vpop.f32.mrb[2].mxu0 }
 0x10b   :  { %16399 = vst [vmem:[#allocation18_spill] sm:$0xff] %v14131_v60  ;;  %v14133_v61 = vpop.f32.mrb[3].mxu0 }
 0x10c   :  { %16400 = vst [vmem:[#allocation19_spill] sm:$0xff] %v14133_v61 }
 0x10e   :  { %v14135_v63 = vpop.f32.mrb[4].mxu0 }
 0x10f   :  { %16401 = vst [vmem:[#allocation20_spill] sm:$0xff] %v14135_v63  ;;  %v14137_v1 = vpop.f32.mrb[5].mxu0 }
 0x110   :  { %16402 = vst [vmem:[#allocation21_spill] sm:$0xff] %v14137_v1 }
 0x112   :  { %v14142_v6 = vpop.f32.mrb[6].mxu0 }
 0x113   :  { %16403 = vst [vmem:[#allocation22_spill] sm:$0xff] %v14142_v6  ;;  %v14144_v7 = vpop.f32.mrb[7].mxu0 }
 0x114   :  { %16404 = vst [vmem:[#allocation23_spill] sm:$0xff] %v14144_v7 }
 0x11e   :  { %v377_v17 = vpop.f32.mrb[0].mxu1 }
 0x11f   :  { %v378_v18 = vadd.f32 %v377_v17, %v14156_v13  ;;  %v14162_v19 = vpop.f32.mrb[1].mxu1  ;;  %v115_v13 = vld [vmem:[#allocation2 + $0x170] sm:$0xff] }
 0x121   :  { %v454_v22 = vcombine.high %v378_v18, %v378_v18  ;;  %v461_v23 = vrot.slane %v378_v18, %v14159_v16 }
 0x123   :  { %v468_v24 = vrot.slane %v454_v22, %v14159_v16  ;;  %v469_v25 = vcombine.high %v461_v23, %v461_v23  ;;  %v477_v26 = vrot.slane %v461_v23, %v14159_v16 }
 0x125   :  { %v470_v32 = vcombine.high %v468_v24, %v468_v24  ;;  %v484_v33 = vrot.slane %v468_v24, %v14159_v16  ;;  %v491_v34 = vrot.slane %v469_v25, %v14159_v16  ;;  %v499_v35 = vcombine.high %v477_v26, %v477_v26 }
 0x126   :  { %v506_v40 = vrot.slane %v477_v26, %v14147_v10 }
 0x127   :  { %v498_v41 = vrot.slane %v470_v32, %v14159_v16  ;;  %v500_v42 = vcombine.high %v484_v33, %v484_v33  ;;  %v501_v43 = vcombine.high %v491_v34, %v491_v34  ;;  %v510_v48 = vrot.slane %v491_v34, %v14147_v10  ;;  %v14189_v32 = vld [vmem:[%s16260_s4] ss:$0 sm:$0xff]  ;;  %v111_v16 = vld [vmem:[#allocation2 + $0x150] sm:$0xff] }
 0x128   :  { %v514_v49 = vrot.slane %v499_v35, %v14147_v10  ;;  %v522_v50 = vrot.slane %v484_v33, %v14147_v10  ;;  %v543_v51 = vadd.f32 %v506_v40, %v14129_v59  ;;  %16407 = vst [vmem:[#allocation26_spill] sm:$0xff] %v14189_v32  ;;  %v107_v59 = vld [vmem:[#allocation2 + $0x130] sm:$0xff] }
 0x129   :  { %v502_v55 = vcombine.high %v498_v41, %v498_v41  ;;  %v518_v56 = vrot.slane %v501_v43, %v14147_v10  ;;  %v526_v3 = vrot.slane %v498_v41, %v14147_v10  ;;  %v530_v5 = vrot.slane %v500_v42, %v14147_v10 }
 0x12a   :  { %13456 = vtanh.f32 %v543_v51  ;;  %v545_v12 = vadd.f32 %v514_v49, %v14133_v61  ;;  %v544_v17 = vadd.f32 %v14127_v58, %v510_v48  ;;  %v547_v18 = vadd.f32 %v522_v50, %v14137_v1 }
 0x12b   :  { %v534_v22 = vrot.slane %v502_v55, %v14147_v10  ;;  %v546_v23 = vadd.f32 %v14131_v60, %v518_v56  ;;  %v548_v24 = vadd.f32 %v14135_v63, %v526_v3  ;;  %v549_v25 = vadd.f32 %v530_v5, %v14144_v7 }
 0x12c   :  { %13458 = vtanh.f32 %v545_v12 }
 0x12d   :  { %13460 = vtanh.f32 %v544_v17  ;;  %v550_v26 = vadd.f32 %v14142_v6, %v534_v22  ;;  %v598_v17 = vand.u32 127, %v291_v62 }
 0x12e   :  { %13462 = vtanh.f32 %v546_v23 }
 0x12f   :  { %13464 = vtanh.f32 %v547_v18  ;;  %v14201_v22 = vsub.s32 %v598_v17, %v14140_v2 }
 0x130   :  { %13466 = vtanh.f32 %v548_v24 }
 0x131   :  { %13468 = vtanh.f32 %v549_v25 }
 0x132   :  { %13470 = vtanh.f32 %v550_v26 }
 0x134   :  { %v13457_v33 = vpop.eup %13456 }
 0x135   :  { %v565_v34 = vmul.f32 %v13457_v33, %v14189_v32 }
 0x136   :  { %v13459_v35 = vpop.eup %13458 }
 0x137   :  { %v13461_v40 = vpop.eup %13460  ;;  %573 = vadd.xlane.f32.xlu0 %v565_v34  ;;  %v567_v41 = vmul.f32 %v13459_v35, %v14189_v32 }
 0x138   :  { %v13463_v42 = vpop.eup %13462  ;;  %v566_v43 = vmul.f32 %v13461_v40, %v14189_v32 }
 0x139   :  { %577 = vadd.xlane.f32.xlu1 %v567_v41  ;;  %v13465_v48 = vpop.eup %13464  ;;  %v568_v49 = vmul.f32 %v13463_v42, %v14189_v32 }
 0x13a   :  { %v13467_v50 = vpop.eup %13466  ;;  %v569_v51 = vmul.f32 %v13465_v48, %v14189_v32 }
 0x13b   :  { %575 = vadd.xlane.f32.xlu0 %v566_v43  ;;  %v13469_v55 = vpop.eup %13468  ;;  %v570_v56 = vmul.f32 %v13467_v50, %v14189_v32 }
 0x13c   :  { %v13471_v3 = vpop.eup %13470  ;;  %v571_v5 = vmul.f32 %v13469_v55, %v14189_v32 }
 0x13d   :  { %579 = vadd.xlane.f32.xlu1 %v568_v49  ;;  %v572_v12 = vmul.f32 %v13471_v3, %v14189_v32 }
 0x13f   :  { %581 = vadd.xlane.f32.xlu0 %v569_v51 }
 0x141   :  { %583 = vadd.xlane.f32.xlu1 %v570_v56 }
 0x143   :  { %585 = vadd.xlane.f32.xlu0 %v571_v5 }
 0x145   :  { %587 = vadd.xlane.f32.xlu1 %v572_v12 }
 0x1c4   :  { %v574_v18 = vpop.xlane.xlu0 %573 }
 0x1c5   :  { %v602_v25 = vrot.slane %v574_v18, %v14201_v22 }
 0x1c6   :  { %v578_v23 = vpop.xlane.xlu1 %577 }
 0x1c7   :  { %v610_v33 = vrot.slane %v578_v23, %v14201_v22 }
 0x1c8   :  { %v576_v24 = vpop.xlane.xlu0 %575 }
 0x1c9   :  { %v606_v26 = vrot.slane %v576_v24, %v14201_v22 }
 0x1ca   :  { %v580_v34 = vpop.xlane.xlu1 %579 }
 0x1cb   :  { %v632_v35 = vsel %vm631_vm2, %v606_v26, %v602_v25  ;;  %v614_v62 = vrot.slane %v580_v34, %v14201_v22  ;;  %v13933_v26 = vmov 0  }
 0x1cc   :  { %v634_v40 = vsel %vm633_vm3, %v610_v33, %v632_v35  ;;  %v582_v41 = vpop.xlane.xlu0 %581  ;;  %13454 = vset.pattern.permute.xlu0 %v13933_v26  ;;  %13453 = vset.pattern.permute.xlu1 %v13933_v26  ;;  %v14220_v33 = vsub.s32 2, %v14140_v2  ;;  %v14223_v35 = vsub.s32 1, %v14140_v2  ;;  %v14236_v26 = vsub.s32 5, %v14140_v2 }
 0x1cd   :  { %v636_v42 = vsel %vm635_vm4, %v614_v62, %v634_v40  ;;  %v618_v43 = vrot.slane %v582_v41, %v14201_v22  ;;  %v14226_v62 = vsub.s32 3, %v14140_v2 }
 0x1ce   :  { %v584_v48 = vpop.xlane.xlu1 %583 }
 0x1cf   :  { %v638_v49 = vsel %vm637_vm5, %v618_v43, %v636_v42  ;;  %v622_v50 = vrot.slane %v584_v48, %v14201_v22 }
 0x1d0   :  { %v586_v51 = vpop.xlane.xlu0 %585 }
 0x1d1   :  { %v626_v55 = vrot.slane %v586_v51, %v14201_v22  ;;  %v640_v56 = vsel %vm639_vm6, %v622_v50, %v638_v49 }
 0x1d2   :  { %v588_v3 = vpop.xlane.xlu1 %587 }
 0x1d3   :  { %v630_v5 = vrot.slane %v588_v3, %v14201_v22  ;;  %v642_v12 = vsel %vm641_vm7, %v626_v55, %v640_v56  ;;  %v14232_v56 = vsub.s32 4, %v14140_v2 }
 0x1d5   :  { %v644_v17 = vsel %vm643_vm8, %v630_v5, %v642_v12 }
 0x1d6   :  { %v647_v25 = vsel %vm646_vm9, %v644_v17, -inf }
 0x1d7   :  { %648 = vmax.xlane.f32.xlu0 %v647_v25 }
 0x264   :  { %v649_v40 = vpop.xlane.xlu0 %648 }
 0x265   :  { %v654_v42 = vrot.slane %v649_v40, %v14147_v10  ;;  %v658_v43 = vrot.slane %v649_v40, %v14223_v35  ;;  %v662_v49 = vrot.slane %v649_v40, %v14220_v33  ;;  %v666_v5 = vrot.slane %v649_v40, %v14226_v62 }
 0x266   :  { %v670_v0 = vrot.slane %v649_v40, %v14232_v56 }
 0x267   :  { %v692_v50 = vsub.f32 %v576_v24, %v658_v43  ;;  %v691_v55 = vsub.f32 %v574_v18, %v654_v42  ;;  %v693_v12 = vsub.f32 %v578_v23, %v662_v49  ;;  %v694_v6 = vsub.f32 %v580_v34, %v666_v5 }
 0x268   :  { %v14240_v24 = vsub.s32 6, %v14140_v2  ;;  %v674_v18 = vrot.slane %v649_v40, %v14236_v26  ;;  %v695_v43 = vsub.f32 %v582_v41, %v670_v0  ;;  %v14244_v23 = vsub.s32 7, %v14140_v2 }
 0x269   :  { %v701_v17 = vmul.f32 1.442695, %v692_v50  ;;  %v699_v25 = vmul.f32 1.442695, %v691_v55  ;;  %v703_v32 = vmul.f32 1.442695, %v693_v12 }
 0x26a   :  { %v705_v42 = vmul.f32 1.442695, %v694_v6  ;;  %v678_v49 = vrot.slane %v649_v40, %v14240_v24  ;;  %v707_v50 = vmul.f32 1.442695, %v695_v43  ;;  %v696_v55 = vsub.f32 %v584_v48, %v674_v18 }
 0x26b   :  { %13472 = vpow2.f32 %v701_v17 }
 0x26c   :  { %13474 = vpow2.f32 %v699_v25  ;;  %v709_v0 = vmul.f32 1.442695, %v696_v55  ;;  %v697_v6 = vsub.f32 %v586_v51, %v678_v49 }
 0x26d   :  { %13476 = vpow2.f32 %v703_v32  ;;  %v682_v32 = vrot.slane %v649_v40, %v14244_v23 }
 0x26e   :  { %13478 = vpow2.f32 %v705_v42  ;;  %v711_v34 = vmul.f32 1.442695, %v697_v6 }
 0x26f   :  { %13480 = vpow2.f32 %v707_v50  ;;  %v698_v41 = vsub.f32 %v588_v3, %v682_v32 }
 0x270   :  { %13482 = vpow2.f32 %v709_v0 }
 0x271   :  { %13484 = vpow2.f32 %v711_v34  ;;  %v713_v5 = vmul.f32 1.442695, %v698_v41 }
 0x273   :  { %13486 = vpow2.f32 %v713_v5 }
 0x275   :  { %v14247_v17 = vpop.eup %13472 }
 0x276   :  { %v14249_v12 = vpop.eup %13474  ;;  %727 = vperm.xlu0 %13454, %v14247_v17  }
 0x277   :  { %724 = vperm.xlu1 %13453, %v14249_v12   ;;  %v14254_v2 = vpop.eup %13476 }
 0x278   :  { %v14257_v48 = vpop.eup %13478 }
 0x279   :  { %v14260_v25 = vpop.eup %13480 }
 0x27a   :  { %v14263_v40 = vpop.eup %13482 }
 0x27b   :  { %730 = vperm.xlu1 %13453, %v14254_v2   ;;  %v14266_v51 = vpop.eup %13484 }
 0x27d   :  { %v14269_v3 = vpop.eup %13486 }
 0x27f   :  { %733 = vperm.xlu1 %13453, %v14257_v48  }
 0x283   :  { %736 = vperm.xlu1 %13453, %v14260_v25  }
 0x287   :  { %739 = vperm.xlu1 %13453, %v14263_v40  }
 0x28b   :  { %742 = vperm.xlu1 %13453, %v14266_v51  }
 0x28f   :  { %745 = vperm.xlu1 %13453, %v14269_v3  }
 0x2f5   :  { %v728_v50 = vpop.permute.xlu0 %727 }
 0x2f6   :  { %v725_v18 = vpop.permute.xlu1 %724  ;;  %v754_v32 = vrot.slane %v728_v50, %v14201_v22 }
 0x2f7   :  { %v750_v0 = vrot.slane %v725_v18, %v14201_v22 }
 0x2f9   :  { %v779_v7 = vsel %vm631_vm2, %v754_v32, %v750_v0  ;;  %v71_v0 = vld [vmem:[#allocation2 + $0x10] sm:$0xff] }
 0x2fa   :  { %v731_v42 = vpop.permute.xlu1 %730 }
 0x2fb   :  { %v758_v6 = vrot.slane %v731_v42, %v14201_v22 }
 0x2fd   :  { %v780_v60 = vsel %vm633_vm3, %v758_v6, %v779_v7  ;;  %v76_v7 = vld [vmem:[#allocation2 + $0x38] sm:$0xff] }
 0x2fe   :  { %v734_v43 = vpop.permute.xlu1 %733 }
 0x2ff   :  { %v762_v34 = vrot.slane %v734_v43, %v14201_v22 }
 0x301   :  { %v781_v61 = vsel %vm635_vm4, %v762_v34, %v780_v60  ;;  %v75_v60 = vld [vmem:[#allocation2 + $0x30] sm:$0xff]  ;;  %v80_v34 = vld [vmem:[#allocation2 + $0x58] sm:$0xff] }
 0x302   :  { %v737_v49 = vpop.permute.xlu1 %736 }
 0x303   :  { %v766_v41 = vrot.slane %v737_v49, %v14201_v22 }
 0x305   :  { %v782_v50 = vsel %vm637_vm5, %v766_v41, %v781_v61  ;;  %v84_v61 = vld [vmem:[#allocation2 + $0x78] sm:$0xff]  ;;  %v14290_v41 = vpack.c.bf16 %v75_v60, %v71_v0  ;;  %v95_v60 = vld [vmem:[#allocation2 + $0xd0] sm:$0xff] }
 0x306   :  { %v740_v55 = vpop.permute.xlu1 %739 }
 0x307   :  { %v770_v63 = vrot.slane %v740_v55, %v14201_v22  ;;  %v72_v55 = vld [vmem:[#allocation2 + $0x18] sm:$0xff]  ;;  %16409 = vst [vmem:[#allocation28_spill] sm:$0xff] %v14290_v41 }
 0x308   :  { %v14288_v6 = vpack.c.bf16 %v76_v7, %v72_v55  ;;  %v100_v55 = vld [vmem:[#allocation2 + $0xf8] sm:$0xff] }
 0x309   :  { %v783_v43 = vsel %vm639_vm6, %v770_v63, %v782_v50  ;;  %v79_v63 = vld [vmem:[#allocation2 + $0x50] sm:$0xff] }
 0x30a   :  { %v743_v5 = vpop.permute.xlu1 %742  ;;  %16408 = vst [vmem:[#allocation27_spill] sm:$0xff] %v14288_v6  ;;  %v83_v50 = vld [vmem:[#allocation2 + $0x70] sm:$0xff]  ;;  %12770 = vmatprep.subr.bf16.mxu0 %v14288_v6 }
 0x30b   :  { %v774_v1 = vrot.slane %v743_v5, %v14201_v22  ;;  %v14292_v5 = vpack.c.bf16 %v84_v61, %v80_v34  ;;  %12772 = vmatpush1.bf16.msra.mxu0 %v14290_v41  ;;  %v99_v34 = vld [vmem:[#allocation2 + $0xf0] sm:$0xff]  ;;  %v104_v61 = vld [vmem:[#allocation2 + $0x118] sm:$0xff] }
 0x30d   :  { %v784_v49 = vsel %vm641_vm7, %v774_v1, %v783_v43  ;;  %16410 = vst [vmem:[#allocation29_spill] sm:$0xff] %v14292_v5  ;;  %v88_v1 = vld [vmem:[#allocation2 + $0x98] sm:$0xff]  ;;  %12774 = vmatprep.subr.bf16.mxu0 %v14292_v5  ;;  %v87_v43 = vld [vmem:[#allocation2 + $0x90] sm:$0xff] }
 0x30e   :  { %v746_v18 = vpop.permute.xlu1 %745 }
 0x30f   :  { %v778_v42 = vrot.slane %v746_v18, %v14201_v22  ;;  %v92_v18 = vld [vmem:[#allocation2 + $0xb8] sm:$0xff] }
 0x311   :  { %v785_v58 = vsel %vm643_vm8, %v778_v42, %v784_v49  ;;  %v14299_v42 = vpack.c.bf16 %v92_v18, %v88_v1  ;;  %v91_v49 = vld [vmem:[#allocation2 + $0xb0] sm:$0xff] }
 0x312   :  { %v787_v32 = vsel %vm646_vm9, %v785_v58, 0.0  ;;  %v14296_v58 = vpack.c.bf16 %v83_v50, %v79_v63  ;;  %v14302_v7 = vpack.c.bf16 %v91_v49, %v87_v43  ;;  %v108_v63 = vld [vmem:[#allocation2 + $0x138] sm:$0xff]  ;;  %v14308_v50 = vpack.c.bf16 %v99_v34, %v95_v60  ;;  %v103_v18 = vld [vmem:[#allocation2 + $0x110] sm:$0xff] }
 0x313   :  { %788 = vadd.xlane.f32.xlu1 %v787_v32  ;;  %16412 = vst [vmem:[#allocation31_spill] sm:$0xff] %v14299_v42  ;;  %v96_v32 = vld [vmem:[#allocation2 + $0xd8] sm:$0xff]  ;;  %v14311_v1 = vpack.c.bf16 %v108_v63, %v104_v61  ;;  %v14320_v61 = vpack.c.bf16 %v115_v13, %v111_v16  ;;  %v16424_v16 = vmov 0.0  }
 0x314   :  { %16411 = vst [vmem:[#allocation30_spill] sm:$0xff] %v14296_v58  ;;  %12776 = vmatpush1.bf16.msra.mxu0 %v14296_v58  ;;  %16413 = vst [vmem:[#allocation32_spill] sm:$0xff] %v14302_v7  ;;  %v14305_v0 = vpack.c.bf16 %v100_v55, %v96_v32  ;;  %v112_v43 = vld [vmem:[#allocation2 + $0x158] sm:$0xff]  ;;  %v14314_v32 = vpack.c.bf16 %v107_v59, %v103_v18 }
 0x315   :  { %12778 = vmatprep.subr.bf16.mxu0 %v14299_v42  ;;  %16415 = vst [vmem:[#allocation34_spill] sm:$0xff] %v14308_v50  ;;  %16416 = vst [vmem:[#allocation35_spill] sm:$0xff] %v14311_v1  ;;  %v116_v49 = vld [vmem:[#allocation2 + $0x178] sm:$0xff] }
 0x316   :  { %16414 = vst [vmem:[#allocation33_spill] sm:$0xff] %v14305_v0  ;;  %16417 = vst [vmem:[#allocation36_spill] sm:$0xff] %v14314_v32  ;;  %v14317_v55 = vpack.c.bf16 %v116_v49, %v112_v43  ;;  %v120_v60 = vld [vmem:[#allocation2 + $0x198] sm:$0xff] }
 0x317   :  { %v124_v34 = vld [vmem:[#allocation2 + $0x1b8] sm:$0xff]  ;;  %16419 = vst [vmem:[#allocation38_spill] sm:$0xff] %v14320_v61 }
 0x318   :  { %12780 = vmatpush1.bf16.msra.mxu0 %v14302_v7  ;;  %16418 = vst [vmem:[#allocation37_spill] sm:$0xff] %v14317_v55  ;;  %v14323_v63 = vpack.c.bf16 %v124_v34, %v120_v60  ;;  %v128_v59 = vld [vmem:[#allocation2 + $0x1d8] sm:$0xff] }
 0x319   :  { %12782 = vmatprep.subr.bf16.mxu0 %v14305_v0  ;;  %v119_v0 = vld [vmem:[#allocation2 + $0x190] sm:$0xff]  ;;  %v132_v18 = vld [vmem:[#allocation2 + $0x1f8] sm:$0xff] }
 0x31a   :  { %16420 = vst [vmem:[#allocation39_spill] sm:$0xff] %v14323_v63  ;;  %v14329_v49 = vpack.c.bf16 %v132_v18, %v128_v59 }
 0x31c   :  { %12784 = vmatpush1.bf16.msra.mxu0 %v14308_v50  ;;  %v123_v50 = vld [vmem:[#allocation2 + $0x1b0] sm:$0xff]  ;;  %16422 = vst [vmem:[#allocation41_spill] sm:$0xff] %v14329_v49 }
 0x31d   :  { %12786 = vmatprep.subr.bf16.mxu0 %v14311_v1  ;;  %v14326_v43 = vpack.c.bf16 %v123_v50, %v119_v0  ;;  %v127_v1 = vld [vmem:[#allocation2 + $0x1d0] sm:$0xff] }
 0x31f   :  { %16421 = vst [vmem:[#allocation40_spill] sm:$0xff] %v14326_v43 }
 0x320   :  { %12788 = vmatpush1.bf16.msra.mxu0 %v14314_v32  ;;  %v131_v32 = vld [vmem:[#allocation2 + $0x1f0] sm:$0xff] }
 0x321   :  { %12790 = vmatprep.subr.bf16.mxu0 %v14317_v55  ;;  %v14332_v13 = vpack.c.bf16 %v131_v32, %v127_v1 }
 0x323   :  { %16423 = vst [vmem:[#allocation42_spill] sm:$0xff] %v14332_v13 }
 0x324   :  { %12792 = vmatpush1.bf16.msra.mxu0 %v14320_v61 }
 0x325   :  { %12794 = vmatprep.subr.bf16.mxu0 %v14323_v63 }
 0x328   :  { %12796 = vmatpush1.bf16.msra.mxu0 %v14326_v43 }
 0x329   :  { %12798 = vmatprep.subr.bf16.mxu0 %v14329_v49 }
 0x32c   :  { %12800 = vmatpush1.bf16.msra.mxu0 %v14332_v13 }
 0x32d   :  { %12097 = vmatprep.subr.mxu0 %v16424_v16 }
 0x32f   :  { %447 = vmatmul.mubr.f32.vlgmr.msra.gmra.mrb[8].mxu0 %v16424_v16 }
 0x330   :  { %12098 = vmatpush3.msra.mxu0 %v14041_v27  ;;  %12099 = vmatprep.mubr.msk.f32.mxu0 %vm13934_vm10, %v16424_v16 }
 0x331   :  { %12102 = vmatprep.subr.mxu0 %v16424_v16 }
 0x3a0   :  { %v789_v0 = vpop.xlane.xlu1 %788 }
 0x3a1   :  { %13488 = vrcp.f32 %v789_v0 }
 0x3ab   :  { %v13489_v50 = vpop.eup %13488 }
 0x3ac   :  { %v795_v60 = vrot.slane %v13489_v50, %v14147_v10  ;;  %v799_v32 = vrot.slane %v13489_v50, %v14223_v35  ;;  %v803_v27 = vrot.slane %v13489_v50, %v14220_v33  ;;  %v807_v18 = vrot.slane %v13489_v50, %v14226_v62 }
 0x3ae   :  { %v832_v1 = vmul.f32 %v14249_v12, %v795_v60  ;;  %v833_v34 = vmul.f32 %v14247_v17, %v799_v32  ;;  %v834_v59 = vmul.f32 %v14254_v2, %v803_v27  ;;  %v835_v0 = vmul.f32 %v14257_v48, %v807_v18 }
 0x3af   :  { %v811_v12 = vrot.slane %v13489_v50, %v14232_v56  ;;  %v819_v32 = vrot.slane %v13489_v50, %v14240_v24 }
 0x3b0   :  { %842 = vperm.xlu0 %13454, %v832_v1   ;;  %v815_v1 = vrot.slane %v13489_v50, %v14236_v26 }
 0x3b1   :  { %v836_v60 = vmul.f32 %v14260_v25, %v811_v12  ;;  %v838_v2 = vmul.f32 %v14266_v51, %v819_v32  ;;  %v14424_v32 = vld [vmem:[%s16261_s5 + $0x8] sm:$0xf] }
 0x3b2   :  { %v837_v17 = vmul.f32 %v14263_v40, %v815_v1 }
 0x3b4   :  { %922 = vperm.xlu0 %13454, %v833_v34   ;;  %v823_v34 = vrot.slane %v13489_v50, %v14244_v23 }
 0x3b6   :  { %v839_v48 = vmul.f32 %v14269_v3, %v823_v34 }
 0x3b8   :  { %1002 = vperm.xlu0 %13454, %v834_v59  }
 0x3bc   :  { %1082 = vperm.xlu0 %13454, %v835_v0  }
 0x3c0   :  { %1162 = vperm.xlu0 %13454, %v836_v60  }
 0x3c4   :  { %1242 = vperm.xlu0 %13454, %v837_v17  }
 0x3c8   :  { %1322 = vperm.xlu0 %13454, %v838_v2  }
 0x3cc   :  { %1402 = vperm.xlu0 %13454, %v839_v48  }
 0x42f   :  { %v843_v27 = vpop.permute.xlu0 %842 }
 0x430   :  { %v847_v59 = vrot.slane %v843_v27, %v14201_v22 }
 0x432   :  { %12100 = vmatmul.mubr.msk.f32.vlgmr.msra.gmra.mrb[10].mxu0 %vm646_vm9, %v847_v59 }
 0x433   :  { %12103 = vmatpush3.msra.mxu0 %v14046_v28  ;;  %v923_v25 = vpop.permute.xlu0 %922  ;;  %12104 = vmatprep.mubr.msk.f32.mxu0 %vm13934_vm10, %v16424_v16 }
 0x434   :  { %v927_v40 = vrot.slane %v923_v25, %v14201_v22  ;;  %12107 = vmatprep.subr.mxu0 %v16424_v16 }
 0x436   :  { %12105 = vmatmul.mubr.msk.f32.vlgmr.msra.gmra.mrb[12].mxu0 %vm646_vm9, %v927_v40 }
 0x437   :  { %12108 = vmatpush3.msra.mxu0 %v14055_v30  ;;  %v1003_v51 = vpop.permute.xlu0 %1002  ;;  %12109 = vmatprep.mubr.msk.f32.mxu0 %vm13934_vm10, %v16424_v16 }
 0x438   :  { %v1007_v3 = vrot.slane %v1003_v51, %v14201_v22  ;;  %12112 = vmatprep.subr.mxu0 %v16424_v16 }
 0x43a   :  { %12110 = vmatmul.mubr.msk.f32.vlgmr.msra.gmra.mrb[14].mxu0 %vm646_vm9, %v1007_v3 }
 0x43b   :  { %12113 = vmatpush3.msra.mxu0 %v14069_v36  ;;  %v1083_v28 = vpop.permute.xlu0 %1082  ;;  %12114 = vmatprep.mubr.msk.f32.mxu0 %vm13934_vm10, %v16424_v16  ;;  %v14384_v36 = vpop.f32.mrb[8].mxu0 }
 0x43c   :  { %v1087_v50 = vrot.slane %v1083_v28, %v14201_v22  ;;  %12117 = vmatprep.subr.mxu0 %v16424_v16  ;;  %v14389_v12 = vpop.f32.mrb[9].mxu0 }
 0x43e   :  { %12115 = vmatmul.mubr.msk.f32.vlgmr.msra.gmra.mrb[16].mxu0 %vm646_vm9, %v1087_v50 }
 0x43f   :  { %12118 = vmatpush3.msra.mxu0 %v14077_v38  ;;  %v1163_v30 = vpop.permute.xlu0 %1162  ;;  %12119 = vmatprep.mubr.msk.f32.mxu0 %vm13934_vm10, %v16424_v16 }
 0x440   :  { %v1167_v18 = vrot.slane %v1163_v30, %v14201_v22  ;;  %12122 = vmatprep.subr.mxu0 %v16424_v16 }
 0x442   :  { %12120 = vmatmul.mubr.msk.f32.vlgmr.msra.gmra.mrb[18].mxu0 %vm646_vm9, %v1167_v18 }
 0x443   :  { %12123 = vmatpush3.msra.mxu0 %v14089_v44  ;;  %v1243_v0 = vpop.permute.xlu0 %1242  ;;  %12124 = vmatprep.mubr.msk.f32.mxu0 %vm13934_vm10, %v16424_v16 }
 0x444   :  { %v1247_v38 = vrot.slane %v1243_v0, %v14201_v22  ;;  %12127 = vmatprep.subr.mxu0 %v16424_v16 }
 0x446   :  { %12125 = vmatmul.mubr.msk.f32.vlgmr.msra.gmra.mrb[20].mxu0 %vm646_vm9, %v1247_v38 }
 0x447   :  { %12128 = vmatpush3.msra.mxu0 %v14097_v46  ;;  %v1323_v60 = vpop.permute.xlu0 %1322  ;;  %12129 = vmatprep.mubr.msk.f32.mxu0 %vm13934_vm10, %v16424_v16  ;;  %v14411_v46 = vld [vmem:[%s16261_s5] sm:$0xff] }
 0x448   :  { %v1327_v44 = vrot.slane %v1323_v60, %v14201_v22  ;;  %12132 = vmatprep.subr.mxu0 %v16424_v16 }
 0x44a   :  { %12130 = vmatmul.mubr.msk.f32.vlgmr.msra.gmra.mrb[22].mxu0 %vm646_vm9, %v1327_v44 }
 0x44b   :  { %12133 = vmatpush3.msra.mxu0 %v14109_v52  ;;  %v1403_v1 = vpop.permute.xlu0 %1402  ;;  %12134 = vmatprep.mubr.msk.f32.mxu0 %vm13934_vm10, %v16424_v16  ;;  %v14415_v52 = vcombine.high %v14411_v46, %v14411_v46 }
 0x44c   :  { %v1407_v17 = vrot.slane %v1403_v1, %v14201_v22  ;;  %12137 = vmatprep.subr.mxu0 %v16424_v16 }
 0x44d   :  { %16425 = vst [vmem:[#allocation43_spill] sm:$0xff] %v14415_v52  ;;  %11681 = vmatprep.subr.msk.mxu1 %vm181_vm0, %v14415_v52 }
 0x44e   :  { %12135 = vmatmul.mubr.msk.f32.vlgmr.msra.gmra.mrb[24].mxu0 %vm646_vm9, %v1407_v17  ;;  %11682 = vmatpush1.msk.msra.mxu1 %vm181_vm0, %v14411_v46 }
 0x44f   :  { %12139 = vmatprep.mubr.msk.f32.mxu0 %vm13934_vm10, %v16424_v16  ;;  %12138 = vmatpush3.msk.msra.mxu0 %vm181_vm0, %v14424_v32 }
 0x450   :  { %12826 = vmatprep.subr.bf16.mxu0 %v14015_v4 }
 0x505   :  { %v916_v2 = vpop.f32.mrb[10].mxu0 }
 0x506   :  { %v12101_v34 = vpop.f32.mrb[11].mxu0 }
 0x509   :  { %v996_v48 = vpop.f32.mrb[12].mxu0 }
 0x50a   :  { %v1504_v27 = vrot.slane %v996_v48, 7  ;;  %v12106_v59 = vpop.f32.mrb[13].mxu0 }
 0x50c   :  { %v1505_v25 = vsel %vm631_vm2, %v1504_v27, %v916_v2 }
 0x50d   :  { %v1076_v40 = vpop.f32.mrb[14].mxu0 }
 0x50e   :  { %v1506_v51 = vrot.slane %v1076_v40, 6  ;;  %v12111_v3 = vpop.f32.mrb[15].mxu0 }
 0x510   :  { %v1507_v28 = vsel %vm633_vm3, %v1506_v51, %v1505_v25 }
 0x511   :  { %v1156_v50 = vpop.f32.mrb[16].mxu0 }
 0x512   :  { %v1508_v30 = vrot.slane %v1156_v50, 5  ;;  %v12116_v18 = vpop.f32.mrb[17].mxu0 }
 0x513   :  { %v139_v18 = vld [vmem:[#allocation5 + $0x8] sm:$0xff] }
 0x514   :  { %v1509_v0 = vsel %vm635_vm4, %v1508_v30, %v1507_v28  ;;  %v138_v30 = vld [vmem:[#allocation5] sm:$0xff] }
 0x515   :  { %v1236_v38 = vpop.f32.mrb[18].mxu0 }
 0x516   :  { %v1510_v60 = vrot.slane %v1236_v38, 4  ;;  %v12121_v44 = vpop.f32.mrb[19].mxu0  ;;  %v16298_v38 = vmov 0.0|0.0  }
 0x517   :  { %12801 = vmatprep.subr.bf16.mxu1 %v16298_v38  ;;  %v141_v44 = vld [vmem:[#allocation5 + $0x18] sm:$0xff] }
 0x518   :  { %v1511_v1 = vsel %vm637_vm5, %v1510_v60, %v1509_v0  ;;  %v14457_v0 = vpack.c.bf16 %v139_v18, %v138_v30  ;;  %v140_v60 = vld [vmem:[#allocation5 + $0x10] sm:$0xff]  ;;  %v150_v30 = vld [vmem:[#allocation5 + $0x60] sm:$0xff]  ;;  %v151_v18 = vld [vmem:[#allocation5 + $0x68] sm:$0xff] }
 0x519   :  { %v1316_v17 = vpop.f32.mrb[20].mxu0 }
 0x51a   :  { %v1512_v34 = vrot.slane %v1316_v17, 3  ;;  %v12126_v48 = vpop.f32.mrb[21].mxu0  ;;  %v142_v17 = vld [vmem:[#allocation5 + $0x20] sm:$0xff] }
 0x51c   :  { %v1513_v2 = vsel %vm639_vm6, %v1512_v34, %v1511_v1  ;;  %v14462_v1 = vpack.c.bf16 %v141_v44, %v140_v60  ;;  %v143_v34 = vld [vmem:[#allocation5 + $0x28] sm:$0xff]  ;;  %v14481_v60 = vpack.c.bf16 %v151_v18, %v150_v30  ;;  %v152_v44 = vld [vmem:[#allocation5 + $0x70] sm:$0xff] }
 0x51d   :  { %v1396_v27 = vpop.f32.mrb[22].mxu0  ;;  %v14466_v48 = vpack.c.bf16 %v143_v34, %v142_v17  ;;  %v153_v17 = vld [vmem:[#allocation5 + $0x78] sm:$0xff] }
 0x51e   :  { %v1514_v59 = vrot.slane %v1396_v27, 2  ;;  %v12131_v40 = vpop.f32.mrb[23].mxu0  ;;  %v145_v27 = vld [vmem:[#allocation5 + $0x38] sm:$0xff]  ;;  %16427 = vst [vmem:[#allocation45_spill] sm:$0xff] %v14481_v60  ;;  %v14485_v34 = vpack.c.bf16 %v153_v17, %v152_v44 }
 0x51f   :  { %v146_v40 = vld [vmem:[#allocation5 + $0x40] sm:$0xff] }
 0x520   :  { %v1515_v25 = vsel %vm641_vm7, %v1514_v59, %v1513_v2  ;;  %v144_v2 = vld [vmem:[#allocation5 + $0x30] sm:$0xff]  ;;  %16428 = vst [vmem:[#allocation46_spill] sm:$0xff] %v14485_v34 }
 0x521   :  { %v1476_v51 = vpop.f32.mrb[24].mxu0  ;;  %v14470_v59 = vpack.c.bf16 %v145_v27, %v144_v2  ;;  %v137_v2 = vld [vmem:[%s16262_s6] sm:$0x7]  ;;  %v14495_v27 = vrot.slane %v14152_v11, %v14223_v35 }
 0x522   :  { %v1516_v3 = vrot.slane %v1476_v51, 1  ;;  %v12136_v50 = vpop.f32.mrb[25].mxu0 }
 0x523   :  { %v149_v50 = vld [vmem:[#allocation5 + $0x58] sm:$0xff]  ;;  %16429 = vst [vmem:[#allocation47_spill] sm:$0xff] %v14495_v27  ;;  %v380_v18 = vadd.f32 %v14162_v19, %v14495_v27  ;;  %v14515_v19 = vrot.slane %v14152_v11, %v14226_v62 }
 0x524   :  { %v1517_v28 = vsel %vm643_vm8, %v1516_v3, %v1515_v25  ;;  %v147_v25 = vld [vmem:[#allocation5 + $0x48] sm:$0xff]  ;;  %v148_v3 = vld [vmem:[#allocation5 + $0x50] sm:$0xff] }
 0x525   :  { %11683 = vmatmul.mubr.msk.f32.vlgmr.msra.gmra.mrb[2].mxu1 %vm156_vm1, %v1517_v28  ;;  %12140 = vmatmul.mubr.msk.f32.vlgmr.msra.gmra.mrb[26].mxu0 %vm156_vm1, %v1517_v28  ;;  %v14473_v51 = vpack.c.bf16 %v147_v25, %v146_v40  ;;  %v14477_v28 = vpack.c.bf16 %v149_v50, %v148_v3  ;;  %v14498_v40 = vrot.slane %v137_v2, %v14147_v10 }
 0x526   :  { %12828 = vmatpush1.bf16.msra.mxu0 %v14017_v8  ;;  %12174 = vmatprep.mubr.msk.f32.mxu1 %vm13934_vm10, %v16424_v16  ;;  %v14502_v25 = vrot.slane %v14152_v11, %v14220_v33  ;;  %v14505_v3 = vrot.slane %v137_v2, %v14223_v35  ;;  %16433 = vst [vmem:[#allocation51_spill] sm:$0xff] %v14515_v19 }
 0x527   :  { %12830 = vmatprep.subr.bf16.mxu0 %v14019_v9  ;;  %1832 = vmatprep.mubr.f32.mxu0 %v16424_v16  ;;  %16426 = vst [vmem:[#allocation44_spill] sm:$0xff] %v14477_v28  ;;  %16430 = vst [vmem:[#allocation48_spill] sm:$0xff] %v14498_v40 }
 0x528   :  { %12803 = vmatpush3.bf16.msra.mxu1 %v14457_v0  ;;  %16431 = vst [vmem:[#allocation49_spill] sm:$0xff] %v14502_v25  ;;  %16432 = vst [vmem:[#allocation50_spill] sm:$0xff] %v14505_v3 }
 0x529   :  { %12804 = vmatprep.subr.bf16.mxu1 %v16298_v38 }
 0x52a   :  { %12832 = vmatpush1.bf16.msra.mxu0 %v14023_v14 }
 0x52b   :  { %12834 = vmatprep.subr.bf16.mxu0 %v14026_v15 }
 0x52c   :  { %12806 = vmatpush3.bf16.msra.mxu1 %v14462_v1 }
 0x52d   :  { %12807 = vmatprep.subr.bf16.mxu1 %v16298_v38 }
 0x52e   :  { %12836 = vmatpush1.bf16.msra.mxu0 %v14029_v20 }
 0x52f   :  { %12838 = vmatprep.subr.bf16.mxu0 %v14032_v21 }
 0x530   :  { %12809 = vmatpush3.bf16.msra.mxu1 %v14466_v48 }
 0x531   :  { %12810 = vmatprep.subr.bf16.mxu1 %v16298_v38 }
 0x532   :  { %12840 = vmatpush1.bf16.msra.mxu0 %v14049_v29 }
 0x533   :  { %12842 = vmatprep.subr.bf16.mxu0 %v14058_v31 }
 0x534   :  { %12812 = vmatpush3.bf16.msra.mxu1 %v14470_v59 }
 0x535   :  { %12813 = vmatprep.subr.bf16.mxu1 %v16298_v38 }
 0x536   :  { %12844 = vmatpush1.bf16.msra.mxu0 %v14072_v37 }
 0x537   :  { %12846 = vmatprep.subr.bf16.mxu0 %v14080_v39 }
 0x538   :  { %12815 = vmatpush3.bf16.msra.mxu1 %v14473_v51 }
 0x539   :  { %12816 = vmatprep.subr.bf16.mxu1 %v16298_v38 }
 0x53a   :  { %12848 = vmatpush1.bf16.msra.mxu0 %v14092_v45 }
 0x53b   :  { %12850 = vmatprep.subr.bf16.mxu0 %v14100_v47 }
 0x53c   :  { %12818 = vmatpush3.bf16.msra.mxu1 %v14477_v28 }
 0x53d   :  { %12819 = vmatprep.subr.bf16.mxu1 %v16298_v38 }
 0x53e   :  { %12852 = vmatpush1.bf16.msra.mxu0 %v14112_v53 }
 0x53f   :  { %12854 = vmatprep.subr.bf16.mxu0 %v14115_v54 }
 0x540   :  { %12821 = vmatpush3.bf16.msra.mxu1 %v14481_v60 }
 0x541   :  { %12822 = vmatprep.subr.bf16.mxu1 %v16298_v38 }
 0x542   :  { %12856 = vmatpush1.bf16.msra.mxu0 %v14121_v57 }
 0x543   :  { %12177 = vmatprep.subr.mxu0 %v16424_v16 }
 0x544   :  { %12824 = vmatpush3.bf16.msra.mxu1 %v14485_v34 }
 0x545   :  { %12858 = vmatprep.subr.bf16.mxu1 %v14288_v6  ;;  %v449_v6 = vadd.f32 %v14384_v36, %v14502_v25 }
 0x5f8   :  { %v1595_v50 = vpop.f32.mrb[2].mxu1  ;;  %v1666_v30 = vpop.f32.mrb[26].mxu0 }
 0x5f9   :  { %v1596_v44 = vadd.f32 %v1595_v50, %v14498_v40  ;;  %v1597_v17 = vpop.f32.mrb[3].mxu1  ;;  %v12141_v38 = vpop.f32.mrb[27].mxu0  ;;  %v451_v50 = vadd.f32 %v14389_v12, %v14515_v19  ;;  %v14533_v12 = vld [vmem:[%s16256_s0] sm:$0xff] }
 0x5fa   :  { %v1598_v57 = vadd.f32 %v1597_v17, %v14505_v3  ;;  %v14518_v38 = vrot.slane %v137_v2, %v14220_v33  ;;  %16436 = vst [vmem:[#allocation54_spill] sm:$0xff] %v14533_v12  ;;  %v16438_v2 = vld [vmem:[#allocation34_spill] sm:$0xff]  ;;  %v16441_v17 = vmov 0.0|0.0  }
 0x5fb   :  { %v1670_v34 = vadd.f32 %v1596_v44, %v380_v18  ;;  %v16440_v44 = vld [vmem:[#allocation36_spill] sm:$0xff] }
 0x5fc   :  { %v1677_v54 = vadd.f32 %v1598_v57, %v449_v6  ;;  %16434 = vst [vmem:[#allocation52_spill] sm:$0xff] %v14518_v38 }
 0x5fd   :  { %v11686_v53 = vmul.f32 -1.442695, %v1670_v34 }
 0x5fe   :  { %v11687_v60 = vmul.f32 -1.442695, %v1677_v54 }
 0x5ff   :  { %13490 = vpow2.f32 %v11686_v53  ;;  %v1667_v53 = vadd.f32 %v1666_v30, %v14518_v38  ;;  %v16439_v30 = vld [vmem:[#allocation35_spill] sm:$0xff] }
 0x600   :  { %13492 = vpow2.f32 %v11687_v60 }
 0x609   :  { %v13491_v47 = vpop.eup %13490 }
 0x60a   :  { %v1674_v45 = vadd.f32 1.0, %v13491_v47  ;;  %v13493_v28 = vpop.eup %13492 }
 0x60b   :  { %v1681_v36 = vadd.f32 1.0, %v13493_v28  ;;  %v16437_v28 = vld [vmem:[#allocation33_spill] sm:$0xff] }
 0x60c   :  { %13494 = vrcp.f32 %v1674_v45 }
 0x60d   :  { %13496 = vrcp.f32 %v1681_v36  ;;  %v14562_v36 = vld [vmem:[%s16264_s8] ss:$0 sm:$0xff] }
 0x60e   :  { %16442 = vst [vmem:[#allocation55_spill] sm:$0xff] %v14562_v36 }
 0x616   :  { %v13495_v57 = vpop.eup %13494 }
 0x617   :  { %v1684_v54 = vmul.f32 %v13495_v57, %v451_v50  ;;  %v13497_v45 = vpop.eup %13496 }
 0x618   :  { %v1687_v47 = vsub.f32 1.0, %v13497_v45  ;;  %v1689_v11 = vmul.f32 0.0, %v13497_v45 }
 0x619   :  { %v1685_v6 = vadd.f32 %v1684_v54, %v1667_v53  ;;  %v16443_v54 = vld [vmem:[#allocation24_spill] sm:$0xff] }
 0x61b   :  { %13498 = vtanh.f32 %v1685_v6 }
 0x625   :  { %v13499_v60 = vpop.eup %13498 }
 0x626   :  { %v1688_v34 = vmul.f32 %v13499_v60, %v1687_v47  ;;  %v16444_v60 = vld [vmem:[#allocation25_spill] sm:$0xff] }
 0x628   :  { %v14523_v18 = vadd.f32 %v1689_v11, %v1688_v34 }
 0x62a   :  { %16435 = vst [vmem:[#allocation53_spill] sm:$0xff] %v14523_v18  ;;  %12175 = vmatmul.mubr.f32.vlgmr.msra.gmra.mrb[4].mxu1 %v14523_v18  ;;  %1833 = vmatmul.mubr.f32.vlgmr.msra.gmra.mrb[28].mxu0 %v14523_v18 }
 0x62b   :  { %12860 = vmatpush1.bf16.msra.mxu1 %v14290_v41  ;;  %1903 = vmatprep.mubr.f32.mxu1 %v16424_v16 }
 0x62c   :  { %12862 = vmatprep.subr.bf16.mxu1 %v14292_v5  ;;  %12178 = vmatpush3.msra.mxu0 %v14533_v12 }
 0x62d   :  { %12179 = vmatprep.mubr.msk.f32.mxu0 %vm13934_vm10, %v16424_v16  ;;  %12182 = vmatprep.subr.mxu0 %v16424_v16 }
 0x62f   :  { %12864 = vmatpush1.bf16.msra.mxu1 %v14296_v58 }
 0x630   :  { %12866 = vmatprep.subr.bf16.mxu1 %v14299_v42 }
 0x633   :  { %12868 = vmatpush1.bf16.msra.mxu1 %v14302_v7  ;;  %v16450_v7 = vld [vmem:[#allocation20_spill] sm:$0xff] }
 0x634   :  { %12870 = vmatprep.subr.bf16.mxu1 %v16437_v28 }
 0x637   :  { %12872 = vmatpush1.bf16.msra.mxu1 %v16438_v2  ;;  %v16448_v2 = vld [vmem:[#allocation21_spill] sm:$0xff] }
 0x638   :  { %12874 = vmatprep.subr.bf16.mxu1 %v16439_v30 }
 0x63b   :  { %12876 = vmatpush1.bf16.msra.mxu1 %v16440_v44 }
 0x63c   :  { %12878 = vmatprep.subr.bf16.mxu1 %v14317_v55 }
 0x63f   :  { %12880 = vmatpush1.bf16.msra.mxu1 %v14320_v61  ;;  %v16445_v61 = vld [vmem:[#allocation17_spill] sm:$0xff] }
 0x640   :  { %12882 = vmatprep.subr.bf16.mxu1 %v14323_v63 }
 0x643   :  { %12884 = vmatpush1.bf16.msra.mxu1 %v14326_v43 }
 0x644   :  { %12886 = vmatprep.subr.bf16.mxu1 %v14329_v49 }
 0x647   :  { %12888 = vmatpush1.bf16.msra.mxu1 %v14332_v13 }
 0x648   :  { %11697 = vmatprep.subr.msk.mxu1 %vm181_vm0, %v14415_v52 }
 0x64a   :  { %1904 = vmatmul.mubr.f32.vlgmr.msra.gmra.mrb[6].mxu1 %v14523_v18 }
 0x64b   :  { %11698 = vmatpush1.msk.msra.mxu1 %vm181_vm0, %v14411_v46  ;;  %3009 = vmatprep.mubr.f32.mxu1 %v16424_v16 }
 0x64c   :  { %12889 = vmatprep.subr.bf16.mxu1 %v16441_v17 }
 0x6fd   :  { %v1763_v50 = vpop.f32.mrb[4].mxu1  ;;  %v1834_v57 = vpop.f32.mrb[28].mxu0 }
 0x6fe   :  { %v1764_v53 = vadd.f32 %v14562_v36, %v1763_v50  ;;  %v1835_v6 = vadd.f32 %v1834_v57, %v16443_v54  ;;  %v12176_v45 = vpop.f32.mrb[5].mxu1  ;;  %v14566_v47 = vpop.f32.mrb[29].mxu0 }
 0x700   :  { %1767 = vst [vmem:[#allocation7] sm:$0xff] %v1764_v53  ;;  %v1911_v46 = vcombine.high %v1835_v6, %v1835_v6  ;;  %v1918_v34 = vrot.slane %v1835_v6, %v16444_v60 }
 0x702   :  { %v1925_v11 = vrot.slane %v1911_v46, %v16444_v60  ;;  %v1926_v52 = vcombine.high %v1918_v34, %v1918_v34  ;;  %v1934_v13 = vrot.slane %v1918_v34, %v16444_v60 }
 0x704   :  { %v1927_v49 = vcombine.high %v1925_v11, %v1925_v11  ;;  %v1941_v43 = vrot.slane %v1925_v11, %v16444_v60  ;;  %v1948_v63 = vrot.slane %v1926_v52, %v16444_v60  ;;  %v1956_v50 = vcombine.high %v1934_v13, %v1934_v13 }
 0x705   :  { %v1963_v57 = vrot.slane %v1934_v13, %v14147_v10  ;;  %v16446_v13 = vld [vmem:[#allocation16_spill] sm:$0xff] }
 0x706   :  { %v1955_v45 = vrot.slane %v1927_v49, %v16444_v60  ;;  %v1957_v54 = vcombine.high %v1941_v43, %v1941_v43  ;;  %v1958_v53 = vcombine.high %v1948_v63, %v1948_v63  ;;  %v1967_v36 = vrot.slane %v1948_v63, %v14147_v10  ;;  %v16447_v49 = vld [vmem:[#allocation19_spill] sm:$0xff] }
 0x707   :  { %v1971_v6 = vrot.slane %v1956_v50, %v14147_v10  ;;  %v1979_v46 = vrot.slane %v1941_v43, %v14147_v10  ;;  %v2000_v34 = vadd.f32 %v1963_v57, %v16445_v61  ;;  %v16449_v50 = vld [vmem:[#allocation18_spill] sm:$0xff]  ;;  %v16451_v61 = vld [vmem:[#allocation23_spill] sm:$0xff] }
 0x708   :  { %v1959_v55 = vcombine.high %v1955_v45, %v1955_v45  ;;  %v1975_v11 = vrot.slane %v1958_v53, %v14147_v10  ;;  %v1983_v52 = vrot.slane %v1955_v45, %v14147_v10  ;;  %v1987_v44 = vrot.slane %v1957_v54, %v14147_v10  ;;  %v16452_v45 = vld [vmem:[#allocation22_spill] sm:$0xff] }
 0x709   :  { %v2001_v30 = vadd.f32 %v16446_v13, %v1967_v36  ;;  %v2002_v60 = vadd.f32 %v1971_v6, %v16447_v49  ;;  %v2004_v28 = vadd.f32 %v1979_v46, %v16448_v2  ;;  %13500 = vtanh.f32 %v2000_v34  ;;  %v16453_v36 = vld [vmem:[#allocation26_spill] sm:$0xff] }
 0x70a   :  { %v1991_v63 = vrot.slane %v1959_v55, %v14147_v10  ;;  %v2003_v43 = vadd.f32 %v16449_v50, %v1975_v11  ;;  %v2005_v57 = vadd.f32 %v16450_v7, %v1983_v52  ;;  %v2006_v42 = vadd.f32 %v1987_v44, %v16451_v61  ;;  %v14601_v52 = vld [vmem:[%s16260_s4] ss:$0 sm:$0xff] }
 0x70b   :  { %13502 = vtanh.f32 %v2001_v30  ;;  %16454 = vst [vmem:[#allocation26_spill] sm:$0xff] %v14601_v52 }
 0x70c   :  { %13504 = vtanh.f32 %v2002_v60  ;;  %v2007_v53 = vadd.f32 %v16452_v45, %v1991_v63 }
 0x70d   :  { %13506 = vtanh.f32 %v2004_v28 }
 0x70e   :  { %13508 = vtanh.f32 %v2003_v43 }
 0x70f   :  { %13510 = vtanh.f32 %v2005_v57 }
 0x710   :  { %13512 = vtanh.f32 %v2006_v42 }
 0x711   :  { %13514 = vtanh.f32 %v2007_v53 }
 0x713   :  { %v13501_v54 = vpop.eup %13500 }
 0x714   :  { %v2016_v6 = vmul.f32 %v13501_v54, %v16453_v36 }
 0x715   :  { %v13503_v49 = vpop.eup %13502 }
 0x716   :  { %v13505_v46 = vpop.eup %13504  ;;  %2024 = vadd.xlane.f32.xlu1 %v2016_v6  ;;  %v2017_v55 = vmul.f32 %v13503_v49, %v16453_v36 }
 0x717   :  { %v2018_v34 = vmul.f32 %v13505_v46, %v16453_v36  ;;  %v13507_v11 = vpop.eup %13506 }
 0x718   :  { %2026 = vadd.xlane.f32.xlu0 %v2017_v55  ;;  %v2020_v30 = vmul.f32 %v13507_v11, %v16453_v36  ;;  %v13509_v44 = vpop.eup %13508 }
 0x719   :  { %v2019_v49 = vmul.f32 %v14601_v52, %v13509_v44  ;;  %v13511_v63 = vpop.eup %13510 }
 0x71a   :  { %2028 = vadd.xlane.f32.xlu1 %v2018_v34  ;;  %v2021_v42 = vmul.f32 %v14601_v52, %v13511_v63  ;;  %v13513_v43 = vpop.eup %13512 }
 0x71b   :  { %v2022_v57 = vmul.f32 %v14601_v52, %v13513_v43  ;;  %v13515_v54 = vpop.eup %13514 }
 0x71c   :  { %v2023_v36 = vmul.f32 %v14601_v52, %v13515_v54 }
 0x71d   :  { %v14594_v28 = vpop.f32.mrb[6].mxu1 }
 0x71e   :  { %2032 = vadd.xlane.f32.xlu1 %v2020_v30  ;;  %v14596_v60 = vpop.f32.mrb[7].mxu1 }
 0x722   :  { %2030 = vadd.xlane.f32.xlu1 %v2019_v49 }
 0x726   :  { %2034 = vadd.xlane.f32.xlu1 %v2021_v42 }
 0x72a   :  { %2036 = vadd.xlane.f32.xlu1 %v2022_v57 }
 0x72e   :  { %2038 = vadd.xlane.f32.xlu1 %v2023_v36 }
 0x7a3   :  { %v2025_v53 = vpop.xlane.xlu1 %2024 }
 0x7a4   :  { %v2051_v30 = vrot.slane %v2025_v53, %v14201_v22 }
 0x7a5   :  { %v2027_v55 = vpop.xlane.xlu0 %2026 }
 0x7a6   :  { %v2055_v11 = vrot.slane %v2027_v55, %v14201_v22 }
 0x7a7   :  { %v2029_v6 = vpop.xlane.xlu1 %2028 }
 0x7a8   :  { %v2059_v44 = vrot.slane %v2029_v6, %v14201_v22  ;;  %v2080_v63 = vsel %vm631_vm2, %v2055_v11, %v2051_v30 }
 0x7aa   :  { %v2081_v43 = vsel %vm633_vm3, %v2059_v44, %v2080_v63 }
 0x7ab   :  { %v2033_v46 = vpop.xlane.xlu1 %2032 }
 0x7ac   :  { %v2067_v52 = vrot.slane %v2033_v46, %v14201_v22 }
 0x7af   :  { %v2031_v34 = vpop.xlane.xlu1 %2030 }
 0x7b0   :  { %v2063_v42 = vrot.slane %v2031_v34, %v14201_v22 }
 0x7b2   :  { %v2082_v54 = vsel %vm635_vm4, %v2063_v42, %v2081_v43 }
 0x7b3   :  { %v2035_v49 = vpop.xlane.xlu1 %2034  ;;  %v2083_v7 = vsel %vm637_vm5, %v2067_v52, %v2082_v54 }
 0x7b4   :  { %v2071_v36 = vrot.slane %v2035_v49, %v14201_v22 }
 0x7b6   :  { %v2084_v11 = vsel %vm639_vm6, %v2071_v36, %v2083_v7 }
 0x7b7   :  { %v2037_v57 = vpop.xlane.xlu1 %2036 }
 0x7b8   :  { %v2075_v45 = vrot.slane %v2037_v57, %v14201_v22 }
 0x7ba   :  { %v2085_v30 = vsel %vm641_vm7, %v2075_v45, %v2084_v11 }
 0x7bb   :  { %v2039_v61 = vpop.xlane.xlu1 %2038 }
 0x7bc   :  { %v2079_v50 = vrot.slane %v2039_v61, %v14201_v22 }
 0x7be   :  { %v2086_v44 = vsel %vm643_vm8, %v2079_v50, %v2085_v30 }
 0x7bf   :  { %v2088_v63 = vsel %vm646_vm9, %v2086_v44, -inf }
 0x7c0   :  { %2089 = vmax.xlane.f32.xlu1 %v2088_v63 }
 0x84d   :  { %v2090_v42 = vpop.xlane.xlu1 %2089 }
 0x84e   :  { %v2095_v43 = vrot.slane %v2090_v42, %v14147_v10  ;;  %v2099_v2 = vrot.slane %v2090_v42, %v14223_v35  ;;  %v2103_v13 = vrot.slane %v2090_v42, %v14220_v33  ;;  %v2111_v52 = vrot.slane %v2090_v42, %v14232_v56 }
 0x84f   :  { %v2119_v54 = vrot.slane %v2090_v42, %v14240_v24  ;;  %v2107_v45 = vrot.slane %v2090_v42, %v14226_v62  ;;  %v2115_v12 = vrot.slane %v2090_v42, %v14236_v26  ;;  %v2123_v38 = vrot.slane %v2090_v42, %v14244_v23 }
 0x850   :  { %v2133_v58 = vsub.f32 %v2027_v55, %v2099_v2  ;;  %v2132_v7 = vsub.f32 %v2025_v53, %v2095_v43  ;;  %v2136_v36 = vsub.f32 %v2033_v46, %v2111_v52  ;;  %v2134_v50 = vsub.f32 %v2029_v6, %v2103_v13 }
 0x851   :  { %v2138_v63 = vsub.f32 %v2037_v57, %v2119_v54  ;;  %v2135_v41 = vsub.f32 %v2031_v34, %v2107_v45  ;;  %v2137_v53 = vsub.f32 %v2035_v49, %v2115_v12 }
 0x852   :  { %v2142_v11 = vmul.f32 1.442695, %v2133_v58  ;;  %v2140_v30 = vmul.f32 1.442695, %v2132_v7  ;;  %v2148_v44 = vmul.f32 1.442695, %v2136_v36  ;;  %v2139_v58 = vsub.f32 %v2039_v61, %v2123_v38 }
 0x853   :  { %v2144_v5 = vmul.f32 1.442695, %v2134_v50  ;;  %v2152_v18 = vmul.f32 1.442695, %v2138_v63  ;;  %v2146_v2 = vmul.f32 1.442695, %v2135_v41 }
 0x854   :  { %13516 = vpow2.f32 %v2142_v11  ;;  %v2150_v13 = vmul.f32 1.442695, %v2137_v53  ;;  %v2154_v55 = vmul.f32 1.442695, %v2139_v58 }
 0x855   :  { %13518 = vpow2.f32 %v2140_v30 }
 0x856   :  { %13520 = vpow2.f32 %v2148_v44 }
 0x857   :  { %13522 = vpow2.f32 %v2144_v5 }
 0x858   :  { %13524 = vpow2.f32 %v2152_v18 }
 0x859   :  { %13526 = vpow2.f32 %v2146_v2 }
 0x85a   :  { %13528 = vpow2.f32 %v2150_v13 }
 0x85b   :  { %13530 = vpow2.f32 %v2154_v55 }
 0x85e   :  { %v13517_v6 = vpop.eup %13516 }
 0x85f   :  { %v13519_v46 = vpop.eup %13518  ;;  %2168 = vperm.xlu0 %13454, %v13517_v6  }
 0x860   :  { %2165 = vperm.xlu1 %13453, %v13519_v46   ;;  %v13521_v57 = vpop.eup %13520 }
 0x861   :  { %v13523_v43 = vpop.eup %13522 }
 0x862   :  { %v13525_v34 = vpop.eup %13524 }
 0x863   :  { %2177 = vperm.xlu0 %13454, %v13521_v57   ;;  %v13527_v42 = vpop.eup %13526 }
 0x864   :  { %2171 = vperm.xlu1 %13453, %v13523_v43   ;;  %v13529_v41 = vpop.eup %13528 }
 0x865   :  { %v13531_v5 = vpop.eup %13530 }
 0x867   :  { %2183 = vperm.xlu0 %13454, %v13525_v34  }
 0x868   :  { %2174 = vperm.xlu1 %13453, %v13527_v42  }
 0x86c   :  { %2180 = vperm.xlu1 %13453, %v13529_v41  }
 0x870   :  { %2186 = vperm.xlu1 %13453, %v13531_v5  }
 0x8de   :  { %v2169_v38 = vpop.permute.xlu0 %2168 }
 0x8df   :  { %v2166_v61 = vpop.permute.xlu1 %2165  ;;  %v2195_v12 = vrot.slane %v2169_v38, %v14201_v22 }
 0x8e0   :  { %v2191_v49 = vrot.slane %v2166_v61, %v14201_v22 }
 0x8e2   :  { %v2178_v54 = vpop.permute.xlu0 %2177  ;;  %v2220_v45 = vsel %vm631_vm2, %v2195_v12, %v2191_v49 }
 0x8e3   :  { %v2172_v18 = vpop.permute.xlu1 %2171  ;;  %v2207_v30 = vrot.slane %v2178_v54, %v14201_v22 }
 0x8e4   :  { %v2199_v52 = vrot.slane %v2172_v18, %v14201_v22 }
 0x8e6   :  { %v2221_v50 = vsel %vm633_vm3, %v2199_v52, %v2220_v45  ;;  %v2184_v63 = vpop.permute.xlu0 %2183 }
 0x8e7   :  { %v2175_v7 = vpop.permute.xlu1 %2174  ;;  %v2215_v58 = vrot.slane %v2184_v63, %v14201_v22 }
 0x8e8   :  { %v2203_v36 = vrot.slane %v2175_v7, %v14201_v22 }
 0x8ea   :  { %v2222_v11 = vsel %vm635_vm4, %v2203_v36, %v2221_v50 }
 0x8eb   :  { %v2181_v44 = vpop.permute.xlu1 %2180  ;;  %v2223_v53 = vsel %vm637_vm5, %v2207_v30, %v2222_v11 }
 0x8ec   :  { %v2211_v2 = vrot.slane %v2181_v44, %v14201_v22 }
 0x8ee   :  { %v2224_v13 = vsel %vm639_vm6, %v2211_v2, %v2223_v53 }
 0x8ef   :  { %v2187_v55 = vpop.permute.xlu1 %2186  ;;  %v2225_v38 = vsel %vm641_vm7, %v2215_v58, %v2224_v13 }
 0x8f0   :  { %v2219_v61 = vrot.slane %v2187_v55, %v14201_v22 }
 0x8f2   :  { %v2226_v18 = vsel %vm643_vm8, %v2219_v61, %v2225_v38 }
 0x8f3   :  { %v2228_v12 = vsel %vm646_vm9, %v2226_v18, 0.0  ;;  %v14682_v18 = vld [vmem:[%s16256_s0 + $0x18] sm:$0xff] }
 0x8f4   :  { %2229 = vadd.xlane.f32.xlu0 %v2228_v12 }
 0x981   :  { %v2230_v49 = vpop.xlane.xlu0 %2229 }
 0x982   :  { %13532 = vrcp.f32 %v2230_v49 }
 0x98c   :  { %v13533_v52 = vpop.eup %13532 }
 0x98d   :  { %v2236_v54 = vrot.slane %v13533_v52, %v14147_v10  ;;  %v2240_v45 = vrot.slane %v13533_v52, %v14223_v35  ;;  %v2244_v50 = vrot.slane %v13533_v52, %v14220_v33  ;;  %v2248_v30 = vrot.slane %v13533_v52, %v14226_v62 }
 0x98e   :  { %v2252_v63 = vrot.slane %v13533_v52, %v14232_v56  ;;  %v2256_v53 = vrot.slane %v13533_v52, %v14236_v26  ;;  %v2260_v13 = vrot.slane %v13533_v52, %v14240_v24  ;;  %v2264_v58 = vrot.slane %v13533_v52, %v14244_v23  ;;  %v14693_v52 = vld [vmem:[%s16256_s0 + $0x20] sm:$0xff] }
 0x98f   :  { %v2273_v7 = vmul.f32 %v13519_v46, %v2236_v54  ;;  %v2274_v36 = vmul.f32 %v13517_v6, %v2240_v45  ;;  %v2275_v11 = vmul.f32 %v13523_v43, %v2244_v50  ;;  %v2276_v44 = vmul.f32 %v13527_v42, %v2248_v30  ;;  %v14704_v45 = vld [vmem:[%s16256_s0 + $0x28] sm:$0xff] }
 0x990   :  { %v2277_v2 = vmul.f32 %v13521_v57, %v2252_v63  ;;  %v2278_v46 = vmul.f32 %v13529_v41, %v2256_v53  ;;  %v2279_v6 = vmul.f32 %v13525_v34, %v2260_v13  ;;  %v2280_v43 = vmul.f32 %v13531_v5, %v2264_v58  ;;  %v14660_v57 = vld [vmem:[%s16256_s0 + $0x8] sm:$0xff]  ;;  %v14671_v5 = vld [vmem:[%s16256_s0 + $0x10] sm:$0xff]  ;;  %v14726_v63 = vld [vmem:[%s16256_s0 + $0x38] sm:$0xff] }
 0x991   :  { %2283 = vperm.xlu1 %13453, %v2273_v7  }
 0x995   :  { %2363 = vperm.xlu1 %13453, %v2274_v36  }
 0x999   :  { %2443 = vperm.xlu1 %13453, %v2275_v11   ;;  %v14715_v11 = vld [vmem:[%s16256_s0 + $0x30] sm:$0xff] }
 0x99d   :  { %2523 = vperm.xlu1 %13453, %v2276_v44  }
 0x9a1   :  { %2603 = vperm.xlu1 %13453, %v2277_v2  }
 0x9a5   :  { %2683 = vperm.xlu1 %13453, %v2278_v46  }
 0x9a9   :  { %2763 = vperm.xlu1 %13453, %v2279_v6  }
 0x9ad   :  { %2843 = vperm.xlu1 %13453, %v2280_v43  }
 0xa10   :  { %v2284_v55 = vpop.permute.xlu1 %2283 }
 0xa11   :  { %v2288_v42 = vrot.slane %v2284_v55, %v14201_v22 }
 0xa13   :  { %12180 = vmatmul.mubr.msk.f32.vlgmr.msra.gmra.mrb[30].mxu0 %vm646_vm9, %v2288_v42 }
 0xa14   :  { %12183 = vmatpush3.msra.mxu0 %v14660_v57  ;;  %v2364_v41 = vpop.permute.xlu1 %2363  ;;  %12184 = vmatprep.mubr.msk.f32.mxu0 %vm13934_vm10, %v16424_v16 }
 0xa15   :  { %v2368_v34 = vrot.slane %v2364_v41, %v14201_v22  ;;  %12187 = vmatprep.subr.mxu0 %v16424_v16 }
 0xa17   :  { %12185 = vmatmul.mubr.msk.f32.vlgmr.msra.gmra.mrb[32].mxu0 %vm646_vm9, %v2368_v34 }
 0xa18   :  { %12188 = vmatpush3.msra.mxu0 %v14671_v5  ;;  %v2444_v61 = vpop.permute.xlu1 %2443  ;;  %12189 = vmatprep.mubr.msk.f32.mxu0 %vm13934_vm10, %v16424_v16 }
 0xa19   :  { %v2448_v38 = vrot.slane %v2444_v61, %v14201_v22  ;;  %12192 = vmatprep.subr.mxu0 %v16424_v16 }
 0xa1b   :  { %12190 = vmatmul.mubr.msk.f32.vlgmr.msra.gmra.mrb[34].mxu0 %vm646_vm9, %v2448_v38 }
 0xa1c   :  { %12193 = vmatpush3.msra.mxu0 %v14682_v18  ;;  %v2524_v12 = vpop.permute.xlu1 %2523  ;;  %12194 = vmatprep.mubr.msk.f32.mxu0 %vm13934_vm10, %v16424_v16 }
 0xa1d   :  { %v2528_v49 = vrot.slane %v2524_v12, %v14201_v22  ;;  %12197 = vmatprep.subr.mxu0 %v16424_v16 }
 0xa1f   :  { %12195 = vmatmul.mubr.msk.f32.vlgmr.msra.gmra.mrb[36].mxu0 %vm646_vm9, %v2528_v49 }
 0xa20   :  { %12198 = vmatpush3.msra.mxu0 %v14693_v52  ;;  %v2604_v54 = vpop.permute.xlu1 %2603  ;;  %12199 = vmatprep.mubr.msk.f32.mxu0 %vm13934_vm10, %v16424_v16 }
 0xa21   :  { %v2608_v7 = vrot.slane %v2604_v54, %v14201_v22  ;;  %12202 = vmatprep.subr.mxu0 %v16424_v16 }
 0xa23   :  { %12200 = vmatmul.mubr.msk.f32.vlgmr.msra.gmra.mrb[38].mxu0 %vm646_vm9, %v2608_v7 }
 0xa24   :  { %12203 = vmatpush3.msra.mxu0 %v14704_v45  ;;  %v2684_v36 = vpop.permute.xlu1 %2683  ;;  %12204 = vmatprep.mubr.msk.f32.mxu0 %vm13934_vm10, %v16424_v16 }
 0xa25   :  { %v2688_v50 = vrot.slane %v2684_v36, %v14201_v22  ;;  %12207 = vmatprep.subr.mxu0 %v16424_v16 }
 0xa27   :  { %12205 = vmatmul.mubr.msk.f32.vlgmr.msra.gmra.mrb[40].mxu0 %vm646_vm9, %v2688_v50 }
 0xa28   :  { %12208 = vmatpush3.msra.mxu0 %v14715_v11  ;;  %v2764_v30 = vpop.permute.xlu1 %2763  ;;  %12209 = vmatprep.mubr.msk.f32.mxu0 %vm13934_vm10, %v16424_v16 }
 0xa29   :  { %v2768_v44 = vrot.slane %v2764_v30, %v14201_v22  ;;  %12212 = vmatprep.subr.mxu0 %v16424_v16 }
 0xa2b   :  { %12210 = vmatmul.mubr.msk.f32.vlgmr.msra.gmra.mrb[42].mxu0 %vm646_vm9, %v2768_v44 }
 0xa2c   :  { %12213 = vmatpush3.msra.mxu0 %v14726_v63  ;;  %v2844_v2 = vpop.permute.xlu1 %2843  ;;  %12214 = vmatprep.mubr.msk.f32.mxu0 %vm13934_vm10, %v16424_v16 }
 0xa2d   :  { %v2848_v53 = vrot.slane %v2844_v2, %v14201_v22  ;;  %12217 = vmatprep.subr.mxu0 %v16424_v16 }
 0xa2f   :  { %12215 = vmatmul.mubr.msk.f32.vlgmr.msra.gmra.mrb[44].mxu0 %vm646_vm9, %v2848_v53 }
 0xa30   :  { %12218 = vmatpush3.msk.msra.mxu0 %vm181_vm0, %v14424_v32  ;;  %12219 = vmatprep.mubr.msk.f32.mxu0 %vm13934_vm10, %v16424_v16 }
 0xa31   :  { %12914 = vmatprep.subr.bf16.mxu0 %v14015_v4 }
 0xae6   :  { %v2357_v46 = vpop.f32.mrb[30].mxu0 }
 0xae7   :  { %v12181_v13 = vpop.f32.mrb[31].mxu0 }
 0xaea   :  { %v2437_v6 = vpop.f32.mrb[32].mxu0 }
 0xaeb   :  { %v2929_v58 = vrot.slane %v2437_v6, 7  ;;  %v12186_v43 = vpop.f32.mrb[33].mxu0 }
 0xaed   :  { %v2930_v55 = vsel %vm631_vm2, %v2929_v58, %v2357_v46 }
 0xaee   :  { %v2517_v42 = vpop.f32.mrb[34].mxu0 }
 0xaef   :  { %v2931_v41 = vrot.slane %v2517_v42, 6  ;;  %v12191_v34 = vpop.f32.mrb[35].mxu0 }
 0xaf0   :  { %v16455_v34 = vld [vmem:[#allocation44_spill] sm:$0xff] }
 0xaf1   :  { %v2932_v61 = vsel %vm633_vm3, %v2931_v41, %v2930_v55 }
 0xaf2   :  { %v2597_v38 = vpop.f32.mrb[36].mxu0 }
 0xaf3   :  { %v2933_v12 = vrot.slane %v2597_v38, 5  ;;  %v12196_v32 = vpop.f32.mrb[37].mxu0  ;;  %v16457_v38 = vld [vmem:[#allocation12_spill] sm:$0xff] }
 0xaf4   :  { %v16459_v32 = vld [vmem:[#allocation13_spill] sm:$0xff] }
 0xaf5   :  { %v2934_v49 = vsel %vm635_vm4, %v2933_v12, %v2932_v61  ;;  %v16456_v61 = vld [vmem:[#allocation11_spill] sm:$0xff]  ;;  %v16458_v12 = vld [vmem:[#allocation45_spill] sm:$0xff] }
 0xaf6   :  { %v2677_v54 = vpop.f32.mrb[38].mxu0 }
 0xaf7   :  { %v2935_v7 = vrot.slane %v2677_v54, 4  ;;  %v12201_v36 = vpop.f32.mrb[39].mxu0  ;;  %v16461_v54 = vld [vmem:[#allocation46_spill] sm:$0xff] }
 0xaf8   :  { %v16463_v36 = vld [vmem:[#allocation27_spill] sm:$0xff] }
 0xaf9   :  { %v2936_v50 = vsel %vm637_vm5, %v2935_v7, %v2934_v49  ;;  %v16460_v49 = vld [vmem:[#allocation14_spill] sm:$0xff]  ;;  %v16462_v7 = vld [vmem:[#allocation15_spill] sm:$0xff] }
 0xafa   :  { %v2757_v30 = vpop.f32.mrb[40].mxu0 }
 0xafb   :  { %v2937_v44 = vrot.slane %v2757_v30, 3  ;;  %v12206_v2 = vpop.f32.mrb[41].mxu0 }
 0xafd   :  { %v2938_v53 = vsel %vm639_vm6, %v2937_v44, %v2936_v50  ;;  %v1837_v44 = vadd.f32 %v14566_v47, %v14495_v27 }
 0xafe   :  { %v2837_v46 = vpop.f32.mrb[42].mxu0 }
 0xaff   :  { %v2939_v13 = vrot.slane %v2837_v46, 2  ;;  %v12211_v6 = vpop.f32.mrb[43].mxu0 }
 0xb01   :  { %v2940_v58 = vsel %vm641_vm7, %v2939_v13, %v2938_v53  ;;  %v1906_v13 = vadd.f32 %v14594_v28, %v14502_v25 }
 0xb02   :  { %v2917_v43 = vpop.f32.mrb[44].mxu0 }
 0xb03   :  { %v2941_v55 = vrot.slane %v2917_v43, 1  ;;  %v12216_v42 = vpop.f32.mrb[45].mxu0 }
 0xb05   :  { %v2942_v41 = vsel %vm643_vm8, %v2941_v55, %v2940_v58 }
 0xb06   :  { %11699 = vmatmul.mubr.msk.f32.vlgmr.msra.gmra.mrb[8].mxu1 %vm156_vm1, %v2942_v41  ;;  %12220 = vmatmul.mubr.msk.f32.vlgmr.msra.gmra.mrb[46].mxu0 %vm156_vm1, %v2942_v41 }
 0xb07   :  { %12891 = vmatpush3.bf16.msra.mxu1 %v14457_v0  ;;  %12916 = vmatpush1.bf16.msra.mxu0 %v14017_v8 }
 0xb08   :  { %12892 = vmatprep.subr.bf16.mxu1 %v16441_v17  ;;  %12918 = vmatprep.subr.bf16.mxu0 %v14019_v9 }
 0xb09   :  { %12254 = vmatprep.mubr.msk.f32.mxu1 %vm13934_vm10, %v16424_v16  ;;  %3243 = vmatprep.mubr.f32.mxu0 %v16424_v16 }
 0xb0b   :  { %12894 = vmatpush3.bf16.msra.mxu1 %v14462_v1  ;;  %12920 = vmatpush1.bf16.msra.mxu0 %v14023_v14 }
 0xb0c   :  { %12895 = vmatprep.subr.bf16.mxu1 %v16441_v17  ;;  %12922 = vmatprep.subr.bf16.mxu0 %v14026_v15 }
 0xb0f   :  { %12897 = vmatpush3.bf16.msra.mxu1 %v14466_v48  ;;  %12924 = vmatpush1.bf16.msra.mxu0 %v14029_v20 }
 0xb10   :  { %12898 = vmatprep.subr.bf16.mxu1 %v16441_v17  ;;  %12926 = vmatprep.subr.bf16.mxu0 %v14032_v21 }
 0xb13   :  { %12900 = vmatpush3.bf16.msra.mxu1 %v14470_v59  ;;  %12928 = vmatpush1.bf16.msra.mxu0 %v14049_v29 }
 0xb14   :  { %12901 = vmatprep.subr.bf16.mxu1 %v16441_v17  ;;  %12930 = vmatprep.subr.bf16.mxu0 %v14058_v31 }
 0xb17   :  { %12903 = vmatpush3.bf16.msra.mxu1 %v14473_v51  ;;  %12932 = vmatpush1.bf16.msra.mxu0 %v14072_v37 }
 0xb18   :  { %12904 = vmatprep.subr.bf16.mxu1 %v16441_v17  ;;  %12934 = vmatprep.subr.bf16.mxu0 %v14080_v39 }
 0xb1b   :  { %12906 = vmatpush3.bf16.msra.mxu1 %v16455_v34  ;;  %12936 = vmatpush1.bf16.msra.mxu0 %v16456_v61 }
 0xb1c   :  { %12907 = vmatprep.subr.bf16.mxu1 %v16441_v17  ;;  %12938 = vmatprep.subr.bf16.mxu0 %v16457_v38 }
 0xb1f   :  { %12909 = vmatpush3.bf16.msra.mxu1 %v16458_v12  ;;  %12940 = vmatpush1.bf16.msra.mxu0 %v16459_v32 }
 0xb20   :  { %12910 = vmatprep.subr.bf16.mxu1 %v16441_v17  ;;  %12942 = vmatprep.subr.bf16.mxu0 %v16460_v49 }
 0xb23   :  { %12912 = vmatpush3.bf16.msra.mxu1 %v16461_v54  ;;  %12944 = vmatpush1.bf16.msra.mxu0 %v16462_v7 }
 0xb24   :  { %12946 = vmatprep.subr.bf16.mxu1 %v16463_v36  ;;  %12257 = vmatprep.subr.mxu0 %v16424_v16 }
 0xbd9   :  { %v3011_v50 = vpop.f32.mrb[8].mxu1  ;;  %v3082_v30 = vpop.f32.mrb[46].mxu0 }
 0xbda   :  { %v3012_v2 = vadd.f32 %v3011_v50, %v14498_v40  ;;  %v3013_v53 = vpop.f32.mrb[9].mxu1  ;;  %v12221_v46 = vpop.f32.mrb[47].mxu0  ;;  %v1908_v50 = vadd.f32 %v14596_v60, %v14515_v19  ;;  %v16464_v40 = vld [vmem:[#allocation52_spill] sm:$0xff] }
 0xbdb   :  { %v3014_v6 = vadd.f32 %v3013_v53, %v14505_v3  ;;  %v3083_v27 = vadd.f32 %v3082_v30, %v16464_v40  ;;  %v16467_v60 = vld [vmem:[#allocation28_spill] sm:$0xff]  ;;  %v16471_v30 = vld [vmem:[#allocation31_spill] sm:$0xff]  ;;  %v16492_v3 = vld [vmem:[#allocation21_spill] sm:$0xff] }
 0xbdc   :  { %v3086_v58 = vadd.f32 %v3012_v2, %v1837_v44 }
 0xbdd   :  { %v3093_v43 = vadd.f32 %v3014_v6, %v1906_v13 }
 0xbde   :  { %v11702_v55 = vmul.f32 -1.442695, %v3086_v58  ;;  %v16465_v58 = vld [vmem:[#allocation53_spill] sm:$0xff] }
 0xbdf   :  { %v11703_v42 = vmul.f32 -1.442695, %v3093_v43 }
 0xbe0   :  { %13534 = vpow2.f32 %v11702_v55 }
 0xbe1   :  { %13536 = vpow2.f32 %v11703_v42  ;;  %v16472_v42 = vld [vmem:[#allocation32_spill] sm:$0xff] }
 0xbea   :  { %v13535_v41 = vpop.eup %13534 }
 0xbeb   :  { %v3090_v36 = vadd.f32 1.0, %v13535_v41  ;;  %v13537_v7 = vpop.eup %13536  ;;  %v16473_v41 = vld [vmem:[#allocation33_spill] sm:$0xff] }
 0xbec   :  { %v3097_v47 = vadd.f32 1.0, %v13537_v7  ;;  %v16468_v7 = vld [vmem:[#allocation29_spill] sm:$0xff] }
 0xbed   :  { %13538 = vrcp.f32 %v3090_v36  ;;  %v16470_v36 = vld [vmem:[#allocation30_spill] sm:$0xff] }
 0xbee   :  { %13540 = vrcp.f32 %v3097_v47  ;;  %v16474_v47 = vld [vmem:[#allocation34_spill] sm:$0xff] }
 0xbf7   :  { %v13539_v46 = vpop.eup %13538 }
 0xbf8   :  { %v3100_v28 = vmul.f32 %v13539_v46, %v1908_v50  ;;  %v13541_v44 = vpop.eup %13540  ;;  %v16475_v50 = vld [vmem:[#allocation35_spill] sm:$0xff]  ;;  %v16476_v46 = vld [vmem:[#allocation36_spill] sm:$0xff] }
 0xbf9   :  { %v3103_v2 = vsub.f32 1.0, %v13541_v44  ;;  %v3105_v43 = vmul.f32 %v13541_v44, %v16465_v58  ;;  %v16479_v44 = vld [vmem:[#allocation39_spill] sm:$0xff] }
 0xbfa   :  { %v3101_v53 = vadd.f32 %v3100_v28, %v3083_v27  ;;  %v16469_v27 = vld [vmem:[#allocation54_spill] sm:$0xff]  ;;  %v16477_v28 = vld [vmem:[#allocation37_spill] sm:$0xff]  ;;  %v16483_v58 = vld [vmem:[#allocation43_spill] sm:$0xff] }
 0xbfc   :  { %13542 = vtanh.f32 %v3101_v53  ;;  %v16478_v53 = vld [vmem:[#allocation38_spill] sm:$0xff] }
 0xc06   :  { %v13543_v13 = vpop.eup %13542 }
 0xc07   :  { %v3104_v6 = vmul.f32 %v13543_v13, %v3103_v2  ;;  %v16480_v2 = vld [vmem:[#allocation40_spill] sm:$0xff]  ;;  %v16481_v13 = vld [vmem:[#allocation41_spill] sm:$0xff] }
 0xc09   :  { %v14793_v55 = vadd.f32 %v3105_v43, %v3104_v6  ;;  %v16482_v6 = vld [vmem:[#allocation42_spill] sm:$0xff]  ;;  %v14823_v43 = vld [vmem:[%s16261_s5] sm:$0xff] }
 0xc0a   :  { %16484 = vst [vmem:[#allocation11_spill] sm:$0xff] %v14823_v43 }
 0xc0b   :  { %16466 = vst [vmem:[#allocation44_spill] sm:$0xff] %v14793_v55  ;;  %12255 = vmatmul.mubr.f32.vlgmr.msra.gmra.mrb[10].mxu1 %v14793_v55  ;;  %3244 = vmatmul.mubr.f32.vlgmr.msra.gmra.mrb[48].mxu0 %v14793_v55 }
 0xc0c   :  { %12948 = vmatpush1.bf16.msra.mxu1 %v16467_v60  ;;  %3314 = vmatprep.mubr.f32.mxu1 %v16424_v16  ;;  %v16489_v60 = vld [vmem:[#allocation17_spill] sm:$0xff] }
 0xc0d   :  { %12950 = vmatprep.subr.bf16.mxu1 %v16468_v7  ;;  %12258 = vmatpush3.msra.mxu0 %v16469_v27 }
 0xc0e   :  { %12259 = vmatprep.mubr.msk.f32.mxu0 %vm13934_vm10, %v16424_v16  ;;  %12262 = vmatprep.subr.mxu0 %v16424_v16 }
 0xc10   :  { %12952 = vmatpush1.bf16.msra.mxu1 %v16470_v36 }
 0xc11   :  { %12954 = vmatprep.subr.bf16.mxu1 %v16471_v30 }
 0xc14   :  { %12956 = vmatpush1.bf16.msra.mxu1 %v16472_v42 }
 0xc15   :  { %12958 = vmatprep.subr.bf16.mxu1 %v16473_v41 }
 0xc18   :  { %12960 = vmatpush1.bf16.msra.mxu1 %v16474_v47 }
 0xc19   :  { %12962 = vmatprep.subr.bf16.mxu1 %v16475_v50  ;;  %v16488_v50 = vld [vmem:[#allocation25_spill] sm:$0xff] }
 0xc1c   :  { %12964 = vmatpush1.bf16.msra.mxu1 %v16476_v46 }
 0xc1d   :  { %12966 = vmatprep.subr.bf16.mxu1 %v16477_v28 }
 0xc20   :  { %12968 = vmatpush1.bf16.msra.mxu1 %v16478_v53 }
 0xc21   :  { %12970 = vmatprep.subr.bf16.mxu1 %v16479_v44  ;;  %v16486_v44 = vld [vmem:[#allocation24_spill] sm:$0xff] }
 0xc24   :  { %12972 = vmatpush1.bf16.msra.mxu1 %v16480_v2 }
 0xc25   :  { %12974 = vmatprep.subr.bf16.mxu1 %v16481_v13 }
 0xc28   :  { %12976 = vmatpush1.bf16.msra.mxu1 %v16482_v6  ;;  %v16485_v6 = vld [vmem:[#allocation55_spill] sm:$0xff] }
 0xc29   :  { %11712 = vmatprep.subr.msk.mxu1 %vm181_vm0, %v16483_v58 }
 0xc2b   :  { %3315 = vmatmul.mubr.f32.vlgmr.msra.gmra.mrb[12].mxu1 %v14793_v55 }
 0xc2c   :  { %11713 = vmatpush1.msk.msra.mxu1 %vm181_vm0, %v14823_v43  ;;  %4420 = vmatprep.mubr.f32.mxu1 %v16424_v16 }
 0xc2d   :  { %12977 = vmatprep.subr.bf16.mxu1 %v16441_v17 }
 0xcde   :  { %v3173_v27 = vpop.f32.mrb[10].mxu1  ;;  %v3245_v13 = vpop.f32.mrb[48].mxu0 }
 0xcdf   :  { %v3174_v2 = vadd.f32 %v16485_v6, %v3173_v27  ;;  %v3246_v58 = vadd.f32 %v3245_v13, %v16486_v44  ;;  %v12256_v53 = vpop.f32.mrb[11].mxu1  ;;  %v14831_v28 = vpop.f32.mrb[49].mxu0 }
 0xce0   :  { %16487 = vst [vmem:[#allocation53_spill] sm:$0xff] %v14831_v28  ;;  %v16494_v28 = vld [vmem:[#allocation20_spill] sm:$0xff] }
 0xce1   :  { %3178 = vst [vmem:[#allocation7 + $0x8] sm:$0xff] %v3174_v2  ;;  %v3322_v46 = vcombine.high %v3246_v58, %v3246_v58  ;;  %v3329_v47 = vrot.slane %v3246_v58, %v16488_v50 }
 0xce3   :  { %v3336_v41 = vrot.slane %v3322_v46, %v16488_v50  ;;  %v3337_v43 = vcombine.high %v3329_v47, %v3329_v47  ;;  %v3345_v42 = vrot.slane %v3329_v47, %v16488_v50 }
 0xce5   :  { %v3338_v30 = vcombine.high %v3336_v41, %v3336_v41  ;;  %v3352_v36 = vrot.slane %v3336_v41, %v16488_v50  ;;  %v3359_v7 = vrot.slane %v3337_v43, %v16488_v50  ;;  %v3367_v6 = vcombine.high %v3345_v42, %v3345_v42 }
 0xce6   :  { %v3374_v13 = vrot.slane %v3345_v42, %v14147_v10  ;;  %v16490_v42 = vld [vmem:[#allocation16_spill] sm:$0xff] }
 0xce7   :  { %v3366_v53 = vrot.slane %v3338_v30, %v16488_v50  ;;  %v3368_v27 = vcombine.high %v3352_v36, %v3352_v36  ;;  %v3369_v2 = vcombine.high %v3359_v7, %v3359_v7  ;;  %v3378_v44 = vrot.slane %v3359_v7, %v14147_v10  ;;  %v16491_v30 = vld [vmem:[#allocation19_spill] sm:$0xff] }
 0xce8   :  { %v3382_v58 = vrot.slane %v3367_v6, %v14147_v10  ;;  %v3390_v46 = vrot.slane %v3352_v36, %v14147_v10  ;;  %v3411_v47 = vadd.f32 %v3374_v13, %v16489_v60  ;;  %v16493_v6 = vld [vmem:[#allocation18_spill] sm:$0xff]  ;;  %v16495_v60 = vld [vmem:[#allocation23_spill] sm:$0xff] }
 0xce9   :  { %v3370_v55 = vcombine.high %v3366_v53, %v3366_v53  ;;  %v3386_v41 = vrot.slane %v3369_v2, %v14147_v10  ;;  %v3394_v43 = vrot.slane %v3366_v53, %v14147_v10  ;;  %v3398_v40 = vrot.slane %v3368_v27, %v14147_v10  ;;  %v16496_v53 = vld [vmem:[#allocation22_spill] sm:$0xff] }
 0xcea   :  { %v3412_v19 = vadd.f32 %v16490_v42, %v3378_v44  ;;  %v3413_v50 = vadd.f32 %v3382_v58, %v16491_v30  ;;  %v3415_v25 = vadd.f32 %v3390_v46, %v16492_v3  ;;  %13544 = vtanh.f32 %v3411_v47  ;;  %v16497_v44 = vld [vmem:[#allocation26_spill] sm:$0xff] }
 0xceb   :  { %v3402_v7 = vrot.slane %v3370_v55, %v14147_v10  ;;  %v3414_v36 = vadd.f32 %v16493_v6, %v3386_v41  ;;  %v3416_v13 = vadd.f32 %v16494_v28, %v3394_v43  ;;  %v3417_v54 = vadd.f32 %v3398_v40, %v16495_v60 }
 0xcec   :  { %13546 = vtanh.f32 %v3412_v19 }
 0xced   :  { %13548 = vtanh.f32 %v3413_v50  ;;  %v3418_v2 = vadd.f32 %v16496_v53, %v3402_v7 }
 0xcee   :  { %13550 = vtanh.f32 %v3415_v25 }
 0xcef   :  { %13552 = vtanh.f32 %v3414_v36 }
 0xcf0   :  { %13554 = vtanh.f32 %v3416_v13 }
 0xcf1   :  { %13556 = vtanh.f32 %v3417_v54 }
 0xcf2   :  { %13558 = vtanh.f32 %v3418_v2 }
 0xcf4   :  { %v13545_v27 = vpop.eup %13544 }
 0xcf5   :  { %v3427_v58 = vmul.f32 %v16497_v44, %v13545_v27 }
 0xcf6   :  { %v13547_v30 = vpop.eup %13546 }
 0xcf7   :  { %v13549_v46 = vpop.eup %13548  ;;  %3435 = vadd.xlane.f32.xlu0 %v3427_v58  ;;  %v3428_v55 = vmul.f32 %v16497_v44, %v13547_v30 }
 0xcf8   :  { %v3429_v47 = vmul.f32 %v16497_v44, %v13549_v46  ;;  %v13551_v41 = vpop.eup %13550 }
 0xcf9   :  { %3437 = vadd.xlane.f32.xlu1 %v3428_v55  ;;  %v3431_v40 = vmul.f32 %v16497_v44, %v13551_v41  ;;  %v13553_v19 = vpop.eup %13552 }
 0xcfa   :  { %v3430_v43 = vmul.f32 %v16497_v44, %v13553_v19  ;;  %v13555_v7 = vpop.eup %13554 }
 0xcfb   :  { %3439 = vadd.xlane.f32.xlu0 %v3429_v47  ;;  %v3432_v30 = vmul.f32 %v16497_v44, %v13555_v7  ;;  %v13557_v36 = vpop.eup %13556 }
 0xcfc   :  { %v3433_v13 = vmul.f32 %v16497_v44, %v13557_v36  ;;  %v13559_v54 = vpop.eup %13558 }
 0xcfd   :  { %v3434_v27 = vmul.f32 %v16497_v44, %v13559_v54 }
 0xcfe   :  { %v14859_v25 = vpop.f32.mrb[12].mxu1 }
 0xcff   :  { %16498 = vst [vmem:[#allocation54_spill] sm:$0xff] %v14859_v25  ;;  %3443 = vadd.xlane.f32.xlu0 %v3431_v40  ;;  %v14861_v50 = vpop.f32.mrb[13].mxu1 }
 0xd00   :  { %16499 = vst [vmem:[#allocation55_spill] sm:$0xff] %v14861_v50 }
 0xd03   :  { %3441 = vadd.xlane.f32.xlu0 %v3430_v43 }
 0xd07   :  { %3445 = vadd.xlane.f32.xlu0 %v3432_v30 }
 0xd0b   :  { %3447 = vadd.xlane.f32.xlu0 %v3433_v13 }
 0xd0f   :  { %3449 = vadd.xlane.f32.xlu0 %v3434_v27 }
 0xd84   :  { %v3436_v58 = vpop.xlane.xlu0 %3435 }
 0xd85   :  { %v3462_v40 = vrot.slane %v3436_v58, %v14201_v22 }
 0xd86   :  { %v3438_v47 = vpop.xlane.xlu1 %3437 }
 0xd87   :  { %v3466_v41 = vrot.slane %v3438_v47, %v14201_v22 }
 0xd88   :  { %v3440_v46 = vpop.xlane.xlu0 %3439 }
 0xd89   :  { %v3470_v19 = vrot.slane %v3440_v46, %v14201_v22  ;;  %v3491_v7 = vsel %vm631_vm2, %v3466_v41, %v3462_v40 }
 0xd8b   :  { %v3492_v36 = vsel %vm633_vm3, %v3470_v19, %v3491_v7 }
 0xd8c   :  { %v3444_v55 = vpop.xlane.xlu0 %3443 }
 0xd8d   :  { %v3478_v27 = vrot.slane %v3444_v55, %v14201_v22 }
 0xd90   :  { %v3442_v2 = vpop.xlane.xlu0 %3441 }
 0xd91   :  { %v3474_v30 = vrot.slane %v3442_v2, %v14201_v22 }
 0xd93   :  { %v3493_v13 = vsel %vm635_vm4, %v3474_v30, %v3492_v36 }
 0xd94   :  { %v3446_v43 = vpop.xlane.xlu0 %3445  ;;  %v3494_v28 = vsel %vm637_vm5, %v3478_v27, %v3493_v13 }
 0xd95   :  { %v3482_v54 = vrot.slane %v3446_v43, %v14201_v22 }
 0xd97   :  { %v3495_v41 = vsel %vm639_vm6, %v3482_v54, %v3494_v28 }
 0xd98   :  { %v3448_v44 = vpop.xlane.xlu0 %3447 }
 0xd99   :  { %v3486_v53 = vrot.slane %v3448_v44, %v14201_v22 }
 0xd9b   :  { %v3496_v40 = vsel %vm641_vm7, %v3486_v53, %v3495_v41 }
 0xd9c   :  { %v3450_v60 = vpop.xlane.xlu0 %3449 }
 0xd9d   :  { %v3490_v6 = vrot.slane %v3450_v60, %v14201_v22 }
 0xd9f   :  { %v3497_v19 = vsel %vm643_vm8, %v3490_v6, %v3496_v40 }
 0xda0   :  { %v3499_v7 = vsel %vm646_vm9, %v3497_v19, -inf }
 0xda1   :  { %3500 = vmax.xlane.f32.xlu0 %v3499_v7 }
 0xe2e   :  { %v3501_v30 = vpop.xlane.xlu0 %3500 }
 0xe2f   :  { %v3506_v36 = vrot.slane %v3501_v30, %v14147_v10  ;;  %v3510_v3 = vrot.slane %v3501_v30, %v14223_v35  ;;  %v3514_v42 = vrot.slane %v3501_v30, %v14220_v33  ;;  %v3518_v13 = vrot.slane %v3501_v30, %v14226_v62 }
 0xe30   :  { %v3526_v27 = vrot.slane %v3501_v30, %v14236_v26  ;;  %v3522_v53 = vrot.slane %v3501_v30, %v14232_v56  ;;  %v3534_v19 = vrot.slane %v3501_v30, %v14244_v23  ;;  %v3530_v49 = vrot.slane %v3501_v30, %v14240_v24 }
 0xe31   :  { %v3544_v50 = vsub.f32 %v3438_v47, %v3510_v3  ;;  %v3543_v28 = vsub.f32 %v3436_v58, %v3506_v36  ;;  %v3546_v54 = vsub.f32 %v3442_v2, %v3518_v13  ;;  %v3545_v6 = vsub.f32 %v3440_v46, %v3514_v42 }
 0xe32   :  { %v3548_v25 = vsub.f32 %v3446_v43, %v3526_v27  ;;  %v3547_v12 = vsub.f32 %v3444_v55, %v3522_v53  ;;  %v3550_v3 = vsub.f32 %v3450_v60, %v3534_v19  ;;  %v3549_v47 = vsub.f32 %v3448_v44, %v3530_v49 }
 0xe33   :  { %v3553_v41 = vmul.f32 1.442695, %v3544_v50  ;;  %v3551_v40 = vmul.f32 1.442695, %v3543_v28  ;;  %v3557_v7 = vmul.f32 1.442695, %v3546_v54 }
 0xe34   :  { %v3555_v32 = vmul.f32 1.442695, %v3545_v6  ;;  %v3561_v38 = vmul.f32 1.442695, %v3548_v25  ;;  %v3559_v58 = vmul.f32 1.442695, %v3547_v12 }
 0xe35   :  { %13560 = vpow2.f32 %v3553_v41  ;;  %v3565_v42 = vmul.f32 1.442695, %v3550_v3  ;;  %v3563_v50 = vmul.f32 1.442695, %v3549_v47 }
 0xe36   :  { %13562 = vpow2.f32 %v3551_v40 }
 0xe37   :  { %13564 = vpow2.f32 %v3557_v7 }
 0xe38   :  { %13566 = vpow2.f32 %v3555_v32 }
 0xe39   :  { %13568 = vpow2.f32 %v3561_v38 }
 0xe3a   :  { %13570 = vpow2.f32 %v3559_v58 }
 0xe3b   :  { %13572 = vpow2.f32 %v3565_v42 }
 0xe3c   :  { %13574 = vpow2.f32 %v3563_v50 }
 0xe3f   :  { %v13561_v46 = vpop.eup %13560 }
 0xe40   :  { %v13563_v2 = vpop.eup %13562  ;;  %3579 = vperm.xlu1 %13453, %v13561_v46  }
 0xe41   :  { %3576 = vperm.xlu0 %13454, %v13563_v2   ;;  %v13565_v43 = vpop.eup %13564 }
 0xe42   :  { %v13567_v30 = vpop.eup %13566 }
 0xe43   :  { %v13569_v55 = vpop.eup %13568 }
 0xe44   :  { %3585 = vperm.xlu1 %13453, %v13565_v43   ;;  %v13571_v25 = vpop.eup %13570 }
 0xe45   :  { %3582 = vperm.xlu0 %13454, %v13567_v30   ;;  %v13573_v12 = vpop.eup %13572 }
 0xe46   :  { %v13575_v32 = vpop.eup %13574 }
 0xe48   :  { %3591 = vperm.xlu1 %13453, %v13569_v55  }
 0xe49   :  { %3588 = vperm.xlu0 %13454, %v13571_v25  }
 0xe4c   :  { %3597 = vperm.xlu1 %13453, %v13573_v12  }
 0xe4d   :  { %3594 = vperm.xlu0 %13454, %v13575_v32  }
 0xebf   :  { %v3580_v38 = vpop.permute.xlu1 %3579 }
 0xec0   :  { %v3577_v49 = vpop.permute.xlu0 %3576  ;;  %v3606_v60 = vrot.slane %v3580_v38, %v14201_v22 }
 0xec1   :  { %v3602_v44 = vrot.slane %v3577_v49, %v14201_v22 }
 0xec3   :  { %v3586_v36 = vpop.permute.xlu1 %3585  ;;  %v3631_v28 = vsel %vm631_vm2, %v3606_v60, %v3602_v44 }
 0xec4   :  { %v3583_v13 = vpop.permute.xlu0 %3582  ;;  %v3614_v54 = vrot.slane %v3586_v36, %v14201_v22 }
 0xec5   :  { %v3610_v27 = vrot.slane %v3583_v13, %v14201_v22 }
 0xec7   :  { %v3632_v53 = vsel %vm633_vm3, %v3610_v27, %v3631_v28  ;;  %v3592_v6 = vpop.permute.xlu1 %3591 }
 0xec8   :  { %v3589_v41 = vpop.permute.xlu0 %3588  ;;  %v3622_v19 = vrot.slane %v3592_v6, %v14201_v22  ;;  %v3633_v7 = vsel %vm635_vm4, %v3614_v54, %v3632_v53 }
 0xec9   :  { %v3618_v40 = vrot.slane %v3589_v41, %v14201_v22 }
 0xecb   :  { %v3634_v3 = vsel %vm637_vm5, %v3618_v40, %v3633_v7  ;;  %v3598_v58 = vpop.permute.xlu1 %3597 }
 0xecc   :  { %v3630_v47 = vrot.slane %v3598_v58, %v14201_v22  ;;  %v3595_v42 = vpop.permute.xlu0 %3594  ;;  %v3635_v38 = vsel %vm639_vm6, %v3622_v19, %v3634_v3 }
 0xecd   :  { %v3626_v50 = vrot.slane %v3595_v42, %v14201_v22 }
 0xecf   :  { %v3636_v49 = vsel %vm641_vm7, %v3626_v50, %v3635_v38 }
 0xed0   :  { %v3637_v60 = vsel %vm643_vm8, %v3630_v47, %v3636_v49 }
 0xed1   :  { %v3639_v44 = vsel %vm646_vm9, %v3637_v60, 0.0 }
 0xed2   :  { %3640 = vadd.xlane.f32.xlu0 %v3639_v44 }
 0xf5f   :  { %v3641_v36 = vpop.xlane.xlu0 %3640 }
 0xf60   :  { %13576 = vrcp.f32 %v3641_v36 }
 0xf6a   :  { %v13577_v13 = vpop.eup %13576 }
 0xf6b   :  { %v3647_v27 = vrot.slane %v13577_v13, %v14147_v10  ;;  %v3651_v54 = vrot.slane %v13577_v13, %v14223_v35  ;;  %v3655_v6 = vrot.slane %v13577_v13, %v14220_v33  ;;  %v3659_v40 = vrot.slane %v13577_v13, %v14226_v62 }
 0xf6c   :  { %v3663_v7 = vrot.slane %v13577_v13, %v14232_v56  ;;  %v3667_v58 = vrot.slane %v13577_v13, %v14236_v26  ;;  %v3671_v47 = vrot.slane %v13577_v13, %v14240_v24  ;;  %v3675_v42 = vrot.slane %v13577_v13, %v14244_v23 }
 0xf6d   :  { %v3684_v28 = vmul.f32 %v13563_v2, %v3647_v27  ;;  %v3685_v53 = vmul.f32 %v13561_v46, %v3651_v54  ;;  %v3686_v41 = vmul.f32 %v13567_v30, %v3655_v6  ;;  %v3687_v19 = vmul.f32 %v13565_v43, %v3659_v40 }
 0xf6e   :  { %v3688_v3 = vmul.f32 %v13571_v25, %v3663_v7  ;;  %v3689_v2 = vmul.f32 %v13569_v55, %v3667_v58  ;;  %v3690_v46 = vmul.f32 %v13575_v32, %v3671_v47  ;;  %v3691_v30 = vmul.f32 %v13573_v12, %v3675_v42 }
 0xf6f   :  { %3694 = vperm.xlu1 %13453, %v3684_v28  }
 0xf73   :  { %3774 = vperm.xlu1 %13453, %v3685_v53  }
 0xf77   :  { %3854 = vperm.xlu1 %13453, %v3686_v41  }
 0xf7b   :  { %3934 = vperm.xlu1 %13453, %v3687_v19  }
 0xf7f   :  { %4014 = vperm.xlu1 %13453, %v3688_v3  }
 0xf83   :  { %4094 = vperm.xlu1 %13453, %v3689_v2  }
 0xf87   :  { %4174 = vperm.xlu1 %13453, %v3690_v46  }
 0xf8b   :  { %4254 = vperm.xlu1 %13453, %v3691_v30  }
 0xfee   :  { %v3695_v50 = vpop.permute.xlu1 %3694 }
 0xfef   :  { %v3699_v43 = vrot.slane %v3695_v50, %v14201_v22 }
 0xff1   :  { %12260 = vmatmul.mubr.msk.f32.vlgmr.msra.gmra.mrb[50].mxu0 %vm646_vm9, %v3699_v43 }
 0xff2   :  { %12263 = vmatpush3.msra.mxu0 %v14660_v57  ;;  %v3775_v25 = vpop.permute.xlu1 %3774  ;;  %12264 = vmatprep.mubr.msk.f32.mxu0 %vm13934_vm10, %v16424_v16 }
 0xff3   :  { %v3779_v55 = vrot.slane %v3775_v25, %v14201_v22  ;;  %12267 = vmatprep.subr.mxu0 %v16424_v16 }
 0xff5   :  { %12265 = vmatmul.mubr.msk.f32.vlgmr.msra.gmra.mrb[52].mxu0 %vm646_vm9, %v3779_v55 }
 0xff6   :  { %12268 = vmatpush3.msra.mxu0 %v14671_v5  ;;  %v3855_v12 = vpop.permute.xlu1 %3854  ;;  %12269 = vmatprep.mubr.msk.f32.mxu0 %vm13934_vm10, %v16424_v16 }
 0xff7   :  { %v3859_v32 = vrot.slane %v3855_v12, %v14201_v22  ;;  %12272 = vmatprep.subr.mxu0 %v16424_v16 }
 0xff9   :  { %12270 = vmatmul.mubr.msk.f32.vlgmr.msra.gmra.mrb[54].mxu0 %vm646_vm9, %v3859_v32 }
 0xffa   :  { %12273 = vmatpush3.msra.mxu0 %v14682_v18  ;;  %v3935_v57 = vpop.permute.xlu1 %3934  ;;  %12274 = vmatprep.mubr.msk.f32.mxu0 %vm13934_vm10, %v16424_v16 }
 0xffb   :  { %v3939_v38 = vrot.slane %v3935_v57, %v14201_v22  ;;  %12277 = vmatprep.subr.mxu0 %v16424_v16 }
 0xffd   :  { %12275 = vmatmul.mubr.msk.f32.vlgmr.msra.gmra.mrb[56].mxu0 %vm646_vm9, %v3939_v38 }
 0xffe   :  { %12278 = vmatpush3.msra.mxu0 %v14693_v52  ;;  %v4015_v5 = vpop.permute.xlu1 %4014  ;;  %12279 = vmatprep.mubr.msk.f32.mxu0 %vm13934_vm10, %v16424_v16 }
 0xfff   :  { %v4019_v49 = vrot.slane %v4015_v5, %v14201_v22  ;;  %12282 = vmatprep.subr.mxu0 %v16424_v16 }
0x1001   :  { %12280 = vmatmul.mubr.msk.f32.vlgmr.msra.gmra.mrb[58].mxu0 %vm646_vm9, %v4019_v49 }
0x1002   :  { %12283 = vmatpush3.msra.mxu0 %v14704_v45  ;;  %v4095_v18 = vpop.permute.xlu1 %4094  ;;  %12284 = vmatprep.mubr.msk.f32.mxu0 %vm13934_vm10, %v16424_v16 }
0x1003   :  { %v4099_v60 = vrot.slane %v4095_v18, %v14201_v22  ;;  %12287 = vmatprep.subr.mxu0 %v16424_v16 }
0x1005   :  { %12285 = vmatmul.mubr.msk.f32.vlgmr.msra.gmra.mrb[60].mxu0 %vm646_vm9, %v4099_v60 }
0x1006   :  { %12288 = vmatpush3.msra.mxu0 %v14715_v11  ;;  %v4175_v52 = vpop.permute.xlu1 %4174  ;;  %12289 = vmatprep.mubr.msk.f32.mxu0 %vm13934_vm10, %v16424_v16  ;;  %v14962_v11 = vld [vmem:[%s16261_s5 + $0x8] sm:$0xf] }
0x1007   :  { %v4179_v44 = vrot.slane %v4175_v52, %v14201_v22  ;;  %12292 = vmatprep.subr.mxu0 %v16424_v16  ;;  %v16500_v52 = vld [vmem:[#allocation12_spill] sm:$0xff] }
0x1009   :  { %12290 = vmatmul.mubr.msk.f32.vlgmr.msra.gmra.mrb[62].mxu0 %vm646_vm9, %v4179_v44  ;;  %v16501_v44 = vld [vmem:[#allocation45_spill] sm:$0xff] }
0x100a   :  { %12293 = vmatpush3.msra.mxu0 %v14726_v63  ;;  %v4255_v45 = vpop.permute.xlu1 %4254  ;;  %12294 = vmatprep.mubr.msk.f32.mxu0 %vm13934_vm10, %v16424_v16 }
0x100b   :  { %v4259_v36 = vrot.slane %v4255_v45, %v14201_v22  ;;  %12297 = vmatprep.subr.mxu0 %v16424_v16  ;;  %v16502_v45 = vld [vmem:[#allocation13_spill] sm:$0xff] }
0x100d   :  { %12295 = vmatmul.mubr.msk.f32.vlgmr.msra.gmra.mrb[64].mxu0 %vm646_vm9, %v4259_v36  ;;  %v16503_v36 = vld [vmem:[#allocation14_spill] sm:$0xff] }
0x100e   :  { %12298 = vmatpush3.msk.msra.mxu0 %vm181_vm0, %v14962_v11  ;;  %12299 = vmatprep.mubr.msk.f32.mxu0 %vm13934_vm10, %v16424_v16 }
0x100f   :  { %13002 = vmatprep.subr.bf16.mxu0 %v14015_v4 }
0x10c4   :  { %v3768_v63 = vpop.f32.mrb[50].mxu0 }
0x10c5   :  { %v12261_v13 = vpop.f32.mrb[51].mxu0 }
0x10c6   :  { %v16505_v13 = vld [vmem:[#allocation15_spill] sm:$0xff] }
0x10c8   :  { %v3848_v27 = vpop.f32.mrb[52].mxu0 }
0x10c9   :  { %v4340_v28 = vrot.slane %v3848_v27, 7  ;;  %v12266_v54 = vpop.f32.mrb[53].mxu0  ;;  %v16506_v27 = vld [vmem:[#allocation27_spill] sm:$0xff] }
0x10cb   :  { %v4341_v53 = vsel %vm631_vm2, %v4340_v28, %v3768_v63  ;;  %v16504_v63 = vld [vmem:[#allocation46_spill] sm:$0xff] }
0x10cc   :  { %v3928_v6 = vpop.f32.mrb[54].mxu0 }
0x10cd   :  { %v4342_v41 = vrot.slane %v3928_v6, 6  ;;  %v12271_v40 = vpop.f32.mrb[55].mxu0  ;;  %v16508_v6 = vld [vmem:[#allocation53_spill] sm:$0xff] }
0x10ce   :  { %v16509_v40 = vld [vmem:[#allocation48_spill] sm:$0xff] }
0x10cf   :  { %v4343_v19 = vsel %vm633_vm3, %v4342_v41, %v4341_v53  ;;  %v16507_v53 = vld [vmem:[#allocation47_spill] sm:$0xff] }
0x10d0   :  { %v4008_v7 = vpop.f32.mrb[56].mxu0  ;;  %v3248_v41 = vadd.f32 %v16508_v6, %v16507_v53 }
0x10d1   :  { %v4344_v3 = vrot.slane %v4008_v7, 5  ;;  %v12276_v58 = vpop.f32.mrb[57].mxu0 }
0x10d2   :  { %v16510_v58 = vld [vmem:[#allocation49_spill] sm:$0xff] }
0x10d3   :  { %v4345_v2 = vsel %vm635_vm4, %v4344_v3, %v4343_v19 }
0x10d4   :  { %v4088_v47 = vpop.f32.mrb[58].mxu0 }
0x10d5   :  { %v4346_v46 = vrot.slane %v4088_v47, 4  ;;  %v12281_v42 = vpop.f32.mrb[59].mxu0 }
0x10d7   :  { %v4347_v30 = vsel %vm637_vm5, %v4346_v46, %v4345_v2  ;;  %v16511_v2 = vld [vmem:[#allocation54_spill] sm:$0xff] }
0x10d8   :  { %v4168_v50 = vpop.f32.mrb[60].mxu0  ;;  %v3317_v47 = vadd.f32 %v16511_v2, %v16510_v58  ;;  %v16512_v46 = vld [vmem:[#allocation50_spill] sm:$0xff] }
0x10d9   :  { %v4348_v43 = vrot.slane %v4168_v50, 3  ;;  %v12286_v25 = vpop.f32.mrb[61].mxu0 }
0x10db   :  { %v4349_v55 = vsel %vm639_vm6, %v4348_v43, %v4347_v30 }
0x10dc   :  { %v4248_v12 = vpop.f32.mrb[62].mxu0 }
0x10dd   :  { %v4350_v32 = vrot.slane %v4248_v12, 2  ;;  %v12291_v57 = vpop.f32.mrb[63].mxu0 }
0x10df   :  { %v4351_v38 = vsel %vm641_vm7, %v4350_v32, %v4349_v55 }
0x10e0   :  { %v4328_v5 = vpop.f32.mrb[64].mxu0 }
0x10e1   :  { %v4352_v49 = vrot.slane %v4328_v5, 1  ;;  %v12296_v18 = vpop.f32.mrb[65].mxu0  ;;  %v16514_v5 = vld [vmem:[#allocation55_spill] sm:$0xff] }
0x10e3   :  { %v4353_v60 = vsel %vm643_vm8, %v4352_v49, %v4351_v38  ;;  %v16513_v38 = vld [vmem:[#allocation51_spill] sm:$0xff] }
0x10e4   :  { %11714 = vmatmul.mubr.msk.f32.vlgmr.msra.gmra.mrb[14].mxu1 %vm156_vm1, %v4353_v60  ;;  %12300 = vmatmul.mubr.msk.f32.vlgmr.msra.gmra.mrb[66].mxu0 %vm156_vm1, %v4353_v60  ;;  %v3319_v49 = vadd.f32 %v16514_v5, %v16513_v38  ;;  %v16515_v60 = vld [vmem:[#allocation52_spill] sm:$0xff]  ;;  %v16526_v5 = vld [vmem:[#allocation35_spill] sm:$0xff] }
0x10e5   :  { %12979 = vmatpush3.bf16.msra.mxu1 %v14457_v0  ;;  %13004 = vmatpush1.bf16.msra.mxu0 %v14017_v8 }
0x10e6   :  { %12980 = vmatprep.subr.bf16.mxu1 %v16441_v17  ;;  %13006 = vmatprep.subr.bf16.mxu0 %v14019_v9 }
0x10e7   :  { %12334 = vmatprep.mubr.msk.f32.mxu1 %vm13934_vm10, %v16424_v16  ;;  %4654 = vmatprep.mubr.f32.mxu0 %v16424_v16 }
0x10e9   :  { %12982 = vmatpush3.bf16.msra.mxu1 %v14462_v1  ;;  %13008 = vmatpush1.bf16.msra.mxu0 %v14023_v14 }
0x10ea   :  { %12983 = vmatprep.subr.bf16.mxu1 %v16441_v17  ;;  %13010 = vmatprep.subr.bf16.mxu0 %v14026_v15 }
0x10ed   :  { %12985 = vmatpush3.bf16.msra.mxu1 %v14466_v48  ;;  %13012 = vmatpush1.bf16.msra.mxu0 %v14029_v20 }
0x10ee   :  { %12986 = vmatprep.subr.bf16.mxu1 %v16441_v17  ;;  %13014 = vmatprep.subr.bf16.mxu0 %v14032_v21 }
0x10f1   :  { %12988 = vmatpush3.bf16.msra.mxu1 %v14470_v59  ;;  %13016 = vmatpush1.bf16.msra.mxu0 %v14049_v29 }
0x10f2   :  { %12989 = vmatprep.subr.bf16.mxu1 %v16441_v17  ;;  %13018 = vmatprep.subr.bf16.mxu0 %v14058_v31 }
0x10f5   :  { %12991 = vmatpush3.bf16.msra.mxu1 %v14473_v51  ;;  %13020 = vmatpush1.bf16.msra.mxu0 %v14072_v37 }
0x10f6   :  { %12992 = vmatprep.subr.bf16.mxu1 %v16441_v17  ;;  %13022 = vmatprep.subr.bf16.mxu0 %v14080_v39 }
0x10f9   :  { %12994 = vmatpush3.bf16.msra.mxu1 %v16455_v34  ;;  %13024 = vmatpush1.bf16.msra.mxu0 %v16456_v61 }
0x10fa   :  { %12995 = vmatprep.subr.bf16.mxu1 %v16441_v17  ;;  %13026 = vmatprep.subr.bf16.mxu0 %v16500_v52 }
0x10fd   :  { %12997 = vmatpush3.bf16.msra.mxu1 %v16501_v44  ;;  %13028 = vmatpush1.bf16.msra.mxu0 %v16502_v45 }
0x10fe   :  { %12998 = vmatprep.subr.bf16.mxu1 %v16441_v17  ;;  %13030 = vmatprep.subr.bf16.mxu0 %v16503_v36 }
0x1101   :  { %13000 = vmatpush3.bf16.msra.mxu1 %v16504_v63  ;;  %13032 = vmatpush1.bf16.msra.mxu0 %v16505_v13 }
0x1102   :  { %13034 = vmatprep.subr.bf16.mxu1 %v16506_v27  ;;  %12337 = vmatprep.subr.mxu0 %v16424_v16 }
0x11b7   :  { %v4422_v28 = vpop.f32.mrb[14].mxu1  ;;  %v4493_v54 = vpop.f32.mrb[66].mxu0 }
0x11b8   :  { %v4423_v19 = vadd.f32 %v4422_v28, %v16509_v40  ;;  %v4424_v7 = vpop.f32.mrb[15].mxu1  ;;  %v12301_v3 = vpop.f32.mrb[67].mxu0  ;;  %v4494_v28 = vadd.f32 %v4493_v54, %v16515_v60  ;;  %v16519_v54 = vld [vmem:[#allocation29_spill] sm:$0xff] }
0x11b9   :  { %v4425_v42 = vadd.f32 %v4424_v7, %v16512_v46  ;;  %v16543_v60 = vld [vmem:[#allocation21_spill] sm:$0xff]  ;;  %v16545_v46 = vld [vmem:[#allocation20_spill] sm:$0xff] }
0x11ba   :  { %v4497_v30 = vadd.f32 %v4423_v19, %v3248_v41 }
0x11bb   :  { %v4504_v50 = vadd.f32 %v4425_v42, %v3317_v47  ;;  %v16516_v47 = vld [vmem:[#allocation44_spill] sm:$0xff] }
0x11bc   :  { %v11717_v43 = vmul.f32 -1.442695, %v4497_v30 }
0x11bd   :  { %v11718_v25 = vmul.f32 -1.442695, %v4504_v50  ;;  %v16518_v50 = vld [vmem:[#allocation28_spill] sm:$0xff] }
0x11be   :  { %13578 = vpow2.f32 %v11717_v43  ;;  %v15033_v43 = vld [vmem:[%s16256_s0] sm:$0xff] }
0x11bf   :  { %13580 = vpow2.f32 %v11718_v25  ;;  %16520 = vst [vmem:[#allocation53_spill] sm:$0xff] %v15033_v43  ;;  %v16521_v25 = vld [vmem:[#allocation30_spill] sm:$0xff] }
0x11c8   :  { %v13579_v55 = vpop.eup %13578 }
0x11c9   :  { %v4501_v12 = vadd.f32 1.0, %v13579_v55  ;;  %v13581_v32 = vpop.eup %13580  ;;  %v16522_v55 = vld [vmem:[#allocation31_spill] sm:$0xff] }
0x11ca   :  { %v4508_v57 = vadd.f32 1.0, %v13581_v32  ;;  %v16524_v32 = vld [vmem:[#allocation33_spill] sm:$0xff] }
0x11cb   :  { %13582 = vrcp.f32 %v4501_v12  ;;  %v16523_v12 = vld [vmem:[#allocation32_spill] sm:$0xff] }
0x11cc   :  { %13584 = vrcp.f32 %v4508_v57  ;;  %v16525_v57 = vld [vmem:[#allocation34_spill] sm:$0xff] }
0x11d5   :  { %v13583_v18 = vpop.eup %13582 }
0x11d6   :  { %v4511_v6 = vmul.f32 %v13583_v18, %v3319_v49  ;;  %v13585_v41 = vpop.eup %13584  ;;  %v16527_v49 = vld [vmem:[#allocation36_spill] sm:$0xff]  ;;  %v16528_v18 = vld [vmem:[#allocation37_spill] sm:$0xff] }
0x11d7   :  { %v4514_v19 = vsub.f32 1.0, %v13585_v41  ;;  %v4516_v42 = vmul.f32 %v13585_v41, %v16516_v47  ;;  %v16532_v41 = vld [vmem:[#allocation41_spill] sm:$0xff] }
0x11d8   :  { %v4512_v7 = vadd.f32 %v4511_v6, %v4494_v28  ;;  %v16529_v28 = vld [vmem:[#allocation38_spill] sm:$0xff]  ;;  %v16530_v6 = vld [vmem:[#allocation39_spill] sm:$0xff] }
0x11da   :  { %13586 = vtanh.f32 %v4512_v7  ;;  %v16531_v7 = vld [vmem:[#allocation40_spill] sm:$0xff] }
0x11e4   :  { %v13587_v3 = vpop.eup %13586 }
0x11e5   :  { %v4515_v2 = vmul.f32 %v13587_v3, %v4514_v19  ;;  %v16533_v19 = vld [vmem:[#allocation42_spill] sm:$0xff]  ;;  %v16534_v3 = vld [vmem:[#allocation43_spill] sm:$0xff] }
0x11e7   :  { %v15023_v30 = vadd.f32 %v4516_v42, %v4515_v2  ;;  %v16535_v2 = vld [vmem:[#allocation11_spill] sm:$0xff] }
0x11e9   :  { %16517 = vst [vmem:[#allocation26_spill] sm:$0xff] %v15023_v30  ;;  %12335 = vmatmul.mubr.f32.vlgmr.msra.gmra.mrb[16].mxu1 %v15023_v30  ;;  %4655 = vmatmul.mubr.f32.vlgmr.msra.gmra.mrb[68].mxu0 %v15023_v30 }
0x11ea   :  { %13036 = vmatpush1.bf16.msra.mxu1 %v16518_v50  ;;  %4725 = vmatprep.mubr.f32.mxu1 %v16424_v16 }
0x11eb   :  { %13038 = vmatprep.subr.bf16.mxu1 %v16519_v54  ;;  %12338 = vmatpush3.msra.mxu0 %v15033_v43  ;;  %v16540_v43 = vld [vmem:[#allocation17_spill] sm:$0xff] }
0x11ec   :  { %12339 = vmatprep.mubr.msk.f32.mxu0 %vm13934_vm10, %v16424_v16  ;;  %12342 = vmatprep.subr.mxu0 %v16424_v16 }
0x11ee   :  { %13040 = vmatpush1.bf16.msra.mxu1 %v16521_v25 }
0x11ef   :  { %13042 = vmatprep.subr.bf16.mxu1 %v16522_v55 }
0x11f2   :  { %13044 = vmatpush1.bf16.msra.mxu1 %v16523_v12 }
0x11f3   :  { %13046 = vmatprep.subr.bf16.mxu1 %v16524_v32 }
0x11f6   :  { %13048 = vmatpush1.bf16.msra.mxu1 %v16525_v57 }
0x11f7   :  { %13050 = vmatprep.subr.bf16.mxu1 %v16526_v5 }
0x11fa   :  { %13052 = vmatpush1.bf16.msra.mxu1 %v16527_v49 }
0x11fb   :  { %13054 = vmatprep.subr.bf16.mxu1 %v16528_v18  ;;  %v16539_v18 = vld [vmem:[#allocation25_spill] sm:$0xff] }
0x11fe   :  { %13056 = vmatpush1.bf16.msra.mxu1 %v16529_v28 }
0x11ff   :  { %13058 = vmatprep.subr.bf16.mxu1 %v16530_v6 }
0x1202   :  { %13060 = vmatpush1.bf16.msra.mxu1 %v16531_v7  ;;  %v16537_v7 = vld [vmem:[#allocation24_spill] sm:$0xff] }
0x1203   :  { %13062 = vmatprep.subr.bf16.mxu1 %v16532_v41  ;;  %v15062_v41 = vld [vmem:[%s16264_s8] ss:$0 sm:$0xff] }
0x1204   :  { %16536 = vst [vmem:[#allocation54_spill] sm:$0xff] %v15062_v41 }
0x1206   :  { %13064 = vmatpush1.bf16.msra.mxu1 %v16533_v19 }
0x1207   :  { %11727 = vmatprep.subr.msk.mxu1 %vm181_vm0, %v16534_v3 }
0x1209   :  { %4726 = vmatmul.mubr.f32.vlgmr.msra.gmra.mrb[18].mxu1 %v15023_v30 }
0x120a   :  { %11728 = vmatpush1.msk.msra.mxu1 %vm181_vm0, %v16535_v2  ;;  %5831 = vmatprep.mubr.f32.mxu1 %v16424_v16 }
0x120b   :  { %13065 = vmatprep.subr.bf16.mxu1 %v16441_v17 }
0x12bc   :  { %v4584_v47 = vpop.f32.mrb[16].mxu1  ;;  %v4656_v42 = vpop.f32.mrb[68].mxu0 }
0x12bd   :  { %v4585_v19 = vadd.f32 %v15062_v41, %v4584_v47  ;;  %v4657_v3 = vadd.f32 %v4656_v42, %v16537_v7  ;;  %v12336_v6 = vpop.f32.mrb[17].mxu1  ;;  %v15066_v28 = vpop.f32.mrb[69].mxu0 }
0x12be   :  { %16538 = vst [vmem:[#allocation55_spill] sm:$0xff] %v15066_v28 }
0x12bf   :  { %4589 = vst [vmem:[#allocation7 + $0x10] sm:$0xff] %v4585_v19  ;;  %v4733_v2 = vcombine.high %v4657_v3, %v4657_v3  ;;  %v4740_v49 = vrot.slane %v4657_v3, %v16539_v18 }
0x12c1   :  { %v4747_v5 = vrot.slane %v4733_v2, %v16539_v18  ;;  %v4748_v57 = vcombine.high %v4740_v49, %v4740_v49  ;;  %v4756_v32 = vrot.slane %v4740_v49, %v16539_v18 }
0x12c3   :  { %v4749_v12 = vcombine.high %v4747_v5, %v4747_v5  ;;  %v4763_v55 = vrot.slane %v4747_v5, %v16539_v18  ;;  %v4770_v25 = vrot.slane %v4748_v57, %v16539_v18  ;;  %v4778_v47 = vcombine.high %v4756_v32, %v4756_v32 }
0x12c4   :  { %v4785_v42 = vrot.slane %v4756_v32, %v14147_v10  ;;  %v16541_v32 = vld [vmem:[#allocation16_spill] sm:$0xff] }
0x12c5   :  { %v4777_v6 = vrot.slane %v4749_v12, %v16539_v18  ;;  %v4779_v7 = vcombine.high %v4763_v55, %v4763_v55  ;;  %v4780_v19 = vcombine.high %v4770_v25, %v4770_v25  ;;  %v4789_v41 = vrot.slane %v4770_v25, %v14147_v10  ;;  %v16542_v12 = vld [vmem:[#allocation19_spill] sm:$0xff] }
0x12c6   :  { %v4793_v3 = vrot.slane %v4778_v47, %v14147_v10  ;;  %v4801_v2 = vrot.slane %v4763_v55, %v14147_v10  ;;  %v4822_v49 = vadd.f32 %v4785_v42, %v16540_v43  ;;  %v16544_v47 = vld [vmem:[#allocation18_spill] sm:$0xff]  ;;  %v16546_v43 = vld [vmem:[#allocation23_spill] sm:$0xff] }
0x12c7   :  { %v4781_v54 = vcombine.high %v4777_v6, %v4777_v6  ;;  %v4797_v5 = vrot.slane %v4780_v19, %v14147_v10  ;;  %v4805_v57 = vrot.slane %v4777_v6, %v14147_v10  ;;  %v4809_v50 = vrot.slane %v4779_v7, %v14147_v10  ;;  %v16547_v6 = vld [vmem:[#allocation22_spill] sm:$0xff] }
0x12c8   :  { %v4823_v30 = vadd.f32 %v16541_v32, %v4789_v41  ;;  %v4824_v18 = vadd.f32 %v4793_v3, %v16542_v12  ;;  %v4826_v38 = vadd.f32 %v4801_v2, %v16543_v60  ;;  %13588 = vtanh.f32 %v4822_v49  ;;  %v15093_v41 = vld [vmem:[%s16260_s4] ss:$0 sm:$0xff] }
0x12c9   :  { %v4813_v25 = vrot.slane %v4781_v54, %v14147_v10  ;;  %v4825_v55 = vadd.f32 %v16544_v47, %v4797_v5  ;;  %v4827_v42 = vadd.f32 %v16545_v46, %v4805_v57  ;;  %v4828_v58 = vadd.f32 %v4809_v50, %v16546_v43  ;;  %16548 = vst [vmem:[#allocation44_spill] sm:$0xff] %v15093_v41 }
0x12ca   :  { %13590 = vtanh.f32 %v4823_v30 }
0x12cb   :  { %13592 = vtanh.f32 %v4824_v18  ;;  %v4829_v19 = vadd.f32 %v16547_v6, %v4813_v25 }
0x12cc   :  { %13594 = vtanh.f32 %v4826_v38 }
0x12cd   :  { %13596 = vtanh.f32 %v4825_v55 }
0x12ce   :  { %13598 = vtanh.f32 %v4827_v42 }
0x12cf   :  { %13600 = vtanh.f32 %v4828_v58 }
0x12d0   :  { %13602 = vtanh.f32 %v4829_v19 }
0x12d2   :  { %v13589_v7 = vpop.eup %13588 }
0x12d3   :  { %v4838_v54 = vmul.f32 %v15093_v41, %v13589_v7 }
0x12d4   :  { %v13591_v3 = vpop.eup %13590 }
0x12d5   :  { %v13593_v2 = vpop.eup %13592  ;;  %4846 = vadd.xlane.f32.xlu0 %v4838_v54  ;;  %v4839_v49 = vmul.f32 %v15093_v41, %v13591_v3 }
0x12d6   :  { %v4840_v30 = vmul.f32 %v15093_v41, %v13593_v2  ;;  %v13595_v50 = vpop.eup %13594 }
0x12d7   :  { %4848 = vadd.xlane.f32.xlu1 %v4839_v49  ;;  %v4842_v38 = vmul.f32 %v15093_v41, %v13595_v50  ;;  %v13597_v18 = vpop.eup %13596 }
0x12d8   :  { %v4841_v25 = vmul.f32 %v15093_v41, %v13597_v18  ;;  %v13599_v55 = vpop.eup %13598 }
0x12d9   :  { %4850 = vadd.xlane.f32.xlu0 %v4840_v30  ;;  %v4843_v42 = vmul.f32 %v15093_v41, %v13599_v55  ;;  %v13601_v7 = vpop.eup %13600 }
0x12da   :  { %v4844_v54 = vmul.f32 %v15093_v41, %v13601_v7  ;;  %v13603_v58 = vpop.eup %13602 }
0x12db   :  { %v4845_v3 = vmul.f32 %v15093_v41, %v13603_v58 }
0x12dc   :  { %v15099_v5 = vpop.f32.mrb[18].mxu1 }
0x12dd   :  { %16549 = vst [vmem:[#allocation11_spill] sm:$0xff] %v15099_v5  ;;  %4854 = vadd.xlane.f32.xlu0 %v4842_v38  ;;  %v15101_v57 = vpop.f32.mrb[19].mxu1 }
0x12de   :  { %16550 = vst [vmem:[#allocation56_spill] sm:$0xff] %v15101_v57 }
0x12e1   :  { %4852 = vadd.xlane.f32.xlu0 %v4841_v25 }
0x12e5   :  { %4856 = vadd.xlane.f32.xlu0 %v4843_v42 }
0x12e9   :  { %4858 = vadd.xlane.f32.xlu0 %v4844_v54 }
0x12ed   :  { %4860 = vadd.xlane.f32.xlu0 %v4845_v3 }
0x1362   :  { %v4847_v2 = vpop.xlane.xlu0 %4846 }
0x1363   :  { %v4873_v18 = vrot.slane %v4847_v2, %v14201_v22 }
0x1364   :  { %v4849_v50 = vpop.xlane.xlu1 %4848 }
0x1365   :  { %v4877_v38 = vrot.slane %v4849_v50, %v14201_v22 }
0x1366   :  { %v4851_v49 = vpop.xlane.xlu0 %4850 }
0x1367   :  { %v4881_v25 = vrot.slane %v4851_v49, %v14201_v22  ;;  %v4902_v42 = vsel %vm631_vm2, %v4877_v38, %v4873_v18 }
0x1369   :  { %v4903_v54 = vsel %vm633_vm3, %v4881_v25, %v4902_v42 }
0x136a   :  { %v4855_v30 = vpop.xlane.xlu0 %4854 }
0x136b   :  { %v4889_v6 = vrot.slane %v4855_v30, %v14201_v22 }
0x136e   :  { %v4853_v19 = vpop.xlane.xlu0 %4852 }
0x136f   :  { %v4885_v7 = vrot.slane %v4853_v19, %v14201_v22 }
0x1371   :  { %v4904_v3 = vsel %vm635_vm4, %v4885_v7, %v4903_v54 }
0x1372   :  { %v4857_v55 = vpop.xlane.xlu0 %4856  ;;  %v4905_v47 = vsel %vm637_vm5, %v4889_v6, %v4904_v3 }
0x1373   :  { %v4893_v41 = vrot.slane %v4857_v55, %v14201_v22 }
0x1375   :  { %v4906_v38 = vsel %vm639_vm6, %v4893_v41, %v4905_v47 }
0x1376   :  { %v4859_v58 = vpop.xlane.xlu0 %4858 }
0x1377   :  { %v4897_v43 = vrot.slane %v4859_v58, %v14201_v22 }
0x1379   :  { %v4907_v18 = vsel %vm641_vm7, %v4897_v43, %v4906_v38 }
0x137a   :  { %v4861_v46 = vpop.xlane.xlu0 %4860 }
0x137b   :  { %v4901_v60 = vrot.slane %v4861_v46, %v14201_v22 }
0x137d   :  { %v4908_v25 = vsel %vm643_vm8, %v4901_v60, %v4907_v18 }
0x137e   :  { %v4910_v42 = vsel %vm646_vm9, %v4908_v25, -inf }
0x137f   :  { %4911 = vmax.xlane.f32.xlu0 %v4910_v42 }
0x140c   :  { %v4912_v7 = vpop.xlane.xlu0 %4911 }
0x140d   :  { %v4917_v54 = vrot.slane %v4912_v7, %v14147_v10  ;;  %v4921_v12 = vrot.slane %v4912_v7, %v14223_v35  ;;  %v4929_v32 = vrot.slane %v4912_v7, %v14226_v62  ;;  %v4925_v6 = vrot.slane %v4912_v7, %v14220_v33 }
0x140e   :  { %v4937_v3 = vrot.slane %v4912_v7, %v14236_v26  ;;  %v4933_v60 = vrot.slane %v4912_v7, %v14232_v56  ;;  %v4945_v25 = vrot.slane %v4912_v7, %v14244_v23  ;;  %v4941_v40 = vrot.slane %v4912_v7, %v14240_v24 }
0x140f   :  { %v4955_v57 = vsub.f32 %v4849_v50, %v4921_v12  ;;  %v4954_v47 = vsub.f32 %v4847_v2, %v4917_v54  ;;  %v4957_v41 = vsub.f32 %v4853_v19, %v4929_v32  ;;  %v4956_v18 = vsub.f32 %v4851_v49, %v4925_v6 }
0x1410   :  { %v4959_v42 = vsub.f32 %v4857_v55, %v4937_v3  ;;  %v4958_v53 = vsub.f32 %v4855_v30, %v4933_v60  ;;  %v4961_v27 = vsub.f32 %v4861_v46, %v4945_v25  ;;  %v4960_v12 = vsub.f32 %v4859_v58, %v4941_v40 }
0x1411   :  { %v4964_v43 = vmul.f32 1.442695, %v4955_v57  ;;  %v4962_v38 = vmul.f32 1.442695, %v4954_v47  ;;  %v4968_v5 = vmul.f32 1.442695, %v4957_v41 }
0x1412   :  { %v4966_v28 = vmul.f32 1.442695, %v4956_v18  ;;  %v4972_v13 = vmul.f32 1.442695, %v4959_v42  ;;  %v4970_v32 = vmul.f32 1.442695, %v4958_v53 }
0x1413   :  { %13604 = vpow2.f32 %v4964_v43  ;;  %v4976_v57 = vmul.f32 1.442695, %v4961_v27  ;;  %v4974_v49 = vmul.f32 1.442695, %v4960_v12 }
0x1414   :  { %13606 = vpow2.f32 %v4962_v38 }
0x1415   :  { %13608 = vpow2.f32 %v4968_v5 }
0x1416   :  { %13610 = vpow2.f32 %v4966_v28 }
0x1417   :  { %13612 = vpow2.f32 %v4972_v13 }
0x1418   :  { %13614 = vpow2.f32 %v4970_v32 }
0x1419   :  { %13616 = vpow2.f32 %v4976_v57 }
0x141a   :  { %13618 = vpow2.f32 %v4974_v49 }
0x141d   :  { %v13605_v2 = vpop.eup %13604 }
0x141e   :  { %4990 = vperm.xlu1 %13453, %v13605_v2   ;;  %v13607_v50 = vpop.eup %13606 }
0x141f   :  { %v13609_v19 = vpop.eup %13608  ;;  %4987 = vperm.xlu0 %13454, %v13607_v50  }
0x1420   :  { %v13611_v55 = vpop.eup %13610 }
0x1421   :  { %v13613_v30 = vpop.eup %13612 }
0x1422   :  { %4996 = vperm.xlu1 %13453, %v13609_v19   ;;  %v13615_v46 = vpop.eup %13614 }
0x1423   :  { %4993 = vperm.xlu0 %13454, %v13611_v55   ;;  %v13617_v28 = vpop.eup %13616 }
0x1424   :  { %v13619_v13 = vpop.eup %13618 }
0x1426   :  { %5002 = vperm.xlu1 %13453, %v13613_v30  }
0x1427   :  { %4999 = vperm.xlu0 %13454, %v13615_v46  }
0x142a   :  { %5008 = vperm.xlu1 %13453, %v13617_v28  }
0x142b   :  { %5005 = vperm.xlu0 %13454, %v13619_v13  }
0x149d   :  { %v4991_v27 = vpop.permute.xlu1 %4990 }
0x149e   :  { %v4988_v53 = vpop.permute.xlu0 %4987  ;;  %v5017_v5 = vrot.slane %v4991_v27, %v14201_v22 }
0x149f   :  { %v5013_v58 = vrot.slane %v4988_v53, %v14201_v22 }
0x14a1   :  { %v4997_v40 = vpop.permute.xlu1 %4996  ;;  %v5042_v3 = vsel %vm631_vm2, %v5017_v5, %v5013_v58 }
0x14a2   :  { %v4994_v7 = vpop.permute.xlu0 %4993  ;;  %v5025_v47 = vrot.slane %v4997_v40, %v14201_v22 }
0x14a3   :  { %v5021_v54 = vrot.slane %v4994_v7, %v14201_v22 }
0x14a5   :  { %v5003_v6 = vpop.permute.xlu1 %5002  ;;  %v5043_v41 = vsel %vm633_vm3, %v5021_v54, %v5042_v3 }
0x14a6   :  { %v5000_v43 = vpop.permute.xlu0 %4999  ;;  %v5033_v18 = vrot.slane %v5003_v6, %v14201_v22  ;;  %v5044_v25 = vsel %vm635_vm4, %v5025_v47, %v5043_v41 }
0x14a7   :  { %v5029_v60 = vrot.slane %v5000_v43, %v14201_v22 }
0x14a9   :  { %v5009_v38 = vpop.permute.xlu1 %5008  ;;  %v5045_v42 = vsel %vm637_vm5, %v5029_v60, %v5044_v25 }
0x14aa   :  { %v5041_v32 = vrot.slane %v5009_v38, %v14201_v22  ;;  %v5006_v12 = vpop.permute.xlu0 %5005  ;;  %v5046_v49 = vsel %vm639_vm6, %v5033_v18, %v5045_v42 }
0x14ab   :  { %v5037_v57 = vrot.slane %v5006_v12, %v14201_v22 }
0x14ad   :  { %v5047_v27 = vsel %vm641_vm7, %v5037_v57, %v5046_v49 }
0x14ae   :  { %v5048_v53 = vsel %vm643_vm8, %v5041_v32, %v5047_v27  ;;  %v15182_v27 = vld [vmem:[%s16256_s0 + $0x18] sm:$0xff] }
0x14af   :  { %v5050_v40 = vsel %vm646_vm9, %v5048_v53, 0.0 }
0x14b0   :  { %5051 = vadd.xlane.f32.xlu0 %v5050_v40 }
0x153d   :  { %v5052_v5 = vpop.xlane.xlu0 %5051 }
0x153e   :  { %13620 = vrcp.f32 %v5052_v5  ;;  %v15193_v5 = vld [vmem:[%s16256_s0 + $0x20] sm:$0xff] }
0x1548   :  { %v13621_v58 = vpop.eup %13620 }
0x1549   :  { %v5058_v7 = vrot.slane %v13621_v58, %v14147_v10  ;;  %v5062_v6 = vrot.slane %v13621_v58, %v14223_v35  ;;  %v5066_v47 = vrot.slane %v13621_v58, %v14220_v33  ;;  %v5070_v43 = vrot.slane %v13621_v58, %v14226_v62 }
0x154a   :  { %v5074_v38 = vrot.slane %v13621_v58, %v14232_v56  ;;  %v5078_v25 = vrot.slane %v13621_v58, %v14236_v26  ;;  %v5082_v42 = vrot.slane %v13621_v58, %v14240_v24  ;;  %v5086_v32 = vrot.slane %v13621_v58, %v14244_v23 }
0x154b   :  { %v5095_v54 = vmul.f32 %v13607_v50, %v5058_v7  ;;  %v5096_v3 = vmul.f32 %v13605_v2, %v5062_v6  ;;  %v5097_v41 = vmul.f32 %v13611_v55, %v5066_v47  ;;  %v5098_v60 = vmul.f32 %v13609_v19, %v5070_v43  ;;  %v15215_v47 = vld [vmem:[%s16256_s0 + $0x30] sm:$0xff] }
0x154c   :  { %v5099_v18 = vmul.f32 %v13615_v46, %v5074_v38  ;;  %v5100_v50 = vmul.f32 %v13613_v30, %v5078_v25  ;;  %v5101_v2 = vmul.f32 %v13619_v13, %v5082_v42  ;;  %v5102_v55 = vmul.f32 %v13617_v28, %v5086_v32  ;;  %v15160_v46 = vld [vmem:[%s16256_s0 + $0x8] sm:$0xff]  ;;  %v15171_v28 = vld [vmem:[%s16256_s0 + $0x10] sm:$0xff] }
0x154d   :  { %5105 = vperm.xlu1 %13453, %v5095_v54   ;;  %v15204_v54 = vld [vmem:[%s16256_s0 + $0x28] sm:$0xff] }
0x1551   :  { %5185 = vperm.xlu1 %13453, %v5096_v3  }
0x1555   :  { %5265 = vperm.xlu1 %13453, %v5097_v41  }
0x1559   :  { %5345 = vperm.xlu1 %13453, %v5098_v60   ;;  %v15226_v60 = vld [vmem:[%s16256_s0 + $0x38] sm:$0xff] }
0x155d   :  { %5425 = vperm.xlu1 %13453, %v5099_v18  }
0x1561   :  { %5505 = vperm.xlu1 %13453, %v5100_v50  }
0x1565   :  { %5585 = vperm.xlu1 %13453, %v5101_v2  }
0x1569   :  { %5665 = vperm.xlu1 %13453, %v5102_v55  }
0x15cc   :  { %v5106_v12 = vpop.permute.xlu1 %5105 }
0x15cd   :  { %v5110_v19 = vrot.slane %v5106_v12, %v14201_v22 }
0x15cf   :  { %12340 = vmatmul.mubr.msk.f32.vlgmr.msra.gmra.mrb[70].mxu0 %vm646_vm9, %v5110_v19 }
0x15d0   :  { %12343 = vmatpush3.msra.mxu0 %v15160_v46  ;;  %v5186_v30 = vpop.permute.xlu1 %5185  ;;  %12344 = vmatprep.mubr.msk.f32.mxu0 %vm13934_vm10, %v16424_v16 }
0x15d1   :  { %v5190_v13 = vrot.slane %v5186_v30, %v14201_v22  ;;  %12347 = vmatprep.subr.mxu0 %v16424_v16 }
0x15d3   :  { %12345 = vmatmul.mubr.msk.f32.vlgmr.msra.gmra.mrb[72].mxu0 %vm646_vm9, %v5190_v13 }
0x15d4   :  { %12348 = vmatpush3.msra.mxu0 %v15171_v28  ;;  %v5266_v57 = vpop.permute.xlu1 %5265  ;;  %12349 = vmatprep.mubr.msk.f32.mxu0 %vm13934_vm10, %v16424_v16 }
0x15d5   :  { %v5270_v49 = vrot.slane %v5266_v57, %v14201_v22  ;;  %12352 = vmatprep.subr.mxu0 %v16424_v16 }
0x15d7   :  { %12350 = vmatmul.mubr.msk.f32.vlgmr.msra.gmra.mrb[74].mxu0 %vm646_vm9, %v5270_v49 }
0x15d8   :  { %12353 = vmatpush3.msra.mxu0 %v15182_v27  ;;  %v5346_v53 = vpop.permute.xlu1 %5345  ;;  %12354 = vmatprep.mubr.msk.f32.mxu0 %vm13934_vm10, %v16424_v16 }
0x15d9   :  { %v5350_v40 = vrot.slane %v5346_v53, %v14201_v22  ;;  %12357 = vmatprep.subr.mxu0 %v16424_v16 }
0x15db   :  { %12355 = vmatmul.mubr.msk.f32.vlgmr.msra.gmra.mrb[76].mxu0 %vm646_vm9, %v5350_v40 }
0x15dc   :  { %12358 = vmatpush3.msra.mxu0 %v15193_v5  ;;  %v5426_v58 = vpop.permute.xlu1 %5425  ;;  %12359 = vmatprep.mubr.msk.f32.mxu0 %vm13934_vm10, %v16424_v16 }
0x15dd   :  { %v5430_v7 = vrot.slane %v5426_v58, %v14201_v22  ;;  %12362 = vmatprep.subr.mxu0 %v16424_v16 }
0x15df   :  { %12360 = vmatmul.mubr.msk.f32.vlgmr.msra.gmra.mrb[78].mxu0 %vm646_vm9, %v5430_v7 }
0x15e0   :  { %12363 = vmatpush3.msra.mxu0 %v15204_v54  ;;  %v5506_v6 = vpop.permute.xlu1 %5505  ;;  %12364 = vmatprep.mubr.msk.f32.mxu0 %vm13934_vm10, %v16424_v16 }
0x15e1   :  { %v5510_v3 = vrot.slane %v5506_v6, %v14201_v22  ;;  %12367 = vmatprep.subr.mxu0 %v16424_v16 }
0x15e3   :  { %12365 = vmatmul.mubr.msk.f32.vlgmr.msra.gmra.mrb[80].mxu0 %vm646_vm9, %v5510_v3 }
0x15e4   :  { %12368 = vmatpush3.msra.mxu0 %v15215_v47  ;;  %v5586_v41 = vpop.permute.xlu1 %5585  ;;  %12369 = vmatprep.mubr.msk.f32.mxu0 %vm13934_vm10, %v16424_v16 }
0x15e5   :  { %v5590_v43 = vrot.slane %v5586_v41, %v14201_v22  ;;  %12372 = vmatprep.subr.mxu0 %v16424_v16 }
0x15e7   :  { %12370 = vmatmul.mubr.msk.f32.vlgmr.msra.gmra.mrb[82].mxu0 %vm646_vm9, %v5590_v43 }
0x15e8   :  { %12373 = vmatpush3.msra.mxu0 %v15226_v60  ;;  %v5666_v38 = vpop.permute.xlu1 %5665  ;;  %12374 = vmatprep.mubr.msk.f32.mxu0 %vm13934_vm10, %v16424_v16 }
0x15e9   :  { %v5670_v18 = vrot.slane %v5666_v38, %v14201_v22  ;;  %12377 = vmatprep.subr.mxu0 %v16424_v16 }
0x15eb   :  { %12375 = vmatmul.mubr.msk.f32.vlgmr.msra.gmra.mrb[84].mxu0 %vm646_vm9, %v5670_v18 }
0x15ec   :  { %12378 = vmatpush3.msk.msra.mxu0 %vm181_vm0, %v14962_v11  ;;  %12379 = vmatprep.mubr.msk.f32.mxu0 %vm13934_vm10, %v16424_v16 }
0x15ed   :  { %13090 = vmatprep.subr.bf16.mxu0 %v14015_v4 }
0x16a2   :  { %v5179_v25 = vpop.f32.mrb[70].mxu0 }
0x16a3   :  { %v12341_v50 = vpop.f32.mrb[71].mxu0 }
0x16a6   :  { %v5259_v42 = vpop.f32.mrb[72].mxu0 }
0x16a7   :  { %v5751_v2 = vrot.slane %v5259_v42, 7  ;;  %v12346_v32 = vpop.f32.mrb[73].mxu0 }
0x16a9   :  { %v5752_v55 = vsel %vm631_vm2, %v5751_v2, %v5179_v25 }
0x16aa   :  { %v5339_v12 = vpop.f32.mrb[74].mxu0 }
0x16ab   :  { %v5753_v19 = vrot.slane %v5339_v12, 6  ;;  %v12351_v30 = vpop.f32.mrb[75].mxu0 }
0x16ac   :  { %v16552_v30 = vld [vmem:[#allocation27_spill] sm:$0xff] }
0x16ad   :  { %v5754_v13 = vsel %vm633_vm3, %v5753_v19, %v5752_v55  ;;  %v16551_v19 = vld [vmem:[#allocation15_spill] sm:$0xff] }
0x16ae   :  { %v5419_v57 = vpop.f32.mrb[76].mxu0 }
0x16af   :  { %v5755_v49 = vrot.slane %v5419_v57, 5  ;;  %v12356_v11 = vpop.f32.mrb[77].mxu0 }
0x16b0   :  { %v16554_v11 = vld [vmem:[#allocation55_spill] sm:$0xff] }
0x16b1   :  { %v5756_v53 = vsel %vm635_vm4, %v5755_v49, %v5754_v13  ;;  %v16553_v49 = vld [vmem:[#allocation47_spill] sm:$0xff] }
0x16b2   :  { %v5499_v40 = vpop.f32.mrb[78].mxu0 }
0x16b3   :  { %v5757_v58 = vrot.slane %v5499_v40, 4  ;;  %v12361_v7 = vpop.f32.mrb[79].mxu0  ;;  %v16555_v40 = vld [vmem:[#allocation48_spill] sm:$0xff] }
0x16b5   :  { %v5758_v6 = vsel %vm637_vm5, %v5757_v58, %v5756_v53  ;;  %v4659_v53 = vadd.f32 %v16554_v11, %v16553_v49  ;;  %v16559_v49 = vld [vmem:[#allocation51_spill] sm:$0xff] }
0x16b6   :  { %v5579_v3 = vpop.f32.mrb[80].mxu0 }
0x16b7   :  { %v5759_v41 = vrot.slane %v5579_v3, 3  ;;  %v12366_v43 = vpop.f32.mrb[81].mxu0  ;;  %v16556_v3 = vld [vmem:[#allocation49_spill] sm:$0xff] }
0x16b9   :  { %v5760_v38 = vsel %vm639_vm6, %v5759_v41, %v5758_v6  ;;  %v16557_v41 = vld [vmem:[#allocation11_spill] sm:$0xff] }
0x16ba   :  { %v5659_v18 = vpop.f32.mrb[82].mxu0  ;;  %v4728_v43 = vadd.f32 %v16557_v41, %v16556_v3 }
0x16bb   :  { %v5761_v25 = vrot.slane %v5659_v18, 2  ;;  %v12371_v50 = vpop.f32.mrb[83].mxu0 }
0x16bd   :  { %v5762_v42 = vsel %vm641_vm7, %v5761_v25, %v5760_v38  ;;  %v16558_v38 = vld [vmem:[#allocation50_spill] sm:$0xff] }
0x16be   :  { %v5739_v2 = vpop.f32.mrb[84].mxu0 }
0x16bf   :  { %v5763_v32 = vrot.slane %v5739_v2, 1  ;;  %v12376_v55 = vpop.f32.mrb[85].mxu0 }
0x16c1   :  { %v5764_v12 = vsel %vm643_vm8, %v5763_v32, %v5762_v42 }
0x16c2   :  { %11729 = vmatmul.mubr.msk.f32.vlgmr.msra.gmra.mrb[20].mxu1 %vm156_vm1, %v5764_v12  ;;  %12380 = vmatmul.mubr.msk.f32.vlgmr.msra.gmra.mrb[86].mxu0 %vm156_vm1, %v5764_v12 }
0x16c3   :  { %13067 = vmatpush3.bf16.msra.mxu1 %v14457_v0  ;;  %13092 = vmatpush1.bf16.msra.mxu0 %v14017_v8 }
0x16c4   :  { %13068 = vmatprep.subr.bf16.mxu1 %v16441_v17  ;;  %13094 = vmatprep.subr.bf16.mxu0 %v14019_v9 }
0x16c5   :  { %12414 = vmatprep.mubr.msk.f32.mxu1 %vm13934_vm10, %v16424_v16  ;;  %6065 = vmatprep.mubr.f32.mxu0 %v16424_v16 }
0x16c7   :  { %13070 = vmatpush3.bf16.msra.mxu1 %v14462_v1  ;;  %13096 = vmatpush1.bf16.msra.mxu0 %v14023_v14 }
0x16c8   :  { %13071 = vmatprep.subr.bf16.mxu1 %v16441_v17  ;;  %13098 = vmatprep.subr.bf16.mxu0 %v14026_v15 }
0x16cb   :  { %13073 = vmatpush3.bf16.msra.mxu1 %v14466_v48  ;;  %13100 = vmatpush1.bf16.msra.mxu0 %v14029_v20 }
0x16cc   :  { %13074 = vmatprep.subr.bf16.mxu1 %v16441_v17  ;;  %13102 = vmatprep.subr.bf16.mxu0 %v14032_v21 }
0x16cf   :  { %13076 = vmatpush3.bf16.msra.mxu1 %v14470_v59  ;;  %13104 = vmatpush1.bf16.msra.mxu0 %v14049_v29 }
0x16d0   :  { %13077 = vmatprep.subr.bf16.mxu1 %v16441_v17  ;;  %13106 = vmatprep.subr.bf16.mxu0 %v14058_v31 }
0x16d3   :  { %13079 = vmatpush3.bf16.msra.mxu1 %v14473_v51  ;;  %13108 = vmatpush1.bf16.msra.mxu0 %v14072_v37 }
0x16d4   :  { %13080 = vmatprep.subr.bf16.mxu1 %v16441_v17  ;;  %13110 = vmatprep.subr.bf16.mxu0 %v14080_v39 }
0x16d7   :  { %13082 = vmatpush3.bf16.msra.mxu1 %v16455_v34  ;;  %13112 = vmatpush1.bf16.msra.mxu0 %v16456_v61 }
0x16d8   :  { %13083 = vmatprep.subr.bf16.mxu1 %v16441_v17  ;;  %13114 = vmatprep.subr.bf16.mxu0 %v16500_v52 }
0x16db   :  { %13085 = vmatpush3.bf16.msra.mxu1 %v16501_v44  ;;  %13116 = vmatpush1.bf16.msra.mxu0 %v16502_v45 }
0x16dc   :  { %13086 = vmatprep.subr.bf16.mxu1 %v16441_v17  ;;  %13118 = vmatprep.subr.bf16.mxu0 %v16503_v36 }
0x16df   :  { %13088 = vmatpush3.bf16.msra.mxu1 %v16504_v63  ;;  %13120 = vmatpush1.bf16.msra.mxu0 %v16551_v19 }
0x16e0   :  { %13122 = vmatprep.subr.bf16.mxu1 %v16552_v30  ;;  %12417 = vmatprep.subr.mxu0 %v16424_v16  ;;  %v16561_v30 = vld [vmem:[#allocation52_spill] sm:$0xff] }
0x1795   :  { %v5833_v13 = vpop.f32.mrb[20].mxu1  ;;  %v5904_v57 = vpop.f32.mrb[86].mxu0 }
0x1796   :  { %v5834_v58 = vadd.f32 %v5833_v13, %v16555_v40  ;;  %v5835_v7 = vpop.f32.mrb[21].mxu1  ;;  %v12381_v6 = vpop.f32.mrb[87].mxu0  ;;  %v16560_v13 = vld [vmem:[#allocation56_spill] sm:$0xff]  ;;  %v5905_v19 = vadd.f32 %v5904_v57, %v16561_v30  ;;  %v16565_v57 = vld [vmem:[#allocation29_spill] sm:$0xff] }
0x1797   :  { %v5836_v18 = vadd.f32 %v5835_v7, %v16558_v38  ;;  %v4730_v40 = vadd.f32 %v16560_v13, %v16559_v49  ;;  %v16572_v13 = vld [vmem:[#allocation35_spill] sm:$0xff]  ;;  %v16589_v38 = vld [vmem:[#allocation21_spill] sm:$0xff] }
0x1798   :  { %v5908_v25 = vadd.f32 %v5834_v58, %v4659_v53 }
0x1799   :  { %v5915_v50 = vadd.f32 %v5836_v18, %v4728_v43 }
0x179a   :  { %v11732_v42 = vmul.f32 -1.442695, %v5908_v25  ;;  %v16562_v25 = vld [vmem:[#allocation26_spill] sm:$0xff] }
0x179b   :  { %v11733_v2 = vmul.f32 -1.442695, %v5915_v50 }
0x179c   :  { %13622 = vpow2.f32 %v11732_v42 }
0x179d   :  { %13624 = vpow2.f32 %v11733_v2  ;;  %v16564_v2 = vld [vmem:[#allocation28_spill] sm:$0xff] }
0x17a6   :  { %v13623_v32 = vpop.eup %13622 }
0x17a7   :  { %v5912_v55 = vadd.f32 1.0, %v13623_v32  ;;  %v13625_v12 = vpop.eup %13624  ;;  %v16568_v32 = vld [vmem:[#allocation31_spill] sm:$0xff] }
0x17a8   :  { %v5919_v11 = vadd.f32 1.0, %v13625_v12  ;;  %v16570_v12 = vld [vmem:[#allocation33_spill] sm:$0xff] }
0x17a9   :  { %13626 = vrcp.f32 %v5912_v55  ;;  %v16569_v55 = vld [vmem:[#allocation32_spill] sm:$0xff] }
0x17aa   :  { %13628 = vrcp.f32 %v5919_v11  ;;  %v16571_v11 = vld [vmem:[#allocation34_spill] sm:$0xff] }
0x17b3   :  { %v13627_v6 = vpop.eup %13626 }
0x17b4   :  { %v5922_v41 = vmul.f32 %v13627_v6, %v4730_v40  ;;  %v13629_v53 = vpop.eup %13628  ;;  %v16567_v40 = vld [vmem:[#allocation30_spill] sm:$0xff]  ;;  %v16573_v6 = vld [vmem:[#allocation36_spill] sm:$0xff] }
0x17b5   :  { %v5925_v58 = vsub.f32 1.0, %v13629_v53  ;;  %v5927_v50 = vmul.f32 %v13629_v53, %v16562_v25  ;;  %v16576_v53 = vld [vmem:[#allocation39_spill] sm:$0xff] }
0x17b6   :  { %v5923_v7 = vadd.f32 %v5922_v41, %v5905_v19  ;;  %v16566_v19 = vld [vmem:[#allocation53_spill] sm:$0xff]  ;;  %v16580_v25 = vld [vmem:[#allocation43_spill] sm:$0xff] }
0x17b7   :  { %v16574_v41 = vld [vmem:[#allocation37_spill] sm:$0xff] }
0x17b8   :  { %13630 = vtanh.f32 %v5923_v7  ;;  %v16575_v7 = vld [vmem:[#allocation38_spill] sm:$0xff] }
0x17c2   :  { %v13631_v43 = vpop.eup %13630 }
0x17c3   :  { %v5926_v18 = vmul.f32 %v13631_v43, %v5925_v58  ;;  %v16577_v58 = vld [vmem:[#allocation40_spill] sm:$0xff]  ;;  %v16578_v43 = vld [vmem:[#allocation41_spill] sm:$0xff] }
0x17c5   :  { %v15293_v42 = vadd.f32 %v5927_v50, %v5926_v18  ;;  %v16579_v18 = vld [vmem:[#allocation42_spill] sm:$0xff]  ;;  %v15323_v50 = vld [vmem:[%s16261_s5] sm:$0xff] }
0x17c6   :  { %16581 = vst [vmem:[#allocation11_spill] sm:$0xff] %v15323_v50 }
0x17c7   :  { %16563 = vst [vmem:[#allocation55_spill] sm:$0xff] %v15293_v42  ;;  %12415 = vmatmul.mubr.f32.vlgmr.msra.gmra.mrb[22].mxu1 %v15293_v42  ;;  %6066 = vmatmul.mubr.f32.vlgmr.msra.gmra.mrb[88].mxu0 %v15293_v42 }
0x17c8   :  { %13124 = vmatpush1.bf16.msra.mxu1 %v16564_v2  ;;  %6136 = vmatprep.mubr.f32.mxu1 %v16424_v16  ;;  %v16586_v2 = vld [vmem:[#allocation17_spill] sm:$0xff] }
0x17c9   :  { %13126 = vmatprep.subr.bf16.mxu1 %v16565_v57  ;;  %12418 = vmatpush3.msra.mxu0 %v16566_v19 }
0x17ca   :  { %12419 = vmatprep.mubr.msk.f32.mxu0 %vm13934_vm10, %v16424_v16  ;;  %12422 = vmatprep.subr.mxu0 %v16424_v16 }
0x17cc   :  { %13128 = vmatpush1.bf16.msra.mxu1 %v16567_v40 }
0x17cd   :  { %13130 = vmatprep.subr.bf16.mxu1 %v16568_v32 }
0x17d0   :  { %13132 = vmatpush1.bf16.msra.mxu1 %v16569_v55 }
0x17d1   :  { %13134 = vmatprep.subr.bf16.mxu1 %v16570_v12 }
0x17d4   :  { %13136 = vmatpush1.bf16.msra.mxu1 %v16571_v11 }
0x17d5   :  { %13138 = vmatprep.subr.bf16.mxu1 %v16572_v13  ;;  %v16585_v13 = vld [vmem:[#allocation25_spill] sm:$0xff] }
0x17d8   :  { %13140 = vmatpush1.bf16.msra.mxu1 %v16573_v6 }
0x17d9   :  { %13142 = vmatprep.subr.bf16.mxu1 %v16574_v41 }
0x17dc   :  { %13144 = vmatpush1.bf16.msra.mxu1 %v16575_v7 }
0x17dd   :  { %13146 = vmatprep.subr.bf16.mxu1 %v16576_v53  ;;  %v16583_v53 = vld [vmem:[#allocation24_spill] sm:$0xff] }
0x17e0   :  { %13148 = vmatpush1.bf16.msra.mxu1 %v16577_v58 }
0x17e1   :  { %13150 = vmatprep.subr.bf16.mxu1 %v16578_v43 }
0x17e4   :  { %13152 = vmatpush1.bf16.msra.mxu1 %v16579_v18  ;;  %v16582_v18 = vld [vmem:[#allocation54_spill] sm:$0xff] }
0x17e5   :  { %11742 = vmatprep.subr.msk.mxu1 %vm181_vm0, %v16580_v25 }
0x17e7   :  { %6137 = vmatmul.mubr.f32.vlgmr.msra.gmra.mrb[24].mxu1 %v15293_v42 }
0x17e8   :  { %11743 = vmatpush1.msk.msra.mxu1 %vm181_vm0, %v15323_v50  ;;  %7242 = vmatprep.mubr.f32.mxu1 %v16424_v16 }
0x17e9   :  { %13153 = vmatprep.subr.bf16.mxu1 %v16441_v17 }
0x189a   :  { %v5995_v19 = vpop.f32.mrb[22].mxu1  ;;  %v6067_v43 = vpop.f32.mrb[88].mxu0 }
0x189b   :  { %v5996_v58 = vadd.f32 %v16582_v18, %v5995_v19  ;;  %v6068_v25 = vadd.f32 %v6067_v43, %v16583_v53  ;;  %v12416_v7 = vpop.f32.mrb[23].mxu1  ;;  %v15331_v41 = vpop.f32.mrb[89].mxu0 }
0x189c   :  { %16584 = vst [vmem:[#allocation56_spill] sm:$0xff] %v15331_v41  ;;  %v16591_v41 = vld [vmem:[#allocation20_spill] sm:$0xff] }
0x189d   :  { %6000 = vst [vmem:[#allocation7 + $0x18] sm:$0xff] %v5996_v58  ;;  %v6144_v6 = vcombine.high %v6068_v25, %v6068_v25  ;;  %v6151_v11 = vrot.slane %v6068_v25, %v16585_v13 }
0x189f   :  { %v6158_v12 = vrot.slane %v6144_v6, %v16585_v13  ;;  %v6159_v50 = vcombine.high %v6151_v11, %v6151_v11  ;;  %v6167_v55 = vrot.slane %v6151_v11, %v16585_v13 }
0x18a1   :  { %v6160_v32 = vcombine.high %v6158_v12, %v6158_v12  ;;  %v6174_v40 = vrot.slane %v6158_v12, %v16585_v13  ;;  %v6181_v57 = vrot.slane %v6159_v50, %v16585_v13  ;;  %v6189_v18 = vcombine.high %v6167_v55, %v6167_v55 }
0x18a2   :  { %v6196_v43 = vrot.slane %v6167_v55, %v14147_v10  ;;  %v16587_v55 = vld [vmem:[#allocation16_spill] sm:$0xff] }
0x18a3   :  { %v6188_v7 = vrot.slane %v6160_v32, %v16585_v13  ;;  %v6190_v19 = vcombine.high %v6174_v40, %v6174_v40  ;;  %v6191_v58 = vcombine.high %v6181_v57, %v6181_v57  ;;  %v6200_v53 = vrot.slane %v6181_v57, %v14147_v10  ;;  %v16588_v32 = vld [vmem:[#allocation19_spill] sm:$0xff] }
0x18a4   :  { %v6204_v25 = vrot.slane %v6189_v18, %v14147_v10  ;;  %v6212_v6 = vrot.slane %v6174_v40, %v14147_v10  ;;  %v6233_v11 = vadd.f32 %v6196_v43, %v16586_v2  ;;  %v16590_v18 = vld [vmem:[#allocation18_spill] sm:$0xff]  ;;  %v16592_v2 = vld [vmem:[#allocation23_spill] sm:$0xff] }
0x18a5   :  { %v6192_v42 = vcombine.high %v6188_v7, %v6188_v7  ;;  %v6208_v12 = vrot.slane %v6191_v58, %v14147_v10  ;;  %v6216_v50 = vrot.slane %v6188_v7, %v14147_v10  ;;  %v6220_v30 = vrot.slane %v6190_v19, %v14147_v10  ;;  %v16593_v58 = vld [vmem:[#allocation22_spill] sm:$0xff] }
0x18a6   :  { %v6234_v49 = vadd.f32 %v16587_v55, %v6200_v53  ;;  %v6235_v13 = vadd.f32 %v6204_v25, %v16588_v32  ;;  %v6237_v3 = vadd.f32 %v6212_v6, %v16589_v38  ;;  %13632 = vtanh.f32 %v6233_v11  ;;  %v16594_v53 = vld [vmem:[#allocation44_spill] sm:$0xff] }
0x18a7   :  { %v6224_v57 = vrot.slane %v6192_v42, %v14147_v10  ;;  %v6236_v40 = vadd.f32 %v16590_v18, %v6208_v12  ;;  %v6238_v43 = vadd.f32 %v16591_v41, %v6216_v50  ;;  %v6239_v63 = vadd.f32 %v6220_v30, %v16592_v2 }
0x18a8   :  { %13634 = vtanh.f32 %v6234_v49 }
0x18a9   :  { %v6240_v7 = vadd.f32 %v16593_v58, %v6224_v57  ;;  %13636 = vtanh.f32 %v6235_v13 }
0x18aa   :  { %13638 = vtanh.f32 %v6237_v3 }
0x18ab   :  { %13640 = vtanh.f32 %v6236_v40 }
0x18ac   :  { %13642 = vtanh.f32 %v6238_v43 }
0x18ad   :  { %13644 = vtanh.f32 %v6239_v63 }
0x18ae   :  { %13646 = vtanh.f32 %v6240_v7 }
0x18b0   :  { %v13633_v19 = vpop.eup %13632 }
0x18b1   :  { %v6249_v25 = vmul.f32 %v16594_v53, %v13633_v19 }
0x18b2   :  { %v13635_v32 = vpop.eup %13634 }
0x18b3   :  { %v13637_v6 = vpop.eup %13636  ;;  %6257 = vadd.xlane.f32.xlu0 %v6249_v25  ;;  %v6250_v42 = vmul.f32 %v16594_v53, %v13635_v32 }
0x18b4   :  { %v6251_v11 = vmul.f32 %v16594_v53, %v13637_v6  ;;  %v13639_v12 = vpop.eup %13638 }
0x18b5   :  { %6259 = vadd.xlane.f32.xlu1 %v6250_v42  ;;  %v6253_v30 = vmul.f32 %v16594_v53, %v13639_v12  ;;  %v13641_v49 = vpop.eup %13640 }
0x18b6   :  { %v6252_v50 = vmul.f32 %v16594_v53, %v13641_v49  ;;  %v13643_v57 = vpop.eup %13642 }
0x18b7   :  { %6261 = vadd.xlane.f32.xlu0 %v6251_v11  ;;  %v6254_v32 = vmul.f32 %v16594_v53, %v13643_v57  ;;  %v13645_v40 = vpop.eup %13644 }
0x18b8   :  { %v6255_v43 = vmul.f32 %v16594_v53, %v13645_v40  ;;  %v13647_v63 = vpop.eup %13646 }
0x18b9   :  { %v6256_v19 = vmul.f32 %v16594_v53, %v13647_v63 }
0x18ba   :  { %v15359_v3 = vpop.f32.mrb[24].mxu1 }
0x18bb   :  { %16595 = vst [vmem:[#allocation26_spill] sm:$0xff] %v15359_v3  ;;  %6265 = vadd.xlane.f32.xlu0 %v6253_v30  ;;  %v15361_v13 = vpop.f32.mrb[25].mxu1 }
0x18bc   :  { %16596 = vst [vmem:[#allocation53_spill] sm:$0xff] %v15361_v13 }
0x18bf   :  { %6263 = vadd.xlane.f32.xlu0 %v6252_v50 }
0x18c3   :  { %6267 = vadd.xlane.f32.xlu0 %v6254_v32 }
0x18c7   :  { %6269 = vadd.xlane.f32.xlu0 %v6255_v43 }
0x18cb   :  { %6271 = vadd.xlane.f32.xlu0 %v6256_v19 }
0x1940   :  { %v6258_v25 = vpop.xlane.xlu0 %6257 }
0x1941   :  { %v6284_v30 = vrot.slane %v6258_v25, %v14201_v22 }
0x1942   :  { %v6260_v11 = vpop.xlane.xlu1 %6259 }
0x1943   :  { %v6288_v12 = vrot.slane %v6260_v11, %v14201_v22 }
0x1944   :  { %v6262_v6 = vpop.xlane.xlu0 %6261 }
0x1945   :  { %v6292_v49 = vrot.slane %v6262_v6, %v14201_v22  ;;  %v6313_v57 = vsel %vm631_vm2, %v6288_v12, %v6284_v30 }
0x1947   :  { %v6314_v40 = vsel %vm633_vm3, %v6292_v49, %v6313_v57 }
0x1948   :  { %v6266_v42 = vpop.xlane.xlu0 %6265 }
0x1949   :  { %v6300_v19 = vrot.slane %v6266_v42, %v14201_v22 }
0x194c   :  { %v6264_v7 = vpop.xlane.xlu0 %6263 }
0x194d   :  { %v6296_v32 = vrot.slane %v6264_v7, %v14201_v22 }
0x194f   :  { %v6315_v43 = vsel %vm635_vm4, %v6296_v32, %v6314_v40 }
0x1950   :  { %v6268_v50 = vpop.xlane.xlu0 %6267  ;;  %v6316_v2 = vsel %vm637_vm5, %v6300_v19, %v6315_v43 }
0x1951   :  { %v6304_v63 = vrot.slane %v6268_v50, %v14201_v22 }
0x1953   :  { %v6317_v18 = vsel %vm639_vm6, %v6304_v63, %v6316_v2 }
0x1954   :  { %v6270_v53 = vpop.xlane.xlu0 %6269 }
0x1955   :  { %v6308_v58 = vrot.slane %v6270_v53, %v14201_v22 }
0x1957   :  { %v6318_v30 = vsel %vm641_vm7, %v6308_v58, %v6317_v18 }
0x1958   :  { %v6272_v41 = vpop.xlane.xlu0 %6271 }
0x1959   :  { %v6312_v12 = vrot.slane %v6272_v41, %v14201_v22 }
0x195b   :  { %v6319_v49 = vsel %vm643_vm8, %v6312_v12, %v6318_v30 }
0x195c   :  { %v6321_v57 = vsel %vm646_vm9, %v6319_v49, -inf }
0x195d   :  { %6322 = vmax.xlane.f32.xlu0 %v6321_v57 }
0x19ea   :  { %v6323_v32 = vpop.xlane.xlu0 %6322 }
0x19eb   :  { %v6328_v40 = vrot.slane %v6323_v32, %v14147_v10  ;;  %v6332_v38 = vrot.slane %v6323_v32, %v14223_v35  ;;  %v6336_v55 = vrot.slane %v6323_v32, %v14220_v33  ;;  %v6340_v43 = vrot.slane %v6323_v32, %v14226_v62 }
0x19ec   :  { %v6344_v2 = vrot.slane %v6323_v32, %v14232_v56  ;;  %v6348_v18 = vrot.slane %v6323_v32, %v14236_v26  ;;  %v6352_v49 = vrot.slane %v6323_v32, %v14240_v24  ;;  %v6356_v36 = vrot.slane %v6323_v32, %v14244_v23 }
0x19ed   :  { %v6365_v63 = vsub.f32 %v6258_v25, %v6328_v40  ;;  %v6366_v19 = vsub.f32 %v6260_v11, %v6332_v38  ;;  %v6367_v13 = vsub.f32 %v6262_v6, %v6336_v55  ;;  %v6368_v58 = vsub.f32 %v6264_v7, %v6340_v43 }
0x19ee   :  { %v6369_v57 = vsub.f32 %v6266_v42, %v6344_v2  ;;  %v6370_v45 = vsub.f32 %v6268_v50, %v6348_v18  ;;  %v6371_v52 = vsub.f32 %v6270_v53, %v6352_v49  ;;  %v6372_v38 = vsub.f32 %v6272_v41, %v6356_v36 }
0x19ef   :  { %v6373_v12 = vmul.f32 1.442695, %v6365_v63  ;;  %v6375_v30 = vmul.f32 1.442695, %v6366_v19  ;;  %v6377_v3 = vmul.f32 1.442695, %v6367_v13 }
0x19f0   :  { %v6379_v44 = vmul.f32 1.442695, %v6368_v58  ;;  %v6381_v25 = vmul.f32 1.442695, %v6369_v57  ;;  %v6383_v55 = vmul.f32 1.442695, %v6370_v45 }
0x19f1   :  { %13648 = vpow2.f32 %v6373_v12  ;;  %v6385_v6 = vmul.f32 1.442695, %v6371_v52  ;;  %v6387_v11 = vmul.f32 1.442695, %v6372_v38 }
0x19f2   :  { %13650 = vpow2.f32 %v6375_v30 }
0x19f3   :  { %13652 = vpow2.f32 %v6377_v3 }
0x19f4   :  { %13654 = vpow2.f32 %v6379_v44 }
0x19f5   :  { %13656 = vpow2.f32 %v6381_v25 }
0x19f6   :  { %13658 = vpow2.f32 %v6383_v55 }
0x19f7   :  { %13660 = vpow2.f32 %v6385_v6 }
0x19f8   :  { %13662 = vpow2.f32 %v6387_v11 }
0x19fb   :  { %v13649_v7 = vpop.eup %13648 }
0x19fc   :  { %v13651_v40 = vpop.eup %13650  ;;  %6398 = vperm.xlu0 %13454, %v13649_v7  }
0x19fd   :  { %6401 = vperm.xlu1 %13453, %v13651_v40   ;;  %v13653_v13 = vpop.eup %13652 }
0x19fe   :  { %v13655_v42 = vpop.eup %13654 }
0x19ff   :  { %v13657_v50 = vpop.eup %13656 }
0x1a00   :  { %6404 = vperm.xlu0 %13454, %v13653_v13   ;;  %v13659_v3 = vpop.eup %13658 }
0x1a01   :  { %6407 = vperm.xlu1 %13453, %v13655_v42   ;;  %v13661_v44 = vpop.eup %13660 }
0x1a02   :  { %v13663_v45 = vpop.eup %13662 }
0x1a04   :  { %6410 = vperm.xlu0 %13454, %v13657_v50  }
0x1a05   :  { %6413 = vperm.xlu1 %13453, %v13659_v3  }
0x1a08   :  { %6416 = vperm.xlu0 %13454, %v13661_v44  }
0x1a09   :  { %6419 = vperm.xlu1 %13453, %v13663_v45  }
0x1a7b   :  { %v6399_v52 = vpop.permute.xlu0 %6398 }
0x1a7c   :  { %v6402_v36 = vpop.permute.xlu1 %6401  ;;  %v6424_v53 = vrot.slane %v6399_v52, %v14201_v22 }
0x1a7d   :  { %v6428_v41 = vrot.slane %v6402_v36, %v14201_v22 }
0x1a7f   :  { %v6405_v32 = vpop.permute.xlu0 %6404  ;;  %v6453_v63 = vsel %vm631_vm2, %v6428_v41, %v6424_v53 }
0x1a80   :  { %v6408_v43 = vpop.permute.xlu1 %6407  ;;  %v6432_v2 = vrot.slane %v6405_v32, %v14201_v22 }
0x1a81   :  { %v6436_v19 = vrot.slane %v6408_v43, %v14201_v22 }
0x1a82   :  { %v6454_v18 = vsel %vm633_vm3, %v6432_v2, %v6453_v63 }
0x1a83   :  { %v6411_v58 = vpop.permute.xlu0 %6410  ;;  %v6455_v57 = vsel %vm635_vm4, %v6436_v19, %v6454_v18 }
0x1a84   :  { %v6414_v12 = vpop.permute.xlu1 %6413  ;;  %v6440_v30 = vrot.slane %v6411_v58, %v14201_v22 }
0x1a85   :  { %v6444_v49 = vrot.slane %v6414_v12, %v14201_v22 }
0x1a86   :  { %v6456_v25 = vsel %vm637_vm5, %v6440_v30, %v6455_v57 }
0x1a87   :  { %v6417_v38 = vpop.permute.xlu0 %6416  ;;  %v6457_v52 = vsel %vm639_vm6, %v6444_v49, %v6456_v25 }
0x1a88   :  { %v6420_v55 = vpop.permute.xlu1 %6419  ;;  %v6448_v6 = vrot.slane %v6417_v38, %v14201_v22 }
0x1a89   :  { %v6452_v11 = vrot.slane %v6420_v55, %v14201_v22 }
0x1a8a   :  { %v6458_v36 = vsel %vm641_vm7, %v6448_v6, %v6457_v52 }
0x1a8b   :  { %v6459_v41 = vsel %vm643_vm8, %v6452_v11, %v6458_v36 }
0x1a8c   :  { %v6461_v53 = vsel %vm646_vm9, %v6459_v41, 0.0 }
0x1a8d   :  { %6462 = vadd.xlane.f32.xlu0 %v6461_v53 }
0x1b1a   :  { %v6463_v32 = vpop.xlane.xlu0 %6462 }
0x1b1b   :  { %13664 = vrcp.f32 %v6463_v32 }
0x1b25   :  { %v13665_v43 = vpop.eup %13664 }
0x1b26   :  { %v6469_v2 = vrot.slane %v13665_v43, %v14147_v10  ;;  %v6473_v19 = vrot.slane %v13665_v43, %v14223_v35  ;;  %v6477_v58 = vrot.slane %v13665_v43, %v14220_v33  ;;  %v6481_v30 = vrot.slane %v13665_v43, %v14226_v62 }
0x1b27   :  { %v6485_v57 = vrot.slane %v13665_v43, %v14232_v56  ;;  %v6489_v38 = vrot.slane %v13665_v43, %v14236_v26  ;;  %v6493_v55 = vrot.slane %v13665_v43, %v14240_v24  ;;  %v6497_v6 = vrot.slane %v13665_v43, %v14244_v23 }
0x1b28   :  { %v6506_v63 = vmul.f32 %v13649_v7, %v6469_v2  ;;  %v6507_v18 = vmul.f32 %v13651_v40, %v6473_v19  ;;  %v6508_v12 = vmul.f32 %v13653_v13, %v6477_v58  ;;  %v6509_v49 = vmul.f32 %v13655_v42, %v6481_v30 }
0x1b29   :  { %v6510_v25 = vmul.f32 %v13657_v50, %v6485_v57  ;;  %v6511_v7 = vmul.f32 %v13659_v3, %v6489_v38  ;;  %v6512_v40 = vmul.f32 %v13661_v44, %v6493_v55  ;;  %v6513_v13 = vmul.f32 %v13663_v45, %v6497_v6 }
0x1b2a   :  { %6516 = vperm.xlu1 %13453, %v6506_v63  }
0x1b2e   :  { %6596 = vperm.xlu1 %13453, %v6507_v18  }
0x1b32   :  { %6676 = vperm.xlu1 %13453, %v6508_v12  }
0x1b36   :  { %6756 = vperm.xlu1 %13453, %v6509_v49  }
0x1b3a   :  { %6836 = vperm.xlu1 %13453, %v6510_v25  }
0x1b3e   :  { %6916 = vperm.xlu1 %13453, %v6511_v7  }
0x1b42   :  { %6996 = vperm.xlu1 %13453, %v6512_v40  }
0x1b46   :  { %7076 = vperm.xlu1 %13453, %v6513_v13  }
0x1ba9   :  { %v6517_v11 = vpop.permute.xlu1 %6516 }
0x1baa   :  { %v6521_v42 = vrot.slane %v6517_v11, %v14201_v22 }
0x1bac   :  { %12420 = vmatmul.mubr.msk.f32.vlgmr.msra.gmra.mrb[90].mxu0 %vm646_vm9, %v6521_v42 }
0x1bad   :  { %12423 = vmatpush3.msra.mxu0 %v15160_v46  ;;  %v6597_v50 = vpop.permute.xlu1 %6596  ;;  %12424 = vmatprep.mubr.msk.f32.mxu0 %vm13934_vm10, %v16424_v16 }
0x1bae   :  { %v6601_v3 = vrot.slane %v6597_v50, %v14201_v22  ;;  %12427 = vmatprep.subr.mxu0 %v16424_v16 }
0x1bb0   :  { %12425 = vmatmul.mubr.msk.f32.vlgmr.msra.gmra.mrb[92].mxu0 %vm646_vm9, %v6601_v3 }
0x1bb1   :  { %12428 = vmatpush3.msra.mxu0 %v15171_v28  ;;  %v6677_v44 = vpop.permute.xlu1 %6676  ;;  %12429 = vmatprep.mubr.msk.f32.mxu0 %vm13934_vm10, %v16424_v16 }
0x1bb2   :  { %v6681_v45 = vrot.slane %v6677_v44, %v14201_v22  ;;  %12432 = vmatprep.subr.mxu0 %v16424_v16 }
0x1bb4   :  { %12430 = vmatmul.mubr.msk.f32.vlgmr.msra.gmra.mrb[94].mxu0 %vm646_vm9, %v6681_v45 }
0x1bb5   :  { %12433 = vmatpush3.msra.mxu0 %v15182_v27  ;;  %v6757_v46 = vpop.permute.xlu1 %6756  ;;  %12434 = vmatprep.mubr.msk.f32.mxu0 %vm13934_vm10, %v16424_v16 }
0x1bb6   :  { %v6761_v52 = vrot.slane %v6757_v46, %v14201_v22  ;;  %12437 = vmatprep.subr.mxu0 %v16424_v16 }
0x1bb8   :  { %12435 = vmatmul.mubr.msk.f32.vlgmr.msra.gmra.mrb[96].mxu0 %vm646_vm9, %v6761_v52 }
0x1bb9   :  { %12438 = vmatpush3.msra.mxu0 %v15193_v5  ;;  %v6837_v28 = vpop.permute.xlu1 %6836  ;;  %12439 = vmatprep.mubr.msk.f32.mxu0 %vm13934_vm10, %v16424_v16 }
0x1bba   :  { %v6841_v36 = vrot.slane %v6837_v28, %v14201_v22  ;;  %12442 = vmatprep.subr.mxu0 %v16424_v16 }
0x1bbc   :  { %12440 = vmatmul.mubr.msk.f32.vlgmr.msra.gmra.mrb[98].mxu0 %vm646_vm9, %v6841_v36 }
0x1bbd   :  { %12443 = vmatpush3.msra.mxu0 %v15204_v54  ;;  %v6917_v27 = vpop.permute.xlu1 %6916  ;;  %12444 = vmatprep.mubr.msk.f32.mxu0 %vm13934_vm10, %v16424_v16 }
0x1bbe   :  { %v6921_v41 = vrot.slane %v6917_v27, %v14201_v22  ;;  %12447 = vmatprep.subr.mxu0 %v16424_v16 }
0x1bc0   :  { %12445 = vmatmul.mubr.msk.f32.vlgmr.msra.gmra.mrb[100].mxu0 %vm646_vm9, %v6921_v41 }
0x1bc1   :  { %12448 = vmatpush3.msra.mxu0 %v15215_v47  ;;  %v6997_v5 = vpop.permute.xlu1 %6996  ;;  %12449 = vmatprep.mubr.msk.f32.mxu0 %vm13934_vm10, %v16424_v16  ;;  %v15462_v47 = vld [vmem:[%s16261_s5 + $0x8] sm:$0xf] }
0x1bc2   :  { %v7001_v53 = vrot.slane %v6997_v5, %v14201_v22  ;;  %12452 = vmatprep.subr.mxu0 %v16424_v16  ;;  %v16597_v5 = vld [vmem:[#allocation12_spill] sm:$0xff] }
0x1bc4   :  { %12450 = vmatmul.mubr.msk.f32.vlgmr.msra.gmra.mrb[102].mxu0 %vm646_vm9, %v7001_v53  ;;  %v16598_v53 = vld [vmem:[#allocation45_spill] sm:$0xff] }
0x1bc5   :  { %12453 = vmatpush3.msra.mxu0 %v15226_v60  ;;  %v7077_v54 = vpop.permute.xlu1 %7076  ;;  %12454 = vmatprep.mubr.msk.f32.mxu0 %vm13934_vm10, %v16424_v16 }
0x1bc6   :  { %v7081_v32 = vrot.slane %v7077_v54, %v14201_v22  ;;  %12457 = vmatprep.subr.mxu0 %v16424_v16  ;;  %v16599_v54 = vld [vmem:[#allocation13_spill] sm:$0xff] }
0x1bc8   :  { %12455 = vmatmul.mubr.msk.f32.vlgmr.msra.gmra.mrb[104].mxu0 %vm646_vm9, %v7081_v32  ;;  %v16600_v32 = vld [vmem:[#allocation14_spill] sm:$0xff] }
0x1bc9   :  { %12458 = vmatpush3.msk.msra.mxu0 %vm181_vm0, %v15462_v47  ;;  %12459 = vmatprep.mubr.msk.f32.mxu0 %vm13934_vm10, %v16424_v16 }
0x1bca   :  { %13178 = vmatprep.subr.bf16.mxu0 %v14015_v4 }
0x1c7f   :  { %v6590_v60 = vpop.f32.mrb[90].mxu0 }
0x1c80   :  { %v12421_v43 = vpop.f32.mrb[91].mxu0 }
0x1c81   :  { %v16602_v43 = vld [vmem:[#allocation15_spill] sm:$0xff] }
0x1c83   :  { %v6670_v2 = vpop.f32.mrb[92].mxu0 }
0x1c84   :  { %v7162_v63 = vrot.slane %v6670_v2, 7  ;;  %v12426_v19 = vpop.f32.mrb[93].mxu0  ;;  %v16603_v2 = vld [vmem:[#allocation27_spill] sm:$0xff] }
0x1c86   :  { %v7163_v18 = vsel %vm631_vm2, %v7162_v63, %v6590_v60  ;;  %v16601_v60 = vld [vmem:[#allocation46_spill] sm:$0xff] }
0x1c87   :  { %v6750_v58 = vpop.f32.mrb[94].mxu0 }
0x1c88   :  { %v7164_v12 = vrot.slane %v6750_v58, 6  ;;  %v12431_v30 = vpop.f32.mrb[95].mxu0  ;;  %v16605_v58 = vld [vmem:[#allocation56_spill] sm:$0xff] }
0x1c89   :  { %v16606_v30 = vld [vmem:[#allocation48_spill] sm:$0xff] }
0x1c8a   :  { %v7165_v49 = vsel %vm633_vm3, %v7164_v12, %v7163_v18  ;;  %v16604_v18 = vld [vmem:[#allocation47_spill] sm:$0xff] }
0x1c8b   :  { %v6830_v57 = vpop.f32.mrb[96].mxu0  ;;  %v6070_v12 = vadd.f32 %v16605_v58, %v16604_v18 }
0x1c8c   :  { %v7166_v25 = vrot.slane %v6830_v57, 5  ;;  %v12436_v38 = vpop.f32.mrb[97].mxu0 }
0x1c8d   :  { %v16607_v38 = vld [vmem:[#allocation49_spill] sm:$0xff] }
0x1c8e   :  { %v7167_v7 = vsel %vm635_vm4, %v7166_v25, %v7165_v49 }
0x1c8f   :  { %v6910_v55 = vpop.f32.mrb[98].mxu0 }
0x1c90   :  { %v7168_v40 = vrot.slane %v6910_v55, 4  ;;  %v12441_v6 = vpop.f32.mrb[99].mxu0 }
0x1c92   :  { %v7169_v13 = vsel %vm637_vm5, %v7168_v40, %v7167_v7  ;;  %v16608_v7 = vld [vmem:[#allocation26_spill] sm:$0xff] }
0x1c93   :  { %v6990_v11 = vpop.f32.mrb[100].mxu0  ;;  %v6139_v55 = vadd.f32 %v16608_v7, %v16607_v38  ;;  %v16609_v40 = vld [vmem:[#allocation50_spill] sm:$0xff] }
0x1c94   :  { %v7170_v42 = vrot.slane %v6990_v11, 3  ;;  %v12446_v50 = vpop.f32.mrb[101].mxu0 }
0x1c96   :  { %v7171_v3 = vsel %vm639_vm6, %v7170_v42, %v7169_v13 }
0x1c97   :  { %v7070_v44 = vpop.f32.mrb[102].mxu0 }
0x1c98   :  { %v7172_v45 = vrot.slane %v7070_v44, 2  ;;  %v12451_v46 = vpop.f32.mrb[103].mxu0 }
0x1c9a   :  { %v7173_v52 = vsel %vm641_vm7, %v7172_v45, %v7171_v3 }
0x1c9b   :  { %v7150_v28 = vpop.f32.mrb[104].mxu0 }
0x1c9c   :  { %v7174_v36 = vrot.slane %v7150_v28, 1  ;;  %v12456_v27 = vpop.f32.mrb[105].mxu0  ;;  %v16611_v28 = vld [vmem:[#allocation53_spill] sm:$0xff] }
0x1c9e   :  { %v7175_v41 = vsel %vm643_vm8, %v7174_v36, %v7173_v52  ;;  %v16610_v52 = vld [vmem:[#allocation51_spill] sm:$0xff] }
0x1c9f   :  { %11744 = vmatmul.mubr.msk.f32.vlgmr.msra.gmra.mrb[26].mxu1 %vm156_vm1, %v7175_v41  ;;  %12460 = vmatmul.mubr.msk.f32.vlgmr.msra.gmra.mrb[106].mxu0 %vm156_vm1, %v7175_v41  ;;  %v6141_v36 = vadd.f32 %v16611_v28, %v16610_v52  ;;  %v16612_v41 = vld [vmem:[#allocation52_spill] sm:$0xff]  ;;  %v16623_v28 = vld [vmem:[#allocation35_spill] sm:$0xff] }
0x1ca0   :  { %13155 = vmatpush3.bf16.msra.mxu1 %v14457_v0  ;;  %13180 = vmatpush1.bf16.msra.mxu0 %v14017_v8 }
0x1ca1   :  { %13156 = vmatprep.subr.bf16.mxu1 %v16441_v17  ;;  %13182 = vmatprep.subr.bf16.mxu0 %v14019_v9 }
0x1ca2   :  { %12494 = vmatprep.mubr.msk.f32.mxu1 %vm13934_vm10, %v16424_v16  ;;  %7476 = vmatprep.mubr.f32.mxu0 %v16424_v16 }
0x1ca4   :  { %13158 = vmatpush3.bf16.msra.mxu1 %v14462_v1  ;;  %13184 = vmatpush1.bf16.msra.mxu0 %v14023_v14 }
0x1ca5   :  { %13159 = vmatprep.subr.bf16.mxu1 %v16441_v17  ;;  %13186 = vmatprep.subr.bf16.mxu0 %v14026_v15 }
0x1ca8   :  { %13161 = vmatpush3.bf16.msra.mxu1 %v14466_v48  ;;  %13188 = vmatpush1.bf16.msra.mxu0 %v14029_v20 }
0x1ca9   :  { %13162 = vmatprep.subr.bf16.mxu1 %v16441_v17  ;;  %13190 = vmatprep.subr.bf16.mxu0 %v14032_v21 }
0x1cac   :  { %13164 = vmatpush3.bf16.msra.mxu1 %v14470_v59  ;;  %13192 = vmatpush1.bf16.msra.mxu0 %v14049_v29 }
0x1cad   :  { %13165 = vmatprep.subr.bf16.mxu1 %v16441_v17  ;;  %13194 = vmatprep.subr.bf16.mxu0 %v14058_v31 }
0x1cb0   :  { %13167 = vmatpush3.bf16.msra.mxu1 %v14473_v51  ;;  %13196 = vmatpush1.bf16.msra.mxu0 %v14072_v37 }
0x1cb1   :  { %13168 = vmatprep.subr.bf16.mxu1 %v16441_v17  ;;  %13198 = vmatprep.subr.bf16.mxu0 %v14080_v39 }
0x1cb4   :  { %13170 = vmatpush3.bf16.msra.mxu1 %v16455_v34  ;;  %13200 = vmatpush1.bf16.msra.mxu0 %v16456_v61 }
0x1cb5   :  { %13171 = vmatprep.subr.bf16.mxu1 %v16441_v17  ;;  %13202 = vmatprep.subr.bf16.mxu0 %v16597_v5 }
0x1cb8   :  { %13173 = vmatpush3.bf16.msra.mxu1 %v16598_v53  ;;  %13204 = vmatpush1.bf16.msra.mxu0 %v16599_v54 }
0x1cb9   :  { %13174 = vmatprep.subr.bf16.mxu1 %v16441_v17  ;;  %13206 = vmatprep.subr.bf16.mxu0 %v16600_v32 }
0x1cbc   :  { %13176 = vmatpush3.bf16.msra.mxu1 %v16601_v60  ;;  %13208 = vmatpush1.bf16.msra.mxu0 %v16602_v43 }
0x1cbd   :  { %13210 = vmatprep.subr.bf16.mxu1 %v16603_v2  ;;  %12497 = vmatprep.subr.mxu0 %v16424_v16 }
0x1d72   :  { %v7244_v63 = vpop.f32.mrb[26].mxu1  ;;  %v7315_v19 = vpop.f32.mrb[106].mxu0 }
0x1d73   :  { %v7245_v49 = vadd.f32 %v7244_v63, %v16606_v30  ;;  %v7246_v57 = vpop.f32.mrb[27].mxu1  ;;  %v12461_v25 = vpop.f32.mrb[107].mxu0  ;;  %v7316_v63 = vadd.f32 %v7315_v19, %v16612_v41  ;;  %v16616_v19 = vld [vmem:[#allocation29_spill] sm:$0xff] }
0x1d74   :  { %v7247_v6 = vadd.f32 %v7246_v57, %v16609_v40  ;;  %v16640_v41 = vld [vmem:[#allocation21_spill] sm:$0xff]  ;;  %v16642_v40 = vld [vmem:[#allocation20_spill] sm:$0xff] }
0x1d75   :  { %v7319_v13 = vadd.f32 %v7245_v49, %v6070_v12 }
0x1d76   :  { %v7326_v11 = vadd.f32 %v7247_v6, %v6139_v55  ;;  %v16613_v55 = vld [vmem:[#allocation55_spill] sm:$0xff] }
0x1d77   :  { %v11747_v42 = vmul.f32 -1.442695, %v7319_v13 }
0x1d78   :  { %v11748_v50 = vmul.f32 -1.442695, %v7326_v11  ;;  %v16615_v11 = vld [vmem:[#allocation28_spill] sm:$0xff] }
0x1d79   :  { %13666 = vpow2.f32 %v11747_v42  ;;  %v15533_v42 = vld [vmem:[%s16256_s0] sm:$0xff] }
0x1d7a   :  { %13668 = vpow2.f32 %v11748_v50  ;;  %16617 = vst [vmem:[#allocation44_spill] sm:$0xff] %v15533_v42  ;;  %v16618_v50 = vld [vmem:[#allocation30_spill] sm:$0xff] }
0x1d83   :  { %v13667_v3 = vpop.eup %13666 }
0x1d84   :  { %v7323_v44 = vadd.f32 1.0, %v13667_v3  ;;  %v13669_v45 = vpop.eup %13668  ;;  %v16619_v3 = vld [vmem:[#allocation31_spill] sm:$0xff] }
0x1d85   :  { %v7330_v46 = vadd.f32 1.0, %v13669_v45  ;;  %v16621_v45 = vld [vmem:[#allocation33_spill] sm:$0xff] }
0x1d86   :  { %13670 = vrcp.f32 %v7323_v44  ;;  %v16620_v44 = vld [vmem:[#allocation32_spill] sm:$0xff] }
0x1d87   :  { %13672 = vrcp.f32 %v7330_v46  ;;  %v16622_v46 = vld [vmem:[#allocation34_spill] sm:$0xff] }
0x1d90   :  { %v13671_v27 = vpop.eup %13670 }
0x1d91   :  { %v7333_v58 = vmul.f32 %v13671_v27, %v6141_v36  ;;  %v13673_v12 = vpop.eup %13672  ;;  %v16624_v36 = vld [vmem:[#allocation36_spill] sm:$0xff]  ;;  %v16625_v27 = vld [vmem:[#allocation37_spill] sm:$0xff] }
0x1d92   :  { %v7336_v49 = vsub.f32 1.0, %v13673_v12  ;;  %v7338_v6 = vmul.f32 %v13673_v12, %v16613_v55  ;;  %v16629_v12 = vld [vmem:[#allocation41_spill] sm:$0xff] }
0x1d93   :  { %v7334_v57 = vadd.f32 %v7333_v58, %v7316_v63  ;;  %v16626_v63 = vld [vmem:[#allocation38_spill] sm:$0xff]  ;;  %v16627_v58 = vld [vmem:[#allocation39_spill] sm:$0xff] }
0x1d95   :  { %13674 = vtanh.f32 %v7334_v57  ;;  %v16628_v57 = vld [vmem:[#allocation40_spill] sm:$0xff] }
0x1d9f   :  { %v13675_v25 = vpop.eup %13674 }
0x1da0   :  { %v7337_v7 = vmul.f32 %v13675_v25, %v7336_v49  ;;  %v16630_v49 = vld [vmem:[#allocation42_spill] sm:$0xff]  ;;  %v16631_v25 = vld [vmem:[#allocation43_spill] sm:$0xff] }
0x1da2   :  { %v15523_v13 = vadd.f32 %v7338_v6, %v7337_v7  ;;  %v16632_v7 = vld [vmem:[#allocation11_spill] sm:$0xff] }
0x1da4   :  { %16614 = vst [vmem:[#allocation54_spill] sm:$0xff] %v15523_v13  ;;  %12495 = vmatmul.mubr.f32.vlgmr.msra.gmra.mrb[28].mxu1 %v15523_v13  ;;  %7477 = vmatmul.mubr.f32.vlgmr.msra.gmra.mrb[108].mxu0 %v15523_v13 }
0x1da5   :  { %13212 = vmatpush1.bf16.msra.mxu1 %v16615_v11  ;;  %7547 = vmatprep.mubr.f32.mxu1 %v16424_v16 }
0x1da6   :  { %13214 = vmatprep.subr.bf16.mxu1 %v16616_v19  ;;  %12498 = vmatpush3.msra.mxu0 %v15533_v42  ;;  %v16637_v42 = vld [vmem:[#allocation17_spill] sm:$0xff] }
0x1da7   :  { %12499 = vmatprep.mubr.msk.f32.mxu0 %vm13934_vm10, %v16424_v16  ;;  %12502 = vmatprep.subr.mxu0 %v16424_v16 }
0x1da9   :  { %13216 = vmatpush1.bf16.msra.mxu1 %v16618_v50 }
0x1daa   :  { %13218 = vmatprep.subr.bf16.mxu1 %v16619_v3 }
0x1dad   :  { %13220 = vmatpush1.bf16.msra.mxu1 %v16620_v44 }
0x1dae   :  { %13222 = vmatprep.subr.bf16.mxu1 %v16621_v45 }
0x1db1   :  { %13224 = vmatpush1.bf16.msra.mxu1 %v16622_v46 }
0x1db2   :  { %13226 = vmatprep.subr.bf16.mxu1 %v16623_v28 }
0x1db5   :  { %13228 = vmatpush1.bf16.msra.mxu1 %v16624_v36 }
0x1db6   :  { %13230 = vmatprep.subr.bf16.mxu1 %v16625_v27  ;;  %v16636_v27 = vld [vmem:[#allocation25_spill] sm:$0xff] }
0x1db9   :  { %13232 = vmatpush1.bf16.msra.mxu1 %v16626_v63 }
0x1dba   :  { %13234 = vmatprep.subr.bf16.mxu1 %v16627_v58 }
0x1dbd   :  { %13236 = vmatpush1.bf16.msra.mxu1 %v16628_v57  ;;  %v16634_v57 = vld [vmem:[#allocation24_spill] sm:$0xff] }
0x1dbe   :  { %13238 = vmatprep.subr.bf16.mxu1 %v16629_v12  ;;  %v15562_v12 = vld [vmem:[%s16264_s8] ss:$0 sm:$0xff] }
0x1dbf   :  { %16633 = vst [vmem:[#allocation56_spill] sm:$0xff] %v15562_v12 }
0x1dc1   :  { %13240 = vmatpush1.bf16.msra.mxu1 %v16630_v49 }
0x1dc2   :  { %11757 = vmatprep.subr.msk.mxu1 %vm181_vm0, %v16631_v25 }
0x1dc4   :  { %7548 = vmatmul.mubr.f32.vlgmr.msra.gmra.mrb[30].mxu1 %v15523_v13 }
0x1dc5   :  { %11758 = vmatpush1.msk.msra.mxu1 %vm181_vm0, %v16632_v7  ;;  %8653 = vmatprep.mubr.f32.mxu1 %v16424_v16 }
0x1dc6   :  { %13241 = vmatprep.subr.bf16.mxu1 %v16441_v17 }
0x1e77   :  { %v7406_v55 = vpop.f32.mrb[28].mxu1  ;;  %v7478_v6 = vpop.f32.mrb[108].mxu0 }
0x1e78   :  { %v7407_v49 = vadd.f32 %v15562_v12, %v7406_v55  ;;  %v7479_v25 = vadd.f32 %v7478_v6, %v16634_v57  ;;  %v12496_v58 = vpop.f32.mrb[29].mxu1  ;;  %v15566_v63 = vpop.f32.mrb[109].mxu0 }
0x1e79   :  { %16635 = vst [vmem:[#allocation26_spill] sm:$0xff] %v15566_v63 }
0x1e7a   :  { %7411 = vst [vmem:[#allocation7 + $0x20] sm:$0xff] %v7407_v49  ;;  %v7555_v7 = vcombine.high %v7479_v25, %v7479_v25  ;;  %v7562_v36 = vrot.slane %v7479_v25, %v16636_v27 }
0x1e7c   :  { %v7569_v28 = vrot.slane %v7555_v7, %v16636_v27  ;;  %v7570_v46 = vcombine.high %v7562_v36, %v7562_v36  ;;  %v7578_v45 = vrot.slane %v7562_v36, %v16636_v27 }
0x1e7e   :  { %v7571_v44 = vcombine.high %v7569_v28, %v7569_v28  ;;  %v7585_v3 = vrot.slane %v7569_v28, %v16636_v27  ;;  %v7592_v50 = vrot.slane %v7570_v46, %v16636_v27  ;;  %v7600_v55 = vcombine.high %v7578_v45, %v7578_v45 }
0x1e7f   :  { %v7607_v6 = vrot.slane %v7578_v45, %v14147_v10  ;;  %v16638_v45 = vld [vmem:[#allocation16_spill] sm:$0xff] }
0x1e80   :  { %v7599_v58 = vrot.slane %v7571_v44, %v16636_v27  ;;  %v7601_v57 = vcombine.high %v7585_v3, %v7585_v3  ;;  %v7602_v49 = vcombine.high %v7592_v50, %v7592_v50  ;;  %v7611_v12 = vrot.slane %v7592_v50, %v14147_v10  ;;  %v16639_v44 = vld [vmem:[#allocation19_spill] sm:$0xff] }
0x1e81   :  { %v7615_v25 = vrot.slane %v7600_v55, %v14147_v10  ;;  %v7623_v7 = vrot.slane %v7585_v3, %v14147_v10  ;;  %v7644_v36 = vadd.f32 %v7607_v6, %v16637_v42  ;;  %v16641_v55 = vld [vmem:[#allocation18_spill] sm:$0xff]  ;;  %v16643_v42 = vld [vmem:[#allocation23_spill] sm:$0xff] }
0x1e82   :  { %v7603_v19 = vcombine.high %v7599_v58, %v7599_v58  ;;  %v7619_v28 = vrot.slane %v7602_v49, %v14147_v10  ;;  %v7627_v46 = vrot.slane %v7599_v58, %v14147_v10  ;;  %v7631_v11 = vrot.slane %v7601_v57, %v14147_v10  ;;  %v16644_v49 = vld [vmem:[#allocation22_spill] sm:$0xff] }
0x1e83   :  { %v7645_v13 = vadd.f32 %v16638_v45, %v7611_v12  ;;  %v7646_v27 = vadd.f32 %v7615_v25, %v16639_v44  ;;  %v7648_v52 = vadd.f32 %v7623_v7, %v16640_v41  ;;  %13676 = vtanh.f32 %v7644_v36  ;;  %v15593_v12 = vld [vmem:[%s16260_s4] ss:$0 sm:$0xff] }
0x1e84   :  { %v7635_v50 = vrot.slane %v7603_v19, %v14147_v10  ;;  %v7647_v3 = vadd.f32 %v16641_v55, %v7619_v28  ;;  %v7649_v6 = vadd.f32 %v16642_v40, %v7627_v46  ;;  %v7650_v38 = vadd.f32 %v7631_v11, %v16643_v42  ;;  %16645 = vst [vmem:[#allocation53_spill] sm:$0xff] %v15593_v12 }
0x1e85   :  { %13678 = vtanh.f32 %v7645_v13 }
0x1e86   :  { %v7651_v58 = vadd.f32 %v16644_v49, %v7635_v50  ;;  %13680 = vtanh.f32 %v7646_v27 }
0x1e87   :  { %13682 = vtanh.f32 %v7648_v52 }
0x1e88   :  { %13684 = vtanh.f32 %v7647_v3 }
0x1e89   :  { %13686 = vtanh.f32 %v7649_v6 }
0x1e8a   :  { %13688 = vtanh.f32 %v7650_v38 }
0x1e8b   :  { %13690 = vtanh.f32 %v7651_v58 }
0x1e8d   :  { %v13677_v57 = vpop.eup %13676 }
0x1e8e   :  { %v7660_v19 = vmul.f32 %v15593_v12, %v13677_v57 }
0x1e8f   :  { %v13679_v25 = vpop.eup %13678 }
0x1e90   :  { %v13681_v7 = vpop.eup %13680  ;;  %7668 = vadd.xlane.f32.xlu0 %v7660_v19  ;;  %v7661_v36 = vmul.f32 %v15593_v12, %v13679_v25 }
0x1e91   :  { %v7662_v13 = vmul.f32 %v15593_v12, %v13681_v7  ;;  %v13683_v11 = vpop.eup %13682 }
0x1e92   :  { %7670 = vadd.xlane.f32.xlu1 %v7661_v36  ;;  %v7664_v52 = vmul.f32 %v15593_v12, %v13683_v11  ;;  %v13685_v27 = vpop.eup %13684 }
0x1e93   :  { %v7663_v50 = vmul.f32 %v15593_v12, %v13685_v27  ;;  %v13687_v3 = vpop.eup %13686 }
0x1e94   :  { %7672 = vadd.xlane.f32.xlu0 %v7662_v13  ;;  %v7665_v6 = vmul.f32 %v15593_v12, %v13687_v3  ;;  %v13689_v57 = vpop.eup %13688 }
0x1e95   :  { %v7666_v19 = vmul.f32 %v15593_v12, %v13689_v57  ;;  %v13691_v38 = vpop.eup %13690 }
0x1e96   :  { %v7667_v25 = vmul.f32 %v15593_v12, %v13691_v38 }
0x1e97   :  { %v15599_v28 = vpop.f32.mrb[30].mxu1 }
0x1e98   :  { %16646 = vst [vmem:[#allocation55_spill] sm:$0xff] %v15599_v28  ;;  %7676 = vadd.xlane.f32.xlu0 %v7664_v52  ;;  %v15601_v46 = vpop.f32.mrb[31].mxu1 }
0x1e99   :  { %16647 = vst [vmem:[#allocation11_spill] sm:$0xff] %v15601_v46 }
0x1e9c   :  { %7674 = vadd.xlane.f32.xlu0 %v7663_v50 }
0x1ea0   :  { %7678 = vadd.xlane.f32.xlu0 %v7665_v6 }
0x1ea4   :  { %7680 = vadd.xlane.f32.xlu0 %v7666_v19 }
0x1ea8   :  { %7682 = vadd.xlane.f32.xlu0 %v7667_v25 }
0x1f1d   :  { %v7669_v7 = vpop.xlane.xlu0 %7668 }
0x1f1e   :  { %v7695_v27 = vrot.slane %v7669_v7, %v14201_v22 }
0x1f1f   :  { %v7671_v11 = vpop.xlane.xlu1 %7670 }
0x1f20   :  { %v7699_v52 = vrot.slane %v7671_v11, %v14201_v22 }
0x1f21   :  { %v7673_v36 = vpop.xlane.xlu0 %7672 }
0x1f22   :  { %v7703_v50 = vrot.slane %v7673_v36, %v14201_v22  ;;  %v7724_v6 = vsel %vm631_vm2, %v7699_v52, %v7695_v27 }
0x1f24   :  { %v7725_v19 = vsel %vm633_vm3, %v7703_v50, %v7724_v6 }
0x1f25   :  { %v7677_v13 = vpop.xlane.xlu0 %7676 }
0x1f26   :  { %v7711_v49 = vrot.slane %v7677_v13, %v14201_v22 }
0x1f29   :  { %v7675_v58 = vpop.xlane.xlu0 %7674 }
0x1f2a   :  { %v7707_v57 = vrot.slane %v7675_v58, %v14201_v22 }
0x1f2c   :  { %v7726_v25 = vsel %vm635_vm4, %v7707_v57, %v7725_v19 }
0x1f2d   :  { %v7679_v3 = vpop.xlane.xlu0 %7678  ;;  %v7727_v40 = vsel %vm637_vm5, %v7711_v49, %v7726_v25 }
0x1f2e   :  { %v7715_v12 = vrot.slane %v7679_v3, %v14201_v22 }
0x1f30   :  { %v7728_v41 = vsel %vm639_vm6, %v7715_v12, %v7727_v40 }
0x1f31   :  { %v7681_v38 = vpop.xlane.xlu0 %7680 }
0x1f32   :  { %v7719_v42 = vrot.slane %v7681_v38, %v14201_v22 }
0x1f34   :  { %v7729_v27 = vsel %vm641_vm7, %v7719_v42, %v7728_v41 }
0x1f35   :  { %v7683_v55 = vpop.xlane.xlu0 %7682 }
0x1f36   :  { %v7723_v52 = vrot.slane %v7683_v55, %v14201_v22 }
0x1f38   :  { %v7730_v50 = vsel %vm643_vm8, %v7723_v52, %v7729_v27 }
0x1f39   :  { %v7732_v6 = vsel %vm646_vm9, %v7730_v50, -inf }
0x1f3a   :  { %7733 = vmax.xlane.f32.xlu0 %v7732_v6 }
0x1fc7   :  { %v7734_v57 = vpop.xlane.xlu0 %7733 }
0x1fc8   :  { %v7739_v19 = vrot.slane %v7734_v57, %v14147_v10  ;;  %v7743_v44 = vrot.slane %v7734_v57, %v14223_v35  ;;  %v7747_v45 = vrot.slane %v7734_v57, %v14220_v33  ;;  %v7751_v49 = vrot.slane %v7734_v57, %v14226_v62 }
0x1fc9   :  { %v7755_v40 = vrot.slane %v7734_v57, %v14232_v56  ;;  %v7759_v41 = vrot.slane %v7734_v57, %v14236_v26  ;;  %v7763_v50 = vrot.slane %v7734_v57, %v14240_v24  ;;  %v7767_v30 = vrot.slane %v7734_v57, %v14244_v23 }
0x1fca   :  { %v7776_v12 = vsub.f32 %v7669_v7, %v7739_v19  ;;  %v7777_v25 = vsub.f32 %v7671_v11, %v7743_v44  ;;  %v7778_v46 = vsub.f32 %v7673_v36, %v7747_v45  ;;  %v7779_v42 = vsub.f32 %v7675_v58, %v7751_v49 }
0x1fcb   :  { %v7780_v6 = vsub.f32 %v7677_v13, %v7755_v40  ;;  %v7781_v63 = vsub.f32 %v7679_v3, %v7759_v41  ;;  %v7782_v2 = vsub.f32 %v7681_v38, %v7763_v50  ;;  %v7783_v44 = vsub.f32 %v7683_v55, %v7767_v30 }
0x1fcc   :  { %v7784_v52 = vmul.f32 1.442695, %v7776_v12  ;;  %v7786_v27 = vmul.f32 1.442695, %v7777_v25  ;;  %v7788_v28 = vmul.f32 1.442695, %v7778_v46 }
0x1fcd   :  { %v7790_v18 = vmul.f32 1.442695, %v7779_v42  ;;  %v7792_v7 = vmul.f32 1.442695, %v7780_v6  ;;  %v7794_v45 = vmul.f32 1.442695, %v7781_v63 }
0x1fce   :  { %13692 = vpow2.f32 %v7784_v52  ;;  %v7796_v36 = vmul.f32 1.442695, %v7782_v2  ;;  %v7798_v11 = vmul.f32 1.442695, %v7783_v44 }
0x1fcf   :  { %13694 = vpow2.f32 %v7786_v27 }
0x1fd0   :  { %13696 = vpow2.f32 %v7788_v28 }
0x1fd1   :  { %13698 = vpow2.f32 %v7790_v18 }
0x1fd2   :  { %13700 = vpow2.f32 %v7792_v7 }
0x1fd3   :  { %13702 = vpow2.f32 %v7794_v45 }
0x1fd4   :  { %13704 = vpow2.f32 %v7796_v36 }
0x1fd5   :  { %13706 = vpow2.f32 %v7798_v11 }
0x1fd8   :  { %v13693_v58 = vpop.eup %13692 }
0x1fd9   :  { %v13695_v19 = vpop.eup %13694  ;;  %7809 = vperm.xlu0 %13454, %v13693_v58  }
0x1fda   :  { %7812 = vperm.xlu1 %13453, %v13695_v19   ;;  %v13697_v46 = vpop.eup %13696 }
0x1fdb   :  { %v13699_v13 = vpop.eup %13698 }
0x1fdc   :  { %v13701_v3 = vpop.eup %13700 }
0x1fdd   :  { %7815 = vperm.xlu0 %13454, %v13697_v46   ;;  %v13703_v28 = vpop.eup %13702 }
0x1fde   :  { %7818 = vperm.xlu1 %13453, %v13699_v13   ;;  %v13705_v18 = vpop.eup %13704 }
0x1fdf   :  { %v13707_v30 = vpop.eup %13706 }
0x1fe1   :  { %7821 = vperm.xlu0 %13454, %v13701_v3  }
0x1fe2   :  { %7824 = vperm.xlu1 %13453, %v13703_v28  }
0x1fe5   :  { %7827 = vperm.xlu0 %13454, %v13705_v18  }
0x1fe6   :  { %7830 = vperm.xlu1 %13453, %v13707_v30  }
0x2058   :  { %v7810_v2 = vpop.permute.xlu0 %7809 }
0x2059   :  { %v7813_v63 = vpop.permute.xlu1 %7812  ;;  %v7835_v38 = vrot.slane %v7810_v2, %v14201_v22 }
0x205a   :  { %v7839_v55 = vrot.slane %v7813_v63, %v14201_v22 }
0x205c   :  { %v7816_v57 = vpop.permute.xlu0 %7815  ;;  %v7864_v12 = vsel %vm631_vm2, %v7839_v55, %v7835_v38 }
0x205d   :  { %v7819_v49 = vpop.permute.xlu1 %7818  ;;  %v7843_v40 = vrot.slane %v7816_v57, %v14201_v22 }
0x205e   :  { %v7847_v25 = vrot.slane %v7819_v49, %v14201_v22 }
0x205f   :  { %v7865_v41 = vsel %vm633_vm3, %v7843_v40, %v7864_v12 }
0x2060   :  { %v7822_v42 = vpop.permute.xlu0 %7821  ;;  %v7866_v6 = vsel %vm635_vm4, %v7847_v25, %v7865_v41 }
0x2061   :  { %v7825_v52 = vpop.permute.xlu1 %7824  ;;  %v7851_v27 = vrot.slane %v7822_v42, %v14201_v22 }
0x2062   :  { %v7855_v50 = vrot.slane %v7825_v52, %v14201_v22 }
0x2063   :  { %v7867_v7 = vsel %vm637_vm5, %v7851_v27, %v7866_v6 }
0x2064   :  { %v7828_v44 = vpop.permute.xlu0 %7827  ;;  %v7868_v2 = vsel %vm639_vm6, %v7855_v50, %v7867_v7 }
0x2065   :  { %v7831_v45 = vpop.permute.xlu1 %7830  ;;  %v7859_v36 = vrot.slane %v7828_v44, %v14201_v22 }
0x2066   :  { %v7863_v11 = vrot.slane %v7831_v45, %v14201_v22 }
0x2067   :  { %v7869_v63 = vsel %vm641_vm7, %v7859_v36, %v7868_v2 }
0x2068   :  { %v7870_v55 = vsel %vm643_vm8, %v7863_v11, %v7869_v63 }
0x2069   :  { %v7872_v38 = vsel %vm646_vm9, %v7870_v55, 0.0  ;;  %v15682_v55 = vld [vmem:[%s16256_s0 + $0x18] sm:$0xff] }
0x206a   :  { %7873 = vadd.xlane.f32.xlu0 %v7872_v38 }
0x20f7   :  { %v7874_v57 = vpop.xlane.xlu0 %7873 }
0x20f8   :  { %13708 = vrcp.f32 %v7874_v57 }
0x2102   :  { %v13709_v49 = vpop.eup %13708 }
0x2103   :  { %v7880_v40 = vrot.slane %v13709_v49, %v14147_v10  ;;  %v7884_v25 = vrot.slane %v13709_v49, %v14223_v35  ;;  %v7888_v42 = vrot.slane %v13709_v49, %v14220_v33  ;;  %v7892_v27 = vrot.slane %v13709_v49, %v14226_v62 }
0x2104   :  { %v7896_v6 = vrot.slane %v13709_v49, %v14232_v56  ;;  %v7900_v44 = vrot.slane %v13709_v49, %v14236_v26  ;;  %v7904_v45 = vrot.slane %v13709_v49, %v14240_v24  ;;  %v7908_v36 = vrot.slane %v13709_v49, %v14244_v23  ;;  %v15693_v49 = vld [vmem:[%s16256_s0 + $0x20] sm:$0xff] }
0x2105   :  { %v7917_v12 = vmul.f32 %v13693_v58, %v7880_v40  ;;  %v7918_v41 = vmul.f32 %v13695_v19, %v7884_v25  ;;  %v7919_v52 = vmul.f32 %v13697_v46, %v7888_v42  ;;  %v7920_v50 = vmul.f32 %v13699_v13, %v7892_v27  ;;  %v15704_v25 = vld [vmem:[%s16256_s0 + $0x28] sm:$0xff] }
0x2106   :  { %v7921_v7 = vmul.f32 %v13701_v3, %v7896_v6  ;;  %v7922_v58 = vmul.f32 %v13703_v28, %v7900_v44  ;;  %v7923_v19 = vmul.f32 %v13705_v18, %v7904_v45  ;;  %v7924_v46 = vmul.f32 %v13707_v30, %v7908_v36  ;;  %v15660_v3 = vld [vmem:[%s16256_s0 + $0x8] sm:$0xff]  ;;  %v15671_v30 = vld [vmem:[%s16256_s0 + $0x10] sm:$0xff]  ;;  %v15726_v6 = vld [vmem:[%s16256_s0 + $0x38] sm:$0xff] }
0x2107   :  { %7927 = vperm.xlu1 %13453, %v7917_v12  }
0x210b   :  { %8007 = vperm.xlu1 %13453, %v7918_v41  }
0x210f   :  { %8087 = vperm.xlu1 %13453, %v7919_v52   ;;  %v15715_v52 = vld [vmem:[%s16256_s0 + $0x30] sm:$0xff] }
0x2113   :  { %8167 = vperm.xlu1 %13453, %v7920_v50  }
0x2117   :  { %8247 = vperm.xlu1 %13453, %v7921_v7  }
0x211b   :  { %8327 = vperm.xlu1 %13453, %v7922_v58  }
0x211f   :  { %8407 = vperm.xlu1 %13453, %v7923_v19  }
0x2123   :  { %8487 = vperm.xlu1 %13453, %v7924_v46  }
0x2186   :  { %v7928_v11 = vpop.permute.xlu1 %7927 }
0x2187   :  { %v7932_v13 = vrot.slane %v7928_v11, %v14201_v22 }
0x2189   :  { %12500 = vmatmul.mubr.msk.f32.vlgmr.msra.gmra.mrb[110].mxu0 %vm646_vm9, %v7932_v13 }
0x218a   :  { %12503 = vmatpush3.msra.mxu0 %v15660_v3  ;;  %v8008_v28 = vpop.permute.xlu1 %8007  ;;  %12504 = vmatprep.mubr.msk.f32.mxu0 %vm13934_vm10, %v16424_v16 }
0x218b   :  { %v8012_v18 = vrot.slane %v8008_v28, %v14201_v22  ;;  %12507 = vmatprep.subr.mxu0 %v16424_v16 }
0x218d   :  { %12505 = vmatmul.mubr.msk.f32.vlgmr.msra.gmra.mrb[112].mxu0 %vm646_vm9, %v8012_v18 }
0x218e   :  { %12508 = vmatpush3.msra.mxu0 %v15671_v30  ;;  %v8088_v2 = vpop.permute.xlu1 %8087  ;;  %12509 = vmatprep.mubr.msk.f32.mxu0 %vm13934_vm10, %v16424_v16 }
0x218f   :  { %v8092_v63 = vrot.slane %v8088_v2, %v14201_v22  ;;  %12512 = vmatprep.subr.mxu0 %v16424_v16 }
0x2191   :  { %12510 = vmatmul.mubr.msk.f32.vlgmr.msra.gmra.mrb[114].mxu0 %vm646_vm9, %v8092_v63 }
0x2192   :  { %12513 = vmatpush3.msra.mxu0 %v15682_v55  ;;  %v8168_v38 = vpop.permute.xlu1 %8167  ;;  %12514 = vmatprep.mubr.msk.f32.mxu0 %vm13934_vm10, %v16424_v16 }
0x2193   :  { %v8172_v57 = vrot.slane %v8168_v38, %v14201_v22  ;;  %12517 = vmatprep.subr.mxu0 %v16424_v16 }
0x2195   :  { %12515 = vmatmul.mubr.msk.f32.vlgmr.msra.gmra.mrb[116].mxu0 %vm646_vm9, %v8172_v57 }
0x2196   :  { %12518 = vmatpush3.msra.mxu0 %v15693_v49  ;;  %v8248_v40 = vpop.permute.xlu1 %8247  ;;  %12519 = vmatprep.mubr.msk.f32.mxu0 %vm13934_vm10, %v16424_v16 }
0x2197   :  { %v8252_v12 = vrot.slane %v8248_v40, %v14201_v22  ;;  %12522 = vmatprep.subr.mxu0 %v16424_v16 }
0x2199   :  { %12520 = vmatmul.mubr.msk.f32.vlgmr.msra.gmra.mrb[118].mxu0 %vm646_vm9, %v8252_v12 }
0x219a   :  { %12523 = vmatpush3.msra.mxu0 %v15704_v25  ;;  %v8328_v41 = vpop.permute.xlu1 %8327  ;;  %12524 = vmatprep.mubr.msk.f32.mxu0 %vm13934_vm10, %v16424_v16 }
0x219b   :  { %v8332_v42 = vrot.slane %v8328_v41, %v14201_v22  ;;  %12527 = vmatprep.subr.mxu0 %v16424_v16 }
0x219d   :  { %12525 = vmatmul.mubr.msk.f32.vlgmr.msra.gmra.mrb[120].mxu0 %vm646_vm9, %v8332_v42 }
0x219e   :  { %12528 = vmatpush3.msra.mxu0 %v15715_v52  ;;  %v8408_v27 = vpop.permute.xlu1 %8407  ;;  %12529 = vmatprep.mubr.msk.f32.mxu0 %vm13934_vm10, %v16424_v16 }
0x219f   :  { %v8412_v50 = vrot.slane %v8408_v27, %v14201_v22  ;;  %12532 = vmatprep.subr.mxu0 %v16424_v16 }
0x21a1   :  { %12530 = vmatmul.mubr.msk.f32.vlgmr.msra.gmra.mrb[122].mxu0 %vm646_vm9, %v8412_v50 }
0x21a2   :  { %12533 = vmatpush3.msra.mxu0 %v15726_v6  ;;  %v8488_v7 = vpop.permute.xlu1 %8487  ;;  %12534 = vmatprep.mubr.msk.f32.mxu0 %vm13934_vm10, %v16424_v16 }
0x21a3   :  { %v8492_v44 = vrot.slane %v8488_v7, %v14201_v22  ;;  %12537 = vmatprep.subr.mxu0 %v16424_v16 }
0x21a5   :  { %12535 = vmatmul.mubr.msk.f32.vlgmr.msra.gmra.mrb[124].mxu0 %vm646_vm9, %v8492_v44 }
0x21a6   :  { %12538 = vmatpush3.msk.msra.mxu0 %vm181_vm0, %v15462_v47  ;;  %12539 = vmatprep.mubr.msk.f32.mxu0 %vm13934_vm10, %v16424_v16 }
0x21a7   :  { %13266 = vmatprep.subr.bf16.mxu0 %v14015_v4 }
0x225c   :  { %v8001_v58 = vpop.f32.mrb[110].mxu0 }
0x225d   :  { %v12501_v45 = vpop.f32.mrb[111].mxu0 }
0x2260   :  { %v8081_v19 = vpop.f32.mrb[112].mxu0 }
0x2261   :  { %v8573_v36 = vrot.slane %v8081_v19, 7  ;;  %v12506_v46 = vpop.f32.mrb[113].mxu0 }
0x2263   :  { %v8574_v11 = vsel %vm631_vm2, %v8573_v36, %v8001_v58 }
0x2264   :  { %v8161_v13 = vpop.f32.mrb[114].mxu0 }
0x2265   :  { %v8575_v28 = vrot.slane %v8161_v13, 6  ;;  %v12511_v18 = vpop.f32.mrb[115].mxu0 }
0x2266   :  { %v16648_v18 = vld [vmem:[#allocation27_spill] sm:$0xff] }
0x2267   :  { %v8576_v2 = vsel %vm633_vm3, %v8575_v28, %v8574_v11 }
0x2268   :  { %v8241_v63 = vpop.f32.mrb[116].mxu0 }
0x2269   :  { %v8577_v38 = vrot.slane %v8241_v63, 5  ;;  %v12516_v47 = vpop.f32.mrb[117].mxu0 }
0x226a   :  { %v16650_v47 = vld [vmem:[#allocation26_spill] sm:$0xff] }
0x226b   :  { %v8578_v57 = vsel %vm635_vm4, %v8577_v38, %v8576_v2  ;;  %v16649_v38 = vld [vmem:[#allocation47_spill] sm:$0xff] }
0x226c   :  { %v8321_v40 = vpop.f32.mrb[118].mxu0 }
0x226d   :  { %v8579_v12 = vrot.slane %v8321_v40, 4  ;;  %v12521_v41 = vpop.f32.mrb[119].mxu0  ;;  %v16651_v40 = vld [vmem:[#allocation48_spill] sm:$0xff] }
0x226f   :  { %v8580_v42 = vsel %vm637_vm5, %v8579_v12, %v8578_v57  ;;  %v7481_v57 = vadd.f32 %v16650_v47, %v16649_v38  ;;  %v16655_v38 = vld [vmem:[#allocation51_spill] sm:$0xff] }
0x2270   :  { %v8401_v27 = vpop.f32.mrb[120].mxu0 }
0x2271   :  { %v8581_v50 = vrot.slane %v8401_v27, 3  ;;  %v12526_v7 = vpop.f32.mrb[121].mxu0  ;;  %v16652_v27 = vld [vmem:[#allocation49_spill] sm:$0xff] }
0x2273   :  { %v8582_v44 = vsel %vm639_vm6, %v8581_v50, %v8580_v42  ;;  %v16653_v50 = vld [vmem:[#allocation55_spill] sm:$0xff] }
0x2274   :  { %v8481_v58 = vpop.f32.mrb[122].mxu0  ;;  %v7550_v7 = vadd.f32 %v16653_v50, %v16652_v27 }
0x2275   :  { %v8583_v45 = vrot.slane %v8481_v58, 2  ;;  %v12531_v19 = vpop.f32.mrb[123].mxu0 }
0x2277   :  { %v8584_v36 = vsel %vm641_vm7, %v8583_v45, %v8582_v44  ;;  %v16654_v44 = vld [vmem:[#allocation50_spill] sm:$0xff] }
0x2278   :  { %v8561_v46 = vpop.f32.mrb[124].mxu0 }
0x2279   :  { %v8585_v11 = vrot.slane %v8561_v46, 1  ;;  %v12536_v13 = vpop.f32.mrb[125].mxu0 }
0x227b   :  { %v8586_v28 = vsel %vm643_vm8, %v8585_v11, %v8584_v36 }
0x227c   :  { %11759 = vmatmul.mubr.msk.f32.vlgmr.msra.gmra.mrb[32].mxu1 %vm156_vm1, %v8586_v28  ;;  %12540 = vmatmul.mubr.msk.f32.vlgmr.msra.gmra.mrb[126].mxu0 %vm156_vm1, %v8586_v28 }
0x227d   :  { %13243 = vmatpush3.bf16.msra.mxu1 %v14457_v0  ;;  %13268 = vmatpush1.bf16.msra.mxu0 %v14017_v8 }
0x227e   :  { %13244 = vmatprep.subr.bf16.mxu1 %v16441_v17  ;;  %13270 = vmatprep.subr.bf16.mxu0 %v14019_v9 }
0x227f   :  { %12574 = vmatprep.mubr.msk.f32.mxu1 %vm13934_vm10, %v16424_v16  ;;  %8887 = vmatprep.mubr.f32.mxu0 %v16424_v16 }
0x2281   :  { %13246 = vmatpush3.bf16.msra.mxu1 %v14462_v1  ;;  %13272 = vmatpush1.bf16.msra.mxu0 %v14023_v14 }
0x2282   :  { %13247 = vmatprep.subr.bf16.mxu1 %v16441_v17  ;;  %13274 = vmatprep.subr.bf16.mxu0 %v14026_v15 }
0x2285   :  { %13249 = vmatpush3.bf16.msra.mxu1 %v14466_v48  ;;  %13276 = vmatpush1.bf16.msra.mxu0 %v14029_v20 }
0x2286   :  { %13250 = vmatprep.subr.bf16.mxu1 %v16441_v17  ;;  %13278 = vmatprep.subr.bf16.mxu0 %v14032_v21 }
0x2289   :  { %13252 = vmatpush3.bf16.msra.mxu1 %v14470_v59  ;;  %13280 = vmatpush1.bf16.msra.mxu0 %v14049_v29 }
0x228a   :  { %13253 = vmatprep.subr.bf16.mxu1 %v16441_v17  ;;  %13282 = vmatprep.subr.bf16.mxu0 %v14058_v31 }
0x228d   :  { %13255 = vmatpush3.bf16.msra.mxu1 %v14473_v51  ;;  %13284 = vmatpush1.bf16.msra.mxu0 %v14072_v37 }
0x228e   :  { %13256 = vmatprep.subr.bf16.mxu1 %v16441_v17  ;;  %13286 = vmatprep.subr.bf16.mxu0 %v14080_v39 }
0x2291   :  { %13258 = vmatpush3.bf16.msra.mxu1 %v16455_v34  ;;  %13288 = vmatpush1.bf16.msra.mxu0 %v16456_v61 }
0x2292   :  { %13259 = vmatprep.subr.bf16.mxu1 %v16441_v17  ;;  %13290 = vmatprep.subr.bf16.mxu0 %v16597_v5 }
0x2295   :  { %13261 = vmatpush3.bf16.msra.mxu1 %v16598_v53  ;;  %13292 = vmatpush1.bf16.msra.mxu0 %v16599_v54 }
0x2296   :  { %13262 = vmatprep.subr.bf16.mxu1 %v16441_v17  ;;  %13294 = vmatprep.subr.bf16.mxu0 %v16600_v32 }
0x2299   :  { %13264 = vmatpush3.bf16.msra.mxu1 %v16601_v60  ;;  %13296 = vmatpush1.bf16.msra.mxu0 %v16602_v43 }
0x229a   :  { %13298 = vmatprep.subr.bf16.mxu1 %v16648_v18  ;;  %12577 = vmatprep.subr.mxu0 %v16424_v16  ;;  %v16657_v18 = vld [vmem:[#allocation52_spill] sm:$0xff] }
0x234f   :  { %v8655_v2 = vpop.f32.mrb[32].mxu1  ;;  %v8726_v63 = vpop.f32.mrb[126].mxu0 }
0x2350   :  { %v8656_v12 = vadd.f32 %v8655_v2, %v16651_v40  ;;  %v8657_v41 = vpop.f32.mrb[33].mxu1  ;;  %v12541_v42 = vpop.f32.mrb[127].mxu0  ;;  %v16656_v2 = vld [vmem:[#allocation11_spill] sm:$0xff]  ;;  %v8727_v43 = vadd.f32 %v8726_v63, %v16657_v18  ;;  %v16661_v63 = vld [vmem:[#allocation29_spill] sm:$0xff] }
0x2351   :  { %v8658_v58 = vadd.f32 %v8657_v41, %v16654_v44  ;;  %v7552_v40 = vadd.f32 %v16656_v2, %v16655_v38  ;;  %v16668_v2 = vld [vmem:[#allocation35_spill] sm:$0xff]  ;;  %v16685_v44 = vld [vmem:[#allocation21_spill] sm:$0xff] }
0x2352   :  { %v8730_v45 = vadd.f32 %v8656_v12, %v7481_v57 }
0x2353   :  { %v8737_v19 = vadd.f32 %v8658_v58, %v7550_v7 }
0x2354   :  { %v11762_v36 = vmul.f32 -1.442695, %v8730_v45  ;;  %v16658_v45 = vld [vmem:[#allocation54_spill] sm:$0xff] }
0x2355   :  { %v11763_v46 = vmul.f32 -1.442695, %v8737_v19 }
0x2356   :  { %13710 = vpow2.f32 %v11762_v36 }
0x2357   :  { %13712 = vpow2.f32 %v11763_v46  ;;  %v16660_v46 = vld [vmem:[#allocation28_spill] sm:$0xff] }
0x2360   :  { %v13711_v11 = vpop.eup %13710 }
0x2361   :  { %v8734_v13 = vadd.f32 1.0, %v13711_v11  ;;  %v13713_v28 = vpop.eup %13712  ;;  %v16664_v11 = vld [vmem:[#allocation31_spill] sm:$0xff] }
0x2362   :  { %v8741_v47 = vadd.f32 1.0, %v13713_v28  ;;  %v16666_v28 = vld [vmem:[#allocation33_spill] sm:$0xff] }
0x2363   :  { %13714 = vrcp.f32 %v8734_v13  ;;  %v16665_v13 = vld [vmem:[#allocation32_spill] sm:$0xff] }
0x2364   :  { %13716 = vrcp.f32 %v8741_v47  ;;  %v16667_v47 = vld [vmem:[#allocation34_spill] sm:$0xff] }
0x236d   :  { %v13715_v42 = vpop.eup %13714 }
0x236e   :  { %v8744_v50 = vmul.f32 %v13715_v42, %v7552_v40  ;;  %v13717_v57 = vpop.eup %13716  ;;  %v16663_v40 = vld [vmem:[#allocation30_spill] sm:$0xff]  ;;  %v16669_v42 = vld [vmem:[#allocation36_spill] sm:$0xff] }
0x236f   :  { %v8747_v12 = vsub.f32 1.0, %v13717_v57  ;;  %v8749_v19 = vmul.f32 %v13717_v57, %v16658_v45  ;;  %v16672_v57 = vld [vmem:[#allocation39_spill] sm:$0xff] }
0x2370   :  { %v8745_v41 = vadd.f32 %v8744_v50, %v8727_v43  ;;  %v16662_v43 = vld [vmem:[#allocation44_spill] sm:$0xff]  ;;  %v16670_v50 = vld [vmem:[#allocation37_spill] sm:$0xff]  ;;  %v16676_v45 = vld [vmem:[#allocation43_spill] sm:$0xff] }
0x2372   :  { %13718 = vtanh.f32 %v8745_v41  ;;  %v16671_v41 = vld [vmem:[#allocation38_spill] sm:$0xff] }
0x237c   :  { %v13719_v7 = vpop.eup %13718 }
0x237d   :  { %v8748_v58 = vmul.f32 %v13719_v7, %v8747_v12  ;;  %v16673_v12 = vld [vmem:[#allocation40_spill] sm:$0xff]  ;;  %v16674_v7 = vld [vmem:[#allocation41_spill] sm:$0xff] }
0x237f   :  { %v15793_v36 = vadd.f32 %v8749_v19, %v8748_v58  ;;  %v16675_v58 = vld [vmem:[#allocation42_spill] sm:$0xff]  ;;  %v15823_v19 = vld [vmem:[%s16261_s5] sm:$0xff] }
0x2380   :  { %16677 = vst [vmem:[#allocation55_spill] sm:$0xff] %v15823_v19 }
0x2381   :  { %16659 = vst [vmem:[#allocation26_spill] sm:$0xff] %v15793_v36  ;;  %12575 = vmatmul.mubr.f32.vlgmr.msra.gmra.mrb[34].mxu1 %v15793_v36  ;;  %8888 = vmatmul.mubr.f32.vlgmr.msra.gmra.mrb[128].mxu0 %v15793_v36 }
0x2382   :  { %13300 = vmatpush1.bf16.msra.mxu1 %v16660_v46  ;;  %8958 = vmatprep.mubr.f32.mxu1 %v16424_v16  ;;  %v16682_v46 = vld [vmem:[#allocation17_spill] sm:$0xff] }
0x2383   :  { %13302 = vmatprep.subr.bf16.mxu1 %v16661_v63  ;;  %12578 = vmatpush3.msra.mxu0 %v16662_v43 }
0x2384   :  { %12579 = vmatprep.mubr.msk.f32.mxu0 %vm13934_vm10, %v16424_v16  ;;  %12582 = vmatprep.subr.mxu0 %v16424_v16 }
0x2386   :  { %13304 = vmatpush1.bf16.msra.mxu1 %v16663_v40 }
0x2387   :  { %13306 = vmatprep.subr.bf16.mxu1 %v16664_v11 }
0x238a   :  { %13308 = vmatpush1.bf16.msra.mxu1 %v16665_v13 }
0x238b   :  { %13310 = vmatprep.subr.bf16.mxu1 %v16666_v28 }
0x238e   :  { %13312 = vmatpush1.bf16.msra.mxu1 %v16667_v47 }
0x238f   :  { %13314 = vmatprep.subr.bf16.mxu1 %v16668_v2  ;;  %v16681_v2 = vld [vmem:[#allocation25_spill] sm:$0xff] }
0x2392   :  { %13316 = vmatpush1.bf16.msra.mxu1 %v16669_v42 }
0x2393   :  { %13318 = vmatprep.subr.bf16.mxu1 %v16670_v50 }
0x2396   :  { %13320 = vmatpush1.bf16.msra.mxu1 %v16671_v41 }
0x2397   :  { %13322 = vmatprep.subr.bf16.mxu1 %v16672_v57  ;;  %v16679_v57 = vld [vmem:[#allocation24_spill] sm:$0xff] }
0x239a   :  { %13324 = vmatpush1.bf16.msra.mxu1 %v16673_v12 }
0x239b   :  { %13326 = vmatprep.subr.bf16.mxu1 %v16674_v7 }
0x239e   :  { %13328 = vmatpush1.bf16.msra.mxu1 %v16675_v58  ;;  %v16678_v58 = vld [vmem:[#allocation56_spill] sm:$0xff] }
0x239f   :  { %11772 = vmatprep.subr.msk.mxu1 %vm181_vm0, %v16676_v45 }
0x23a1   :  { %8959 = vmatmul.mubr.f32.vlgmr.msra.gmra.mrb[36].mxu1 %v15793_v36 }
0x23a2   :  { %11773 = vmatpush1.msk.msra.mxu1 %vm181_vm0, %v15823_v19  ;;  %10064 = vmatprep.mubr.f32.mxu1 %v16424_v16 }
0x23a3   :  { %13329 = vmatprep.subr.bf16.mxu1 %v16441_v17 }
0x2454   :  { %v8817_v43 = vpop.f32.mrb[34].mxu1  ;;  %v8889_v7 = vpop.f32.mrb[128].mxu0 }
0x2455   :  { %v8818_v12 = vadd.f32 %v16678_v58, %v8817_v43  ;;  %v8890_v45 = vadd.f32 %v8889_v7, %v16679_v57  ;;  %v12576_v41 = vpop.f32.mrb[35].mxu1  ;;  %v15831_v50 = vpop.f32.mrb[129].mxu0 }
0x2456   :  { %16680 = vst [vmem:[#allocation11_spill] sm:$0xff] %v15831_v50  ;;  %v16687_v50 = vld [vmem:[#allocation20_spill] sm:$0xff] }
0x2457   :  { %8822 = vst [vmem:[#allocation7 + $0x28] sm:$0xff] %v8818_v12  ;;  %v8966_v42 = vcombine.high %v8890_v45, %v8890_v45  ;;  %v8973_v47 = vrot.slane %v8890_v45, %v16681_v2 }
0x2459   :  { %v8980_v28 = vrot.slane %v8966_v42, %v16681_v2  ;;  %v8981_v19 = vcombine.high %v8973_v47, %v8973_v47  ;;  %v8989_v13 = vrot.slane %v8973_v47, %v16681_v2 }
0x245b   :  { %v8982_v11 = vcombine.high %v8980_v28, %v8980_v28  ;;  %v8996_v40 = vrot.slane %v8980_v28, %v16681_v2  ;;  %v9003_v63 = vrot.slane %v8981_v19, %v16681_v2  ;;  %v9011_v58 = vcombine.high %v8989_v13, %v8989_v13 }
0x245c   :  { %v9018_v7 = vrot.slane %v8989_v13, %v14147_v10  ;;  %v16683_v13 = vld [vmem:[#allocation16_spill] sm:$0xff] }
0x245d   :  { %v9010_v41 = vrot.slane %v8982_v11, %v16681_v2  ;;  %v9012_v43 = vcombine.high %v8996_v40, %v8996_v40  ;;  %v9013_v12 = vcombine.high %v9003_v63, %v9003_v63  ;;  %v9022_v57 = vrot.slane %v9003_v63, %v14147_v10  ;;  %v16684_v11 = vld [vmem:[#allocation19_spill] sm:$0xff] }
0x245e   :  { %v9026_v45 = vrot.slane %v9011_v58, %v14147_v10  ;;  %v9034_v42 = vrot.slane %v8996_v40, %v14147_v10  ;;  %v9055_v47 = vadd.f32 %v9018_v7, %v16682_v46  ;;  %v16686_v58 = vld [vmem:[#allocation18_spill] sm:$0xff]  ;;  %v16688_v46 = vld [vmem:[#allocation23_spill] sm:$0xff] }
0x245f   :  { %v9014_v36 = vcombine.high %v9010_v41, %v9010_v41  ;;  %v9030_v28 = vrot.slane %v9013_v12, %v14147_v10  ;;  %v9038_v19 = vrot.slane %v9010_v41, %v14147_v10  ;;  %v9042_v18 = vrot.slane %v9012_v43, %v14147_v10  ;;  %v16689_v12 = vld [vmem:[#allocation22_spill] sm:$0xff] }
0x2460   :  { %v9056_v38 = vadd.f32 %v16683_v13, %v9022_v57  ;;  %v9057_v2 = vadd.f32 %v9026_v45, %v16684_v11  ;;  %v9059_v27 = vadd.f32 %v9034_v42, %v16685_v44  ;;  %13720 = vtanh.f32 %v9055_v47  ;;  %v16690_v57 = vld [vmem:[#allocation53_spill] sm:$0xff] }
0x2461   :  { %v9046_v63 = vrot.slane %v9014_v36, %v14147_v10  ;;  %v9058_v40 = vadd.f32 %v16686_v58, %v9030_v28  ;;  %v9060_v7 = vadd.f32 %v16687_v50, %v9038_v19  ;;  %v9061_v60 = vadd.f32 %v9042_v18, %v16688_v46 }
0x2462   :  { %13722 = vtanh.f32 %v9056_v38 }
0x2463   :  { %v9062_v41 = vadd.f32 %v16689_v12, %v9046_v63  ;;  %13724 = vtanh.f32 %v9057_v2 }
0x2464   :  { %13726 = vtanh.f32 %v9059_v27 }
0x2465   :  { %13728 = vtanh.f32 %v9058_v40 }
0x2466   :  { %13730 = vtanh.f32 %v9060_v7 }
0x2467   :  { %13732 = vtanh.f32 %v9061_v60 }
0x2468   :  { %13734 = vtanh.f32 %v9062_v41 }
0x246a   :  { %v13721_v43 = vpop.eup %13720 }
0x246b   :  { %v9071_v45 = vmul.f32 %v16690_v57, %v13721_v43 }
0x246c   :  { %v13723_v11 = vpop.eup %13722 }
0x246d   :  { %v13725_v42 = vpop.eup %13724  ;;  %9079 = vadd.xlane.f32.xlu0 %v9071_v45  ;;  %v9072_v36 = vmul.f32 %v16690_v57, %v13723_v11 }
0x246e   :  { %v9073_v47 = vmul.f32 %v16690_v57, %v13725_v42  ;;  %v13727_v28 = vpop.eup %13726 }
0x246f   :  { %9081 = vadd.xlane.f32.xlu1 %v9072_v36  ;;  %v9075_v18 = vmul.f32 %v16690_v57, %v13727_v28  ;;  %v13729_v38 = vpop.eup %13728 }
0x2470   :  { %v9074_v19 = vmul.f32 %v16690_v57, %v13729_v38  ;;  %v13731_v63 = vpop.eup %13730 }
0x2471   :  { %9083 = vadd.xlane.f32.xlu0 %v9073_v47  ;;  %v9076_v11 = vmul.f32 %v16690_v57, %v13731_v63  ;;  %v13733_v40 = vpop.eup %13732 }
0x2472   :  { %v9077_v7 = vmul.f32 %v16690_v57, %v13733_v40  ;;  %v13735_v60 = vpop.eup %13734 }
0x2473   :  { %v9078_v43 = vmul.f32 %v16690_v57, %v13735_v60 }
0x2474   :  { %v15859_v27 = vpop.f32.mrb[36].mxu1 }
0x2475   :  { %16691 = vst [vmem:[#allocation54_spill] sm:$0xff] %v15859_v27  ;;  %9087 = vadd.xlane.f32.xlu0 %v9075_v18  ;;  %v15861_v2 = vpop.f32.mrb[37].mxu1 }
0x2476   :  { %16692 = vst [vmem:[#allocation44_spill] sm:$0xff] %v15861_v2 }
0x2479   :  { %9085 = vadd.xlane.f32.xlu0 %v9074_v19 }
0x247d   :  { %9089 = vadd.xlane.f32.xlu0 %v9076_v11 }
0x2481   :  { %9091 = vadd.xlane.f32.xlu0 %v9077_v7 }
0x2485   :  { %9093 = vadd.xlane.f32.xlu0 %v9078_v43 }
0x24fa   :  { %v9080_v45 = vpop.xlane.xlu0 %9079 }
0x24fb   :  { %v9106_v18 = vrot.slane %v9080_v45, %v14201_v22 }
0x24fc   :  { %v9082_v47 = vpop.xlane.xlu1 %9081 }
0x24fd   :  { %v9110_v28 = vrot.slane %v9082_v47, %v14201_v22 }
0x24fe   :  { %v9084_v42 = vpop.xlane.xlu0 %9083 }
0x24ff   :  { %v9114_v38 = vrot.slane %v9084_v42, %v14201_v22  ;;  %v9135_v63 = vsel %vm631_vm2, %v9110_v28, %v9106_v18 }
0x2501   :  { %v9136_v40 = vsel %vm633_vm3, %v9114_v38, %v9135_v63 }
0x2502   :  { %v9088_v36 = vpop.xlane.xlu0 %9087 }
0x2503   :  { %v9122_v43 = vrot.slane %v9088_v36, %v14201_v22 }
0x2506   :  { %v9086_v41 = vpop.xlane.xlu0 %9085 }
0x2507   :  { %v9118_v11 = vrot.slane %v9086_v41, %v14201_v22 }
0x2509   :  { %v9137_v7 = vsel %vm635_vm4, %v9118_v11, %v9136_v40 }
0x250a   :  { %v9090_v19 = vpop.xlane.xlu0 %9089  ;;  %v9138_v46 = vsel %vm637_vm5, %v9122_v43, %v9137_v7 }
0x250b   :  { %v9126_v60 = vrot.slane %v9090_v19, %v14201_v22 }
0x250d   :  { %v9139_v58 = vsel %vm639_vm6, %v9126_v60, %v9138_v46 }
0x250e   :  { %v9092_v57 = vpop.xlane.xlu0 %9091 }
0x250f   :  { %v9130_v12 = vrot.slane %v9092_v57, %v14201_v22 }
0x2511   :  { %v9140_v18 = vsel %vm641_vm7, %v9130_v12, %v9139_v58 }
0x2512   :  { %v9094_v50 = vpop.xlane.xlu0 %9093 }
0x2513   :  { %v9134_v28 = vrot.slane %v9094_v50, %v14201_v22 }
0x2515   :  { %v9141_v38 = vsel %vm643_vm8, %v9134_v28, %v9140_v18 }
0x2516   :  { %v9143_v63 = vsel %vm646_vm9, %v9141_v38, -inf }
0x2517   :  { %9144 = vmax.xlane.f32.xlu0 %v9143_v63 }
0x25a4   :  { %v9145_v11 = vpop.xlane.xlu0 %9144 }
0x25a5   :  { %v9150_v40 = vrot.slane %v9145_v11, %v14147_v10  ;;  %v9154_v44 = vrot.slane %v9145_v11, %v14223_v35  ;;  %v9158_v13 = vrot.slane %v9145_v11, %v14220_v33  ;;  %v9162_v7 = vrot.slane %v9145_v11, %v14226_v62 }
0x25a6   :  { %v9166_v46 = vrot.slane %v9145_v11, %v14232_v56  ;;  %v9170_v58 = vrot.slane %v9145_v11, %v14236_v26  ;;  %v9174_v38 = vrot.slane %v9145_v11, %v14240_v24  ;;  %v9178_v32 = vrot.slane %v9145_v11, %v14244_v23 }
0x25a7   :  { %v9187_v60 = vsub.f32 %v9080_v45, %v9150_v40  ;;  %v9188_v43 = vsub.f32 %v9082_v47, %v9154_v44  ;;  %v9189_v2 = vsub.f32 %v9084_v42, %v9158_v13  ;;  %v9190_v12 = vsub.f32 %v9086_v41, %v9162_v7 }
0x25a8   :  { %v9191_v63 = vsub.f32 %v9088_v36, %v9166_v46  ;;  %v9192_v54 = vsub.f32 %v9090_v19, %v9170_v58  ;;  %v9193_v5 = vsub.f32 %v9092_v57, %v9174_v38  ;;  %v9194_v44 = vsub.f32 %v9094_v50, %v9178_v32 }
0x25a9   :  { %v9195_v28 = vmul.f32 1.442695, %v9187_v60  ;;  %v9197_v18 = vmul.f32 1.442695, %v9188_v43  ;;  %v9199_v27 = vmul.f32 1.442695, %v9189_v2 }
0x25aa   :  { %v9201_v53 = vmul.f32 1.442695, %v9190_v12  ;;  %v9203_v45 = vmul.f32 1.442695, %v9191_v63  ;;  %v9205_v13 = vmul.f32 1.442695, %v9192_v54 }
0x25ab   :  { %13736 = vpow2.f32 %v9195_v28  ;;  %v9207_v42 = vmul.f32 1.442695, %v9193_v5  ;;  %v9209_v47 = vmul.f32 1.442695, %v9194_v44 }
0x25ac   :  { %13738 = vpow2.f32 %v9197_v18 }
0x25ad   :  { %13740 = vpow2.f32 %v9199_v27 }
0x25ae   :  { %13742 = vpow2.f32 %v9201_v53 }
0x25af   :  { %13744 = vpow2.f32 %v9203_v45 }
0x25b0   :  { %13746 = vpow2.f32 %v9205_v13 }
0x25b1   :  { %13748 = vpow2.f32 %v9207_v42 }
0x25b2   :  { %13750 = vpow2.f32 %v9209_v47 }
0x25b5   :  { %v13737_v41 = vpop.eup %13736 }
0x25b6   :  { %v13739_v40 = vpop.eup %13738  ;;  %9220 = vperm.xlu0 %13454, %v13737_v41  }
0x25b7   :  { %9223 = vperm.xlu1 %13453, %v13739_v40   ;;  %v13741_v2 = vpop.eup %13740 }
0x25b8   :  { %v13743_v36 = vpop.eup %13742 }
0x25b9   :  { %v13745_v19 = vpop.eup %13744 }
0x25ba   :  { %9226 = vperm.xlu0 %13454, %v13741_v2   ;;  %v13747_v27 = vpop.eup %13746 }
0x25bb   :  { %9229 = vperm.xlu1 %13453, %v13743_v36   ;;  %v13749_v53 = vpop.eup %13748 }
0x25bc   :  { %v13751_v54 = vpop.eup %13750 }
0x25be   :  { %9232 = vperm.xlu0 %13454, %v13745_v19  }
0x25bf   :  { %9235 = vperm.xlu1 %13453, %v13747_v27  }
0x25c2   :  { %9238 = vperm.xlu0 %13454, %v13749_v53  }
0x25c3   :  { %9241 = vperm.xlu1 %13453, %v13751_v54  }
0x2635   :  { %v9221_v5 = vpop.permute.xlu0 %9220 }
0x2636   :  { %v9224_v32 = vpop.permute.xlu1 %9223  ;;  %v9246_v57 = vrot.slane %v9221_v5, %v14201_v22 }
0x2637   :  { %v9250_v50 = vrot.slane %v9224_v32, %v14201_v22 }
0x2639   :  { %v9227_v11 = vpop.permute.xlu0 %9226  ;;  %v9275_v60 = vsel %vm631_vm2, %v9250_v50, %v9246_v57 }
0x263a   :  { %v9230_v7 = vpop.permute.xlu1 %9229  ;;  %v9254_v46 = vrot.slane %v9227_v11, %v14201_v22 }
0x263b   :  { %v9258_v43 = vrot.slane %v9230_v7, %v14201_v22 }
0x263c   :  { %v9276_v58 = vsel %vm633_vm3, %v9254_v46, %v9275_v60 }
0x263d   :  { %v9233_v12 = vpop.permute.xlu0 %9232  ;;  %v9277_v63 = vsel %vm635_vm4, %v9258_v43, %v9276_v58 }
0x263e   :  { %v9236_v28 = vpop.permute.xlu1 %9235  ;;  %v9262_v18 = vrot.slane %v9233_v12, %v14201_v22 }
0x263f   :  { %v9266_v38 = vrot.slane %v9236_v28, %v14201_v22 }
0x2640   :  { %v9278_v45 = vsel %vm637_vm5, %v9262_v18, %v9277_v63 }
0x2641   :  { %v9239_v44 = vpop.permute.xlu0 %9238  ;;  %v9279_v5 = vsel %vm639_vm6, %v9266_v38, %v9278_v45 }
0x2642   :  { %v9242_v13 = vpop.permute.xlu1 %9241  ;;  %v9270_v42 = vrot.slane %v9239_v44, %v14201_v22 }
0x2643   :  { %v9274_v47 = vrot.slane %v9242_v13, %v14201_v22 }
0x2644   :  { %v9280_v32 = vsel %vm641_vm7, %v9270_v42, %v9279_v5 }
0x2645   :  { %v9281_v50 = vsel %vm643_vm8, %v9274_v47, %v9280_v32 }
0x2646   :  { %v9283_v57 = vsel %vm646_vm9, %v9281_v50, 0.0 }
0x2647   :  { %9284 = vadd.xlane.f32.xlu0 %v9283_v57 }
0x26d4   :  { %v9285_v11 = vpop.xlane.xlu0 %9284 }
0x26d5   :  { %13752 = vrcp.f32 %v9285_v11 }
0x26df   :  { %v13753_v7 = vpop.eup %13752 }
0x26e0   :  { %v9291_v46 = vrot.slane %v13753_v7, %v14147_v10  ;;  %v9295_v43 = vrot.slane %v13753_v7, %v14223_v35  ;;  %v9299_v12 = vrot.slane %v13753_v7, %v14220_v33  ;;  %v9303_v18 = vrot.slane %v13753_v7, %v14226_v62 }
0x26e1   :  { %v9307_v63 = vrot.slane %v13753_v7, %v14232_v56  ;;  %v9311_v44 = vrot.slane %v13753_v7, %v14236_v26  ;;  %v9315_v13 = vrot.slane %v13753_v7, %v14240_v24  ;;  %v9319_v42 = vrot.slane %v13753_v7, %v14244_v23 }
0x26e2   :  { %v9328_v60 = vmul.f32 %v13737_v41, %v9291_v46  ;;  %v9329_v58 = vmul.f32 %v13739_v40, %v9295_v43  ;;  %v9330_v28 = vmul.f32 %v13741_v2, %v9299_v12  ;;  %v9331_v38 = vmul.f32 %v13743_v36, %v9303_v18 }
0x26e3   :  { %v9332_v45 = vmul.f32 %v13745_v19, %v9307_v63  ;;  %v9333_v41 = vmul.f32 %v13747_v27, %v9311_v44  ;;  %v9334_v40 = vmul.f32 %v13749_v53, %v9315_v13  ;;  %v9335_v2 = vmul.f32 %v13751_v54, %v9319_v42 }
0x26e4   :  { %9338 = vperm.xlu1 %13453, %v9328_v60  }
0x26e8   :  { %9418 = vperm.xlu1 %13453, %v9329_v58  }
0x26ec   :  { %9498 = vperm.xlu1 %13453, %v9330_v28  }
0x26f0   :  { %9578 = vperm.xlu1 %13453, %v9331_v38  }
0x26f4   :  { %9658 = vperm.xlu1 %13453, %v9332_v45  }
0x26f8   :  { %9738 = vperm.xlu1 %13453, %v9333_v41  }
0x26fc   :  { %9818 = vperm.xlu1 %13453, %v9334_v40  }
0x2700   :  { %9898 = vperm.xlu1 %13453, %v9335_v2  }
0x2763   :  { %v9339_v47 = vpop.permute.xlu1 %9338 }
0x2764   :  { %v9343_v36 = vrot.slane %v9339_v47, %v14201_v22 }
0x2766   :  { %12580 = vmatmul.mubr.msk.f32.vlgmr.msra.gmra.mrb[130].mxu0 %vm646_vm9, %v9343_v36 }
0x2767   :  { %12583 = vmatpush3.msra.mxu0 %v15660_v3  ;;  %v9419_v19 = vpop.permute.xlu1 %9418  ;;  %12584 = vmatprep.mubr.msk.f32.mxu0 %vm13934_vm10, %v16424_v16 }
0x2768   :  { %v9423_v27 = vrot.slane %v9419_v19, %v14201_v22  ;;  %12587 = vmatprep.subr.mxu0 %v16424_v16 }
0x276a   :  { %12585 = vmatmul.mubr.msk.f32.vlgmr.msra.gmra.mrb[132].mxu0 %vm646_vm9, %v9423_v27 }
0x276b   :  { %12588 = vmatpush3.msra.mxu0 %v15671_v30  ;;  %v9499_v53 = vpop.permute.xlu1 %9498  ;;  %12589 = vmatprep.mubr.msk.f32.mxu0 %vm13934_vm10, %v16424_v16 }
0x276c   :  { %v9503_v54 = vrot.slane %v9499_v53, %v14201_v22  ;;  %12592 = vmatprep.subr.mxu0 %v16424_v16 }
0x276e   :  { %12590 = vmatmul.mubr.msk.f32.vlgmr.msra.gmra.mrb[134].mxu0 %vm646_vm9, %v9503_v54 }
0x276f   :  { %12593 = vmatpush3.msra.mxu0 %v15682_v55  ;;  %v9579_v3 = vpop.permute.xlu1 %9578  ;;  %12594 = vmatprep.mubr.msk.f32.mxu0 %vm13934_vm10, %v16424_v16 }
0x2770   :  { %v9583_v5 = vrot.slane %v9579_v3, %v14201_v22  ;;  %12597 = vmatprep.subr.mxu0 %v16424_v16 }
0x2772   :  { %12595 = vmatmul.mubr.msk.f32.vlgmr.msra.gmra.mrb[136].mxu0 %vm646_vm9, %v9583_v5 }
0x2773   :  { %12598 = vmatpush3.msra.mxu0 %v15693_v49  ;;  %v9659_v30 = vpop.permute.xlu1 %9658  ;;  %12599 = vmatprep.mubr.msk.f32.mxu0 %vm13934_vm10, %v16424_v16 }
0x2774   :  { %v9663_v32 = vrot.slane %v9659_v30, %v14201_v22  ;;  %12602 = vmatprep.subr.mxu0 %v16424_v16 }
0x2776   :  { %12600 = vmatmul.mubr.msk.f32.vlgmr.msra.gmra.mrb[138].mxu0 %vm646_vm9, %v9663_v32 }
0x2777   :  { %12603 = vmatpush3.msra.mxu0 %v15704_v25  ;;  %v9739_v55 = vpop.permute.xlu1 %9738  ;;  %12604 = vmatprep.mubr.msk.f32.mxu0 %vm13934_vm10, %v16424_v16 }
0x2778   :  { %v9743_v50 = vrot.slane %v9739_v55, %v14201_v22  ;;  %12607 = vmatprep.subr.mxu0 %v16424_v16 }
0x277a   :  { %12605 = vmatmul.mubr.msk.f32.vlgmr.msra.gmra.mrb[140].mxu0 %vm646_vm9, %v9743_v50 }
0x277b   :  { %12608 = vmatpush3.msra.mxu0 %v15715_v52  ;;  %v9819_v49 = vpop.permute.xlu1 %9818  ;;  %12609 = vmatprep.mubr.msk.f32.mxu0 %vm13934_vm10, %v16424_v16  ;;  %v15962_v52 = vld [vmem:[%s16261_s5 + $0x8] sm:$0xf] }
0x277c   :  { %v9823_v57 = vrot.slane %v9819_v49, %v14201_v22  ;;  %12612 = vmatprep.subr.mxu0 %v16424_v16  ;;  %v16702_v49 = vld [vmem:[#allocation48_spill] sm:$0xff] }
0x277e   :  { %12610 = vmatmul.mubr.msk.f32.vlgmr.msra.gmra.mrb[142].mxu0 %vm646_vm9, %v9823_v57 }
0x277f   :  { %12613 = vmatpush3.msra.mxu0 %v15726_v6  ;;  %v9899_v25 = vpop.permute.xlu1 %9898  ;;  %12614 = vmatprep.mubr.msk.f32.mxu0 %vm13934_vm10, %v16424_v16 }
0x2780   :  { %v9903_v11 = vrot.slane %v9899_v25, %v14201_v22  ;;  %12617 = vmatprep.subr.mxu0 %v16424_v16 }
0x2782   :  { %12615 = vmatmul.mubr.msk.f32.vlgmr.msra.gmra.mrb[144].mxu0 %vm646_vm9, %v9903_v11 }
0x2783   :  { %12618 = vmatpush3.msk.msra.mxu0 %vm181_vm0, %v15962_v52  ;;  %12619 = vmatprep.mubr.msk.f32.mxu0 %vm13934_vm10, %v16424_v16 }
0x2784   :  { %13354 = vmatprep.subr.bf16.mxu0 %v14015_v4 }
0x2839   :  { %v9412_v6 = vpop.f32.mrb[130].mxu0 }
0x283a   :  { %v12581_v7 = vpop.f32.mrb[131].mxu0 }
0x283b   :  { %v16704_v7 = vld [vmem:[#allocation54_spill] sm:$0xff] }
0x283d   :  { %v9492_v46 = vpop.f32.mrb[132].mxu0 }
0x283e   :  { %v9984_v60 = vrot.slane %v9492_v46, 7  ;;  %v12586_v43 = vpop.f32.mrb[133].mxu0 }
0x2840   :  { %v9985_v58 = vsel %vm631_vm2, %v9984_v60, %v9412_v6  ;;  %v16703_v6 = vld [vmem:[#allocation49_spill] sm:$0xff]  ;;  %v16705_v60 = vld [vmem:[#allocation50_spill] sm:$0xff] }
0x2841   :  { %v9572_v12 = vpop.f32.mrb[134].mxu0  ;;  %v8961_v46 = vadd.f32 %v16704_v7, %v16703_v6  ;;  %v16723_v7 = vld [vmem:[#allocation41_spill] sm:$0xff] }
0x2842   :  { %v9986_v28 = vrot.slane %v9572_v12, 6  ;;  %v12591_v18 = vpop.f32.mrb[135].mxu0 }
0x2844   :  { %v9987_v38 = vsel %vm633_vm3, %v9986_v28, %v9985_v58 }
0x2845   :  { %v9652_v63 = vpop.f32.mrb[136].mxu0 }
0x2846   :  { %v9988_v45 = vrot.slane %v9652_v63, 5  ;;  %v12596_v44 = vpop.f32.mrb[137].mxu0 }
0x2848   :  { %v9989_v41 = vsel %vm635_vm4, %v9988_v45, %v9987_v38 }
0x2849   :  { %v9732_v13 = vpop.f32.mrb[138].mxu0 }
0x284a   :  { %v9990_v40 = vrot.slane %v9732_v13, 4  ;;  %v12601_v4 = vpop.f32.mrb[139].mxu0  ;;  %v16707_v13 = vld [vmem:[#allocation44_spill] sm:$0xff] }
0x284c   :  { %v9991_v42 = vsel %vm637_vm5, %v9990_v40, %v9989_v41  ;;  %v16706_v41 = vld [vmem:[#allocation51_spill] sm:$0xff] }
0x284d   :  { %v9812_v2 = vpop.f32.mrb[140].mxu0  ;;  %v8963_v40 = vadd.f32 %v16707_v13, %v16706_v41 }
0x284e   :  { %v9992_v47 = vrot.slane %v9812_v2, 3  ;;  %v12606_v36 = vpop.f32.mrb[141].mxu0 }
0x2850   :  { %v9993_v19 = vsel %vm639_vm6, %v9992_v47, %v9991_v42  ;;  %v16708_v42 = vld [vmem:[#allocation52_spill] sm:$0xff] }
0x2851   :  { %v9892_v27 = vpop.f32.mrb[142].mxu0 }
0x2852   :  { %v9994_v53 = vrot.slane %v9892_v27, 2  ;;  %v12611_v54 = vpop.f32.mrb[143].mxu0 }
0x2854   :  { %v9995_v3 = vsel %vm641_vm7, %v9994_v53, %v9993_v19 }
0x2855   :  { %v9972_v5 = vpop.f32.mrb[144].mxu0 }
0x2856   :  { %v9996_v30 = vrot.slane %v9972_v5, 1  ;;  %v12616_v32 = vpop.f32.mrb[145].mxu0 }
0x2857   :  { %v16710_v32 = vld [vmem:[#allocation28_spill] sm:$0xff] }
0x2858   :  { %v9997_v55 = vsel %vm643_vm8, %v9996_v30, %v9995_v3  ;;  %v16709_v3 = vld [vmem:[#allocation26_spill] sm:$0xff] }
0x2859   :  { %11774 = vmatmul.mubr.msk.f32.vlgmr.msra.gmra.mrb[38].mxu1 %vm156_vm1, %v9997_v55  ;;  %12620 = vmatmul.mubr.msk.f32.vlgmr.msra.gmra.mrb[146].mxu0 %vm156_vm1, %v9997_v55  ;;  %v16711_v55 = vld [vmem:[#allocation29_spill] sm:$0xff] }
0x285a   :  { %13331 = vmatpush3.bf16.msra.mxu1 %v14457_v0  ;;  %13356 = vmatpush1.bf16.msra.mxu0 %v14017_v8  ;;  %v16693_v8 = vld [vmem:[#allocation12_spill] sm:$0xff] }
0x285b   :  { %13332 = vmatprep.subr.bf16.mxu1 %v16441_v17  ;;  %13358 = vmatprep.subr.bf16.mxu0 %v14019_v9  ;;  %v16694_v9 = vld [vmem:[#allocation45_spill] sm:$0xff] }
0x285c   :  { %12654 = vmatprep.mubr.msk.f32.mxu1 %vm13934_vm10, %v16424_v16  ;;  %10298 = vmatprep.mubr.f32.mxu0 %v16424_v16 }
0x285e   :  { %13334 = vmatpush3.bf16.msra.mxu1 %v14462_v1  ;;  %13360 = vmatpush1.bf16.msra.mxu0 %v14023_v14  ;;  %v16695_v14 = vld [vmem:[#allocation13_spill] sm:$0xff] }
0x285f   :  { %13335 = vmatprep.subr.bf16.mxu1 %v16441_v17  ;;  %13362 = vmatprep.subr.bf16.mxu0 %v14026_v15  ;;  %v16696_v15 = vld [vmem:[#allocation14_spill] sm:$0xff] }
0x2862   :  { %13337 = vmatpush3.bf16.msra.mxu1 %v14466_v48  ;;  %13364 = vmatpush1.bf16.msra.mxu0 %v14029_v20  ;;  %v16697_v20 = vld [vmem:[#allocation46_spill] sm:$0xff] }
0x2863   :  { %13338 = vmatprep.subr.bf16.mxu1 %v16441_v17  ;;  %13366 = vmatprep.subr.bf16.mxu0 %v14032_v21  ;;  %v16698_v21 = vld [vmem:[#allocation15_spill] sm:$0xff] }
0x2866   :  { %13340 = vmatpush3.bf16.msra.mxu1 %v14470_v59  ;;  %13368 = vmatpush1.bf16.msra.mxu0 %v14049_v29  ;;  %v16699_v29 = vld [vmem:[#allocation27_spill] sm:$0xff] }
0x2867   :  { %13341 = vmatprep.subr.bf16.mxu1 %v16441_v17  ;;  %13370 = vmatprep.subr.bf16.mxu0 %v14058_v31 }
0x286a   :  { %13343 = vmatpush3.bf16.msra.mxu1 %v14473_v51  ;;  %13372 = vmatpush1.bf16.msra.mxu0 %v14072_v37 }
0x286b   :  { %13344 = vmatprep.subr.bf16.mxu1 %v16441_v17  ;;  %13374 = vmatprep.subr.bf16.mxu0 %v14080_v39  ;;  %v16700_v39 = vld [vmem:[#allocation47_spill] sm:$0xff] }
0x286e   :  { %13346 = vmatpush3.bf16.msra.mxu1 %v16455_v34  ;;  %13376 = vmatpush1.bf16.msra.mxu0 %v16456_v61  ;;  %v16701_v61 = vld [vmem:[#allocation11_spill] sm:$0xff] }
0x286f   :  { %13347 = vmatprep.subr.bf16.mxu1 %v16441_v17  ;;  %13378 = vmatprep.subr.bf16.mxu0 %v16693_v8  ;;  %v8892_v50 = vadd.f32 %v16701_v61, %v16700_v39  ;;  %v13843_v8 = vld [vmem:[%s16256_s0] sm:$0xff]  ;;  %v16718_v61 = vld [vmem:[#allocation36_spill] sm:$0xff] }
0x2872   :  { %13349 = vmatpush3.bf16.msra.mxu1 %v16694_v9  ;;  %13380 = vmatpush1.bf16.msra.mxu0 %v16695_v14  ;;  %v16712_v14 = vld [vmem:[#allocation30_spill] sm:$0xff] }
0x2873   :  { %13350 = vmatprep.subr.bf16.mxu1 %v16441_v17  ;;  %13382 = vmatprep.subr.bf16.mxu0 %v16696_v15  ;;  %v16713_v15 = vld [vmem:[#allocation31_spill] sm:$0xff] }
0x2876   :  { %13352 = vmatpush3.bf16.msra.mxu1 %v16697_v20  ;;  %13384 = vmatpush1.bf16.msra.mxu0 %v16698_v21  ;;  %v16714_v21 = vld [vmem:[#allocation32_spill] sm:$0xff] }
0x2877   :  { %13386 = vmatprep.subr.bf16.mxu1 %v16699_v29  ;;  %12657 = vmatprep.subr.mxu0 %v16424_v16  ;;  %v16715_v29 = vld [vmem:[#allocation33_spill] sm:$0xff] }
0x292c   :  { %v10066_v31 = vpop.f32.mrb[38].mxu1  ;;  %v10137_v37 = vpop.f32.mrb[146].mxu0 }
0x292d   :  { %v10067_v57 = vadd.f32 %v10066_v31, %v16702_v49  ;;  %v10068_v25 = vpop.f32.mrb[39].mxu1  ;;  %v12621_v11 = vpop.f32.mrb[147].mxu0  ;;  %v10138_v2 = vadd.f32 %v10137_v37, %v16708_v42  ;;  %v16716_v31 = vld [vmem:[#allocation34_spill] sm:$0xff]  ;;  %v16717_v37 = vld [vmem:[#allocation35_spill] sm:$0xff] }
0x292e   :  { %v10069_v43 = vadd.f32 %v10068_v25, %v16705_v60  ;;  %v16721_v25 = vld [vmem:[#allocation39_spill] sm:$0xff]  ;;  %v16722_v11 = vld [vmem:[#allocation40_spill] sm:$0xff] }
0x292f   :  { %v10141_v58 = vadd.f32 %v10067_v57, %v8892_v50  ;;  %v16719_v50 = vld [vmem:[#allocation37_spill] sm:$0xff]  ;;  %v16720_v57 = vld [vmem:[#allocation38_spill] sm:$0xff] }
0x2930   :  { %v10148_v12 = vadd.f32 %v10069_v43, %v8961_v46  ;;  %v16724_v46 = vld [vmem:[#allocation42_spill] sm:$0xff]  ;;  %v16725_v43 = vld [vmem:[#allocation43_spill] sm:$0xff] }
0x2931   :  { %v11777_v28 = vmul.f32 -1.442695, %v10141_v58  ;;  %v16726_v58 = vld [vmem:[#allocation55_spill] sm:$0xff] }
0x2932   :  { %v11778_v18 = vmul.f32 -1.442695, %v10148_v12 }
0x2933   :  { %13754 = vpow2.f32 %v11777_v28 }
0x2934   :  { %13756 = vpow2.f32 %v11778_v18  ;;  %v16059_v18 = vld [vmem:[%s16264_s8] ss:$0 sm:$0xff] }
0x293d   :  { %v13755_v38 = vpop.eup %13754 }
0x293e   :  { %v10145_v63 = vadd.f32 1.0, %v13755_v38  ;;  %v13757_v45 = vpop.eup %13756 }
0x293f   :  { %v10152_v44 = vadd.f32 1.0, %v13757_v45 }
0x2940   :  { %13758 = vrcp.f32 %v10145_v63  ;;  %v16727_v63 = vld [vmem:[#allocation24_spill] sm:$0xff] }
0x2941   :  { %13760 = vrcp.f32 %v10152_v44 }
0x294a   :  { %v13759_v4 = vpop.eup %13758 }
0x294b   :  { %v10155_v47 = vmul.f32 %v13759_v4, %v8963_v40  ;;  %v13761_v19 = vpop.eup %13760  ;;  %v16728_v4 = vld [vmem:[#allocation25_spill] sm:$0xff] }
0x294c   :  { %v10158_v27 = vsub.f32 1.0, %v13761_v19  ;;  %v10160_v5 = vmul.f32 %v13761_v19, %v16709_v3 }
0x294d   :  { %v10156_v36 = vadd.f32 %v10155_v47, %v10138_v2 }
0x294f   :  { %13762 = vtanh.f32 %v10156_v36 }
0x2959   :  { %v13763_v53 = vpop.eup %13762 }
0x295a   :  { %v10159_v54 = vmul.f32 %v13763_v53, %v10158_v27 }
0x295c   :  { %v16023_v30 = vadd.f32 %v10160_v5, %v10159_v54 }
0x295e   :  { %12655 = vmatmul.mubr.f32.vlgmr.msra.gmra.mrb[40].mxu1 %v16023_v30  ;;  %10299 = vmatmul.mubr.f32.vlgmr.msra.gmra.mrb[148].mxu0 %v16023_v30 }
0x295f   :  { %13388 = vmatpush1.bf16.msra.mxu1 %v16710_v32  ;;  %10369 = vmatprep.mubr.f32.mxu1 %v16424_v16 }
0x2960   :  { %13390 = vmatprep.subr.bf16.mxu1 %v16711_v55  ;;  %12658 = vmatpush3.msra.mxu0 %v13843_v8 }
0x2961   :  { %12659 = vmatprep.mubr.msk.f32.mxu0 %vm13934_vm10, %v16424_v16  ;;  %12662 = vmatprep.subr.mxu0 %v16424_v16 }
0x2963   :  { %13392 = vmatpush1.bf16.msra.mxu1 %v16712_v14 }
0x2964   :  { %13394 = vmatprep.subr.bf16.mxu1 %v16713_v15 }
0x2967   :  { %13396 = vmatpush1.bf16.msra.mxu1 %v16714_v21 }
0x2968   :  { %13398 = vmatprep.subr.bf16.mxu1 %v16715_v29  ;;  %v16729_v29 = vld [vmem:[#allocation17_spill] sm:$0xff] }
0x296b   :  { %13400 = vmatpush1.bf16.msra.mxu1 %v16716_v31 }
0x296c   :  { %13402 = vmatprep.subr.bf16.mxu1 %v16717_v37 }
0x296f   :  { %13404 = vmatpush1.bf16.msra.mxu1 %v16718_v61 }
0x2970   :  { %13406 = vmatprep.subr.bf16.mxu1 %v16719_v50 }
0x2973   :  { %13408 = vmatpush1.bf16.msra.mxu1 %v16720_v57 }
0x2974   :  { %13410 = vmatprep.subr.bf16.mxu1 %v16721_v25  ;;  %v16730_v25 = vld [vmem:[#allocation16_spill] sm:$0xff] }
0x2977   :  { %13412 = vmatpush1.bf16.msra.mxu1 %v16722_v11 }
0x2978   :  { %13414 = vmatprep.subr.bf16.mxu1 %v16723_v7  ;;  %v16731_v7 = vld [vmem:[#allocation19_spill] sm:$0xff] }
0x297b   :  { %13416 = vmatpush1.bf16.msra.mxu1 %v16724_v46 }
0x297c   :  { %11787 = vmatprep.subr.msk.mxu1 %vm181_vm0, %v16725_v43  ;;  %v16732_v43 = vld [vmem:[#allocation21_spill] sm:$0xff] }
0x297e   :  { %10370 = vmatmul.mubr.f32.vlgmr.msra.gmra.mrb[42].mxu1 %v16023_v30 }
0x297f   :  { %11788 = vmatpush1.msk.msra.mxu1 %vm181_vm0, %v16726_v58  ;;  %11475 = vmatprep.mubr.f32.mxu1 %v16424_v16 }
0x2980   :  { %13417 = vmatprep.subr.bf16.mxu1 %v16441_v17 }
0x2a31   :  { %v10228_v12 = vpop.f32.mrb[40].mxu1  ;;  %v10300_v28 = vpop.f32.mrb[148].mxu0 }
0x2a32   :  { %v10229_v38 = vadd.f32 %v16059_v18, %v10228_v12  ;;  %v10301_v45 = vadd.f32 %v10300_v28, %v16727_v63  ;;  %v12656_v44 = vpop.f32.mrb[41].mxu1  ;;  %v16063_v13 = vpop.f32.mrb[149].mxu0  ;;  %v16733_v28 = vld [vmem:[#allocation18_spill] sm:$0xff]  ;;  %v16734_v63 = vld [vmem:[#allocation20_spill] sm:$0xff] }
0x2a33   :  { %v16735_v44 = vld [vmem:[#allocation23_spill] sm:$0xff] }
0x2a34   :  { %10233 = vst [vmem:[#allocation7 + $0x30] sm:$0xff] %v10229_v38  ;;  %v10377_v40 = vcombine.high %v10301_v45, %v10301_v45  ;;  %v10384_v2 = vrot.slane %v10301_v45, %v16728_v4 }
0x2a36   :  { %v10391_v47 = vrot.slane %v10377_v40, %v16728_v4  ;;  %v10392_v36 = vcombine.high %v10384_v2, %v10384_v2  ;;  %v10400_v19 = vrot.slane %v10384_v2, %v16728_v4 }
0x2a38   :  { %v10393_v27 = vcombine.high %v10391_v47, %v10391_v47  ;;  %v10407_v53 = vrot.slane %v10391_v47, %v16728_v4  ;;  %v10414_v54 = vrot.slane %v10392_v36, %v16728_v4  ;;  %v10422_v3 = vcombine.high %v10400_v19, %v10400_v19  ;;  %v13845_v36 = vld [vmem:[%s16260_s4] ss:$0 sm:$0xff] }
0x2a39   :  { %v10429_v5 = vrot.slane %v10400_v19, %v14147_v10 }
0x2a3a   :  { %v10421_v32 = vrot.slane %v10393_v27, %v16728_v4  ;;  %v10423_v55 = vcombine.high %v10407_v53, %v10407_v53  ;;  %v10424_v8 = vcombine.high %v10414_v54, %v10414_v54  ;;  %v10433_v14 = vrot.slane %v10414_v54, %v14147_v10  ;;  %v16736_v4 = vld [vmem:[#allocation22_spill] sm:$0xff] }
0x2a3b   :  { %v10437_v15 = vrot.slane %v10422_v3, %v14147_v10  ;;  %v10445_v21 = vrot.slane %v10407_v53, %v14147_v10  ;;  %v10466_v31 = vadd.f32 %v10429_v5, %v16729_v29 }
0x2a3c   :  { %v10425_v37 = vcombine.high %v10421_v32, %v10421_v32  ;;  %v10441_v61 = vrot.slane %v10424_v8, %v14147_v10  ;;  %v10449_v50 = vrot.slane %v10421_v32, %v14147_v10  ;;  %v10453_v57 = vrot.slane %v10423_v55, %v14147_v10 }
0x2a3d   :  { %v10467_v11 = vadd.f32 %v16730_v25, %v10433_v14  ;;  %v10468_v46 = vadd.f32 %v10437_v15, %v16731_v7  ;;  %v10470_v58 = vadd.f32 %v10445_v21, %v16732_v43  ;;  %13764 = vtanh.f32 %v10466_v31 }
0x2a3e   :  { %v10457_v12 = vrot.slane %v10425_v37, %v14147_v10  ;;  %v10469_v38 = vadd.f32 %v16733_v28, %v10441_v61  ;;  %v10471_v45 = vadd.f32 %v16734_v63, %v10449_v50  ;;  %v10472_v40 = vadd.f32 %v10453_v57, %v16735_v44 }
0x2a3f   :  { %13766 = vtanh.f32 %v10467_v11 }
0x2a40   :  { %v10473_v2 = vadd.f32 %v16736_v4, %v10457_v12  ;;  %13768 = vtanh.f32 %v10468_v46 }
0x2a41   :  { %13770 = vtanh.f32 %v10470_v58 }
0x2a42   :  { %13772 = vtanh.f32 %v10469_v38 }
0x2a43   :  { %13774 = vtanh.f32 %v10471_v45 }
0x2a44   :  { %13776 = vtanh.f32 %v10472_v40 }
0x2a45   :  { %13778 = vtanh.f32 %v10473_v2 }
0x2a47   :  { %v13765_v47 = vpop.eup %13764 }
0x2a48   :  { %v10482_v19 = vmul.f32 %v13845_v36, %v13765_v47 }
0x2a49   :  { %v13767_v27 = vpop.eup %13766 }
0x2a4a   :  { %v13769_v53 = vpop.eup %13768  ;;  %10490 = vadd.xlane.f32.xlu0 %v10482_v19  ;;  %v10483_v54 = vmul.f32 %v13845_v36, %v13767_v27 }
0x2a4b   :  { %v10484_v3 = vmul.f32 %v13845_v36, %v13769_v53  ;;  %v13771_v5 = vpop.eup %13770 }
0x2a4c   :  { %10492 = vadd.xlane.f32.xlu1 %v10483_v54  ;;  %v10486_v32 = vmul.f32 %v13845_v36, %v13771_v5  ;;  %v13773_v55 = vpop.eup %13772 }
0x2a4d   :  { %v10485_v15 = vmul.f32 %v13845_v36, %v13773_v55  ;;  %v13775_v21 = vpop.eup %13774 }
0x2a4e   :  { %10494 = vadd.xlane.f32.xlu0 %v10484_v3  ;;  %v10487_v29 = vmul.f32 %v13845_v36, %v13775_v21  ;;  %v13777_v31 = vpop.eup %13776 }
0x2a4f   :  { %v10488_v37 = vmul.f32 %v13845_v36, %v13777_v31  ;;  %v13779_v61 = vpop.eup %13778 }
0x2a50   :  { %v10489_v50 = vmul.f32 %v13845_v36, %v13779_v61 }
0x2a51   :  { %v16090_v8 = vpop.f32.mrb[42].mxu1 }
0x2a52   :  { %10498 = vadd.xlane.f32.xlu0 %v10486_v32  ;;  %v16092_v14 = vpop.f32.mrb[43].mxu1 }
0x2a56   :  { %10496 = vadd.xlane.f32.xlu0 %v10485_v15 }
0x2a5a   :  { %10500 = vadd.xlane.f32.xlu0 %v10487_v29 }
0x2a5e   :  { %10502 = vadd.xlane.f32.xlu0 %v10488_v37 }
0x2a62   :  { %10504 = vadd.xlane.f32.xlu0 %v10489_v50 }
0x2ad7   :  { %v10491_v57 = vpop.xlane.xlu0 %10490 }
0x2ad8   :  { %v10517_v58 = vrot.slane %v10491_v57, %v14201_v22 }
0x2ad9   :  { %v10493_v7 = vpop.xlane.xlu1 %10492 }
0x2ada   :  { %v10521_v43 = vrot.slane %v10493_v7, %v14201_v22 }
0x2adb   :  { %v10495_v25 = vpop.xlane.xlu0 %10494 }
0x2adc   :  { %v10525_v12 = vrot.slane %v10495_v25, %v14201_v22  ;;  %v10546_v38 = vsel %vm631_vm2, %v10521_v43, %v10517_v58 }
0x2ade   :  { %v10547_v45 = vsel %vm633_vm3, %v10525_v12, %v10546_v38 }
0x2adf   :  { %v10499_v11 = vpop.xlane.xlu0 %10498 }
0x2ae0   :  { %v10533_v2 = vrot.slane %v10499_v11, %v14201_v22 }
0x2ae3   :  { %v10497_v46 = vpop.xlane.xlu0 %10496 }
0x2ae4   :  { %v10529_v63 = vrot.slane %v10497_v46, %v14201_v22 }
0x2ae6   :  { %v10548_v40 = vsel %vm635_vm4, %v10529_v63, %v10547_v45 }
0x2ae7   :  { %v10501_v28 = vpop.xlane.xlu0 %10500  ;;  %v10549_v36 = vsel %vm637_vm5, %v10533_v2, %v10548_v40 }
0x2ae8   :  { %v10537_v4 = vrot.slane %v10501_v28, %v14201_v22 }
0x2aea   :  { %v10550_v27 = vsel %vm639_vm6, %v10537_v4, %v10549_v36 }
0x2aeb   :  { %v10503_v44 = vpop.xlane.xlu0 %10502 }
0x2aec   :  { %v10541_v47 = vrot.slane %v10503_v44, %v14201_v22 }
0x2aee   :  { %v10551_v54 = vsel %vm641_vm7, %v10541_v47, %v10550_v27 }
0x2aef   :  { %v10505_v19 = vpop.xlane.xlu0 %10504 }
0x2af0   :  { %v10545_v53 = vrot.slane %v10505_v19, %v14201_v22 }
0x2af2   :  { %v10552_v3 = vsel %vm643_vm8, %v10545_v53, %v10551_v54 }
0x2af3   :  { %v10554_v5 = vsel %vm646_vm9, %v10552_v3, -inf }
0x2af4   :  { %10555 = vmax.xlane.f32.xlu0 %v10554_v5 }
0x2b81   :  { %v10556_v32 = vpop.xlane.xlu0 %10555 }
0x2b82   :  { %v10561_v55 = vrot.slane %v10556_v32, %v14147_v10  ;;  %v10565_v15 = vrot.slane %v10556_v32, %v14223_v35  ;;  %v10569_v21 = vrot.slane %v10556_v32, %v14220_v33  ;;  %v10573_v29 = vrot.slane %v10556_v32, %v14226_v62 }
0x2b83   :  { %v10577_v31 = vrot.slane %v10556_v32, %v14232_v56  ;;  %v10581_v43 = vrot.slane %v10556_v32, %v14236_v26  ;;  %v10585_v63 = vrot.slane %v10556_v32, %v14240_v24  ;;  %v10589_v4 = vrot.slane %v10556_v32, %v14244_v23 }
0x2b84   :  { %v10598_v37 = vsub.f32 %v10491_v57, %v10561_v55  ;;  %v10599_v61 = vsub.f32 %v10493_v7, %v10565_v15  ;;  %v10600_v50 = vsub.f32 %v10495_v25, %v10569_v21  ;;  %v10601_v58 = vsub.f32 %v10497_v46, %v10573_v29 }
0x2b85   :  { %v10602_v45 = vsub.f32 %v10499_v11, %v10577_v31  ;;  %v10603_v2 = vsub.f32 %v10501_v28, %v10581_v43  ;;  %v10604_v36 = vsub.f32 %v10503_v44, %v10585_v63  ;;  %v10605_v7 = vsub.f32 %v10505_v19, %v10589_v4 }
0x2b86   :  { %v10606_v12 = vmul.f32 1.442695, %v10598_v37  ;;  %v10608_v38 = vmul.f32 1.442695, %v10599_v61  ;;  %v10610_v40 = vmul.f32 1.442695, %v10600_v50 }
0x2b87   :  { %v10612_v47 = vmul.f32 1.442695, %v10601_v58  ;;  %v10614_v57 = vmul.f32 1.442695, %v10602_v45  ;;  %v10616_v25 = vmul.f32 1.442695, %v10603_v2 }
0x2b88   :  { %13780 = vpow2.f32 %v10606_v12  ;;  %v10618_v46 = vmul.f32 1.442695, %v10604_v36  ;;  %v10620_v27 = vmul.f32 1.442695, %v10605_v7 }
0x2b89   :  { %13782 = vpow2.f32 %v10608_v38 }
0x2b8a   :  { %13784 = vpow2.f32 %v10610_v40 }
0x2b8b   :  { %13786 = vpow2.f32 %v10612_v47 }
0x2b8c   :  { %13788 = vpow2.f32 %v10614_v57 }
0x2b8d   :  { %13790 = vpow2.f32 %v10616_v25 }
0x2b8e   :  { %13792 = vpow2.f32 %v10618_v46 }
0x2b8f   :  { %13794 = vpow2.f32 %v10620_v27 }
0x2b92   :  { %v13781_v53 = vpop.eup %13780 }
0x2b93   :  { %v13783_v54 = vpop.eup %13782  ;;  %10631 = vperm.xlu0 %13454, %v13781_v53  }
0x2b94   :  { %10634 = vperm.xlu1 %13453, %v13783_v54   ;;  %v13785_v11 = vpop.eup %13784 }
0x2b95   :  { %v13787_v28 = vpop.eup %13786 }
0x2b96   :  { %v13789_v44 = vpop.eup %13788 }
0x2b97   :  { %10637 = vperm.xlu0 %13454, %v13785_v11   ;;  %v13791_v3 = vpop.eup %13790 }
0x2b98   :  { %10640 = vperm.xlu1 %13453, %v13787_v28   ;;  %v13793_v19 = vpop.eup %13792 }
0x2b99   :  { %v13795_v5 = vpop.eup %13794 }
0x2b9b   :  { %10643 = vperm.xlu0 %13454, %v13789_v44  }
0x2b9c   :  { %10646 = vperm.xlu1 %13453, %v13791_v3  }
0x2b9f   :  { %10649 = vperm.xlu0 %13454, %v13793_v19  }
0x2ba0   :  { %10652 = vperm.xlu1 %13453, %v13795_v5  }
0x2c12   :  { %v10632_v32 = vpop.permute.xlu0 %10631 }
0x2c13   :  { %v10635_v55 = vpop.permute.xlu1 %10634  ;;  %v10657_v21 = vrot.slane %v10632_v32, %v14201_v22 }
0x2c14   :  { %v10661_v15 = vrot.slane %v10635_v55, %v14201_v22 }
0x2c16   :  { %v10638_v29 = vpop.permute.xlu0 %10637  ;;  %v10686_v61 = vsel %vm631_vm2, %v10661_v15, %v10657_v21 }
0x2c17   :  { %v10641_v31 = vpop.permute.xlu1 %10640  ;;  %v10665_v37 = vrot.slane %v10638_v29, %v14201_v22 }
0x2c18   :  { %v10669_v50 = vrot.slane %v10641_v31, %v14201_v22 }
0x2c19   :  { %v10687_v43 = vsel %vm633_vm3, %v10665_v37, %v10686_v61 }
0x2c1a   :  { %v10644_v58 = vpop.permute.xlu0 %10643  ;;  %v10688_v45 = vsel %vm635_vm4, %v10669_v50, %v10687_v43 }
0x2c1b   :  { %v10647_v12 = vpop.permute.xlu1 %10646  ;;  %v10673_v38 = vrot.slane %v10644_v58, %v14201_v22 }
0x2c1c   :  { %v10677_v63 = vrot.slane %v10647_v12, %v14201_v22 }
0x2c1d   :  { %v10689_v40 = vsel %vm637_vm5, %v10673_v38, %v10688_v45  ;;  %v13849_v38 = vld [vmem:[%s16256_s0 + $0x20] sm:$0xff] }
0x2c1e   :  { %v10650_v4 = vpop.permute.xlu0 %10649  ;;  %v10690_v57 = vsel %vm639_vm6, %v10677_v63, %v10689_v40  ;;  %v13850_v40 = vld [vmem:[%s16256_s0 + $0x28] sm:$0xff] }
0x2c1f   :  { %v10653_v2 = vpop.permute.xlu1 %10652  ;;  %v10681_v47 = vrot.slane %v10650_v4, %v14201_v22 }
0x2c20   :  { %v10685_v36 = vrot.slane %v10653_v2, %v14201_v22 }
0x2c21   :  { %v10691_v7 = vsel %vm641_vm7, %v10681_v47, %v10690_v57  ;;  %v13851_v47 = vld [vmem:[%s16256_s0 + $0x30] sm:$0xff] }
0x2c22   :  { %v10692_v25 = vsel %vm643_vm8, %v10685_v36, %v10691_v7  ;;  %v13852_v7 = vld [vmem:[%s16256_s0 + $0x38] sm:$0xff] }
0x2c23   :  { %v10694_v46 = vsel %vm646_vm9, %v10692_v25, 0.0 }
0x2c24   :  { %10695 = vadd.xlane.f32.xlu0 %v10694_v46 }
0x2cb1   :  { %v10696_v27 = vpop.xlane.xlu0 %10695 }
0x2cb2   :  { %13796 = vrcp.f32 %v10696_v27 }
0x2cbc   :  { %v13797_v32 = vpop.eup %13796 }
0x2cbd   :  { %v10702_v55 = vrot.slane %v13797_v32, %v14147_v10  ;;  %v10706_v21 = vrot.slane %v13797_v32, %v14223_v35  ;;  %v10710_v31 = vrot.slane %v13797_v32, %v14220_v33  ;;  %v10714_v61 = vrot.slane %v13797_v32, %v14226_v62 }
0x2cbe   :  { %v10718_v43 = vrot.slane %v13797_v32, %v14232_v56  ;;  %v10722_v12 = vrot.slane %v13797_v32, %v14236_v26  ;;  %v10726_v35 = vrot.slane %v13797_v32, %v14240_v24  ;;  %v10730_v33 = vrot.slane %v13797_v32, %v14244_v23  ;;  %v13846_v56 = vld [vmem:[%s16256_s0 + $0x8] sm:$0xff]  ;;  %v13847_v23 = vld [vmem:[%s16256_s0 + $0x10] sm:$0xff] }
0x2cbf   :  { %v10739_v15 = vmul.f32 %v13781_v53, %v10702_v55  ;;  %v10740_v29 = vmul.f32 %v13783_v54, %v10706_v21  ;;  %v10741_v37 = vmul.f32 %v13785_v11, %v10710_v31  ;;  %v10742_v50 = vmul.f32 %v13787_v28, %v10714_v61 }
0x2cc0   :  { %v10743_v58 = vmul.f32 %v13789_v44, %v10718_v43  ;;  %v10744_v10 = vmul.f32 %v13791_v3, %v10722_v12  ;;  %v10745_v53 = vmul.f32 %v13793_v19, %v10726_v35  ;;  %v10746_v54 = vmul.f32 %v13795_v5, %v10730_v33  ;;  %v13848_v3 = vld [vmem:[%s16256_s0 + $0x18] sm:$0xff]  ;;  %s13936_s0 = smov [#allocation7]  }
0x2cc1   :  { %10749 = vperm.xlu1 %13453, %v10739_v15   ;;  %s11650_s13 = sshll.u32 %s13936_s0, 4  ;;  %s11651_s13 = int_to_ptr.vmem [resolvable:$true] %s11650_s13 }
0x2cc2   :  { %s13897_s14 = scalar_lea.vmem %s11651_s13, 1024  ;;  %p13902_p3 = scmp.lt.s32.totalorder %s11651_s13, %s11651_s13 }
0x2cc3   :  { %p13898_p2 = scmp.ne.s32.totalorder %s11651_s13, %s13897_s14  ;;  %p13903_p4 = scmp.lt.s32.totalorder %s13897_s14, %s13897_s14 }
0x2cc5   :  { %10829 = vperm.xlu1 %13453, %v10740_v29   ;;  %p13904_p5 = por %p13903_p4, %p13902_p3 }
0x2cc7   :  { %p13905_p6 = pnand %p13904_p5, %p13898_p2 }
0x2cc9   :  { %10909 = vperm.xlu1 %13453, %v10741_v37  }
0x2ccd   :  { %10989 = vperm.xlu1 %13453, %v10742_v50  }
0x2cd1   :  { %11069 = vperm.xlu1 %13453, %v10743_v58  }
0x2cd5   :  { %11149 = vperm.xlu1 %13453, %v10744_v10  }
0x2cd9   :  { %11229 = vperm.xlu1 %13453, %v10745_v53  }
0x2cdd   :  { %11309 = vperm.xlu1 %13453, %v10746_v54  }
0x2d40   :  { %v10750_v62 = vpop.permute.xlu1 %10749 }
0x2d41   :  { %v10754_v11 = vrot.slane %v10750_v62, %v14201_v22 }
0x2d43   :  { %12660 = vmatmul.mubr.msk.f32.vlgmr.msra.gmra.mrb[150].mxu0 %vm646_vm9, %v10754_v11 }
0x2d44   :  { %12663 = vmatpush3.msra.mxu0 %v13846_v56  ;;  %v10830_v26 = vpop.permute.xlu1 %10829  ;;  %12664 = vmatprep.mubr.msk.f32.mxu0 %vm13934_vm10, %v16424_v16 }
0x2d45   :  { %v10834_v24 = vrot.slane %v10830_v26, %v14201_v22  ;;  %12667 = vmatprep.subr.mxu0 %v16424_v16 }
0x2d47   :  { %12665 = vmatmul.mubr.msk.f32.vlgmr.msra.gmra.mrb[152].mxu0 %vm646_vm9, %v10834_v24 }
0x2d48   :  { %12668 = vmatpush3.msra.mxu0 %v13847_v23  ;;  %v10910_v28 = vpop.permute.xlu1 %10909  ;;  %12669 = vmatprep.mubr.msk.f32.mxu0 %vm13934_vm10, %v16424_v16 }
0x2d49   :  { %v10914_v44 = vrot.slane %v10910_v28, %v14201_v22  ;;  %12672 = vmatprep.subr.mxu0 %v16424_v16 }
0x2d4b   :  { %12670 = vmatmul.mubr.msk.f32.vlgmr.msra.gmra.mrb[154].mxu0 %vm646_vm9, %v10914_v44 }
0x2d4c   :  { %12673 = vmatpush3.msra.mxu0 %v13848_v3  ;;  %v10990_v19 = vpop.permute.xlu1 %10989  ;;  %12674 = vmatprep.mubr.msk.f32.mxu0 %vm13934_vm10, %v16424_v16 }
0x2d4d   :  { %v10994_v5 = vrot.slane %v10990_v19, %v14201_v22  ;;  %12677 = vmatprep.subr.mxu0 %v16424_v16 }
0x2d4f   :  { %12675 = vmatmul.mubr.msk.f32.vlgmr.msra.gmra.mrb[156].mxu0 %vm646_vm9, %v10994_v5 }
0x2d50   :  { %12678 = vmatpush3.msra.mxu0 %v13849_v38  ;;  %v11070_v63 = vpop.permute.xlu1 %11069  ;;  %12679 = vmatprep.mubr.msk.f32.mxu0 %vm13934_vm10, %v16424_v16 }
0x2d51   :  { %v11074_v45 = vrot.slane %v11070_v63, %v14201_v22  ;;  %12682 = vmatprep.subr.mxu0 %v16424_v16 }
0x2d53   :  { %12680 = vmatmul.mubr.msk.f32.vlgmr.msra.gmra.mrb[158].mxu0 %vm646_vm9, %v11074_v45 }
0x2d54   :  { %12683 = vmatpush3.msra.mxu0 %v13850_v40  ;;  %v11150_v4 = vpop.permute.xlu1 %11149  ;;  %12684 = vmatprep.mubr.msk.f32.mxu0 %vm13934_vm10, %v16424_v16 }
0x2d55   :  { %v11154_v2 = vrot.slane %v11150_v4, %v14201_v22  ;;  %12687 = vmatprep.subr.mxu0 %v16424_v16 }
0x2d57   :  { %12685 = vmatmul.mubr.msk.f32.vlgmr.msra.gmra.mrb[160].mxu0 %vm646_vm9, %v11154_v2 }
0x2d58   :  { %12688 = vmatpush3.msra.mxu0 %v13851_v47  ;;  %v11230_v36 = vpop.permute.xlu1 %11229  ;;  %12689 = vmatprep.mubr.msk.f32.mxu0 %vm13934_vm10, %v16424_v16 }
0x2d59   :  { %v11234_v57 = vrot.slane %v11230_v36, %v14201_v22  ;;  %12692 = vmatprep.subr.mxu0 %v16424_v16 }
0x2d5b   :  { %12690 = vmatmul.mubr.msk.f32.vlgmr.msra.gmra.mrb[162].mxu0 %vm646_vm9, %v11234_v57 }
0x2d5c   :  { %12693 = vmatpush3.msra.mxu0 %v13852_v7  ;;  %v11310_v25 = vpop.permute.xlu1 %11309  ;;  %12694 = vmatprep.mubr.msk.f32.mxu0 %vm13934_vm10, %v16424_v16 }
0x2d5d   :  { %v11314_v46 = vrot.slane %v11310_v25, %v14201_v22  ;;  %12697 = vmatprep.subr.mxu0 %v16424_v16 }
0x2d5f   :  { %12695 = vmatmul.mubr.msk.f32.vlgmr.msra.gmra.mrb[164].mxu0 %vm646_vm9, %v11314_v46 }
0x2d60   :  { %12698 = vmatpush3.msk.msra.mxu0 %vm181_vm0, %v15962_v52  ;;  %12699 = vmatprep.mubr.msk.f32.mxu0 %vm13934_vm10, %v16424_v16 }
0x2e16   :  { %v10823_v27 = vpop.f32.mrb[150].mxu0 }
0x2e17   :  { %v12661_v32 = vpop.f32.mrb[151].mxu0 }
0x2e1a   :  { %v10903_v55 = vpop.f32.mrb[152].mxu0 }
0x2e1b   :  { %v11395_v15 = vrot.slane %v10903_v55, 7  ;;  %v12666_v21 = vpop.f32.mrb[153].mxu0 }
0x2e1d   :  { %v11396_v29 = vsel %vm631_vm2, %v11395_v15, %v10823_v27 }
0x2e1e   :  { %v10983_v31 = vpop.f32.mrb[154].mxu0 }
0x2e1f   :  { %v11397_v37 = vrot.slane %v10983_v31, 6  ;;  %v12671_v22 = vpop.f32.mrb[155].mxu0 }
0x2e21   :  { %v11398_v61 = vsel %vm633_vm3, %v11397_v37, %v11396_v29 }
0x2e22   :  { %v11063_v50 = vpop.f32.mrb[156].mxu0 }
0x2e23   :  { %v11399_v43 = vrot.slane %v11063_v50, 5  ;;  %v12676_v58 = vpop.f32.mrb[157].mxu0 }
0x2e25   :  { %v11400_v52 = vsel %vm635_vm4, %v11399_v43, %v11398_v61 }
0x2e26   :  { %v11143_v12 = vpop.f32.mrb[158].mxu0 }
0x2e27   :  { %v11401_v10 = vrot.slane %v11143_v12, 4  ;;  %v12681_v35 = vpop.f32.mrb[159].mxu0 }
0x2e29   :  { %v11402_v53 = vsel %vm637_vm5, %v11401_v10, %v11400_v52 }
0x2e2a   :  { %v11223_v33 = vpop.f32.mrb[160].mxu0 }
0x2e2b   :  { %v11403_v54 = vrot.slane %v11223_v33, 3  ;;  %v12686_v62 = vpop.f32.mrb[161].mxu0 }
0x2e2d   :  { %v11404_v11 = vsel %vm639_vm6, %v11403_v54, %v11402_v53 }
0x2e2e   :  { %v11303_v56 = vpop.f32.mrb[162].mxu0 }
0x2e2f   :  { %v11405_v26 = vrot.slane %v11303_v56, 2  ;;  %v12691_v24 = vpop.f32.mrb[163].mxu0 }
0x2e31   :  { %v11406_v23 = vsel %vm641_vm7, %v11405_v26, %v11404_v11 }
0x2e32   :  { %v11383_v28 = vpop.f32.mrb[164].mxu0 }
0x2e33   :  { %v11407_v44 = vrot.slane %v11383_v28, 1  ;;  %v12696_v3 = vpop.f32.mrb[165].mxu0 }
0x2e35   :  { %v11408_v19 = vsel %vm643_vm8, %v11407_v44, %v11406_v23 }
0x2e36   :  { %11789 = vmatmul.mubr.msk.f32.vlgmr.msra.gmra.mrb[44].mxu1 %vm156_vm1, %v11408_v19  ;;  %12700 = vmatmul.mubr.msk.f32.vlgmr.msra.gmra.mrb[166].mxu0 %vm156_vm1, %v11408_v19 }
0x2e37   :  { %13419 = vmatpush3.bf16.msra.mxu1 %v14457_v0  ;;  %12734 = vmatprep.mubr.msk.f32.mxu1 %vm13934_vm10, %v16424_v16 }
0x2e38   :  { %13420 = vmatprep.subr.bf16.mxu1 %v16441_v17 }
0x2e3b   :  { %13422 = vmatpush3.bf16.msra.mxu1 %v14462_v1  ;;  %v10303_v1 = vadd.f32 %v16063_v13, %v16700_v39 }
0x2e3c   :  { %13423 = vmatprep.subr.bf16.mxu1 %v16441_v17 }
0x2e3f   :  { %13425 = vmatpush3.bf16.msra.mxu1 %v14466_v48 }
0x2e40   :  { %13426 = vmatprep.subr.bf16.mxu1 %v16441_v17 }
0x2e43   :  { %13428 = vmatpush3.bf16.msra.mxu1 %v14470_v59 }
0x2e44   :  { %13429 = vmatprep.subr.bf16.mxu1 %v16441_v17 }
0x2e47   :  { %13431 = vmatpush3.bf16.msra.mxu1 %v14473_v51 }
0x2e48   :  { %13432 = vmatprep.subr.bf16.mxu1 %v16441_v17 }
0x2e4b   :  { %13434 = vmatpush3.bf16.msra.mxu1 %v16455_v34  ;;  %v10372_v34 = vadd.f32 %v16090_v8, %v16703_v6 }
0x2e4c   :  { %13435 = vmatprep.subr.bf16.mxu1 %v16441_v17 }
0x2e4f   :  { %13437 = vmatpush3.bf16.msra.mxu1 %v16694_v9 }
0x2e50   :  { %13438 = vmatprep.subr.bf16.mxu1 %v16441_v17 }
0x2e53   :  { %13440 = vmatpush3.bf16.msra.mxu1 %v16697_v20 }
0x2f09   :  { %v11477_v16 = vpop.f32.mrb[44].mxu1  ;;  %v11548_v0 = vpop.f32.mrb[166].mxu0 }
0x2f0a   :  { %v11478_v48 = vadd.f32 %v11477_v16, %v16702_v49  ;;  %v11479_v59 = vpop.f32.mrb[45].mxu1  ;;  %v12701_v51 = vpop.f32.mrb[167].mxu0  ;;  %v10374_v49 = vadd.f32 %v16092_v14, %v16706_v41  ;;  %v11549_v4 = vadd.f32 %v11548_v0, %v16708_v42 }
0x2f0b   :  { %v11480_v5 = vadd.f32 %v11479_v59, %v16705_v60 }
0x2f0c   :  { %v11552_v38 = vadd.f32 %v11478_v48, %v10303_v1 }
0x2f0d   :  { %v11559_v9 = vadd.f32 %v11480_v5, %v10372_v34 }
0x2f0e   :  { %v11792_v63 = vmul.f32 -1.442695, %v11552_v38 }
0x2f0f   :  { %v11793_v17 = vmul.f32 -1.442695, %v11559_v9 }
0x2f10   :  { %13798 = vpow2.f32 %v11792_v63 }
0x2f11   :  { %13800 = vpow2.f32 %v11793_v17 }
0x2f1a   :  { %v13799_v20 = vpop.eup %13798 }
0x2f1b   :  { %v11556_v45 = vadd.f32 1.0, %v13799_v20  ;;  %v13801_v40 = vpop.eup %13800 }
0x2f1c   :  { %v11563_v39 = vadd.f32 1.0, %v13801_v40 }
0x2f1d   :  { %13802 = vrcp.f32 %v11556_v45 }
0x2f1e   :  { %13804 = vrcp.f32 %v11563_v39 }
0x2f27   :  { %v13803_v13 = vpop.eup %13802 }
0x2f28   :  { %v11566_v6 = vmul.f32 %v13803_v13, %v10374_v49  ;;  %v13805_v8 = vpop.eup %13804 }
0x2f29   :  { %v11569_v2 = vsub.f32 1.0, %v13805_v8  ;;  %v11571_v57 = vmul.f32 %v13805_v8, %v16023_v30 }
0x2f2a   :  { %v11567_v60 = vadd.f32 %v11566_v6, %v11549_v4 }
0x2f2c   :  { %13806 = vtanh.f32 %v11567_v60 }
0x2f36   :  { %v13807_v47 = vpop.eup %13806 }
0x2f37   :  { %v11570_v36 = vmul.f32 %v13807_v47, %v11569_v2 }
0x2f39   :  { %v11572_v7 = vadd.f32 %v11571_v57, %v11570_v36 }
0x2f3b   :  { %12735 = vmatmul.mubr.f32.vlgmr.msra.gmra.mrb[46].mxu1 %v11572_v7 }
0x300e   :  { %v11639_v25 = vpop.f32.mrb[46].mxu1 }
0x300f   :  { %v11640_v41 = vadd.f32 %v16059_v18, %v11639_v25  ;;  %v12736_v14 = vpop.f32.mrb[47].mxu1 }
0x3011   :  { %11644 = vst [vmem:[#allocation7 + $0x38] sm:$0xff] %v11640_v41 }
0x3012   :  { %13908 = shalt.err (!%p13905_p6)
}
0x3013   :  { %s13909_s16 = scalar_lea.hbm %s16265_s9, 1024 }
0x3014   :  { %p13910_p7 = scmp.ne.s32.totalorder %s16265_s9, %s13909_s16  ;;  %p13913_p8 = scmp.lt.u32.totalorder %s13909_s16, %s16265_s9 }
0x3016   :  { %p13915_p9 = pnand %p13913_p8, %p13910_p7 }
0x3018   :  { %13918 = shalt.err (!%p13915_p9)
}
0x3019   :  { %11656 = dma.vmem_to_hbm [thread:$0]  %s11651_s13, 1024, %s16265_s9, [#allocation4], %s13929_s2, %s13929_s2, %s13930_s10  }
0x301a   :  { %13923 = dma.done.wait [#allocation4], 1024  }
0x301b   :  { %13924 = vsyncadd [#allocation4], 4294966272 }
0x301c   :  { %11660 = vsyncpa [#allocation3], 1 }
0x301d   :  { %11661 = vsyncpa [#allocation6], 1 }
0x301e   :  { %11662 = vsyncpa [#allocation4], 1 }

</bundles_post_ra>
